<compile_context>
chip_gen: v7x
topology: tpu7x:2x2x1
jax: 0.10.0
libtpu: 0.0.40
codegen_flags: <defaults>
</compile_context>

<pallas_src>
import functools

import jax
import jax.numpy as jnp
from jax.experimental import pallas as pl
from jax.experimental.pallas import tpu as pltpu


# ----------------------------------------------------------------------------
# Fused linear kernel (full K, N-tiled):  out = act(x @ W + b)
# Grid = (N_tiles,), all parallel — no reduction axis, output written once.
# ----------------------------------------------------------------------------
def _linear_kernel(x_ref, w_ref, b_ref, o_ref, *, apply_relu):
    xb = x_ref[...].astype(jnp.bfloat16)
    out = jnp.dot(xb, w_ref[...], preferred_element_type=jnp.float32)
    out = out + b_ref[...]
    if apply_relu:
        out = jnp.maximum(out, 0.0)
    o_ref[...] = out


def linear_pallas(x, w, b, apply_relu=False, tn_pref=512):
    """y = relu?(x @ w + b); w is bf16, accumulation in f32."""
    M, K = x.shape
    Kw, N = w.shape
    assert K == Kw
    # 512-wide output tiles when they divide N (keeps >=2 parallel blocks for
    # the dual-TC chips on the 1024-wide layer); otherwise full N (128, 45).
    tn = tn_pref if N % tn_pref == 0 else N
    kernel = functools.partial(_linear_kernel, apply_relu=apply_relu)
    return pl.pallas_call(
        kernel,
        out_shape=jax.ShapeDtypeStruct((M, N), jnp.float32),
        grid_spec=pltpu.PrefetchScalarGridSpec(
            num_scalar_prefetch=0,
            grid=(N // tn,),
            in_specs=[
                pl.BlockSpec((M, K), lambda n: (0, 0)),    # x (tiny, resident)
                pl.BlockSpec((K, tn), lambda n: (0, n)),   # W (bf16)
                pl.BlockSpec((1, tn), lambda n: (0, n)),   # b
            ],
            out_specs=pl.BlockSpec((M, tn), lambda n: (0, n)),
        ),
        compiler_params=pltpu.CompilerParams(
            dimension_semantics=("parallel",)
        ),
    )(x, w, b)


# ----------------------------------------------------------------------------
# Fused ResBlock kernel:
#   out = relu( relu(x @ W1 + b1) @ W2 + b2 + x )   [+ tem  (last block only)]
# Grid = (H // tj,) over the 2048-wide hidden dim (a reduction -> "arbitrary").
# The (M, tj) intermediate h stays in vregs/VMEM; the (M, N) output block is
# resident across the grid and used directly as the accumulator.
# Note: the hidden-dim axis is sequential, so on v7x this runs on one TC; the
# kernel is HBM-bound on the two bf16 weight streams, which it keeps at
# roofline with 1 MiB double-buffered weight chunks (~4.5 MiB VMEM total).
# ----------------------------------------------------------------------------
def _resblock_kernel(*refs, fuse_post_add):
    if fuse_post_add:
        x_ref, w1_ref, b1_ref, w2_ref, b2_ref, tem_ref, o_ref = refs
    else:
        x_ref, w1_ref, b1_ref, w2_ref, b2_ref, o_ref = refs
        tem_ref = None
    j = pl.program_id(0)

    @pl.when(j == 0)
    def _():
        o_ref[...] = jnp.zeros_like(o_ref)

    xb = x_ref[...].astype(jnp.bfloat16)
    h = jnp.dot(xb, w1_ref[...], preferred_element_type=jnp.float32) + b1_ref[...]
    h = jnp.maximum(h, 0.0)
    # TODO(synk): Dropout(0.2) is identity in eval mode; training-mode dropout
    # (random masking + 1/0.8 scaling) is not implemented here.
    o_ref[...] += jnp.dot(
        h.astype(jnp.bfloat16), w2_ref[...], preferred_element_type=jnp.float32
    )

    @pl.when(j == pl.num_programs(0) - 1)
    def _():
        out = o_ref[...] + b2_ref[...] + x_ref[...]
        out = jnp.maximum(out, 0.0)
        if fuse_post_add:
            out = out + tem_ref[...]  # exact: relu(relu(z)+tem) == relu(z)+tem
        o_ref[...] = out


def resblock_pallas(x, w1, b1, w2, b2, tem=None, tj=512):
    M, K = x.shape
    _, H = w1.shape
    _, N = w2.shape
    assert w2.shape[0] == H and H % tj == 0
    fuse_post_add = tem is not None
    kernel = functools.partial(_resblock_kernel, fuse_post_add=fuse_post_add)

    in_specs = [
        pl.BlockSpec((M, K), lambda j: (0, 0)),     # x (resident)
        pl.BlockSpec((K, tj), lambda j: (0, j)),    # W1 chunk (bf16)
        pl.BlockSpec((1, tj), lambda j: (0, j)),    # b1 chunk
        pl.BlockSpec((tj, N), lambda j: (j, 0)),    # W2 chunk (bf16)
        pl.BlockSpec((1, N), lambda j: (0, 0)),     # b2 (resident)
    ]
    args = [x, w1, b1, w2, b2]
    if fuse_post_add:
        in_specs.append(pl.BlockSpec((M, N), lambda j: (0, 0)))  # tem (resident)
        args.append(tem)

    return pl.pallas_call(
        kernel,
        out_shape=jax.ShapeDtypeStruct((M, N), jnp.float32),
        grid_spec=pltpu.PrefetchScalarGridSpec(
            num_scalar_prefetch=0,
            grid=(H // tj,),
            in_specs=in_specs,
            out_specs=pl.BlockSpec((M, N), lambda j: (0, 0)),
        ),
        compiler_params=pltpu.CompilerParams(
            dimension_semantics=("arbitrary",)
        ),
    )(*args)


# ----------------------------------------------------------------------------
# Parameter init (deterministic, mimics torch.nn.Linear default uniform init).
# Weights stored as bf16, biases as (1, N) f32.
# ----------------------------------------------------------------------------
def _init_linear(key, in_dim, out_dim):
    kw, kb = jax.random.split(key)
    bound = 1.0 / (in_dim ** 0.5)
    w = jax.random.uniform(kw, (in_dim, out_dim), jnp.float32, -bound, bound)
    b = jax.random.uniform(kb, (1, out_dim), jnp.float32, -bound, bound)
    return w.astype(jnp.bfloat16), b


def init_params(key):
    keys = jax.random.split(key, 11)
    p = {}
    p["dec1"] = _init_linear(keys[0], 64, 128)
    p["dec2"] = _init_linear(keys[1], 128, 1024)
    for i in range(4):
        p[f"res{i + 1}_1"] = _init_linear(keys[2 + 2 * i], 1024, 2048)
        p[f"res{i + 1}_2"] = _init_linear(keys[3 + 2 * i], 2048, 1024)
    p["deep_to"] = _init_linear(keys[10], 1024, 45)
    return p


# ----------------------------------------------------------------------------
# De_net forward pass
# ----------------------------------------------------------------------------
def de_net_forward(params, x):
    # decoder: Linear(64,128) + ReLU, Linear(128,1024) + ReLU
    x = linear_pallas(x, *params["dec1"], apply_relu=True)
    x = linear_pallas(x, *params["dec2"], apply_relu=True)
    tem = x  # x.detach() has the same forward value

    # ResBlocks 1-3, each followed by torch.relu (fused into the epilogue).
    for i in range(1, 4):
        x = resblock_pallas(x, *params[f"res{i}_1"], *params[f"res{i}_2"])

    # ResBlock 4 additionally folds in the final `x = relu(x + tem)` skip:
    # both operands are post-ReLU (>= 0), so relu(relu(z)+tem) == relu(z)+tem.
    x = resblock_pallas(x, *params["res4_1"], *params["res4_2"], tem=tem)

    # deep_to: Linear(1024, 45), no activation
    return linear_pallas(x, *params["deep_to"], apply_relu=False)


if __name__ == "__main__":
    key = jax.random.PRNGKey(0)
    pkey, xkey = jax.random.split(key)
    params = init_params(pkey)

    batch = 8
    x = jax.random.normal(xkey, (batch, 64), jnp.float32)

    out = jax.jit(de_net_forward)(params, x)
    out = jax.block_until_ready(out)
    assert out.shape == (batch, 45), out.shape
    assert out.dtype == jnp.float32
    print("KERNEL_OK")
</pallas_src>

<mosaic_0001>
module attributes {stable_mosaic.version = 11 : i64} {
  func.func @_resblock_kernel(%arg0: i32, %arg1: memref<8x1024xf32, #tpu.memory_space<vmem>>, %arg2: memref<1024x512xbf16, #tpu.memory_space<vmem>>, %arg3: memref<1x512xf32, #tpu.memory_space<vmem>>, %arg4: memref<512x1024xbf16, #tpu.memory_space<vmem>>, %arg5: memref<1x1024xf32, #tpu.memory_space<vmem>>, %arg6: memref<8x1024xf32, #tpu.memory_space<vmem>>) attributes {dimension_semantics = [#tpu.dimension_semantics<arbitrary>], iteration_bounds = array<i64: 4>, scalar_prefetch = 0 : i64, scratch_operands = 0 : i64, tpu.core_type = #tpu.core_type<tc>, window_params = [{pipeline_mode = #tpu.pipeline_mode<synchronous>, transform_indices = @transform_0, window_bounds = array<i64: 8, 1024>}, {transform_indices = @transform_1, window_bounds = array<i64: 1024, 512>}, {transform_indices = @transform_2, window_bounds = array<i64: 1, 512>}, {transform_indices = @transform_3, window_bounds = array<i64: 512, 1024>}, {pipeline_mode = #tpu.pipeline_mode<synchronous>, transform_indices = @transform_4, window_bounds = array<i64: 1, 1024>}, {pipeline_mode = #tpu.pipeline_mode<synchronous>, transform_indices = @transform_5, window_bounds = array<i64: 8, 1024>}]} {
    %c0_i32 = arith.constant 0 : i32
    %0 = arith.cmpi eq, %arg0, %c0_i32 : i32
    %1 = arith.extui %0 : i1 to i32
    %c0_i32_0 = arith.constant 0 : i32
    %2 = arith.cmpi ne, %1, %c0_i32_0 : i32
    scf.if %2 {
      %cst_15 = arith.constant 0.000000e+00 : f32
      %21 = vector.broadcast %cst_15 : f32 to vector<8x1024xf32>
      %c0_16 = arith.constant 0 : index
      %c0_17 = arith.constant 0 : index
      %22 = vector.load %arg6[%c0_16, %c0_17] : memref<8x1024xf32, #tpu.memory_space<vmem>>, vector<8x1024xf32>
      tpu.vector_store %arg6[%c0_16, %c0_17], %21 {strides = array<i32>} : memref<8x1024xf32, #tpu.memory_space<vmem>>, vector<8x1024xf32>,
    } else {
    }
    %c0 = arith.constant 0 : index
    %c0_1 = arith.constant 0 : index
    %3 = vector.load %arg1[%c0, %c0_1] : memref<8x1024xf32, #tpu.memory_space<vmem>>, vector<8x1024xf32>
    %4 = arith.truncf %3 : vector<8x1024xf32> to vector<8x1024xbf16>
    %c0_2 = arith.constant 0 : index
    %c0_3 = arith.constant 0 : index
    %5 = vector.load %arg2[%c0_2, %c0_3] : memref<1024x512xbf16, #tpu.memory_space<vmem>>, vector<1024x512xbf16>
    %cst = arith.constant dense<0.000000e+00> : vector<8x512xf32>
    %6 = tpu.matmul %4, %5, %cst {dimension_numbers = #tpu.dot_dimension_numbers<[1], [0], [0], [1], [0, 0, 1, 1], [], []>} : vector<8x1024xbf16>, vector<1024x512xbf16>, vector<8x512xf32> -> vector<8x512xf32>
    %c0_4 = arith.constant 0 : index
    %c0_5 = arith.constant 0 : index
    %7 = vector.load %arg3[%c0_4, %c0_5] : memref<1x512xf32, #tpu.memory_space<vmem>>, vector<1x512xf32>
    %8 = vector.broadcast %7 : vector<1x512xf32> to vector<8x512xf32>
    %9 = arith.addf %6, %8 : vector<8x512xf32>
    %cst_6 = arith.constant 0.000000e+00 : f32
    %10 = vector.broadcast %cst_6 : f32 to vector<8x512xf32>
    %11 = arith.maximumf %9, %10 : vector<8x512xf32>
    %c0_7 = arith.constant 0 : index
    %c0_8 = arith.constant 0 : index
    %12 = vector.load %arg6[%c0_7, %c0_8] : memref<8x1024xf32, #tpu.memory_space<vmem>>, vector<8x1024xf32>
    %13 = arith.truncf %11 : vector<8x512xf32> to vector<8x512xbf16>
    %c0_9 = arith.constant 0 : index
    %c0_10 = arith.constant 0 : index
    %14 = vector.load %arg4[%c0_9, %c0_10] : memref<512x1024xbf16, #tpu.memory_space<vmem>>, vector<512x1024xbf16>
    %cst_11 = arith.constant dense<0.000000e+00> : vector<8x1024xf32>
    %15 = tpu.matmul %13, %14, %cst_11 {dimension_numbers = #tpu.dot_dimension_numbers<[1], [0], [0], [1], [0, 0, 1, 1], [], []>} : vector<8x512xbf16>, vector<512x1024xbf16>, vector<8x1024xf32> -> vector<8x1024xf32>
    %16 = arith.addf %12, %15 : vector<8x1024xf32>
    %c0_12 = arith.constant 0 : index
    %c0_13 = arith.constant 0 : index
    %17 = vector.load %arg6[%c0_12, %c0_13] : memref<8x1024xf32, #tpu.memory_space<vmem>>, vector<8x1024xf32>
    tpu.vector_store %arg6[%c0_12, %c0_13], %16 {strides = array<i32>} : memref<8x1024xf32, #tpu.memory_space<vmem>>, vector<8x1024xf32>,
    %c3_i32 = arith.constant 3 : i32
    %18 = arith.cmpi eq, %arg0, %c3_i32 : i32
    %19 = arith.extui %18 : i1 to i32
    %c0_i32_14 = arith.constant 0 : i32
    %20 = arith.cmpi ne, %19, %c0_i32_14 : i32
    scf.if %20 {
      %c0_15 = arith.constant 0 : index
      %c0_16 = arith.constant 0 : index
      %21 = vector.load %arg6[%c0_15, %c0_16] : memref<8x1024xf32, #tpu.memory_space<vmem>>, vector<8x1024xf32>
      %c0_17 = arith.constant 0 : index
      %c0_18 = arith.constant 0 : index
      %22 = vector.load %arg5[%c0_17, %c0_18] : memref<1x1024xf32, #tpu.memory_space<vmem>>, vector<1x1024xf32>
      %23 = vector.broadcast %22 : vector<1x1024xf32> to vector<8x1024xf32>
      %24 = arith.addf %21, %23 : vector<8x1024xf32>
      %c0_19 = arith.constant 0 : index
      %c0_20 = arith.constant 0 : index
      %25 = vector.load %arg1[%c0_19, %c0_20] : memref<8x1024xf32, #tpu.memory_space<vmem>>, vector<8x1024xf32>
      %26 = arith.addf %24, %25 : vector<8x1024xf32>
      %cst_21 = arith.constant 0.000000e+00 : f32
      %27 = vector.broadcast %cst_21 : f32 to vector<8x1024xf32>
      %28 = arith.maximumf %26, %27 : vector<8x1024xf32>
      %c0_22 = arith.constant 0 : index
      %c0_23 = arith.constant 0 : index
      %29 = vector.load %arg6[%c0_22, %c0_23] : memref<8x1024xf32, #tpu.memory_space<vmem>>, vector<8x1024xf32>
      tpu.vector_store %arg6[%c0_22, %c0_23], %28 {strides = array<i32>} : memref<8x1024xf32, #tpu.memory_space<vmem>>, vector<8x1024xf32>,
    } else {
    }
    return
  }
  func.func @transform_0(%arg0: i32) -> (i32, i32) {
    %c0_i32 = arith.constant 0 : i32
    %c0_i32_0 = arith.constant 0 : i32
    %c0_i32_1 = arith.constant 0 : i32
    return %c0_i32, %c0_i32_0 : i32, i32
  }
  func.func @transform_1(%arg0: i32) -> (i32, i32) {
    %c0_i32 = arith.constant 0 : i32
    %c0_i32_0 = arith.constant 0 : i32
    return %c0_i32, %arg0 : i32, i32
  }
  func.func @transform_2(%arg0: i32) -> (i32, i32) {
    %c0_i32 = arith.constant 0 : i32
    %c0_i32_0 = arith.constant 0 : i32
    return %c0_i32, %arg0 : i32, i32
  }
  func.func @transform_3(%arg0: i32) -> (i32, i32) {
    %c0_i32 = arith.constant 0 : i32
    %c0_i32_0 = arith.constant 0 : i32
    return %arg0, %c0_i32 : i32, i32
  }
  func.func @transform_4(%arg0: i32) -> (i32, i32) {
    %c0_i32 = arith.constant 0 : i32
    %c0_i32_0 = arith.constant 0 : i32
    %c0_i32_1 = arith.constant 0 : i32
    return %c0_i32, %c0_i32_0 : i32, i32
  }
  func.func @transform_5(%arg0: i32) -> (i32, i32) {
    %c0_i32 = arith.constant 0 : i32
    %c0_i32_0 = arith.constant 0 : i32
    %c0_i32_1 = arith.constant 0 : i32
    return %c0_i32, %c0_i32_0 : i32, i32
  }
}

module attributes {stable_mosaic.version = 11 : i64} {
  func.func @_linear_kernel(%arg0: i32, %arg1: memref<8x128xf32, #tpu.memory_space<vmem>>, %arg2: memref<128x512xbf16, #tpu.memory_space<vmem>>, %arg3: memref<1x512xf32, #tpu.memory_space<vmem>>, %arg4: memref<8x512xf32, #tpu.memory_space<vmem>>) attributes {dimension_semantics = [#tpu.dimension_semantics<parallel>], iteration_bounds = array<i64: 2>, scalar_prefetch = 0 : i64, scratch_operands = 0 : i64, tpu.core_type = #tpu.core_type<tc>, window_params = [{pipeline_mode = #tpu.pipeline_mode<synchronous>, transform_indices = @transform_0, window_bounds = array<i64: 8, 128>}, {transform_indices = @transform_1, window_bounds = array<i64: 128, 512>}, {transform_indices = @transform_2, window_bounds = array<i64: 1, 512>}, {transform_indices = @transform_3, window_bounds = array<i64: 8, 512>}]} {
    %c0 = arith.constant 0 : index
    %c0_0 = arith.constant 0 : index
    %0 = vector.load %arg1[%c0, %c0_0] : memref<8x128xf32, #tpu.memory_space<vmem>>, vector<8x128xf32>
    %1 = arith.truncf %0 : vector<8x128xf32> to vector<8x128xbf16>
    %c0_1 = arith.constant 0 : index
    %c0_2 = arith.constant 0 : index
    %2 = vector.load %arg2[%c0_1, %c0_2] : memref<128x512xbf16, #tpu.memory_space<vmem>>, vector<128x512xbf16>
    %cst = arith.constant dense<0.000000e+00> : vector<8x512xf32>
    %3 = tpu.matmul %1, %2, %cst {dimension_numbers = #tpu.dot_dimension_numbers<[1], [0], [0], [1], [0, 0, 1, 1], [], []>} : vector<8x128xbf16>, vector<128x512xbf16>, vector<8x512xf32> -> vector<8x512xf32>
    %c0_3 = arith.constant 0 : index
    %c0_4 = arith.constant 0 : index
    %4 = vector.load %arg3[%c0_3, %c0_4] : memref<1x512xf32, #tpu.memory_space<vmem>>, vector<1x512xf32>
    %5 = vector.broadcast %4 : vector<1x512xf32> to vector<8x512xf32>
    %6 = arith.addf %3, %5 : vector<8x512xf32>
    %cst_5 = arith.constant 0.000000e+00 : f32
    %7 = vector.broadcast %cst_5 : f32 to vector<8x512xf32>
    %8 = arith.maximumf %6, %7 : vector<8x512xf32>
    %c0_6 = arith.constant 0 : index
    %c0_7 = arith.constant 0 : index
    %9 = vector.load %arg4[%c0_6, %c0_7] : memref<8x512xf32, #tpu.memory_space<vmem>>, vector<8x512xf32>
    tpu.vector_store %arg4[%c0_6, %c0_7], %8 {strides = array<i32>} : memref<8x512xf32, #tpu.memory_space<vmem>>, vector<8x512xf32>,
    return
  }
  func.func @transform_0(%arg0: i32) -> (i32, i32) {
    %c0_i32 = arith.constant 0 : i32
    %c0_i32_0 = arith.constant 0 : i32
    %c0_i32_1 = arith.constant 0 : i32
    return %c0_i32, %c0_i32_0 : i32, i32
  }
  func.func @transform_1(%arg0: i32) -> (i32, i32) {
    %c0_i32 = arith.constant 0 : i32
    %c0_i32_0 = arith.constant 0 : i32
    return %c0_i32, %arg0 : i32, i32
  }
  func.func @transform_2(%arg0: i32) -> (i32, i32) {
    %c0_i32 = arith.constant 0 : i32
    %c0_i32_0 = arith.constant 0 : i32
    return %c0_i32, %arg0 : i32, i32
  }
  func.func @transform_3(%arg0: i32) -> (i32, i32) {
    %c0_i32 = arith.constant 0 : i32
    %c0_i32_0 = arith.constant 0 : i32
    return %c0_i32, %arg0 : i32, i32
  }
}

module attributes {stable_mosaic.version = 11 : i64} {
  func.func @_linear_kernel(%arg0: i32, %arg1: memref<8x64xf32, #tpu.memory_space<vmem>>, %arg2: memref<64x128xbf16, #tpu.memory_space<vmem>>, %arg3: memref<1x128xf32, #tpu.memory_space<vmem>>, %arg4: memref<8x128xf32, #tpu.memory_space<vmem>>) attributes {dimension_semantics = [#tpu.dimension_semantics<parallel>], iteration_bounds = array<i64: 1>, scalar_prefetch = 0 : i64, scratch_operands = 0 : i64, tpu.core_type = #tpu.core_type<tc>, window_params = [{pipeline_mode = #tpu.pipeline_mode<synchronous>, transform_indices = @transform_0, window_bounds = array<i64: 8, 64>}, {transform_indices = @transform_1, window_bounds = array<i64: 64, 128>}, {transform_indices = @transform_2, window_bounds = array<i64: 1, 128>}, {transform_indices = @transform_3, window_bounds = array<i64: 8, 128>}]} {
    %c0 = arith.constant 0 : index
    %c0_0 = arith.constant 0 : index
    %0 = vector.load %arg1[%c0, %c0_0] : memref<8x64xf32, #tpu.memory_space<vmem>>, vector<8x64xf32>
    %1 = arith.truncf %0 : vector<8x64xf32> to vector<8x64xbf16>
    %c0_1 = arith.constant 0 : index
    %c0_2 = arith.constant 0 : index
    %2 = vector.load %arg2[%c0_1, %c0_2] : memref<64x128xbf16, #tpu.memory_space<vmem>>, vector<64x128xbf16>
    %cst = arith.constant dense<0.000000e+00> : vector<8x128xf32>
    %3 = tpu.matmul %1, %2, %cst {dimension_numbers = #tpu.dot_dimension_numbers<[1], [0], [0], [1], [0, 0, 1, 1], [], []>} : vector<8x64xbf16>, vector<64x128xbf16>, vector<8x128xf32> -> vector<8x128xf32>
    %c0_3 = arith.constant 0 : index
    %c0_4 = arith.constant 0 : index
    %4 = vector.load %arg3[%c0_3, %c0_4] : memref<1x128xf32, #tpu.memory_space<vmem>>, vector<1x128xf32>
    %5 = vector.broadcast %4 : vector<1x128xf32> to vector<8x128xf32>
    %6 = arith.addf %3, %5 : vector<8x128xf32>
    %cst_5 = arith.constant 0.000000e+00 : f32
    %7 = vector.broadcast %cst_5 : f32 to vector<8x128xf32>
    %8 = arith.maximumf %6, %7 : vector<8x128xf32>
    %c0_6 = arith.constant 0 : index
    %c0_7 = arith.constant 0 : index
    %9 = vector.load %arg4[%c0_6, %c0_7] : memref<8x128xf32, #tpu.memory_space<vmem>>, vector<8x128xf32>
    tpu.vector_store %arg4[%c0_6, %c0_7], %8 {strides = array<i32>} : memref<8x128xf32, #tpu.memory_space<vmem>>, vector<8x128xf32>,
    return
  }
  func.func @transform_0(%arg0: i32) -> (i32, i32) {
    %c0_i32 = arith.constant 0 : i32
    %c0_i32_0 = arith.constant 0 : i32
    %c0_i32_1 = arith.constant 0 : i32
    return %c0_i32, %c0_i32_0 : i32, i32
  }
  func.func @transform_1(%arg0: i32) -> (i32, i32) {
    %c0_i32 = arith.constant 0 : i32
    %c0_i32_0 = arith.constant 0 : i32
    return %c0_i32, %arg0 : i32, i32
  }
  func.func @transform_2(%arg0: i32) -> (i32, i32) {
    %c0_i32 = arith.constant 0 : i32
    %c0_i32_0 = arith.constant 0 : i32
    return %c0_i32, %arg0 : i32, i32
  }
  func.func @transform_3(%arg0: i32) -> (i32, i32) {
    %c0_i32 = arith.constant 0 : i32
    %c0_i32_0 = arith.constant 0 : i32
    return %c0_i32, %arg0 : i32, i32
  }
}

module attributes {stable_mosaic.version = 11 : i64} {
  func.func @_resblock_kernel(%arg0: i32, %arg1: memref<8x1024xf32, #tpu.memory_space<vmem>>, %arg2: memref<1024x512xbf16, #tpu.memory_space<vmem>>, %arg3: memref<1x512xf32, #tpu.memory_space<vmem>>, %arg4: memref<512x1024xbf16, #tpu.memory_space<vmem>>, %arg5: memref<1x1024xf32, #tpu.memory_space<vmem>>, %arg6: memref<8x1024xf32, #tpu.memory_space<vmem>>) attributes {dimension_semantics = [#tpu.dimension_semantics<arbitrary>], iteration_bounds = array<i64: 4>, scalar_prefetch = 0 : i64, scratch_operands = 0 : i64, tpu.core_type = #tpu.core_type<tc>, window_params = [{pipeline_mode = #tpu.pipeline_mode<synchronous>, transform_indices = @transform_0, window_bounds = array<i64: 8, 1024>}, {transform_indices = @transform_1, window_bounds = array<i64: 1024, 512>}, {transform_indices = @transform_2, window_bounds = array<i64: 1, 512>}, {transform_indices = @transform_3, window_bounds = array<i64: 512, 1024>}, {pipeline_mode = #tpu.pipeline_mode<synchronous>, transform_indices = @transform_4, window_bounds = array<i64: 1, 1024>}, {pipeline_mode = #tpu.pipeline_mode<synchronous>, transform_indices = @transform_5, window_bounds = array<i64: 8, 1024>}]} {
    %c0_i32 = arith.constant 0 : i32
    %0 = arith.cmpi eq, %arg0, %c0_i32 : i32
    %1 = arith.extui %0 : i1 to i32
    %c0_i32_0 = arith.constant 0 : i32
    %2 = arith.cmpi ne, %1, %c0_i32_0 : i32
    scf.if %2 {
      %cst_15 = arith.constant 0.000000e+00 : f32
      %21 = vector.broadcast %cst_15 : f32 to vector<8x1024xf32>
      %c0_16 = arith.constant 0 : index
      %c0_17 = arith.constant 0 : index
      %22 = vector.load %arg6[%c0_16, %c0_17] : memref<8x1024xf32, #tpu.memory_space<vmem>>, vector<8x1024xf32>
      tpu.vector_store %arg6[%c0_16, %c0_17], %21 {strides = array<i32>} : memref<8x1024xf32, #tpu.memory_space<vmem>>, vector<8x1024xf32>,
    } else {
    }
    %c0 = arith.constant 0 : index
    %c0_1 = arith.constant 0 : index
    %3 = vector.load %arg1[%c0, %c0_1] : memref<8x1024xf32, #tpu.memory_space<vmem>>, vector<8x1024xf32>
    %4 = arith.truncf %3 : vector<8x1024xf32> to vector<8x1024xbf16>
    %c0_2 = arith.constant 0 : index
    %c0_3 = arith.constant 0 : index
    %5 = vector.load %arg2[%c0_2, %c0_3] : memref<1024x512xbf16, #tpu.memory_space<vmem>>, vector<1024x512xbf16>
    %cst = arith.constant dense<0.000000e+00> : vector<8x512xf32>
    %6 = tpu.matmul %4, %5, %cst {dimension_numbers = #tpu.dot_dimension_numbers<[1], [0], [0], [1], [0, 0, 1, 1], [], []>} : vector<8x1024xbf16>, vector<1024x512xbf16>, vector<8x512xf32> -> vector<8x512xf32>
    %c0_4 = arith.constant 0 : index
    %c0_5 = arith.constant 0 : index
    %7 = vector.load %arg3[%c0_4, %c0_5] : memref<1x512xf32, #tpu.memory_space<vmem>>, vector<1x512xf32>
    %8 = vector.broadcast %7 : vector<1x512xf32> to vector<8x512xf32>
    %9 = arith.addf %6, %8 : vector<8x512xf32>
    %cst_6 = arith.constant 0.000000e+00 : f32
    %10 = vector.broadcast %cst_6 : f32 to vector<8x512xf32>
    %11 = arith.maximumf %9, %10 : vector<8x512xf32>
    %c0_7 = arith.constant 0 : index
    %c0_8 = arith.constant 0 : index
    %12 = vector.load %arg6[%c0_7, %c0_8] : memref<8x1024xf32, #tpu.memory_space<vmem>>, vector<8x1024xf32>
    %13 = arith.truncf %11 : vector<8x512xf32> to vector<8x512xbf16>
    %c0_9 = arith.constant 0 : index
    %c0_10 = arith.constant 0 : index
    %14 = vector.load %arg4[%c0_9, %c0_10] : memref<512x1024xbf16, #tpu.memory_space<vmem>>, vector<512x1024xbf16>
    %cst_11 = arith.constant dense<0.000000e+00> : vector<8x1024xf32>
    %15 = tpu.matmul %13, %14, %cst_11 {dimension_numbers = #tpu.dot_dimension_numbers<[1], [0], [0], [1], [0, 0, 1, 1], [], []>} : vector<8x512xbf16>, vector<512x1024xbf16>, vector<8x1024xf32> -> vector<8x1024xf32>
    %16 = arith.addf %12, %15 : vector<8x1024xf32>
    %c0_12 = arith.constant 0 : index
    %c0_13 = arith.constant 0 : index
    %17 = vector.load %arg6[%c0_12, %c0_13] : memref<8x1024xf32, #tpu.memory_space<vmem>>, vector<8x1024xf32>
    tpu.vector_store %arg6[%c0_12, %c0_13], %16 {strides = array<i32>} : memref<8x1024xf32, #tpu.memory_space<vmem>>, vector<8x1024xf32>,
    %c3_i32 = arith.constant 3 : i32
    %18 = arith.cmpi eq, %arg0, %c3_i32 : i32
    %19 = arith.extui %18 : i1 to i32
    %c0_i32_14 = arith.constant 0 : i32
    %20 = arith.cmpi ne, %19, %c0_i32_14 : i32
    scf.if %20 {
      %c0_15 = arith.constant 0 : index
      %c0_16 = arith.constant 0 : index
      %21 = vector.load %arg6[%c0_15, %c0_16] : memref<8x1024xf32, #tpu.memory_space<vmem>>, vector<8x1024xf32>
      %c0_17 = arith.constant 0 : index
      %c0_18 = arith.constant 0 : index
      %22 = vector.load %arg5[%c0_17, %c0_18] : memref<1x1024xf32, #tpu.memory_space<vmem>>, vector<1x1024xf32>
      %23 = vector.broadcast %22 : vector<1x1024xf32> to vector<8x1024xf32>
      %24 = arith.addf %21, %23 : vector<8x1024xf32>
      %c0_19 = arith.constant 0 : index
      %c0_20 = arith.constant 0 : index
      %25 = vector.load %arg1[%c0_19, %c0_20] : memref<8x1024xf32, #tpu.memory_space<vmem>>, vector<8x1024xf32>
      %26 = arith.addf %24, %25 : vector<8x1024xf32>
      %cst_21 = arith.constant 0.000000e+00 : f32
      %27 = vector.broadcast %cst_21 : f32 to vector<8x1024xf32>
      %28 = arith.maximumf %26, %27 : vector<8x1024xf32>
      %c0_22 = arith.constant 0 : index
      %c0_23 = arith.constant 0 : index
      %29 = vector.load %arg6[%c0_22, %c0_23] : memref<8x1024xf32, #tpu.memory_space<vmem>>, vector<8x1024xf32>
      tpu.vector_store %arg6[%c0_22, %c0_23], %28 {strides = array<i32>} : memref<8x1024xf32, #tpu.memory_space<vmem>>, vector<8x1024xf32>,
    } else {
    }
    return
  }
  func.func @transform_0(%arg0: i32) -> (i32, i32) {
    %c0_i32 = arith.constant 0 : i32
    %c0_i32_0 = arith.constant 0 : i32
    %c0_i32_1 = arith.constant 0 : i32
    return %c0_i32, %c0_i32_0 : i32, i32
  }
  func.func @transform_1(%arg0: i32) -> (i32, i32) {
    %c0_i32 = arith.constant 0 : i32
    %c0_i32_0 = arith.constant 0 : i32
    return %c0_i32, %arg0 : i32, i32
  }
  func.func @transform_2(%arg0: i32) -> (i32, i32) {
    %c0_i32 = arith.constant 0 : i32
    %c0_i32_0 = arith.constant 0 : i32
    return %c0_i32, %arg0 : i32, i32
  }
  func.func @transform_3(%arg0: i32) -> (i32, i32) {
    %c0_i32 = arith.constant 0 : i32
    %c0_i32_0 = arith.constant 0 : i32
    return %arg0, %c0_i32 : i32, i32
  }
  func.func @transform_4(%arg0: i32) -> (i32, i32) {
    %c0_i32 = arith.constant 0 : i32
    %c0_i32_0 = arith.constant 0 : i32
    %c0_i32_1 = arith.constant 0 : i32
    return %c0_i32, %c0_i32_0 : i32, i32
  }
  func.func @transform_5(%arg0: i32) -> (i32, i32) {
    %c0_i32 = arith.constant 0 : i32
    %c0_i32_0 = arith.constant 0 : i32
    %c0_i32_1 = arith.constant 0 : i32
    return %c0_i32, %c0_i32_0 : i32, i32
  }
}

module attributes {stable_mosaic.version = 11 : i64} {
  func.func @_resblock_kernel(%arg0: i32, %arg1: memref<8x1024xf32, #tpu.memory_space<vmem>>, %arg2: memref<1024x512xbf16, #tpu.memory_space<vmem>>, %arg3: memref<1x512xf32, #tpu.memory_space<vmem>>, %arg4: memref<512x1024xbf16, #tpu.memory_space<vmem>>, %arg5: memref<1x1024xf32, #tpu.memory_space<vmem>>, %arg6: memref<8x1024xf32, #tpu.memory_space<vmem>>, %arg7: memref<8x1024xf32, #tpu.memory_space<vmem>>) attributes {dimension_semantics = [#tpu.dimension_semantics<arbitrary>], iteration_bounds = array<i64: 4>, scalar_prefetch = 0 : i64, scratch_operands = 0 : i64, tpu.core_type = #tpu.core_type<tc>, window_params = [{pipeline_mode = #tpu.pipeline_mode<synchronous>, transform_indices = @transform_0, window_bounds = array<i64: 8, 1024>}, {transform_indices = @transform_1, window_bounds = array<i64: 1024, 512>}, {transform_indices = @transform_2, window_bounds = array<i64: 1, 512>}, {transform_indices = @transform_3, window_bounds = array<i64: 512, 1024>}, {pipeline_mode = #tpu.pipeline_mode<synchronous>, transform_indices = @transform_4, window_bounds = array<i64: 1, 1024>}, {pipeline_mode = #tpu.pipeline_mode<synchronous>, transform_indices = @transform_5, window_bounds = array<i64: 8, 1024>}, {pipeline_mode = #tpu.pipeline_mode<synchronous>, transform_indices = @transform_6, window_bounds = array<i64: 8, 1024>}]} {
    %c0_i32 = arith.constant 0 : i32
    %0 = arith.cmpi eq, %arg0, %c0_i32 : i32
    %1 = arith.extui %0 : i1 to i32
    %c0_i32_0 = arith.constant 0 : i32
    %2 = arith.cmpi ne, %1, %c0_i32_0 : i32
    scf.if %2 {
      %cst_15 = arith.constant 0.000000e+00 : f32
      %21 = vector.broadcast %cst_15 : f32 to vector<8x1024xf32>
      %c0_16 = arith.constant 0 : index
      %c0_17 = arith.constant 0 : index
      %22 = vector.load %arg7[%c0_16, %c0_17] : memref<8x1024xf32, #tpu.memory_space<vmem>>, vector<8x1024xf32>
      tpu.vector_store %arg7[%c0_16, %c0_17], %21 {strides = array<i32>} : memref<8x1024xf32, #tpu.memory_space<vmem>>, vector<8x1024xf32>,
    } else {
    }
    %c0 = arith.constant 0 : index
    %c0_1 = arith.constant 0 : index
    %3 = vector.load %arg1[%c0, %c0_1] : memref<8x1024xf32, #tpu.memory_space<vmem>>, vector<8x1024xf32>
    %4 = arith.truncf %3 : vector<8x1024xf32> to vector<8x1024xbf16>
    %c0_2 = arith.constant 0 : index
    %c0_3 = arith.constant 0 : index
    %5 = vector.load %arg2[%c0_2, %c0_3] : memref<1024x512xbf16, #tpu.memory_space<vmem>>, vector<1024x512xbf16>
    %cst = arith.constant dense<0.000000e+00> : vector<8x512xf32>
    %6 = tpu.matmul %4, %5, %cst {dimension_numbers = #tpu.dot_dimension_numbers<[1], [0], [0], [1], [0, 0, 1, 1], [], []>} : vector<8x1024xbf16>, vector<1024x512xbf16>, vector<8x512xf32> -> vector<8x512xf32>
    %c0_4 = arith.constant 0 : index
    %c0_5 = arith.constant 0 : index
    %7 = vector.load %arg3[%c0_4, %c0_5] : memref<1x512xf32, #tpu.memory_space<vmem>>, vector<1x512xf32>
    %8 = vector.broadcast %7 : vector<1x512xf32> to vector<8x512xf32>
    %9 = arith.addf %6, %8 : vector<8x512xf32>
    %cst_6 = arith.constant 0.000000e+00 : f32
    %10 = vector.broadcast %cst_6 : f32 to vector<8x512xf32>
    %11 = arith.maximumf %9, %10 : vector<8x512xf32>
    %c0_7 = arith.constant 0 : index
    %c0_8 = arith.constant 0 : index
    %12 = vector.load %arg7[%c0_7, %c0_8] : memref<8x1024xf32, #tpu.memory_space<vmem>>, vector<8x1024xf32>
    %13 = arith.truncf %11 : vector<8x512xf32> to vector<8x512xbf16>
    %c0_9 = arith.constant 0 : index
    %c0_10 = arith.constant 0 : index
    %14 = vector.load %arg4[%c0_9, %c0_10] : memref<512x1024xbf16, #tpu.memory_space<vmem>>, vector<512x1024xbf16>
    %cst_11 = arith.constant dense<0.000000e+00> : vector<8x1024xf32>
    %15 = tpu.matmul %13, %14, %cst_11 {dimension_numbers = #tpu.dot_dimension_numbers<[1], [0], [0], [1], [0, 0, 1, 1], [], []>} : vector<8x512xbf16>, vector<512x1024xbf16>, vector<8x1024xf32> -> vector<8x1024xf32>
    %16 = arith.addf %12, %15 : vector<8x1024xf32>
    %c0_12 = arith.constant 0 : index
    %c0_13 = arith.constant 0 : index
    %17 = vector.load %arg7[%c0_12, %c0_13] : memref<8x1024xf32, #tpu.memory_space<vmem>>, vector<8x1024xf32>
    tpu.vector_store %arg7[%c0_12, %c0_13], %16 {strides = array<i32>} : memref<8x1024xf32, #tpu.memory_space<vmem>>, vector<8x1024xf32>,
    %c3_i32 = arith.constant 3 : i32
    %18 = arith.cmpi eq, %arg0, %c3_i32 : i32
    %19 = arith.extui %18 : i1 to i32
    %c0_i32_14 = arith.constant 0 : i32
    %20 = arith.cmpi ne, %19, %c0_i32_14 : i32
    scf.if %20 {
      %c0_15 = arith.constant 0 : index
      %c0_16 = arith.constant 0 : index
      %21 = vector.load %arg7[%c0_15, %c0_16] : memref<8x1024xf32, #tpu.memory_space<vmem>>, vector<8x1024xf32>
      %c0_17 = arith.constant 0 : index
      %c0_18 = arith.constant 0 : index
      %22 = vector.load %arg5[%c0_17, %c0_18] : memref<1x1024xf32, #tpu.memory_space<vmem>>, vector<1x1024xf32>
      %23 = vector.broadcast %22 : vector<1x1024xf32> to vector<8x1024xf32>
      %24 = arith.addf %21, %23 : vector<8x1024xf32>
      %c0_19 = arith.constant 0 : index
      %c0_20 = arith.constant 0 : index
      %25 = vector.load %arg1[%c0_19, %c0_20] : memref<8x1024xf32, #tpu.memory_space<vmem>>, vector<8x1024xf32>
      %26 = arith.addf %24, %25 : vector<8x1024xf32>
      %cst_21 = arith.constant 0.000000e+00 : f32
      %27 = vector.broadcast %cst_21 : f32 to vector<8x1024xf32>
      %28 = arith.maximumf %26, %27 : vector<8x1024xf32>
      %c0_22 = arith.constant 0 : index
      %c0_23 = arith.constant 0 : index
      %29 = vector.load %arg6[%c0_22, %c0_23] : memref<8x1024xf32, #tpu.memory_space<vmem>>, vector<8x1024xf32>
      %30 = arith.addf %28, %29 : vector<8x1024xf32>
      %c0_24 = arith.constant 0 : index
      %c0_25 = arith.constant 0 : index
      %31 = vector.load %arg7[%c0_24, %c0_25] : memref<8x1024xf32, #tpu.memory_space<vmem>>, vector<8x1024xf32>
      tpu.vector_store %arg7[%c0_24, %c0_25], %30 {strides = array<i32>} : memref<8x1024xf32, #tpu.memory_space<vmem>>, vector<8x1024xf32>,
    } else {
    }
    return
  }
  func.func @transform_0(%arg0: i32) -> (i32, i32) {
    %c0_i32 = arith.constant 0 : i32
    %c0_i32_0 = arith.constant 0 : i32
    %c0_i32_1 = arith.constant 0 : i32
    return %c0_i32, %c0_i32_0 : i32, i32
  }
  func.func @transform_1(%arg0: i32) -> (i32, i32) {
    %c0_i32 = arith.constant 0 : i32
    %c0_i32_0 = arith.constant 0 : i32
    return %c0_i32, %arg0 : i32, i32
  }
  func.func @transform_2(%arg0: i32) -> (i32, i32) {
    %c0_i32 = arith.constant 0 : i32
    %c0_i32_0 = arith.constant 0 : i32
    return %c0_i32, %arg0 : i32, i32
  }
  func.func @transform_3(%arg0: i32) -> (i32, i32) {
    %c0_i32 = arith.constant 0 : i32
    %c0_i32_0 = arith.constant 0 : i32
    return %arg0, %c0_i32 : i32, i32
  }
  func.func @transform_4(%arg0: i32) -> (i32, i32) {
    %c0_i32 = arith.constant 0 : i32
    %c0_i32_0 = arith.constant 0 : i32
    %c0_i32_1 = arith.constant 0 : i32
    return %c0_i32, %c0_i32_0 : i32, i32
  }
  func.func @transform_5(%arg0: i32) -> (i32, i32) {
    %c0_i32 = arith.constant 0 : i32
    %c0_i32_0 = arith.constant 0 : i32
    %c0_i32_1 = arith.constant 0 : i32
    return %c0_i32, %c0_i32_0 : i32, i32
  }
  func.func @transform_6(%arg0: i32) -> (i32, i32) {
    %c0_i32 = arith.constant 0 : i32
    %c0_i32_0 = arith.constant 0 : i32
    %c0_i32_1 = arith.constant 0 : i32
    return %c0_i32, %c0_i32_0 : i32, i32
  }
}

module attributes {stable_mosaic.version = 11 : i64} {
  func.func @_linear_kernel(%arg0: i32, %arg1: memref<8x1024xf32, #tpu.memory_space<vmem>>, %arg2: memref<1024x45xbf16, #tpu.memory_space<vmem>>, %arg3: memref<1x45xf32, #tpu.memory_space<vmem>>, %arg4: memref<8x45xf32, #tpu.memory_space<vmem>>) attributes {dimension_semantics = [#tpu.dimension_semantics<parallel>], iteration_bounds = array<i64: 1>, scalar_prefetch = 0 : i64, scratch_operands = 0 : i64, tpu.core_type = #tpu.core_type<tc>, window_params = [{pipeline_mode = #tpu.pipeline_mode<synchronous>, transform_indices = @transform_0, window_bounds = array<i64: 8, 1024>}, {transform_indices = @transform_1, window_bounds = array<i64: 1024, 45>}, {transform_indices = @transform_2, window_bounds = array<i64: 1, 45>}, {transform_indices = @transform_3, window_bounds = array<i64: 8, 45>}]} {
    %c0 = arith.constant 0 : index
    %c0_0 = arith.constant 0 : index
    %0 = vector.load %arg1[%c0, %c0_0] : memref<8x1024xf32, #tpu.memory_space<vmem>>, vector<8x1024xf32>
    %1 = arith.truncf %0 : vector<8x1024xf32> to vector<8x1024xbf16>
    %c0_1 = arith.constant 0 : index
    %c0_2 = arith.constant 0 : index
    %2 = vector.load %arg2[%c0_1, %c0_2] : memref<1024x45xbf16, #tpu.memory_space<vmem>>, vector<1024x45xbf16>
    %cst = arith.constant dense<0.000000e+00> : vector<8x45xf32>
    %3 = tpu.matmul %1, %2, %cst {dimension_numbers = #tpu.dot_dimension_numbers<[1], [0], [0], [1], [0, 0, 1, 1], [], []>} : vector<8x1024xbf16>, vector<1024x45xbf16>, vector<8x45xf32> -> vector<8x45xf32>
    %c0_3 = arith.constant 0 : index
    %c0_4 = arith.constant 0 : index
    %4 = vector.load %arg3[%c0_3, %c0_4] : memref<1x45xf32, #tpu.memory_space<vmem>>, vector<1x45xf32>
    %5 = vector.broadcast %4 : vector<1x45xf32> to vector<8x45xf32>
    %6 = arith.addf %3, %5 : vector<8x45xf32>
    %c0_5 = arith.constant 0 : index
    %c0_6 = arith.constant 0 : index
    %7 = vector.load %arg4[%c0_5, %c0_6] : memref<8x45xf32, #tpu.memory_space<vmem>>, vector<8x45xf32>
    tpu.vector_store %arg4[%c0_5, %c0_6], %6 {strides = array<i32>} : memref<8x45xf32, #tpu.memory_space<vmem>>, vector<8x45xf32>,
    return
  }
  func.func @transform_0(%arg0: i32) -> (i32, i32) {
    %c0_i32 = arith.constant 0 : i32
    %c0_i32_0 = arith.constant 0 : i32
    %c0_i32_1 = arith.constant 0 : i32
    return %c0_i32, %c0_i32_0 : i32, i32
  }
  func.func @transform_1(%arg0: i32) -> (i32, i32) {
    %c0_i32 = arith.constant 0 : i32
    %c0_i32_0 = arith.constant 0 : i32
    return %c0_i32, %arg0 : i32, i32
  }
  func.func @transform_2(%arg0: i32) -> (i32, i32) {
    %c0_i32 = arith.constant 0 : i32
    %c0_i32_0 = arith.constant 0 : i32
    return %c0_i32, %arg0 : i32, i32
  }
  func.func @transform_3(%arg0: i32) -> (i32, i32) {
    %c0_i32 = arith.constant 0 : i32
    %c0_i32_0 = arith.constant 0 : i32
    return %c0_i32, %arg0 : i32, i32
  }
}

</mosaic_0001>

<bundles_post_ra>
// kernel: de_net_forward.8
= control target key start
LH: loop header
LB: loop body
LE: loop exit
PB: predicated region body
PF: predicated region fallthrough
CT: control target
= control target key end

     0   :  { %8 = vsyncpa [#allocation3], 0  ;;  %s1087_s0 = inlined_call_operand.vmem [shape: f32[8,128], index: 0, kind: input, shape index: {}]   ;;  %s1088_s1 = inlined_call_operand.hbm [shape: bf16[128,1024], index: 1, kind: input, shape index: {}]   ;;  %s1089_s2 = inlined_call_operand.hbm [shape: f32[1,1024], index: 2, kind: input, shape index: {}]   ;;  %s1090_s3 = inlined_call_operand.vmem [shape: f32[8,1024], index: 3, kind: output, shape index: {}]  }
   0x1   :  { %10 = vsyncpa [#allocation3 + $0x1], 0 }
   0x2   :  { %11 = vsyncpa [#allocation5], 0 }
   0x3   :  { %13 = vsyncpa [#allocation5 + $0x1], 0  ;;  %s902_s12 = smov 0   ;;  %s904_s13 = smov 0  }
   0x4   :  { %s906_s14 = smov 0   ;;  %s908_s15 = smov 0  }
   0x5 LB: > { %s629_s16 = sadd.s32 4294967295, %s874_s15   ;;  %s922_s17 = sadd.s32 1, %s874_s15   ;;  %s874_s15 = sphi %s908_s15, %s1100_s15   ;;  %s870_s14 = sphi %s906_s14, %s1099_s14   ;;  %s866_s13 = sphi %s904_s13, %s1098_s13   ;;  %s862_s12 = sphi %s902_s12, %s1097_s12  }
   0x6   : > { %s44_s18 = ssub.s32 %s874_s15, %s922_s17  ;;  %s47_s19 = sadd.s32 1, %s870_s14 }
   0x7   : > { %p45_p0 = scmp.eq.s32.totalorder %s44_s18, 0  ;;  %p54_p1 = scmp.ne.s32.totalorder %s870_s14, %s866_s13 }
   0x8   : > { %p55_p2 = scmp.eq.s32.totalorder %s874_s15, 0  ;;  %p60_p3 = scmp.ne.s32.totalorder %s866_s13, %s862_s12 }
   0x9   : > { %s932_s20 = scalar_select %p45_p0, %s870_s14, %s47_s19  }
   0xa   : > { %p56_p4 = por %p55_p2, %p54_p1  ;;  %p61_p5 = scmp.eq.s32.totalorder %s629_s16, 0 }
   0xb   : > { %p691_p6 = scmp.lt.s32.totalorder %s874_s15, 2  ;;  %s942_s22 = sand.u32 1, %s870_s14  }
   0xc   : > { %p937_p7 = por %p61_p5, %p60_p3  ;;  %s633_s23 = sshll.u32 %s942_s22, 8 }
   0xd   : > { %s678_s24 = sshll.u32 %s874_s15, 8  ;;  %s143_s28 = scalar_lea.vmem [#allocation2], %s633_s23 }
   0xe   : > { %s1092_s21 = scalar_select %p937_p7, 1, 0 }
   0xf   : > { %s949_s27 = scalar_lea.hbm %s1088_s1, %s678_s24  ;;  %s150_s29 = sshll.u32 %s143_s28, 4  ;;  %s951_s29 = int_to_ptr.vmem [resolvable:$true] %s150_s29 }
  0x10   : > { %p953_p8 = pnand %p691_p6, %p56_p4  ;;  %s140_s4 = scalar_lea.sflag [#allocation3], %s942_s22 }
  0x11   : > { %s776_s5 = scalar_lea.hbm %s949_s27, 4096  ;;  %s781_s8 = scalar_lea.hbm %s1088_s1, 8192 }
  0x12   : > { %p777_p9 = scmp.ne.s32.totalorder %s949_s27, %s776_s5  ;;  %p778_p10 = pneg %p953_p8 }
  0x13   : > { %p782_p13 = scmp.lt.u32.totalorder %s949_s27, %s1088_s1  ;;  %p783_p0 = scmp.lt.u32.totalorder %s781_s8, %s776_s5 }
  0x14   : > { %p779_p11 = pnand %p778_p10, %p777_p9  ;;  %p785_p2 = scmp.lt.u32.totalorder %s776_s5, %s949_s27 }
  0x15   : > { %p784_p1 = por %p783_p0, %p782_p13 }
  0x16   : > { %p780_p12 = pneg %p779_p11 }
  0x17   : > { %p786_p3 = por %p785_p2, %p784_p1 }
  0x19   : > { %p787_p4 = pnand %p786_p3, %p780_p12 }
  0x1b   : > { %790 = shalt.err (!%p787_p4)
}
  0x1c   : > { %s791_s11 = scalar_lea.vmem %s951_s29, 4096  ;;  %s876_s12 = smov [#allocation2]  }
  0x1d   : > { %p792_p5 = scmp.ne.s32.totalorder %s951_s29, %s791_s11  ;;  %s796_s18 = sshll.u32 %s876_s12, 4  ;;  %s797_s18 = int_to_ptr.vmem [resolvable:$false] %s796_s18 }
  0x1e   : > { %s798_s19 = scalar_lea.vmem %s797_s18, 8192  ;;  %p799_p11 = scmp.lt.s32.totalorder %s951_s29, %s797_s18 }
  0x1f   : > { %p794_p6 = pnand %p792_p5, %p778_p10  ;;  %p800_p13 = scmp.lt.s32.totalorder %s798_s19, %s791_s11 }
  0x21   : > { %p795_p9 = pneg %p794_p6  ;;  %p801_p0 = por %p800_p13, %p799_p11 }
  0x23   : > { %p802_p1 = pnand %p801_p0, %p795_p9 }
  0x25   : > { %805 = shalt.err (!%p802_p1)
}
  0x26   : > { %s877_s23 = smov 512   ;;  %s878_s24 = smov 256  }
  0x27   : > { %s879_s25 = smov 16   ;;  %p639_p12 = scmp.ge.s32.totalorder %s874_s15, 1 }
  0x28   : > { %687 = dma.hbm_to_vmem [thread:$0]  (!%p953_p8), %s949_s27, 4096, %s951_s29, %s140_s4, %s877_s23, %s878_s24, %s879_s25  }
  0x29   : > { %p177_p2 = scmp.lt.s32.totalorder %s874_s15, 3  ;;  %s636_s26 = sshll.u32 %s942_s22, 2 }
  0x2a   : > { %s679_s5 = sshll.u32 %s874_s15, 6  ;;  %s164_s6 = scalar_lea.vmem [#allocation4], %s636_s26 }
  0x2b   : > { %p988_p3 = pnand %p639_p12, %p177_p2  ;;  %s172_s7 = sshll.u32 %s164_s6, 4  ;;  %s173_s7 = int_to_ptr.vmem [resolvable:$true] %s172_s7 }
  0x2c   : > { %s996_s10 = scalar_lea.hbm %s1089_s2, %s679_s5  ;;  %s161_s27 = scalar_lea.sflag [#allocation5], %s942_s22 }
  0x2d   : > { %s1094_s28 = scalar_select %p988_p3, 1, 0 }
  0x2e   : > { %s806_s29 = scalar_lea.hbm %s996_s10, 64  ;;  %s811_s12 = scalar_lea.hbm %s1089_s2, 128 }
  0x2f   : > { %p807_p4 = scmp.ne.s32.totalorder %s996_s10, %s806_s29  ;;  %p812_p9 = scmp.lt.u32.totalorder %s996_s10, %s1089_s2 }
  0x30   : > { %p813_p11 = scmp.lt.u32.totalorder %s811_s12, %s806_s29  ;;  %p815_p0 = scmp.lt.u32.totalorder %s806_s29, %s996_s10 }
  0x31   : > { %p809_p5 = pnand %p807_p4, %p778_p10 }
  0x32   : > { %p814_p13 = por %p813_p11, %p812_p9 }
  0x33   : > { %p810_p6 = pneg %p809_p5 }
  0x34   : > { %p816_p1 = por %p815_p0, %p814_p13 }
  0x36   : > { %p817_p12 = pnand %p816_p1, %p810_p6 }
  0x38   : > { %820 = shalt.err (!%p817_p12)
}
  0x39   : > { %s821_s22 = scalar_lea.vmem %s173_s7, 64  ;;  %s880_s23 = smov [#allocation4]  }
  0x3a   : > { %p822_p2 = scmp.ne.s32.totalorder %s173_s7, %s821_s22  ;;  %s826_s24 = sshll.u32 %s880_s23, 4  ;;  %s827_s24 = int_to_ptr.vmem [resolvable:$false] %s826_s24 }
  0x3b   : > { %s828_s25 = scalar_lea.vmem %s827_s24, 128  ;;  %p829_p7 = scmp.lt.s32.totalorder %s173_s7, %s827_s24 }
  0x3c   : > { %p824_p4 = pnand %p822_p2, %p778_p10  ;;  %p830_p3 = scmp.lt.s32.totalorder %s828_s25, %s821_s22 }
  0x3e   : > { %p825_p5 = pneg %p824_p4  ;;  %p831_p9 = por %p830_p3, %p829_p7 }
  0x40   : > { %p832_p11 = pnand %p831_p9, %p825_p5 }
  0x42   : > { %835 = shalt.err (!%p832_p11)
}
  0x43   : > { %690 = dma.hbm_to_vmem [thread:$0]  (!%p953_p8), %s996_s10, 64, %s173_s7, %s161_s27  }
  0x44   : > { %p1095_p6 = scmp.ne.s32.totalorder %s1094_s28, 0 }
  0x45   : > { %s183_s26 = sand.u32 (!%p1095_p6), 1, %s866_s13   ;;  %p1096_p10 = scmp.ne.s32.totalorder (!%p1095_p6), %s1092_s21, 0 }
  0x46   : > { %181 = sbr.rel (%p1095_p6) target bundleno = 333 (0x14d), region = 32  ;;  %s640_s5 = sshll.u32 (!%p1095_p6), %s183_s26, 8 }
  0x47   : > { %s184_s6 = scalar_lea.sflag (!%p1095_p6), [#allocation3], %s183_s26  ;;  %s1021_s8 = scalar_lea.vmem (!%p1095_p6), [#allocation2], %s640_s5 }
  0x4d   : > { %853 = dma.done.wait (%p1096_p10), %s184_s6, 4096  }
  0x4e   : > { %855 = vsyncadd (%p1096_p10), %s184_s6, 4294963200  ;;  %s641_s9 = sshll.u32 %s183_s26, 2  ;;  %s193_s30 = scalar_lea.sflag [#allocation5], %s183_s26 }
  0x4f   : > { %s1027_s29 = scalar_lea.vmem [#allocation4], %s641_s9 }
  0x50   : > { %857 = dma.done.wait (%p1096_p10), %s193_s30, 64  }
  0x51   : > { %859 = vsyncadd (%p1096_p10), %s193_s30, 4294967232  ;;  %v881_v0 = vmov 0   ;;  %v728_v1 = vld [vmem:[%s1021_s8 + $0x4] ss:$16 sps:$4 sm:$0xff]   ;;  %v730_v2 = vld [vmem:[%s1021_s8 + $0xc] ss:$16 sps:$4 sm:$0xff]   ;;  %v269_v35 = vlaneseq }
  0x52   : > { %481 = vmatprep.mubr.bf16.mxu0 %v881_v0  ;;  %522 = vmatprep.mubr.bf16.mxu1 %v881_v0  ;;  %v732_v3 = vld [vmem:[%s1021_s8] ss:$16 sps:$4 sm:$0xff]   ;;  %v733_v4 = vld [vmem:[%s1021_s8 + $0x8] ss:$16 sps:$4 sm:$0xff]   ;;  %v734_v5 = vld [vmem:[%s1021_s8 + $0x24] ss:$16 sps:$4 sm:$0xff]  }
  0x53   : > { %449 = vmatprep.subr.bf16.mxu0 %v728_v1  ;;  %490 = vmatprep.subr.bf16.mxu1 %v730_v2  ;;  %v736_v6 = vld [vmem:[%s1021_s8 + $0x2c] ss:$16 sps:$4 sm:$0xff]   ;;  %v738_v7 = vld [vmem:[%s1021_s8 + $0x20] ss:$16 sps:$4 sm:$0xff]   ;;  %v739_v8 = vld [vmem:[%s1021_s8 + $0x28] ss:$16 sps:$4 sm:$0xff]  }
  0x54   : > { %450 = vmatpush1.bf16.msra.mxu0 %v732_v3  ;;  %491 = vmatpush1.bf16.msra.mxu1 %v733_v4  ;;  %v740_v9 = vld [vmem:[%s1021_s8 + $0x44] ss:$16 sps:$4 sm:$0xff]   ;;  %v742_v10 = vld [vmem:[%s1021_s8 + $0x4c] ss:$16 sps:$4 sm:$0xff]   ;;  %v744_v11 = vld [vmem:[%s1021_s8 + $0x40] ss:$16 sps:$4 sm:$0xff]  }
  0x55   : > { %451 = vmatprep.subr.bf16.mxu0 %v734_v5  ;;  %492 = vmatprep.subr.bf16.mxu1 %v736_v6  ;;  %v745_v12 = vld [vmem:[%s1021_s8 + $0x48] ss:$16 sps:$4 sm:$0xff]   ;;  %v746_v13 = vld [vmem:[%s1021_s8 + $0x64] ss:$16 sps:$4 sm:$0xff]   ;;  %v748_v14 = vld [vmem:[%s1021_s8 + $0x6c] ss:$16 sps:$4 sm:$0xff]  }
  0x56   : > { %v750_v15 = vld [vmem:[%s1021_s8 + $0x60] ss:$16 sps:$4 sm:$0xff]   ;;  %v751_v16 = vld [vmem:[%s1021_s8 + $0x68] ss:$16 sps:$4 sm:$0xff]   ;;  %v752_v17 = vld [vmem:[%s1021_s8 + $0x84] ss:$16 sps:$4 sm:$0xff]  }
  0x57   : > { %v754_v18 = vld [vmem:[%s1021_s8 + $0x8c] ss:$16 sps:$4 sm:$0xff]   ;;  %v756_v19 = vld [vmem:[%s1021_s8 + $0x80] ss:$16 sps:$4 sm:$0xff]   ;;  %v757_v20 = vld [vmem:[%s1021_s8 + $0x88] ss:$16 sps:$4 sm:$0xff]  }
  0x58   : > { %452 = vmatpush1.bf16.msra.mxu0 %v738_v7  ;;  %493 = vmatpush1.bf16.msra.mxu1 %v739_v8  ;;  %v758_v21 = vld [vmem:[%s1021_s8 + $0xa4] ss:$16 sps:$4 sm:$0xff]   ;;  %v760_v22 = vld [vmem:[%s1021_s8 + $0xac] ss:$16 sps:$4 sm:$0xff]   ;;  %v762_v23 = vld [vmem:[%s1021_s8 + $0xa0] ss:$16 sps:$4 sm:$0xff]  }
  0x59   : > { %453 = vmatprep.subr.bf16.mxu0 %v740_v9  ;;  %494 = vmatprep.subr.bf16.mxu1 %v742_v10  ;;  %v763_v24 = vld [vmem:[%s1021_s8 + $0xa8] ss:$16 sps:$4 sm:$0xff]   ;;  %v764_v25 = vld [vmem:[%s1021_s8 + $0xc4] ss:$16 sps:$4 sm:$0xff]   ;;  %v766_v26 = vld [vmem:[%s1021_s8 + $0xcc] ss:$16 sps:$4 sm:$0xff]  }
  0x5a   : > { %v768_v27 = vld [vmem:[%s1021_s8 + $0xc0] ss:$16 sps:$4 sm:$0xff]   ;;  %v769_v28 = vld [vmem:[%s1021_s8 + $0xc8] ss:$16 sps:$4 sm:$0xff]   ;;  %v770_v29 = vld [vmem:[%s1021_s8 + $0xe4] ss:$16 sps:$4 sm:$0xff]  }
  0x5b   : > { %v772_v30 = vld [vmem:[%s1021_s8 + $0xec] ss:$16 sps:$4 sm:$0xff]   ;;  %v774_v31 = vld [vmem:[%s1021_s8 + $0xe0] ss:$16 sps:$4 sm:$0xff]   ;;  %v775_v32 = vld [vmem:[%s1021_s8 + $0xe8] ss:$16 sps:$4 sm:$0xff]  }
  0x5c   : > { %454 = vmatpush1.bf16.msra.mxu0 %v744_v11  ;;  %495 = vmatpush1.bf16.msra.mxu1 %v745_v12  ;;  %v233_v33 = vld [vmem:[%s1087_s0] sm:$0xff]  ;;  %s642_s7 = sshll.u32 %s629_s16, 2  ;;  %v270_v36 = vshrl.u32 %v269_v35, 7 }
  0x5d   : > { %455 = vmatprep.subr.bf16.mxu0 %v746_v13  ;;  %496 = vmatprep.subr.bf16.mxu1 %v748_v14  ;;  %v234_v34 = vpack.c.bf16 %v233_v33, %v233_v33  ;;  %p227_p7 = scmp.lt.s32.totalorder %s642_s7, 7  ;;  %v267_v39 = vld [vmem:[%s1027_s29] sm:$0xf] }
  0x5e   : > { %v271_v37 = vsub.s32 0, %v270_v36  ;;  %v279_v38 = vsub.s32 2, %v270_v36  ;;  %v275_v40 = vsub.s32 1, %v270_v36  ;;  %v283_v41 = vsub.s32 3, %v270_v36 }
  0x5f   : > { %s1102_s7 = smov (!%p227_p7, %s642_s7), 7 }
  0x60   : > { %456 = vmatpush1.bf16.msra.mxu0 %v750_v15  ;;  %497 = vmatpush1.bf16.msra.mxu1 %v751_v16  ;;  %v272_v42 = vrot.slane %v267_v39, %v271_v37  ;;  %v280_v43 = vrot.slane %v267_v39, %v279_v38  ;;  %v276_v44 = vrot.slane %v267_v39, %v275_v40  ;;  %s643_s10 = sshll.u32 %s1102_s7, 3 }
  0x61   : > { %457 = vmatprep.subr.bf16.mxu0 %v752_v17  ;;  %498 = vmatprep.subr.bf16.mxu1 %v754_v18  ;;  %v284_v45 = vrot.slane %v267_v39, %v283_v41  ;;  %s230_s27 = scalar_lea.vmem %s1090_s3, %s643_s10 }
  0x64   : > { %458 = vmatpush1.bf16.msra.mxu0 %v756_v19  ;;  %499 = vmatpush1.bf16.msra.mxu1 %v757_v20 }
  0x65   : > { %459 = vmatprep.subr.bf16.mxu0 %v758_v21  ;;  %500 = vmatprep.subr.bf16.mxu1 %v760_v22 }
  0x68   : > { %460 = vmatpush1.bf16.msra.mxu0 %v762_v23  ;;  %501 = vmatpush1.bf16.msra.mxu1 %v763_v24 }
  0x69   : > { %461 = vmatprep.subr.bf16.mxu0 %v764_v25  ;;  %502 = vmatprep.subr.bf16.mxu1 %v766_v26 }
  0x6c   : > { %462 = vmatpush1.bf16.msra.mxu0 %v768_v27  ;;  %503 = vmatpush1.bf16.msra.mxu1 %v769_v28 }
  0x6d   : > { %463 = vmatprep.subr.bf16.mxu0 %v770_v29  ;;  %504 = vmatprep.subr.bf16.mxu1 %v772_v30 }
  0x70   : > { %464 = vmatpush1.bf16.msra.mxu0 %v774_v31  ;;  %505 = vmatpush1.bf16.msra.mxu1 %v775_v32 }
  0x73   : > { %482 = vmatmul.mubr.bf16.vlgmr.msra.gmra.mrb[0].mxu0 %v234_v34  ;;  %523 = vmatmul.mubr.bf16.vlgmr.msra.gmra.mrb[0].mxu1 %v234_v34 }
 0x146   : > { %v483_v46 = vpop.f32.mrb[0].mxu0  ;;  %v524_v47 = vpop.f32.mrb[0].mxu1 }
 0x147   : > { %v484_v48 = vadd.f32 %v483_v46, %v272_v42  ;;  %v525_v49 = vadd.f32 %v524_v47, %v280_v43  ;;  %v485_v50 = vpop.f32.mrb[1].mxu0  ;;  %v526_v51 = vpop.f32.mrb[1].mxu1 }
 0x148   : > { %v486_v52 = vadd.f32 %v485_v50, %v276_v44  ;;  %v527_v53 = vadd.f32 %v526_v51, %v284_v45  ;;  %v487_v54 = vpop.f32.mrb[2].mxu0  ;;  %v528_v55 = vpop.f32.mrb[2].mxu1 }
 0x149   : > { %v531_v56 = vmax.f32 %v484_v48, 0.0  ;;  %v533_v57 = vmax.f32 %v525_v49, 0.0  ;;  %v488_v58 = vpop.f32.mrb[3].mxu0  ;;  %v529_v59 = vpop.f32.mrb[3].mxu1 }
 0x14a   : > { %v532_v60 = vmax.f32 %v486_v52, 0.0  ;;  %v534_v61 = vmax.f32 %v527_v53, 0.0 }
 0x14b   : > { %535 = vst [vmem:[%s230_s27] sm:$0xff] %v531_v56  ;;  %537 = vst [vmem:[%s230_s27 + $0x10] sm:$0xff] %v533_v57 }
 0x14c   : > { %536 = vst [vmem:[%s230_s27 + $0x8] sm:$0xff] %v532_v60  ;;  %538 = vst [vmem:[%s230_s27 + $0x18] sm:$0xff] %v534_v61 }
 0x14d PF: > { %p16_p8 = scmp.ge.s32.totalorder %s922_s17, 4   ;;  %s1097_s12 = smov %s866_s13 }
 0x14e   : > { %s1098_s13 = smov %s870_s14  ;;  %s1099_s14 = smov %s932_s20 }
 0x14f   : > { %s1100_s15 = smov %s922_s17  ;;  %18 = sbr.rel (!%p16_p8) target bundleno = 5 (0x5), region = 85 }
 0x156   :  { %561 = vsyncpa [#allocation3], 1 }
 0x157   :  { %563 = vsyncpa [#allocation3 + $0x1], 1 }
 0x158   :  { %564 = vsyncpa [#allocation5], 1 }
 0x159   :  { %566 = vsyncpa [#allocation5 + $0x1], 1 }

// kernel: de_net_forward.7
= control target key start
LH: loop header
LB: loop body
LE: loop exit
PB: predicated region body
PF: predicated region fallthrough
CT: control target
= control target key end

     0   :  { %8 = vsyncpa [#allocation3], 0  ;;  %s315_s0 = inlined_call_operand.hbm [shape: f32[8,64], index: 0, kind: input, shape index: {}]   ;;  %s316_s1 = inlined_call_operand.hbm [shape: bf16[64,128], index: 1, kind: input, shape index: {}]   ;;  %s317_s2 = inlined_call_operand.hbm [shape: f32[1,128], index: 2, kind: input, shape index: {}]   ;;  %s318_s3 = inlined_call_operand.vmem [shape: f32[8,128], index: 3, kind: output, shape index: {}]  }
   0x1   :  { %9 = vsyncpa [#allocation5], 0  ;;  %s249_s12 = smov [#allocation4]   ;;  %s179_s16 = scalar_lea.hbm %s316_s1, 512 }
   0x2   :  { %s25_s13 = sshll.u32 %s249_s12, 4  ;;  %p180_p0 = scmp.ne.s32.totalorder %s316_s1, %s179_s16  ;;  %s26_s13 = int_to_ptr.vmem [resolvable:$true] %s25_s13 }
   0x3   :  { %p183_p1 = scmp.lt.u32.totalorder %s179_s16, %s316_s1 }
   0x5   :  { %p185_p2 = pnand %p183_p1, %p180_p0 }
   0x7   :  { %188 = shalt.err (!%p185_p2)
}
   0x8   :  { %s189_s21 = scalar_lea.vmem %s26_s13, 512  ;;  %p194_p4 = scmp.lt.s32.totalorder %s26_s13, %s26_s13 }
   0x9   :  { %p190_p3 = scmp.ne.s32.totalorder %s26_s13, %s189_s21  ;;  %p195_p5 = scmp.lt.s32.totalorder %s189_s21, %s189_s21 }
   0xb   :  { %p196_p6 = por %p195_p5, %p194_p4 }
   0xd   :  { %p197_p7 = pnand %p196_p6, %p190_p3 }
   0xf   :  { %200 = shalt.err (!%p197_p7)
}
  0x10   :  { %s250_s22 = smov 64   ;;  %s251_s23 = smov 4  }
  0x11   :  { %31 = dma.hbm_to_vmem [thread:$0]  %s316_s1, 512, %s26_s13, [#allocation5], %s250_s22, %s250_s22, %s251_s23  }
  0x12   :  { %s252_s26 = smov [#allocation2]   ;;  %s253_s28 = smov [#allocation6]  }
  0x13   :  { %s16_s27 = sshll.u32 %s252_s26, 4  ;;  %s38_s29 = sshll.u32 %s253_s28, 4  ;;  %s17_s27 = int_to_ptr.vmem [resolvable:$true] %s16_s27  ;;  %s39_s29 = int_to_ptr.vmem [resolvable:$true] %s38_s29 }
  0x14   :  { %s201_s5 = scalar_lea.hbm %s315_s0, 128 }
  0x15   :  { %p202_p8 = scmp.ne.s32.totalorder %s315_s0, %s201_s5  ;;  %p205_p9 = scmp.lt.u32.totalorder %s201_s5, %s315_s0 }
  0x17   :  { %p207_p10 = pnand %p205_p9, %p202_p8 }
  0x19   :  { %210 = shalt.err (!%p207_p10)
}
  0x1a   :  { %s211_s1 = scalar_lea.vmem %s17_s27, 128  ;;  %p216_p12 = scmp.lt.s32.totalorder %s17_s27, %s17_s27 }
  0x1b   :  { %p212_p11 = scmp.ne.s32.totalorder %s17_s27, %s211_s1  ;;  %p217_p13 = scmp.lt.s32.totalorder %s211_s1, %s211_s1 }
  0x1d   :  { %p218_p0 = por %p217_p13, %p216_p12 }
  0x1f   :  { %p219_p1 = pnand %p218_p0, %p212_p11 }
  0x21   :  { %222 = shalt.err (!%p219_p1)
}
  0x22   :  { %19 = dma.hbm_to_vmem [thread:$0]  %s315_s0, 128, %s17_s27, [#allocation3]  }
  0x23   :  { %s223_s14 = scalar_lea.hbm %s317_s2, 16 }
  0x24   :  { %p224_p2 = scmp.ne.s32.totalorder %s317_s2, %s223_s14  ;;  %p227_p3 = scmp.lt.u32.totalorder %s223_s14, %s317_s2 }
  0x26   :  { %p229_p4 = pnand %p227_p3, %p224_p2 }
  0x28   :  { %232 = shalt.err (!%p229_p4)
}
  0x29   :  { %s233_s19 = scalar_lea.vmem %s39_s29, 16  ;;  %s237_s20 = scalar_lea.vmem %s39_s29, 32 }
  0x2a   :  { %p234_p5 = scmp.ne.s32.totalorder %s39_s29, %s233_s19  ;;  %p238_p6 = scmp.lt.s32.totalorder %s39_s29, %s39_s29 }
  0x2b   :  { %p239_p7 = scmp.lt.s32.totalorder %s237_s20, %s233_s19 }
  0x2d   :  { %p240_p8 = por %p239_p7, %p238_p6 }
  0x2f   :  { %p241_p9 = pnand %p240_p8, %p234_p5 }
  0x31   :  { %244 = shalt.err (!%p241_p9)
}
  0x32   :  { %41 = dma.hbm_to_vmem [thread:$0]  %s317_s2, 16, %s39_s29, [#allocation5]  }
  0x33   :  { %245 = dma.done.wait [#allocation3], 128  }
  0x34   :  { %246 = vsyncadd [#allocation3], 4294967168 }
  0x35   :  { %247 = dma.done.wait [#allocation5], 528  }
  0x36   :  { %248 = vsyncadd [#allocation5], 4294966768  ;;  %v254_v0 = vmov 0.0   ;;  %vm255_vm0 = vmmov 0   ;;  %v175_v1 = vld [vmem:[#allocation4] sm:$0xff]   ;;  %v176_v2 = vld [vmem:[#allocation4 + $0x8] sm:$0xff]  }
  0x37   :  { %156 = vmatprep.subr.bf16.mxu0 %v254_v0  ;;  %164 = vmatprep.mubr.msk.bf16.mxu0 %vm255_vm0, %v254_v0  ;;  %v177_v3 = vld [vmem:[#allocation4 + $0x10] sm:$0xff]   ;;  %v178_v4 = vld [vmem:[#allocation4 + $0x18] sm:$0xff]   ;;  %vm93_vm1 = vcmask 523264   ;;  %v145_v7 = vld [vmem:[#allocation6] ss:$0 sm:$0xff] }
  0x38   :  { %157 = vmatpush3.bf16.msra.mxu0 %v175_v1  ;;  %v52_v5 = vld [vmem:[#allocation2] sm:$0xff] }
  0x39   :  { %158 = vmatprep.subr.bf16.mxu0 %v254_v0  ;;  %v53_v6 = vpack.c.bf16 %v52_v5, %v52_v5 }
  0x3c   :  { %159 = vmatpush3.bf16.msra.mxu0 %v176_v2 }
  0x3d   :  { %160 = vmatprep.subr.bf16.mxu0 %v254_v0 }
  0x40   :  { %161 = vmatpush3.bf16.msra.mxu0 %v177_v3 }
  0x41   :  { %162 = vmatprep.subr.bf16.mxu0 %v254_v0 }
  0x44   :  { %163 = vmatpush3.bf16.msra.mxu0 %v178_v4 }
  0x47   :  { %165 = vmatmul.mubr.msk.bf16.vlgmr.msra.gmra.mrb[0].mxu0 %vm93_vm1, %v53_v6 }
 0x11a   :  { %v131_v8 = vpop.f32.mrb[0].mxu0 }
 0x11b   :  { %v132_v9 = vadd.f32 %v145_v7, %v131_v8  ;;  %v166_v10 = vpop.f32.mrb[1].mxu0 }
 0x11c   :  { %v134_v11 = vpop.f32.mrb[2].mxu0 }
 0x11d   :  { %v137_v12 = vmax.f32 %v132_v9, 0.0  ;;  %v167_v13 = vpop.f32.mrb[3].mxu0 }
 0x11f   :  { %138 = vst [vmem:[%s318_s3] sm:$0xff] %v137_v12 }
 0x120   :  { %143 = vsyncpa [#allocation3], 1 }
 0x121   :  { %144 = vsyncpa [#allocation5], 1 }

// kernel: de_net_forward.10
= control target key start
LH: loop header
LB: loop body
LE: loop exit
PB: predicated region body
PF: predicated region fallthrough
CT: control target
= control target key end

     0   :  { %s5766_s18 = smov 0   ;;  %s5768_s19 = smov 0   ;;  %s7086_s0 = inlined_call_operand.vmem [shape: f32[8,1024], index: 0, kind: input, shape index: {}]   ;;  %s7087_s1 = inlined_call_operand.vmem [shape: bf16[1024,2048], index: 1, kind: input, shape index: {}]   ;;  %s7088_s2 = inlined_call_operand.vmem [shape: f32[1,2048], index: 2, kind: input, shape index: {}]   ;;  %s7089_s3 = inlined_call_operand.vmem [shape: bf16[2048,1024], index: 3, kind: input, shape index: {}]   ;;  %s7090_s4 = inlined_call_operand.vmem [shape: f32[1,1024], index: 4, kind: input, shape index: {}]   ;;  %s7091_s5 = inlined_call_operand.vmem [shape: f32[8,1024], index: 5, kind: output, shape index: {}]  }
   0x1   :  { %s5770_s20 = smov 0  }
   0x2 LB: > { %s5782_s21 = sadd.s32 4294967295, %s5733_s20   ;;  %s5785_s22 = sadd.s32 1, %s5733_s20   ;;  %s5733_s20 = sphi %s5770_s20, %s7094_s20   ;;  %s5729_s19 = sphi %s5768_s19, %s7093_s19   ;;  %s5725_s18 = sphi %s5766_s18, %s7092_s18  }
   0x3   : > { %s40_s23 = ssub.s32 %s5733_s20, %s5785_s22  ;;  %s43_s24 = sadd.s32 1, %s5729_s19 }
   0x4   : > { %p41_p0 = scmp.eq.s32.totalorder %s40_s23, 0  ;;  %p50_p1 = scmp.ne.s32.totalorder %s5729_s19, %s5725_s18 }
   0x5   : > { %p51_p2 = scmp.eq.s32.totalorder %s5733_s20, 0  ;;  %p4746_p4 = scmp.ge.s32.totalorder %s5733_s20, 4 }
   0x6   : > { %s5794_s25 = scalar_select %p41_p0, %s5729_s19, %s43_s24  }
   0x7   : > { %p52_p3 = por %p51_p2, %p50_p1  ;;  %176 = sbr.rel (%p4746_p4) target bundleno = 146 (0x92), region = 24 }
   0xe   : > { %179 = sbr.rel (!%p52_p3) target bundleno = 146 (0x92), region = 28  ;;  %s181_s26 = sand.u32 (%p52_p3), 1, %s5729_s19  }
   0xf   : > { %s5272_s27 = sshll.u32 (%p52_p3), %s5733_s20, 4  ;;  %s4747_s28 = sshll.u32 (%p52_p3), %s181_s26, 11 }
  0x10   : > { %s5802_s6 = scalar_lea.vmem (%p52_p3), %s7087_s1, %s5272_s27  ;;  %s5807_s7 = scalar_lea.vmem (%p52_p3), [#allocation2], %s4747_s28 }
  0x11   : > { %v199_v0 = vld [vmem:[%s5802_s6] sm:$0xff] (%p52_p3)  ;;  %v201_v1 = vld [vmem:[%s5802_s6 + $0x8] sm:$0xff] (%p52_p3) }
  0x12   : > { %v203_v2 = vld [vmem:[%s5802_s6 + $0x40] sm:$0xff] (%p52_p3)  ;;  %200 = vst [vmem:[%s5807_s7] sm:$0xff] (%p52_p3), %v199_v0  ;;  %202 = vst [vmem:[%s5807_s7 + $0x8] sm:$0xff] (%p52_p3), %v201_v1  ;;  %v205_v3 = vld [vmem:[%s5802_s6 + $0x48] sm:$0xff] (%p52_p3) }
  0x13   : > { %204 = vst [vmem:[%s5807_s7 + $0x10] sm:$0xff] (%p52_p3), %v203_v2  ;;  %v207_v4 = vld [vmem:[%s5802_s6 + $0x80] sm:$0xff] (%p52_p3)  ;;  %v209_v5 = vld [vmem:[%s5802_s6 + $0x88] sm:$0xff] (%p52_p3)  ;;  %206 = vst [vmem:[%s5807_s7 + $0x18] sm:$0xff] (%p52_p3), %v205_v3 }
  0x14   : > { %208 = vst [vmem:[%s5807_s7 + $0x20] sm:$0xff] (%p52_p3), %v207_v4  ;;  %210 = vst [vmem:[%s5807_s7 + $0x28] sm:$0xff] (%p52_p3), %v209_v5  ;;  %v211_v6 = vld [vmem:[%s5802_s6 + $0xc0] sm:$0xff] (%p52_p3)  ;;  %v213_v7 = vld [vmem:[%s5802_s6 + $0xc8] sm:$0xff] (%p52_p3) }
  0x15   : > { %v215_v8 = vld [vmem:[%s5802_s6 + $0x100] sm:$0xff]  ;;  %212 = vst [vmem:[%s5807_s7 + $0x30] sm:$0xff] %v211_v6  ;;  %214 = vst [vmem:[%s5807_s7 + $0x38] sm:$0xff] %v213_v7  ;;  %v217_v9 = vld [vmem:[%s5802_s6 + $0x108] sm:$0xff] }
  0x16   : > { %216 = vst [vmem:[%s5807_s7 + $0x40] sm:$0xff] %v215_v8  ;;  %v219_v10 = vld [vmem:[%s5802_s6 + $0x140] sm:$0xff]  ;;  %v221_v11 = vld [vmem:[%s5802_s6 + $0x148] sm:$0xff]  ;;  %218 = vst [vmem:[%s5807_s7 + $0x48] sm:$0xff] %v217_v9 }
  0x17   : > { %220 = vst [vmem:[%s5807_s7 + $0x50] sm:$0xff] %v219_v10  ;;  %222 = vst [vmem:[%s5807_s7 + $0x58] sm:$0xff] %v221_v11  ;;  %v223_v12 = vld [vmem:[%s5802_s6 + $0x180] sm:$0xff]  ;;  %v225_v13 = vld [vmem:[%s5802_s6 + $0x188] sm:$0xff] }
  0x18   : > { %v227_v14 = vld [vmem:[%s5802_s6 + $0x1c0] sm:$0xff]  ;;  %224 = vst [vmem:[%s5807_s7 + $0x60] sm:$0xff] %v223_v12  ;;  %226 = vst [vmem:[%s5807_s7 + $0x68] sm:$0xff] %v225_v13  ;;  %v229_v15 = vld [vmem:[%s5802_s6 + $0x1c8] sm:$0xff] }
  0x19   : > { %228 = vst [vmem:[%s5807_s7 + $0x70] sm:$0xff] %v227_v14  ;;  %v231_v16 = vld [vmem:[%s5802_s6 + $0x200] sm:$0xff]  ;;  %v233_v17 = vld [vmem:[%s5802_s6 + $0x208] sm:$0xff]  ;;  %230 = vst [vmem:[%s5807_s7 + $0x78] sm:$0xff] %v229_v15 }
  0x1a   : > { %232 = vst [vmem:[%s5807_s7 + $0x80] sm:$0xff] %v231_v16  ;;  %234 = vst [vmem:[%s5807_s7 + $0x88] sm:$0xff] %v233_v17  ;;  %v235_v18 = vld [vmem:[%s5802_s6 + $0x240] sm:$0xff]  ;;  %v237_v19 = vld [vmem:[%s5802_s6 + $0x248] sm:$0xff] }
  0x1b   : > { %v239_v20 = vld [vmem:[%s5802_s6 + $0x280] sm:$0xff]  ;;  %236 = vst [vmem:[%s5807_s7 + $0x90] sm:$0xff] %v235_v18  ;;  %238 = vst [vmem:[%s5807_s7 + $0x98] sm:$0xff] %v237_v19  ;;  %v241_v21 = vld [vmem:[%s5802_s6 + $0x288] sm:$0xff] }
  0x1c   : > { %240 = vst [vmem:[%s5807_s7 + $0xa0] sm:$0xff] %v239_v20  ;;  %v243_v22 = vld [vmem:[%s5802_s6 + $0x2c0] sm:$0xff]  ;;  %v245_v23 = vld [vmem:[%s5802_s6 + $0x2c8] sm:$0xff]  ;;  %242 = vst [vmem:[%s5807_s7 + $0xa8] sm:$0xff] %v241_v21 }
  0x1d   : > { %244 = vst [vmem:[%s5807_s7 + $0xb0] sm:$0xff] %v243_v22  ;;  %246 = vst [vmem:[%s5807_s7 + $0xb8] sm:$0xff] %v245_v23  ;;  %v247_v24 = vld [vmem:[%s5802_s6 + $0x300] sm:$0xff]  ;;  %v249_v25 = vld [vmem:[%s5802_s6 + $0x308] sm:$0xff] }
  0x1e   : > { %v251_v26 = vld [vmem:[%s5802_s6 + $0x340] sm:$0xff]  ;;  %248 = vst [vmem:[%s5807_s7 + $0xc0] sm:$0xff] %v247_v24  ;;  %250 = vst [vmem:[%s5807_s7 + $0xc8] sm:$0xff] %v249_v25  ;;  %v253_v27 = vld [vmem:[%s5802_s6 + $0x348] sm:$0xff] }
  0x1f   : > { %252 = vst [vmem:[%s5807_s7 + $0xd0] sm:$0xff] %v251_v26  ;;  %v255_v28 = vld [vmem:[%s5802_s6 + $0x380] sm:$0xff]  ;;  %v257_v29 = vld [vmem:[%s5802_s6 + $0x388] sm:$0xff]  ;;  %254 = vst [vmem:[%s5807_s7 + $0xd8] sm:$0xff] %v253_v27 }
  0x20   : > { %256 = vst [vmem:[%s5807_s7 + $0xe0] sm:$0xff] %v255_v28  ;;  %258 = vst [vmem:[%s5807_s7 + $0xe8] sm:$0xff] %v257_v29  ;;  %v259_v30 = vld [vmem:[%s5802_s6 + $0x3c0] sm:$0xff]  ;;  %v261_v31 = vld [vmem:[%s5802_s6 + $0x3c8] sm:$0xff] }
  0x21   : > { %v263_v32 = vld [vmem:[%s5802_s6 + $0x400] sm:$0xff]  ;;  %260 = vst [vmem:[%s5807_s7 + $0xf0] sm:$0xff] %v259_v30  ;;  %262 = vst [vmem:[%s5807_s7 + $0xf8] sm:$0xff] %v261_v31  ;;  %v265_v33 = vld [vmem:[%s5802_s6 + $0x408] sm:$0xff] }
  0x22   : > { %264 = vst [vmem:[%s5807_s7 + $0x100] sm:$0xff] %v263_v32  ;;  %v267_v34 = vld [vmem:[%s5802_s6 + $0x440] sm:$0xff]  ;;  %v269_v35 = vld [vmem:[%s5802_s6 + $0x448] sm:$0xff]  ;;  %266 = vst [vmem:[%s5807_s7 + $0x108] sm:$0xff] %v265_v33 }
  0x23   : > { %268 = vst [vmem:[%s5807_s7 + $0x110] sm:$0xff] %v267_v34  ;;  %270 = vst [vmem:[%s5807_s7 + $0x118] sm:$0xff] %v269_v35  ;;  %v271_v36 = vld [vmem:[%s5802_s6 + $0x480] sm:$0xff]  ;;  %v273_v37 = vld [vmem:[%s5802_s6 + $0x488] sm:$0xff] }
  0x24   : > { %v275_v38 = vld [vmem:[%s5802_s6 + $0x4c0] sm:$0xff]  ;;  %272 = vst [vmem:[%s5807_s7 + $0x120] sm:$0xff] %v271_v36  ;;  %274 = vst [vmem:[%s5807_s7 + $0x128] sm:$0xff] %v273_v37  ;;  %v277_v39 = vld [vmem:[%s5802_s6 + $0x4c8] sm:$0xff] }
  0x25   : > { %276 = vst [vmem:[%s5807_s7 + $0x130] sm:$0xff] %v275_v38  ;;  %v279_v40 = vld [vmem:[%s5802_s6 + $0x500] sm:$0xff]  ;;  %v281_v41 = vld [vmem:[%s5802_s6 + $0x508] sm:$0xff]  ;;  %278 = vst [vmem:[%s5807_s7 + $0x138] sm:$0xff] %v277_v39 }
  0x26   : > { %280 = vst [vmem:[%s5807_s7 + $0x140] sm:$0xff] %v279_v40  ;;  %282 = vst [vmem:[%s5807_s7 + $0x148] sm:$0xff] %v281_v41  ;;  %v283_v42 = vld [vmem:[%s5802_s6 + $0x540] sm:$0xff]  ;;  %v285_v43 = vld [vmem:[%s5802_s6 + $0x548] sm:$0xff] }
  0x27   : > { %v287_v44 = vld [vmem:[%s5802_s6 + $0x580] sm:$0xff]  ;;  %284 = vst [vmem:[%s5807_s7 + $0x150] sm:$0xff] %v283_v42  ;;  %286 = vst [vmem:[%s5807_s7 + $0x158] sm:$0xff] %v285_v43  ;;  %v289_v45 = vld [vmem:[%s5802_s6 + $0x588] sm:$0xff] }
  0x28   : > { %288 = vst [vmem:[%s5807_s7 + $0x160] sm:$0xff] %v287_v44  ;;  %v291_v46 = vld [vmem:[%s5802_s6 + $0x5c0] sm:$0xff]  ;;  %v293_v47 = vld [vmem:[%s5802_s6 + $0x5c8] sm:$0xff]  ;;  %290 = vst [vmem:[%s5807_s7 + $0x168] sm:$0xff] %v289_v45 }
  0x29   : > { %292 = vst [vmem:[%s5807_s7 + $0x170] sm:$0xff] %v291_v46  ;;  %294 = vst [vmem:[%s5807_s7 + $0x178] sm:$0xff] %v293_v47  ;;  %v295_v48 = vld [vmem:[%s5802_s6 + $0x600] sm:$0xff]  ;;  %v297_v49 = vld [vmem:[%s5802_s6 + $0x608] sm:$0xff] }
  0x2a   : > { %v299_v50 = vld [vmem:[%s5802_s6 + $0x640] sm:$0xff]  ;;  %296 = vst [vmem:[%s5807_s7 + $0x180] sm:$0xff] %v295_v48  ;;  %298 = vst [vmem:[%s5807_s7 + $0x188] sm:$0xff] %v297_v49  ;;  %v301_v51 = vld [vmem:[%s5802_s6 + $0x648] sm:$0xff] }
  0x2b   : > { %300 = vst [vmem:[%s5807_s7 + $0x190] sm:$0xff] %v299_v50  ;;  %v303_v52 = vld [vmem:[%s5802_s6 + $0x680] sm:$0xff]  ;;  %v305_v53 = vld [vmem:[%s5802_s6 + $0x688] sm:$0xff]  ;;  %302 = vst [vmem:[%s5807_s7 + $0x198] sm:$0xff] %v301_v51 }
  0x2c   : > { %304 = vst [vmem:[%s5807_s7 + $0x1a0] sm:$0xff] %v303_v52  ;;  %306 = vst [vmem:[%s5807_s7 + $0x1a8] sm:$0xff] %v305_v53  ;;  %v307_v54 = vld [vmem:[%s5802_s6 + $0x6c0] sm:$0xff]  ;;  %v309_v55 = vld [vmem:[%s5802_s6 + $0x6c8] sm:$0xff] }
  0x2d   : > { %v311_v56 = vld [vmem:[%s5802_s6 + $0x700] sm:$0xff]  ;;  %308 = vst [vmem:[%s5807_s7 + $0x1b0] sm:$0xff] %v307_v54  ;;  %310 = vst [vmem:[%s5807_s7 + $0x1b8] sm:$0xff] %v309_v55  ;;  %v313_v57 = vld [vmem:[%s5802_s6 + $0x708] sm:$0xff] }
  0x2e   : > { %312 = vst [vmem:[%s5807_s7 + $0x1c0] sm:$0xff] %v311_v56  ;;  %v315_v58 = vld [vmem:[%s5802_s6 + $0x740] sm:$0xff]  ;;  %v317_v59 = vld [vmem:[%s5802_s6 + $0x748] sm:$0xff]  ;;  %314 = vst [vmem:[%s5807_s7 + $0x1c8] sm:$0xff] %v313_v57 }
  0x2f   : > { %316 = vst [vmem:[%s5807_s7 + $0x1d0] sm:$0xff] %v315_v58  ;;  %318 = vst [vmem:[%s5807_s7 + $0x1d8] sm:$0xff] %v317_v59  ;;  %v319_v60 = vld [vmem:[%s5802_s6 + $0x780] sm:$0xff]  ;;  %v321_v61 = vld [vmem:[%s5802_s6 + $0x788] sm:$0xff] }
  0x30   : > { %v323_v62 = vld [vmem:[%s5802_s6 + $0x7c0] sm:$0xff]  ;;  %320 = vst [vmem:[%s5807_s7 + $0x1e0] sm:$0xff] %v319_v60  ;;  %322 = vst [vmem:[%s5807_s7 + $0x1e8] sm:$0xff] %v321_v61  ;;  %v325_v63 = vld [vmem:[%s5802_s6 + $0x7c8] sm:$0xff] }
  0x31   : > { %324 = vst [vmem:[%s5807_s7 + $0x1f0] sm:$0xff] %v323_v62  ;;  %v327_v0 = vld [vmem:[%s5802_s6 + $0x800] sm:$0xff]  ;;  %v329_v1 = vld [vmem:[%s5802_s6 + $0x808] sm:$0xff]  ;;  %326 = vst [vmem:[%s5807_s7 + $0x1f8] sm:$0xff] %v325_v63 }
  0x32   : > { %328 = vst [vmem:[%s5807_s7 + $0x200] sm:$0xff] %v327_v0  ;;  %330 = vst [vmem:[%s5807_s7 + $0x208] sm:$0xff] %v329_v1  ;;  %v331_v2 = vld [vmem:[%s5802_s6 + $0x840] sm:$0xff]  ;;  %v333_v3 = vld [vmem:[%s5802_s6 + $0x848] sm:$0xff] }
  0x33   : > { %v335_v4 = vld [vmem:[%s5802_s6 + $0x880] sm:$0xff]  ;;  %332 = vst [vmem:[%s5807_s7 + $0x210] sm:$0xff] %v331_v2  ;;  %334 = vst [vmem:[%s5807_s7 + $0x218] sm:$0xff] %v333_v3  ;;  %v337_v5 = vld [vmem:[%s5802_s6 + $0x888] sm:$0xff] }
  0x34   : > { %336 = vst [vmem:[%s5807_s7 + $0x220] sm:$0xff] %v335_v4  ;;  %v339_v6 = vld [vmem:[%s5802_s6 + $0x8c0] sm:$0xff]  ;;  %v341_v7 = vld [vmem:[%s5802_s6 + $0x8c8] sm:$0xff]  ;;  %338 = vst [vmem:[%s5807_s7 + $0x228] sm:$0xff] %v337_v5 }
  0x35   : > { %340 = vst [vmem:[%s5807_s7 + $0x230] sm:$0xff] %v339_v6  ;;  %342 = vst [vmem:[%s5807_s7 + $0x238] sm:$0xff] %v341_v7  ;;  %v343_v8 = vld [vmem:[%s5802_s6 + $0x900] sm:$0xff]  ;;  %v345_v9 = vld [vmem:[%s5802_s6 + $0x908] sm:$0xff] }
  0x36   : > { %v347_v10 = vld [vmem:[%s5802_s6 + $0x940] sm:$0xff]  ;;  %344 = vst [vmem:[%s5807_s7 + $0x240] sm:$0xff] %v343_v8  ;;  %346 = vst [vmem:[%s5807_s7 + $0x248] sm:$0xff] %v345_v9  ;;  %v349_v11 = vld [vmem:[%s5802_s6 + $0x948] sm:$0xff] }
  0x37   : > { %348 = vst [vmem:[%s5807_s7 + $0x250] sm:$0xff] %v347_v10  ;;  %v351_v12 = vld [vmem:[%s5802_s6 + $0x980] sm:$0xff]  ;;  %v353_v13 = vld [vmem:[%s5802_s6 + $0x988] sm:$0xff]  ;;  %350 = vst [vmem:[%s5807_s7 + $0x258] sm:$0xff] %v349_v11 }
  0x38   : > { %352 = vst [vmem:[%s5807_s7 + $0x260] sm:$0xff] %v351_v12  ;;  %354 = vst [vmem:[%s5807_s7 + $0x268] sm:$0xff] %v353_v13  ;;  %v355_v14 = vld [vmem:[%s5802_s6 + $0x9c0] sm:$0xff]  ;;  %v357_v15 = vld [vmem:[%s5802_s6 + $0x9c8] sm:$0xff] }
  0x39   : > { %v359_v16 = vld [vmem:[%s5802_s6 + $0xa00] sm:$0xff]  ;;  %356 = vst [vmem:[%s5807_s7 + $0x270] sm:$0xff] %v355_v14  ;;  %358 = vst [vmem:[%s5807_s7 + $0x278] sm:$0xff] %v357_v15  ;;  %v361_v17 = vld [vmem:[%s5802_s6 + $0xa08] sm:$0xff] }
  0x3a   : > { %360 = vst [vmem:[%s5807_s7 + $0x280] sm:$0xff] %v359_v16  ;;  %v363_v18 = vld [vmem:[%s5802_s6 + $0xa40] sm:$0xff]  ;;  %v365_v19 = vld [vmem:[%s5802_s6 + $0xa48] sm:$0xff]  ;;  %362 = vst [vmem:[%s5807_s7 + $0x288] sm:$0xff] %v361_v17 }
  0x3b   : > { %364 = vst [vmem:[%s5807_s7 + $0x290] sm:$0xff] %v363_v18  ;;  %366 = vst [vmem:[%s5807_s7 + $0x298] sm:$0xff] %v365_v19  ;;  %v367_v20 = vld [vmem:[%s5802_s6 + $0xa80] sm:$0xff]  ;;  %v369_v21 = vld [vmem:[%s5802_s6 + $0xa88] sm:$0xff] }
  0x3c   : > { %v371_v22 = vld [vmem:[%s5802_s6 + $0xac0] sm:$0xff]  ;;  %368 = vst [vmem:[%s5807_s7 + $0x2a0] sm:$0xff] %v367_v20  ;;  %370 = vst [vmem:[%s5807_s7 + $0x2a8] sm:$0xff] %v369_v21  ;;  %v373_v23 = vld [vmem:[%s5802_s6 + $0xac8] sm:$0xff] }
  0x3d   : > { %372 = vst [vmem:[%s5807_s7 + $0x2b0] sm:$0xff] %v371_v22  ;;  %v375_v24 = vld [vmem:[%s5802_s6 + $0xb00] sm:$0xff]  ;;  %v377_v25 = vld [vmem:[%s5802_s6 + $0xb08] sm:$0xff]  ;;  %374 = vst [vmem:[%s5807_s7 + $0x2b8] sm:$0xff] %v373_v23 }
  0x3e   : > { %376 = vst [vmem:[%s5807_s7 + $0x2c0] sm:$0xff] %v375_v24  ;;  %378 = vst [vmem:[%s5807_s7 + $0x2c8] sm:$0xff] %v377_v25  ;;  %v379_v26 = vld [vmem:[%s5802_s6 + $0xb40] sm:$0xff]  ;;  %v381_v27 = vld [vmem:[%s5802_s6 + $0xb48] sm:$0xff] }
  0x3f   : > { %v383_v28 = vld [vmem:[%s5802_s6 + $0xb80] sm:$0xff]  ;;  %380 = vst [vmem:[%s5807_s7 + $0x2d0] sm:$0xff] %v379_v26  ;;  %382 = vst [vmem:[%s5807_s7 + $0x2d8] sm:$0xff] %v381_v27  ;;  %v385_v29 = vld [vmem:[%s5802_s6 + $0xb88] sm:$0xff] }
  0x40   : > { %384 = vst [vmem:[%s5807_s7 + $0x2e0] sm:$0xff] %v383_v28  ;;  %v387_v30 = vld [vmem:[%s5802_s6 + $0xbc0] sm:$0xff]  ;;  %v389_v31 = vld [vmem:[%s5802_s6 + $0xbc8] sm:$0xff]  ;;  %386 = vst [vmem:[%s5807_s7 + $0x2e8] sm:$0xff] %v385_v29 }
  0x41   : > { %388 = vst [vmem:[%s5807_s7 + $0x2f0] sm:$0xff] %v387_v30  ;;  %390 = vst [vmem:[%s5807_s7 + $0x2f8] sm:$0xff] %v389_v31  ;;  %v391_v32 = vld [vmem:[%s5802_s6 + $0xc00] sm:$0xff]  ;;  %v393_v33 = vld [vmem:[%s5802_s6 + $0xc08] sm:$0xff] }
  0x42   : > { %v395_v34 = vld [vmem:[%s5802_s6 + $0xc40] sm:$0xff]  ;;  %392 = vst [vmem:[%s5807_s7 + $0x300] sm:$0xff] %v391_v32  ;;  %394 = vst [vmem:[%s5807_s7 + $0x308] sm:$0xff] %v393_v33  ;;  %v397_v35 = vld [vmem:[%s5802_s6 + $0xc48] sm:$0xff] }
  0x43   : > { %396 = vst [vmem:[%s5807_s7 + $0x310] sm:$0xff] %v395_v34  ;;  %v399_v36 = vld [vmem:[%s5802_s6 + $0xc80] sm:$0xff]  ;;  %v401_v37 = vld [vmem:[%s5802_s6 + $0xc88] sm:$0xff]  ;;  %398 = vst [vmem:[%s5807_s7 + $0x318] sm:$0xff] %v397_v35 }
  0x44   : > { %400 = vst [vmem:[%s5807_s7 + $0x320] sm:$0xff] %v399_v36  ;;  %402 = vst [vmem:[%s5807_s7 + $0x328] sm:$0xff] %v401_v37  ;;  %v403_v38 = vld [vmem:[%s5802_s6 + $0xcc0] sm:$0xff]  ;;  %v405_v39 = vld [vmem:[%s5802_s6 + $0xcc8] sm:$0xff] }
  0x45   : > { %v407_v40 = vld [vmem:[%s5802_s6 + $0xd00] sm:$0xff]  ;;  %404 = vst [vmem:[%s5807_s7 + $0x330] sm:$0xff] %v403_v38  ;;  %406 = vst [vmem:[%s5807_s7 + $0x338] sm:$0xff] %v405_v39  ;;  %v409_v41 = vld [vmem:[%s5802_s6 + $0xd08] sm:$0xff] }
  0x46   : > { %408 = vst [vmem:[%s5807_s7 + $0x340] sm:$0xff] %v407_v40  ;;  %v411_v42 = vld [vmem:[%s5802_s6 + $0xd40] sm:$0xff]  ;;  %v413_v43 = vld [vmem:[%s5802_s6 + $0xd48] sm:$0xff]  ;;  %410 = vst [vmem:[%s5807_s7 + $0x348] sm:$0xff] %v409_v41 }
  0x47   : > { %412 = vst [vmem:[%s5807_s7 + $0x350] sm:$0xff] %v411_v42  ;;  %414 = vst [vmem:[%s5807_s7 + $0x358] sm:$0xff] %v413_v43  ;;  %v415_v44 = vld [vmem:[%s5802_s6 + $0xd80] sm:$0xff]  ;;  %v417_v45 = vld [vmem:[%s5802_s6 + $0xd88] sm:$0xff] }
  0x48   : > { %v419_v46 = vld [vmem:[%s5802_s6 + $0xdc0] sm:$0xff]  ;;  %416 = vst [vmem:[%s5807_s7 + $0x360] sm:$0xff] %v415_v44  ;;  %418 = vst [vmem:[%s5807_s7 + $0x368] sm:$0xff] %v417_v45  ;;  %v421_v47 = vld [vmem:[%s5802_s6 + $0xdc8] sm:$0xff] }
  0x49   : > { %420 = vst [vmem:[%s5807_s7 + $0x370] sm:$0xff] %v419_v46  ;;  %v423_v48 = vld [vmem:[%s5802_s6 + $0xe00] sm:$0xff]  ;;  %v425_v49 = vld [vmem:[%s5802_s6 + $0xe08] sm:$0xff]  ;;  %422 = vst [vmem:[%s5807_s7 + $0x378] sm:$0xff] %v421_v47 }
  0x4a   : > { %424 = vst [vmem:[%s5807_s7 + $0x380] sm:$0xff] %v423_v48  ;;  %426 = vst [vmem:[%s5807_s7 + $0x388] sm:$0xff] %v425_v49  ;;  %v427_v50 = vld [vmem:[%s5802_s6 + $0xe40] sm:$0xff]  ;;  %v429_v51 = vld [vmem:[%s5802_s6 + $0xe48] sm:$0xff] }
  0x4b   : > { %v431_v52 = vld [vmem:[%s5802_s6 + $0xe80] sm:$0xff]  ;;  %428 = vst [vmem:[%s5807_s7 + $0x390] sm:$0xff] %v427_v50  ;;  %430 = vst [vmem:[%s5807_s7 + $0x398] sm:$0xff] %v429_v51  ;;  %v433_v53 = vld [vmem:[%s5802_s6 + $0xe88] sm:$0xff] }
  0x4c   : > { %432 = vst [vmem:[%s5807_s7 + $0x3a0] sm:$0xff] %v431_v52  ;;  %v435_v54 = vld [vmem:[%s5802_s6 + $0xec0] sm:$0xff]  ;;  %v437_v55 = vld [vmem:[%s5802_s6 + $0xec8] sm:$0xff]  ;;  %434 = vst [vmem:[%s5807_s7 + $0x3a8] sm:$0xff] %v433_v53 }
  0x4d   : > { %436 = vst [vmem:[%s5807_s7 + $0x3b0] sm:$0xff] %v435_v54  ;;  %438 = vst [vmem:[%s5807_s7 + $0x3b8] sm:$0xff] %v437_v55  ;;  %v439_v56 = vld [vmem:[%s5802_s6 + $0xf00] sm:$0xff]  ;;  %v441_v57 = vld [vmem:[%s5802_s6 + $0xf08] sm:$0xff] }
  0x4e   : > { %v443_v58 = vld [vmem:[%s5802_s6 + $0xf40] sm:$0xff]  ;;  %440 = vst [vmem:[%s5807_s7 + $0x3c0] sm:$0xff] %v439_v56  ;;  %442 = vst [vmem:[%s5807_s7 + $0x3c8] sm:$0xff] %v441_v57  ;;  %v445_v59 = vld [vmem:[%s5802_s6 + $0xf48] sm:$0xff] }
  0x4f   : > { %444 = vst [vmem:[%s5807_s7 + $0x3d0] sm:$0xff] %v443_v58  ;;  %v447_v60 = vld [vmem:[%s5802_s6 + $0xf80] sm:$0xff]  ;;  %v449_v61 = vld [vmem:[%s5802_s6 + $0xf88] sm:$0xff]  ;;  %446 = vst [vmem:[%s5807_s7 + $0x3d8] sm:$0xff] %v445_v59 }
  0x50   : > { %448 = vst [vmem:[%s5807_s7 + $0x3e0] sm:$0xff] %v447_v60  ;;  %450 = vst [vmem:[%s5807_s7 + $0x3e8] sm:$0xff] %v449_v61  ;;  %v451_v62 = vld [vmem:[%s5802_s6 + $0xfc0] sm:$0xff]  ;;  %v453_v63 = vld [vmem:[%s5802_s6 + $0xfc8] sm:$0xff] }
  0x51   : > { %v455_v0 = vld [vmem:[%s5802_s6 + $0x1000] sm:$0xff]  ;;  %452 = vst [vmem:[%s5807_s7 + $0x3f0] sm:$0xff] %v451_v62  ;;  %454 = vst [vmem:[%s5807_s7 + $0x3f8] sm:$0xff] %v453_v63  ;;  %v457_v1 = vld [vmem:[%s5802_s6 + $0x1008] sm:$0xff] }
  0x52   : > { %456 = vst [vmem:[%s5807_s7 + $0x400] sm:$0xff] %v455_v0  ;;  %v459_v2 = vld [vmem:[%s5802_s6 + $0x1040] sm:$0xff]  ;;  %v461_v3 = vld [vmem:[%s5802_s6 + $0x1048] sm:$0xff]  ;;  %458 = vst [vmem:[%s5807_s7 + $0x408] sm:$0xff] %v457_v1 }
  0x53   : > { %460 = vst [vmem:[%s5807_s7 + $0x410] sm:$0xff] %v459_v2  ;;  %462 = vst [vmem:[%s5807_s7 + $0x418] sm:$0xff] %v461_v3  ;;  %v463_v4 = vld [vmem:[%s5802_s6 + $0x1080] sm:$0xff]  ;;  %v465_v5 = vld [vmem:[%s5802_s6 + $0x1088] sm:$0xff] }
  0x54   : > { %v467_v6 = vld [vmem:[%s5802_s6 + $0x10c0] sm:$0xff]  ;;  %464 = vst [vmem:[%s5807_s7 + $0x420] sm:$0xff] %v463_v4  ;;  %466 = vst [vmem:[%s5807_s7 + $0x428] sm:$0xff] %v465_v5  ;;  %v469_v7 = vld [vmem:[%s5802_s6 + $0x10c8] sm:$0xff] }
  0x55   : > { %468 = vst [vmem:[%s5807_s7 + $0x430] sm:$0xff] %v467_v6  ;;  %v471_v8 = vld [vmem:[%s5802_s6 + $0x1100] sm:$0xff]  ;;  %v473_v9 = vld [vmem:[%s5802_s6 + $0x1108] sm:$0xff]  ;;  %470 = vst [vmem:[%s5807_s7 + $0x438] sm:$0xff] %v469_v7 }
  0x56   : > { %472 = vst [vmem:[%s5807_s7 + $0x440] sm:$0xff] %v471_v8  ;;  %474 = vst [vmem:[%s5807_s7 + $0x448] sm:$0xff] %v473_v9  ;;  %v475_v10 = vld [vmem:[%s5802_s6 + $0x1140] sm:$0xff]  ;;  %v477_v11 = vld [vmem:[%s5802_s6 + $0x1148] sm:$0xff] }
  0x57   : > { %v479_v12 = vld [vmem:[%s5802_s6 + $0x1180] sm:$0xff]  ;;  %476 = vst [vmem:[%s5807_s7 + $0x450] sm:$0xff] %v475_v10  ;;  %478 = vst [vmem:[%s5807_s7 + $0x458] sm:$0xff] %v477_v11  ;;  %v481_v13 = vld [vmem:[%s5802_s6 + $0x1188] sm:$0xff] }
  0x58   : > { %480 = vst [vmem:[%s5807_s7 + $0x460] sm:$0xff] %v479_v12  ;;  %v483_v14 = vld [vmem:[%s5802_s6 + $0x11c0] sm:$0xff]  ;;  %v485_v15 = vld [vmem:[%s5802_s6 + $0x11c8] sm:$0xff]  ;;  %482 = vst [vmem:[%s5807_s7 + $0x468] sm:$0xff] %v481_v13 }
  0x59   : > { %484 = vst [vmem:[%s5807_s7 + $0x470] sm:$0xff] %v483_v14  ;;  %486 = vst [vmem:[%s5807_s7 + $0x478] sm:$0xff] %v485_v15  ;;  %v487_v16 = vld [vmem:[%s5802_s6 + $0x1200] sm:$0xff]  ;;  %v489_v17 = vld [vmem:[%s5802_s6 + $0x1208] sm:$0xff] }
  0x5a   : > { %v491_v18 = vld [vmem:[%s5802_s6 + $0x1240] sm:$0xff]  ;;  %488 = vst [vmem:[%s5807_s7 + $0x480] sm:$0xff] %v487_v16  ;;  %490 = vst [vmem:[%s5807_s7 + $0x488] sm:$0xff] %v489_v17  ;;  %v493_v19 = vld [vmem:[%s5802_s6 + $0x1248] sm:$0xff] }
  0x5b   : > { %492 = vst [vmem:[%s5807_s7 + $0x490] sm:$0xff] %v491_v18  ;;  %v495_v20 = vld [vmem:[%s5802_s6 + $0x1280] sm:$0xff]  ;;  %v497_v21 = vld [vmem:[%s5802_s6 + $0x1288] sm:$0xff]  ;;  %494 = vst [vmem:[%s5807_s7 + $0x498] sm:$0xff] %v493_v19 }
  0x5c   : > { %496 = vst [vmem:[%s5807_s7 + $0x4a0] sm:$0xff] %v495_v20  ;;  %498 = vst [vmem:[%s5807_s7 + $0x4a8] sm:$0xff] %v497_v21  ;;  %v499_v22 = vld [vmem:[%s5802_s6 + $0x12c0] sm:$0xff]  ;;  %v501_v23 = vld [vmem:[%s5802_s6 + $0x12c8] sm:$0xff] }
  0x5d   : > { %v503_v24 = vld [vmem:[%s5802_s6 + $0x1300] sm:$0xff]  ;;  %500 = vst [vmem:[%s5807_s7 + $0x4b0] sm:$0xff] %v499_v22  ;;  %502 = vst [vmem:[%s5807_s7 + $0x4b8] sm:$0xff] %v501_v23  ;;  %v505_v25 = vld [vmem:[%s5802_s6 + $0x1308] sm:$0xff] }
  0x5e   : > { %504 = vst [vmem:[%s5807_s7 + $0x4c0] sm:$0xff] %v503_v24  ;;  %v507_v26 = vld [vmem:[%s5802_s6 + $0x1340] sm:$0xff]  ;;  %v509_v27 = vld [vmem:[%s5802_s6 + $0x1348] sm:$0xff]  ;;  %506 = vst [vmem:[%s5807_s7 + $0x4c8] sm:$0xff] %v505_v25 }
  0x5f   : > { %508 = vst [vmem:[%s5807_s7 + $0x4d0] sm:$0xff] %v507_v26  ;;  %510 = vst [vmem:[%s5807_s7 + $0x4d8] sm:$0xff] %v509_v27  ;;  %v511_v28 = vld [vmem:[%s5802_s6 + $0x1380] sm:$0xff]  ;;  %v513_v29 = vld [vmem:[%s5802_s6 + $0x1388] sm:$0xff] }
  0x60   : > { %v515_v30 = vld [vmem:[%s5802_s6 + $0x13c0] sm:$0xff]  ;;  %512 = vst [vmem:[%s5807_s7 + $0x4e0] sm:$0xff] %v511_v28  ;;  %514 = vst [vmem:[%s5807_s7 + $0x4e8] sm:$0xff] %v513_v29  ;;  %v517_v31 = vld [vmem:[%s5802_s6 + $0x13c8] sm:$0xff] }
  0x61   : > { %516 = vst [vmem:[%s5807_s7 + $0x4f0] sm:$0xff] %v515_v30  ;;  %v519_v32 = vld [vmem:[%s5802_s6 + $0x1400] sm:$0xff]  ;;  %v521_v33 = vld [vmem:[%s5802_s6 + $0x1408] sm:$0xff]  ;;  %518 = vst [vmem:[%s5807_s7 + $0x4f8] sm:$0xff] %v517_v31 }
  0x62   : > { %520 = vst [vmem:[%s5807_s7 + $0x500] sm:$0xff] %v519_v32  ;;  %522 = vst [vmem:[%s5807_s7 + $0x508] sm:$0xff] %v521_v33  ;;  %v523_v34 = vld [vmem:[%s5802_s6 + $0x1440] sm:$0xff]  ;;  %v525_v35 = vld [vmem:[%s5802_s6 + $0x1448] sm:$0xff] }
  0x63   : > { %v527_v36 = vld [vmem:[%s5802_s6 + $0x1480] sm:$0xff]  ;;  %524 = vst [vmem:[%s5807_s7 + $0x510] sm:$0xff] %v523_v34  ;;  %526 = vst [vmem:[%s5807_s7 + $0x518] sm:$0xff] %v525_v35  ;;  %v529_v37 = vld [vmem:[%s5802_s6 + $0x1488] sm:$0xff] }
  0x64   : > { %528 = vst [vmem:[%s5807_s7 + $0x520] sm:$0xff] %v527_v36  ;;  %v531_v38 = vld [vmem:[%s5802_s6 + $0x14c0] sm:$0xff]  ;;  %v533_v39 = vld [vmem:[%s5802_s6 + $0x14c8] sm:$0xff]  ;;  %530 = vst [vmem:[%s5807_s7 + $0x528] sm:$0xff] %v529_v37 }
  0x65   : > { %532 = vst [vmem:[%s5807_s7 + $0x530] sm:$0xff] %v531_v38  ;;  %534 = vst [vmem:[%s5807_s7 + $0x538] sm:$0xff] %v533_v39  ;;  %v535_v40 = vld [vmem:[%s5802_s6 + $0x1500] sm:$0xff]  ;;  %v537_v41 = vld [vmem:[%s5802_s6 + $0x1508] sm:$0xff] }
  0x66   : > { %v539_v42 = vld [vmem:[%s5802_s6 + $0x1540] sm:$0xff]  ;;  %536 = vst [vmem:[%s5807_s7 + $0x540] sm:$0xff] %v535_v40  ;;  %538 = vst [vmem:[%s5807_s7 + $0x548] sm:$0xff] %v537_v41  ;;  %v541_v43 = vld [vmem:[%s5802_s6 + $0x1548] sm:$0xff] }
  0x67   : > { %540 = vst [vmem:[%s5807_s7 + $0x550] sm:$0xff] %v539_v42  ;;  %v543_v44 = vld [vmem:[%s5802_s6 + $0x1580] sm:$0xff]  ;;  %v545_v45 = vld [vmem:[%s5802_s6 + $0x1588] sm:$0xff]  ;;  %542 = vst [vmem:[%s5807_s7 + $0x558] sm:$0xff] %v541_v43 }
  0x68   : > { %544 = vst [vmem:[%s5807_s7 + $0x560] sm:$0xff] %v543_v44  ;;  %546 = vst [vmem:[%s5807_s7 + $0x568] sm:$0xff] %v545_v45  ;;  %v547_v46 = vld [vmem:[%s5802_s6 + $0x15c0] sm:$0xff]  ;;  %v549_v47 = vld [vmem:[%s5802_s6 + $0x15c8] sm:$0xff] }
  0x69   : > { %v551_v48 = vld [vmem:[%s5802_s6 + $0x1600] sm:$0xff]  ;;  %548 = vst [vmem:[%s5807_s7 + $0x570] sm:$0xff] %v547_v46  ;;  %550 = vst [vmem:[%s5807_s7 + $0x578] sm:$0xff] %v549_v47  ;;  %v553_v49 = vld [vmem:[%s5802_s6 + $0x1608] sm:$0xff] }
  0x6a   : > { %552 = vst [vmem:[%s5807_s7 + $0x580] sm:$0xff] %v551_v48  ;;  %v555_v50 = vld [vmem:[%s5802_s6 + $0x1640] sm:$0xff]  ;;  %v557_v51 = vld [vmem:[%s5802_s6 + $0x1648] sm:$0xff]  ;;  %554 = vst [vmem:[%s5807_s7 + $0x588] sm:$0xff] %v553_v49 }
  0x6b   : > { %556 = vst [vmem:[%s5807_s7 + $0x590] sm:$0xff] %v555_v50  ;;  %558 = vst [vmem:[%s5807_s7 + $0x598] sm:$0xff] %v557_v51  ;;  %v559_v52 = vld [vmem:[%s5802_s6 + $0x1680] sm:$0xff]  ;;  %v561_v53 = vld [vmem:[%s5802_s6 + $0x1688] sm:$0xff] }
  0x6c   : > { %v563_v54 = vld [vmem:[%s5802_s6 + $0x16c0] sm:$0xff]  ;;  %560 = vst [vmem:[%s5807_s7 + $0x5a0] sm:$0xff] %v559_v52  ;;  %562 = vst [vmem:[%s5807_s7 + $0x5a8] sm:$0xff] %v561_v53  ;;  %v565_v55 = vld [vmem:[%s5802_s6 + $0x16c8] sm:$0xff] }
  0x6d   : > { %564 = vst [vmem:[%s5807_s7 + $0x5b0] sm:$0xff] %v563_v54  ;;  %v567_v56 = vld [vmem:[%s5802_s6 + $0x1700] sm:$0xff]  ;;  %v569_v57 = vld [vmem:[%s5802_s6 + $0x1708] sm:$0xff]  ;;  %566 = vst [vmem:[%s5807_s7 + $0x5b8] sm:$0xff] %v565_v55 }
  0x6e   : > { %568 = vst [vmem:[%s5807_s7 + $0x5c0] sm:$0xff] %v567_v56  ;;  %570 = vst [vmem:[%s5807_s7 + $0x5c8] sm:$0xff] %v569_v57  ;;  %v571_v58 = vld [vmem:[%s5802_s6 + $0x1740] sm:$0xff]  ;;  %v573_v59 = vld [vmem:[%s5802_s6 + $0x1748] sm:$0xff] }
  0x6f   : > { %v575_v60 = vld [vmem:[%s5802_s6 + $0x1780] sm:$0xff]  ;;  %572 = vst [vmem:[%s5807_s7 + $0x5d0] sm:$0xff] %v571_v58  ;;  %574 = vst [vmem:[%s5807_s7 + $0x5d8] sm:$0xff] %v573_v59  ;;  %v577_v61 = vld [vmem:[%s5802_s6 + $0x1788] sm:$0xff] }
  0x70   : > { %576 = vst [vmem:[%s5807_s7 + $0x5e0] sm:$0xff] %v575_v60  ;;  %v579_v62 = vld [vmem:[%s5802_s6 + $0x17c0] sm:$0xff]  ;;  %v581_v63 = vld [vmem:[%s5802_s6 + $0x17c8] sm:$0xff]  ;;  %578 = vst [vmem:[%s5807_s7 + $0x5e8] sm:$0xff] %v577_v61 }
  0x71   : > { %580 = vst [vmem:[%s5807_s7 + $0x5f0] sm:$0xff] %v579_v62  ;;  %582 = vst [vmem:[%s5807_s7 + $0x5f8] sm:$0xff] %v581_v63  ;;  %v583_v0 = vld [vmem:[%s5802_s6 + $0x1800] sm:$0xff]  ;;  %v585_v1 = vld [vmem:[%s5802_s6 + $0x1808] sm:$0xff] }
  0x72   : > { %v587_v2 = vld [vmem:[%s5802_s6 + $0x1840] sm:$0xff]  ;;  %584 = vst [vmem:[%s5807_s7 + $0x600] sm:$0xff] %v583_v0  ;;  %586 = vst [vmem:[%s5807_s7 + $0x608] sm:$0xff] %v585_v1  ;;  %v589_v3 = vld [vmem:[%s5802_s6 + $0x1848] sm:$0xff] }
  0x73   : > { %588 = vst [vmem:[%s5807_s7 + $0x610] sm:$0xff] %v587_v2  ;;  %v591_v4 = vld [vmem:[%s5802_s6 + $0x1880] sm:$0xff]  ;;  %v593_v5 = vld [vmem:[%s5802_s6 + $0x1888] sm:$0xff]  ;;  %590 = vst [vmem:[%s5807_s7 + $0x618] sm:$0xff] %v589_v3 }
  0x74   : > { %592 = vst [vmem:[%s5807_s7 + $0x620] sm:$0xff] %v591_v4  ;;  %594 = vst [vmem:[%s5807_s7 + $0x628] sm:$0xff] %v593_v5  ;;  %v595_v6 = vld [vmem:[%s5802_s6 + $0x18c0] sm:$0xff]  ;;  %v597_v7 = vld [vmem:[%s5802_s6 + $0x18c8] sm:$0xff] }
  0x75   : > { %v599_v8 = vld [vmem:[%s5802_s6 + $0x1900] sm:$0xff]  ;;  %596 = vst [vmem:[%s5807_s7 + $0x630] sm:$0xff] %v595_v6  ;;  %598 = vst [vmem:[%s5807_s7 + $0x638] sm:$0xff] %v597_v7  ;;  %v601_v9 = vld [vmem:[%s5802_s6 + $0x1908] sm:$0xff] }
  0x76   : > { %600 = vst [vmem:[%s5807_s7 + $0x640] sm:$0xff] %v599_v8  ;;  %v603_v10 = vld [vmem:[%s5802_s6 + $0x1940] sm:$0xff]  ;;  %v605_v11 = vld [vmem:[%s5802_s6 + $0x1948] sm:$0xff]  ;;  %602 = vst [vmem:[%s5807_s7 + $0x648] sm:$0xff] %v601_v9 }
  0x77   : > { %604 = vst [vmem:[%s5807_s7 + $0x650] sm:$0xff] %v603_v10  ;;  %606 = vst [vmem:[%s5807_s7 + $0x658] sm:$0xff] %v605_v11  ;;  %v607_v12 = vld [vmem:[%s5802_s6 + $0x1980] sm:$0xff]  ;;  %v609_v13 = vld [vmem:[%s5802_s6 + $0x1988] sm:$0xff] }
  0x78   : > { %v611_v14 = vld [vmem:[%s5802_s6 + $0x19c0] sm:$0xff]  ;;  %608 = vst [vmem:[%s5807_s7 + $0x660] sm:$0xff] %v607_v12  ;;  %610 = vst [vmem:[%s5807_s7 + $0x668] sm:$0xff] %v609_v13  ;;  %v613_v15 = vld [vmem:[%s5802_s6 + $0x19c8] sm:$0xff] }
  0x79   : > { %612 = vst [vmem:[%s5807_s7 + $0x670] sm:$0xff] %v611_v14  ;;  %v615_v16 = vld [vmem:[%s5802_s6 + $0x1a00] sm:$0xff]  ;;  %v617_v17 = vld [vmem:[%s5802_s6 + $0x1a08] sm:$0xff]  ;;  %614 = vst [vmem:[%s5807_s7 + $0x678] sm:$0xff] %v613_v15 }
  0x7a   : > { %616 = vst [vmem:[%s5807_s7 + $0x680] sm:$0xff] %v615_v16  ;;  %618 = vst [vmem:[%s5807_s7 + $0x688] sm:$0xff] %v617_v17  ;;  %v619_v18 = vld [vmem:[%s5802_s6 + $0x1a40] sm:$0xff]  ;;  %v621_v19 = vld [vmem:[%s5802_s6 + $0x1a48] sm:$0xff] }
  0x7b   : > { %v623_v20 = vld [vmem:[%s5802_s6 + $0x1a80] sm:$0xff]  ;;  %620 = vst [vmem:[%s5807_s7 + $0x690] sm:$0xff] %v619_v18  ;;  %622 = vst [vmem:[%s5807_s7 + $0x698] sm:$0xff] %v621_v19  ;;  %v625_v21 = vld [vmem:[%s5802_s6 + $0x1a88] sm:$0xff] }
  0x7c   : > { %624 = vst [vmem:[%s5807_s7 + $0x6a0] sm:$0xff] %v623_v20  ;;  %v627_v22 = vld [vmem:[%s5802_s6 + $0x1ac0] sm:$0xff]  ;;  %v629_v23 = vld [vmem:[%s5802_s6 + $0x1ac8] sm:$0xff]  ;;  %626 = vst [vmem:[%s5807_s7 + $0x6a8] sm:$0xff] %v625_v21 }
  0x7d   : > { %628 = vst [vmem:[%s5807_s7 + $0x6b0] sm:$0xff] %v627_v22  ;;  %630 = vst [vmem:[%s5807_s7 + $0x6b8] sm:$0xff] %v629_v23  ;;  %v631_v24 = vld [vmem:[%s5802_s6 + $0x1b00] sm:$0xff]  ;;  %v633_v25 = vld [vmem:[%s5802_s6 + $0x1b08] sm:$0xff] }
  0x7e   : > { %v635_v26 = vld [vmem:[%s5802_s6 + $0x1b40] sm:$0xff]  ;;  %632 = vst [vmem:[%s5807_s7 + $0x6c0] sm:$0xff] %v631_v24  ;;  %634 = vst [vmem:[%s5807_s7 + $0x6c8] sm:$0xff] %v633_v25  ;;  %v637_v27 = vld [vmem:[%s5802_s6 + $0x1b48] sm:$0xff] }
  0x7f   : > { %636 = vst [vmem:[%s5807_s7 + $0x6d0] sm:$0xff] %v635_v26  ;;  %v639_v28 = vld [vmem:[%s5802_s6 + $0x1b80] sm:$0xff]  ;;  %v641_v29 = vld [vmem:[%s5802_s6 + $0x1b88] sm:$0xff]  ;;  %638 = vst [vmem:[%s5807_s7 + $0x6d8] sm:$0xff] %v637_v27 }
  0x80   : > { %640 = vst [vmem:[%s5807_s7 + $0x6e0] sm:$0xff] %v639_v28  ;;  %642 = vst [vmem:[%s5807_s7 + $0x6e8] sm:$0xff] %v641_v29  ;;  %v643_v30 = vld [vmem:[%s5802_s6 + $0x1bc0] sm:$0xff]  ;;  %v645_v31 = vld [vmem:[%s5802_s6 + $0x1bc8] sm:$0xff] }
  0x81   : > { %v647_v32 = vld [vmem:[%s5802_s6 + $0x1c00] sm:$0xff]  ;;  %644 = vst [vmem:[%s5807_s7 + $0x6f0] sm:$0xff] %v643_v30  ;;  %646 = vst [vmem:[%s5807_s7 + $0x6f8] sm:$0xff] %v645_v31  ;;  %v649_v33 = vld [vmem:[%s5802_s6 + $0x1c08] sm:$0xff] }
  0x82   : > { %648 = vst [vmem:[%s5807_s7 + $0x700] sm:$0xff] %v647_v32  ;;  %v651_v34 = vld [vmem:[%s5802_s6 + $0x1c40] sm:$0xff]  ;;  %v653_v35 = vld [vmem:[%s5802_s6 + $0x1c48] sm:$0xff]  ;;  %650 = vst [vmem:[%s5807_s7 + $0x708] sm:$0xff] %v649_v33 }
  0x83   : > { %652 = vst [vmem:[%s5807_s7 + $0x710] sm:$0xff] %v651_v34  ;;  %654 = vst [vmem:[%s5807_s7 + $0x718] sm:$0xff] %v653_v35  ;;  %v655_v36 = vld [vmem:[%s5802_s6 + $0x1c80] sm:$0xff]  ;;  %v657_v37 = vld [vmem:[%s5802_s6 + $0x1c88] sm:$0xff] }
  0x84   : > { %v659_v38 = vld [vmem:[%s5802_s6 + $0x1cc0] sm:$0xff]  ;;  %656 = vst [vmem:[%s5807_s7 + $0x720] sm:$0xff] %v655_v36  ;;  %658 = vst [vmem:[%s5807_s7 + $0x728] sm:$0xff] %v657_v37  ;;  %v661_v39 = vld [vmem:[%s5802_s6 + $0x1cc8] sm:$0xff] }
  0x85   : > { %660 = vst [vmem:[%s5807_s7 + $0x730] sm:$0xff] %v659_v38  ;;  %v663_v40 = vld [vmem:[%s5802_s6 + $0x1d00] sm:$0xff]  ;;  %v665_v41 = vld [vmem:[%s5802_s6 + $0x1d08] sm:$0xff]  ;;  %662 = vst [vmem:[%s5807_s7 + $0x738] sm:$0xff] %v661_v39 }
  0x86   : > { %664 = vst [vmem:[%s5807_s7 + $0x740] sm:$0xff] %v663_v40  ;;  %666 = vst [vmem:[%s5807_s7 + $0x748] sm:$0xff] %v665_v41  ;;  %v667_v42 = vld [vmem:[%s5802_s6 + $0x1d40] sm:$0xff]  ;;  %v669_v43 = vld [vmem:[%s5802_s6 + $0x1d48] sm:$0xff] }
  0x87   : > { %v671_v44 = vld [vmem:[%s5802_s6 + $0x1d80] sm:$0xff]  ;;  %668 = vst [vmem:[%s5807_s7 + $0x750] sm:$0xff] %v667_v42  ;;  %670 = vst [vmem:[%s5807_s7 + $0x758] sm:$0xff] %v669_v43  ;;  %v673_v45 = vld [vmem:[%s5802_s6 + $0x1d88] sm:$0xff] }
  0x88   : > { %672 = vst [vmem:[%s5807_s7 + $0x760] sm:$0xff] %v671_v44  ;;  %v675_v46 = vld [vmem:[%s5802_s6 + $0x1dc0] sm:$0xff]  ;;  %v677_v47 = vld [vmem:[%s5802_s6 + $0x1dc8] sm:$0xff]  ;;  %674 = vst [vmem:[%s5807_s7 + $0x768] sm:$0xff] %v673_v45 }
  0x89   : > { %676 = vst [vmem:[%s5807_s7 + $0x770] sm:$0xff] %v675_v46  ;;  %678 = vst [vmem:[%s5807_s7 + $0x778] sm:$0xff] %v677_v47  ;;  %v679_v48 = vld [vmem:[%s5802_s6 + $0x1e00] sm:$0xff]  ;;  %v681_v49 = vld [vmem:[%s5802_s6 + $0x1e08] sm:$0xff] }
  0x8a   : > { %v683_v50 = vld [vmem:[%s5802_s6 + $0x1e40] sm:$0xff]  ;;  %680 = vst [vmem:[%s5807_s7 + $0x780] sm:$0xff] %v679_v48  ;;  %682 = vst [vmem:[%s5807_s7 + $0x788] sm:$0xff] %v681_v49  ;;  %v685_v51 = vld [vmem:[%s5802_s6 + $0x1e48] sm:$0xff] }
  0x8b   : > { %684 = vst [vmem:[%s5807_s7 + $0x790] sm:$0xff] %v683_v50  ;;  %v687_v52 = vld [vmem:[%s5802_s6 + $0x1e80] sm:$0xff]  ;;  %v689_v53 = vld [vmem:[%s5802_s6 + $0x1e88] sm:$0xff]  ;;  %686 = vst [vmem:[%s5807_s7 + $0x798] sm:$0xff] %v685_v51 }
  0x8c   : > { %688 = vst [vmem:[%s5807_s7 + $0x7a0] sm:$0xff] %v687_v52  ;;  %690 = vst [vmem:[%s5807_s7 + $0x7a8] sm:$0xff] %v689_v53  ;;  %v691_v54 = vld [vmem:[%s5802_s6 + $0x1ec0] sm:$0xff]  ;;  %v693_v55 = vld [vmem:[%s5802_s6 + $0x1ec8] sm:$0xff] }
  0x8d   : > { %v695_v56 = vld [vmem:[%s5802_s6 + $0x1f00] sm:$0xff]  ;;  %692 = vst [vmem:[%s5807_s7 + $0x7b0] sm:$0xff] %v691_v54  ;;  %694 = vst [vmem:[%s5807_s7 + $0x7b8] sm:$0xff] %v693_v55  ;;  %v697_v57 = vld [vmem:[%s5802_s6 + $0x1f08] sm:$0xff] }
  0x8e   : > { %696 = vst [vmem:[%s5807_s7 + $0x7c0] sm:$0xff] %v695_v56  ;;  %v699_v58 = vld [vmem:[%s5802_s6 + $0x1f40] sm:$0xff]  ;;  %v701_v59 = vld [vmem:[%s5802_s6 + $0x1f48] sm:$0xff]  ;;  %698 = vst [vmem:[%s5807_s7 + $0x7c8] sm:$0xff] %v697_v57 }
  0x8f   : > { %700 = vst [vmem:[%s5807_s7 + $0x7d0] sm:$0xff] %v699_v58  ;;  %702 = vst [vmem:[%s5807_s7 + $0x7d8] sm:$0xff] %v701_v59  ;;  %v703_v60 = vld [vmem:[%s5802_s6 + $0x1f80] sm:$0xff]  ;;  %v705_v61 = vld [vmem:[%s5802_s6 + $0x1f88] sm:$0xff] }
  0x90   : > { %v707_v62 = vld [vmem:[%s5802_s6 + $0x1fc0] sm:$0xff]  ;;  %704 = vst [vmem:[%s5807_s7 + $0x7e0] sm:$0xff] %v703_v60  ;;  %706 = vst [vmem:[%s5807_s7 + $0x7e8] sm:$0xff] %v705_v61  ;;  %v709_v63 = vld [vmem:[%s5802_s6 + $0x1fc8] sm:$0xff] }
  0x91   : > { %708 = vst [vmem:[%s5807_s7 + $0x7f0] sm:$0xff] %v707_v62  ;;  %710 = vst [vmem:[%s5807_s7 + $0x7f8] sm:$0xff] %v709_v63 }
  0x92 PF: > { %p4750_p5 = scmp.ge.s32.totalorder %s5733_s20, 1  ;;  %p733_p6 = scmp.lt.s32.totalorder %s5733_s20, 5 }
  0x94   : > { %p734_p7 = pnand %p4750_p5, %p733_p6 }
  0x95   : > { %s740_s8 = sand.u32 (!%p734_p7), 1, %s5725_s18   ;;  %s4752_s9 = sshll.u32 (!%p734_p7), %s5782_s21, 2 }
  0x96   : > { %737 = sbr.rel (%p734_p7) target bundleno = 1068 (0x42c), region = 59  ;;  %s4751_s10 = sshll.u32 (!%p734_p7), %s740_s8, 11 }
  0x97   : > { %p774_p8 = scmp.lt.s32.totalorder (!%p734_p7), %s4752_s9, 15  ;;  %s4753_s11 = sshll.u32 (!%p734_p7), %s5782_s21, 6 }
  0x98   : > { %p779_p9 = scmp.lt.s32.totalorder (!%p734_p7), %s4753_s11, 255  ;;  %s6334_s18 = scalar_lea.vmem (!%p734_p7), [#allocation2], %s4751_s10 }
  0x99   : > { %p4756_p10 = scmp.ne.s32.totalorder (!%p734_p7), %s5782_s21, 0 }
  0x9d   : > { %s7096_s9 = smov (!%p774_p8, %s4752_s9), 15  ;;  %s7098_s11 = smov (!%p779_p9, %s4753_s11), 255 }
  0x9e   : > { %s776_s14 = scalar_lea.vmem %s7088_s2, %s7096_s9  ;;  %s5273_s15 = sshll.u32 %s7098_s11, 5  ;;  %v5735_v0 = vmov (!%p4756_p10), 0.0  }
  0x9f   : > { %s6332_s20 = scalar_lea.vmem %s7089_s3, %s5273_s15  ;;  %788 = sbr.rel (%p4756_p10) target bundleno = 166 (0xa6), region = 67  ;;  %789 = vst [vmem:[%s7091_s5] sm:$0xff] (!%p4756_p10), %v5735_v0  ;;  %790 = vst [vmem:[%s7091_s5 + $0x8] sm:$0xff] (!%p4756_p10), %v5735_v0 }
  0xa0   : > { %791 = vst [vmem:[%s7091_s5 + $0x10] sm:$0xff] (!%p4756_p10), %v5735_v0  ;;  %792 = vst [vmem:[%s7091_s5 + $0x18] sm:$0xff] (!%p4756_p10), %v5735_v0 }
  0xa1   : > { %793 = vst [vmem:[%s7091_s5 + $0x20] sm:$0xff] (!%p4756_p10), %v5735_v0  ;;  %794 = vst [vmem:[%s7091_s5 + $0x28] sm:$0xff] (!%p4756_p10), %v5735_v0 }
  0xa2   : > { %795 = vst [vmem:[%s7091_s5 + $0x30] sm:$0xff] (!%p4756_p10), %v5735_v0  ;;  %796 = vst [vmem:[%s7091_s5 + $0x38] sm:$0xff] (!%p4756_p10), %v5735_v0 }
  0xa6 PF: > { %v5327_v1 = vld [vmem:[%s6334_s18 + $0x4] ss:$16 sps:$4 sm:$0xff]   ;;  %v5329_v2 = vld [vmem:[%s6334_s18 + $0xc] ss:$16 sps:$4 sm:$0xff]   ;;  %v5331_v3 = vld [vmem:[%s6334_s18] ss:$16 sps:$4 sm:$0xff]  }
  0xa7   : > { %2371 = vmatprep.subr.bf16.mxu0 %v5327_v1  ;;  %v5332_v4 = vld [vmem:[%s6334_s18 + $0x8] ss:$16 sps:$4 sm:$0xff]   ;;  %2535 = vmatprep.subr.bf16.mxu1 %v5329_v2  ;;  %v5333_v5 = vld [vmem:[%s6334_s18 + $0x24] ss:$16 sps:$4 sm:$0xff]   ;;  %v5335_v6 = vld [vmem:[%s6334_s18 + $0x2c] ss:$16 sps:$4 sm:$0xff]  }
  0xa8   : > { %2372 = vmatpush1.bf16.msra.mxu0 %v5331_v3  ;;  %2536 = vmatpush1.bf16.msra.mxu1 %v5332_v4  ;;  %v5337_v7 = vld [vmem:[%s6334_s18 + $0x20] ss:$16 sps:$4 sm:$0xff]   ;;  %v5338_v8 = vld [vmem:[%s6334_s18 + $0x28] ss:$16 sps:$4 sm:$0xff]   ;;  %v5339_v9 = vld [vmem:[%s6334_s18 + $0x44] ss:$16 sps:$4 sm:$0xff]  }
  0xa9   : > { %2373 = vmatprep.subr.bf16.mxu0 %v5333_v5  ;;  %2537 = vmatprep.subr.bf16.mxu1 %v5335_v6  ;;  %v5341_v10 = vld [vmem:[%s6334_s18 + $0x4c] ss:$16 sps:$4 sm:$0xff]   ;;  %v5343_v11 = vld [vmem:[%s6334_s18 + $0x40] ss:$16 sps:$4 sm:$0xff]   ;;  %v5344_v12 = vld [vmem:[%s6334_s18 + $0x48] ss:$16 sps:$4 sm:$0xff]  }
  0xaa   : > { %v5345_v13 = vld [vmem:[%s6334_s18 + $0x64] ss:$16 sps:$4 sm:$0xff]   ;;  %v5347_v14 = vld [vmem:[%s6334_s18 + $0x6c] ss:$16 sps:$4 sm:$0xff]   ;;  %v5349_v15 = vld [vmem:[%s6334_s18 + $0x60] ss:$16 sps:$4 sm:$0xff]  }
  0xab   : > { %v5350_v16 = vld [vmem:[%s6334_s18 + $0x68] ss:$16 sps:$4 sm:$0xff]   ;;  %v5351_v17 = vld [vmem:[%s6334_s18 + $0x84] ss:$16 sps:$4 sm:$0xff]   ;;  %v5353_v18 = vld [vmem:[%s6334_s18 + $0x8c] ss:$16 sps:$4 sm:$0xff]  }
  0xac   : > { %2374 = vmatpush1.bf16.msra.mxu0 %v5337_v7  ;;  %2538 = vmatpush1.bf16.msra.mxu1 %v5338_v8  ;;  %v5355_v19 = vld [vmem:[%s6334_s18 + $0x80] ss:$16 sps:$4 sm:$0xff]   ;;  %v5356_v20 = vld [vmem:[%s6334_s18 + $0x88] ss:$16 sps:$4 sm:$0xff]   ;;  %v5357_v21 = vld [vmem:[%s6334_s18 + $0xa4] ss:$16 sps:$4 sm:$0xff]  }
  0xad   : > { %2375 = vmatprep.subr.bf16.mxu0 %v5339_v9  ;;  %2539 = vmatprep.subr.bf16.mxu1 %v5341_v10  ;;  %v5359_v22 = vld [vmem:[%s6334_s18 + $0xac] ss:$16 sps:$4 sm:$0xff]   ;;  %v5361_v23 = vld [vmem:[%s6334_s18 + $0xa0] ss:$16 sps:$4 sm:$0xff]   ;;  %v5362_v24 = vld [vmem:[%s6334_s18 + $0xa8] ss:$16 sps:$4 sm:$0xff]  }
  0xae   : > { %v5363_v25 = vld [vmem:[%s6334_s18 + $0xc4] ss:$16 sps:$4 sm:$0xff]   ;;  %v5365_v26 = vld [vmem:[%s6334_s18 + $0xcc] ss:$16 sps:$4 sm:$0xff]   ;;  %v5367_v27 = vld [vmem:[%s6334_s18 + $0xc0] ss:$16 sps:$4 sm:$0xff]  }
  0xaf   : > { %v5368_v28 = vld [vmem:[%s6334_s18 + $0xc8] ss:$16 sps:$4 sm:$0xff]   ;;  %v5369_v29 = vld [vmem:[%s6334_s18 + $0xe4] ss:$16 sps:$4 sm:$0xff]   ;;  %v5371_v30 = vld [vmem:[%s6334_s18 + $0xec] ss:$16 sps:$4 sm:$0xff]  }
  0xb0   : > { %2376 = vmatpush1.bf16.msra.mxu0 %v5343_v11  ;;  %2540 = vmatpush1.bf16.msra.mxu1 %v5344_v12  ;;  %v5373_v31 = vld [vmem:[%s6334_s18 + $0xe0] ss:$16 sps:$4 sm:$0xff]   ;;  %v5374_v32 = vld [vmem:[%s6334_s18 + $0xe8] ss:$16 sps:$4 sm:$0xff]   ;;  %v5375_v33 = vld [vmem:[%s6334_s18 + $0x104] ss:$16 sps:$4 sm:$0xff]  }
  0xb1   : > { %2377 = vmatprep.subr.bf16.mxu0 %v5345_v13  ;;  %2541 = vmatprep.subr.bf16.mxu1 %v5347_v14  ;;  %v5377_v34 = vld [vmem:[%s6334_s18 + $0x10c] ss:$16 sps:$4 sm:$0xff]   ;;  %v5379_v35 = vld [vmem:[%s6334_s18 + $0x100] ss:$16 sps:$4 sm:$0xff]   ;;  %v5380_v36 = vld [vmem:[%s6334_s18 + $0x108] ss:$16 sps:$4 sm:$0xff]  }
  0xb2   : > { %v5381_v37 = vld [vmem:[%s6334_s18 + $0x124] ss:$16 sps:$4 sm:$0xff]   ;;  %v5383_v38 = vld [vmem:[%s6334_s18 + $0x12c] ss:$16 sps:$4 sm:$0xff]   ;;  %v5385_v39 = vld [vmem:[%s6334_s18 + $0x120] ss:$16 sps:$4 sm:$0xff]  }
  0xb3   : > { %v5386_v40 = vld [vmem:[%s6334_s18 + $0x128] ss:$16 sps:$4 sm:$0xff]   ;;  %v5387_v41 = vld [vmem:[%s6334_s18 + $0x144] ss:$16 sps:$4 sm:$0xff]   ;;  %v5389_v42 = vld [vmem:[%s6334_s18 + $0x14c] ss:$16 sps:$4 sm:$0xff]  }
  0xb4   : > { %2378 = vmatpush1.bf16.msra.mxu0 %v5349_v15  ;;  %2542 = vmatpush1.bf16.msra.mxu1 %v5350_v16  ;;  %v5391_v43 = vld [vmem:[%s6334_s18 + $0x140] ss:$16 sps:$4 sm:$0xff]   ;;  %v5392_v44 = vld [vmem:[%s6334_s18 + $0x148] ss:$16 sps:$4 sm:$0xff]   ;;  %v5393_v45 = vld [vmem:[%s6334_s18 + $0x164] ss:$16 sps:$4 sm:$0xff]  }
  0xb5   : > { %2379 = vmatprep.subr.bf16.mxu0 %v5351_v17  ;;  %2543 = vmatprep.subr.bf16.mxu1 %v5353_v18  ;;  %v5395_v46 = vld [vmem:[%s6334_s18 + $0x16c] ss:$16 sps:$4 sm:$0xff]   ;;  %v5397_v48 = vld [vmem:[%s6334_s18 + $0x160] ss:$16 sps:$4 sm:$0xff]   ;;  %v5398_v50 = vld [vmem:[%s6334_s18 + $0x168] ss:$16 sps:$4 sm:$0xff]  }
  0xb6   : > { %v798_v47 = vld [vmem:[%s7086_s0 + $0x8] sm:$0xff]  ;;  %v5399_v51 = vld [vmem:[%s6334_s18 + $0x184] ss:$16 sps:$4 sm:$0xff]   ;;  %v5403_v53 = vld [vmem:[%s6334_s18 + $0x180] ss:$16 sps:$4 sm:$0xff]   ;;  %p5269_p11 = scmp.ne.s32.totalorder %s5782_s21, 3 }
  0xb7   : > { %v806_v49 = vpack.c.bf16 %v798_v47, %v798_v47  ;;  %v5401_v52 = vld [vmem:[%s6334_s18 + $0x18c] ss:$16 sps:$4 sm:$0xff]   ;;  %v5404_v54 = vld [vmem:[%s6334_s18 + $0x188] ss:$16 sps:$4 sm:$0xff]   ;;  %v5405_v55 = vld [vmem:[%s6334_s18 + $0x1a4] ss:$16 sps:$4 sm:$0xff]  }
  0xb8   : > { %2380 = vmatpush1.bf16.msra.mxu0 %v5355_v19  ;;  %2544 = vmatpush1.bf16.msra.mxu1 %v5356_v20  ;;  %v5407_v56 = vld [vmem:[%s6334_s18 + $0x1ac] ss:$16 sps:$4 sm:$0xff]   ;;  %v5409_v57 = vld [vmem:[%s6334_s18 + $0x1a0] ss:$16 sps:$4 sm:$0xff]   ;;  %v5410_v58 = vld [vmem:[%s6334_s18 + $0x1a8] ss:$16 sps:$4 sm:$0xff]  }
  0xb9   : > { %2381 = vmatprep.subr.bf16.mxu0 %v5357_v21  ;;  %2545 = vmatprep.subr.bf16.mxu1 %v5359_v22  ;;  %v5411_v59 = vld [vmem:[%s6334_s18 + $0x1c4] ss:$16 sps:$4 sm:$0xff]   ;;  %v5413_v60 = vld [vmem:[%s6334_s18 + $0x1cc] ss:$16 sps:$4 sm:$0xff]   ;;  %v5415_v61 = vld [vmem:[%s6334_s18 + $0x1c0] ss:$16 sps:$4 sm:$0xff]  }
  0xba   : > { %2403 = vmatprep.mubr.bf16.mxu0 %v806_v49  ;;  %2567 = vmatprep.mubr.bf16.mxu1 %v806_v49  ;;  %v5416_v62 = vld [vmem:[%s6334_s18 + $0x1c8] ss:$16 sps:$4 sm:$0xff]   ;;  %v5417_v63 = vld [vmem:[%s6334_s18 + $0x1e4] ss:$16 sps:$4 sm:$0xff]   ;;  %v5419_v0 = vld [vmem:[%s6334_s18 + $0x1ec] ss:$16 sps:$4 sm:$0xff]  }
  0xbb   : > { %v5421_v1 = vld [vmem:[%s6334_s18 + $0x1e0] ss:$16 sps:$4 sm:$0xff]   ;;  %v5422_v2 = vld [vmem:[%s6334_s18 + $0x1e8] ss:$16 sps:$4 sm:$0xff]   ;;  %v5425_v4 = vld [vmem:[%s6334_s18 + $0x204] ss:$16 sps:$4 sm:$0xff]  }
  0xbc   : > { %2382 = vmatpush1.bf16.msra.mxu0 %v5361_v23  ;;  %2546 = vmatpush1.bf16.msra.mxu1 %v5362_v24  ;;  %v797_v3 = vld [vmem:[%s7086_s0] sm:$0xff]  ;;  %v5428_v5 = vld [vmem:[%s6334_s18 + $0x20c] ss:$16 sps:$4 sm:$0xff]   ;;  %v5426_v8 = vld [vmem:[%s6334_s18 + $0x208] ss:$16 sps:$4 sm:$0xff]  }
  0xbd   : > { %2383 = vmatprep.subr.bf16.mxu0 %v5363_v25  ;;  %2547 = vmatprep.subr.bf16.mxu1 %v5365_v26  ;;  %v805_v6 = vpack.c.bf16 %v797_v3, %v797_v3  ;;  %v5423_v7 = vld [vmem:[%s6334_s18 + $0x200] ss:$16 sps:$4 sm:$0xff]   ;;  %v5431_v9 = vld [vmem:[%s6334_s18 + $0x224] ss:$16 sps:$4 sm:$0xff]   ;;  %v5434_v10 = vld [vmem:[%s6334_s18 + $0x22c] ss:$16 sps:$4 sm:$0xff]  }
  0xbe   : > { %v5429_v11 = vld [vmem:[%s6334_s18 + $0x220] ss:$16 sps:$4 sm:$0xff]   ;;  %v5432_v12 = vld [vmem:[%s6334_s18 + $0x228] ss:$16 sps:$4 sm:$0xff]   ;;  %v5437_v13 = vld [vmem:[%s6334_s18 + $0x244] ss:$16 sps:$4 sm:$0xff]  }
  0xbf   : > { %v5440_v14 = vld [vmem:[%s6334_s18 + $0x24c] ss:$16 sps:$4 sm:$0xff]   ;;  %v5435_v15 = vld [vmem:[%s6334_s18 + $0x240] ss:$16 sps:$4 sm:$0xff]   ;;  %v5438_v16 = vld [vmem:[%s6334_s18 + $0x248] ss:$16 sps:$4 sm:$0xff]  }
  0xc0   : > { %2384 = vmatpush1.bf16.msra.mxu0 %v5367_v27  ;;  %2548 = vmatpush1.bf16.msra.mxu1 %v5368_v28  ;;  %v5443_v17 = vld [vmem:[%s6334_s18 + $0x264] ss:$16 sps:$4 sm:$0xff]   ;;  %v5446_v18 = vld [vmem:[%s6334_s18 + $0x26c] ss:$16 sps:$4 sm:$0xff]   ;;  %v5441_v19 = vld [vmem:[%s6334_s18 + $0x260] ss:$16 sps:$4 sm:$0xff]  }
  0xc1   : > { %2385 = vmatprep.subr.bf16.mxu0 %v5369_v29  ;;  %2549 = vmatprep.subr.bf16.mxu1 %v5371_v30  ;;  %v5444_v20 = vld [vmem:[%s6334_s18 + $0x268] ss:$16 sps:$4 sm:$0xff]   ;;  %v5449_v21 = vld [vmem:[%s6334_s18 + $0x284] ss:$16 sps:$4 sm:$0xff]   ;;  %v5452_v22 = vld [vmem:[%s6334_s18 + $0x28c] ss:$16 sps:$4 sm:$0xff]  }
  0xc2   : > { %v5447_v23 = vld [vmem:[%s6334_s18 + $0x280] ss:$16 sps:$4 sm:$0xff]   ;;  %v5450_v24 = vld [vmem:[%s6334_s18 + $0x288] ss:$16 sps:$4 sm:$0xff]   ;;  %v5455_v25 = vld [vmem:[%s6334_s18 + $0x2a4] ss:$16 sps:$4 sm:$0xff]  }
  0xc3   : > { %v5458_v26 = vld [vmem:[%s6334_s18 + $0x2ac] ss:$16 sps:$4 sm:$0xff]   ;;  %v5453_v27 = vld [vmem:[%s6334_s18 + $0x2a0] ss:$16 sps:$4 sm:$0xff]   ;;  %v5456_v28 = vld [vmem:[%s6334_s18 + $0x2a8] ss:$16 sps:$4 sm:$0xff]  }
  0xc4   : > { %2386 = vmatpush1.bf16.msra.mxu0 %v5373_v31  ;;  %2550 = vmatpush1.bf16.msra.mxu1 %v5374_v32  ;;  %v5461_v29 = vld [vmem:[%s6334_s18 + $0x2c4] ss:$16 sps:$4 sm:$0xff]   ;;  %v5464_v30 = vld [vmem:[%s6334_s18 + $0x2cc] ss:$16 sps:$4 sm:$0xff]   ;;  %v5459_v32 = vld [vmem:[%s6334_s18 + $0x2c0] ss:$16 sps:$4 sm:$0xff]  }
  0xc5   : > { %2387 = vmatprep.subr.bf16.mxu0 %v5375_v33  ;;  %2551 = vmatprep.subr.bf16.mxu1 %v5377_v34  ;;  %v800_v31 = vld [vmem:[%s7086_s0 + $0x18] sm:$0xff]  ;;  %v5485_v47 = vld [vmem:[%s6334_s18 + $0x344] ss:$16 sps:$4 sm:$0xff]   ;;  %v5483_v49 = vld [vmem:[%s6334_s18 + $0x340] ss:$16 sps:$4 sm:$0xff]  }
  0xc6   : > { %v808_v33 = vpack.c.bf16 %v800_v31, %v800_v31  ;;  %v5462_v34 = vld [vmem:[%s6334_s18 + $0x2c8] ss:$16 sps:$4 sm:$0xff]   ;;  %v5515_v3 = vld [vmem:[%s6334_s18 + $0x3e4] ss:$16 sps:$4 sm:$0xff]  }
  0xc7   : > { %v5551_v31 = vld [vmem:[%s6334_s18 + $0x4a4] ss:$16 sps:$4 sm:$0xff]  }
  0xc8   : > { %2388 = vmatpush1.bf16.msra.mxu0 %v5379_v35  ;;  %2552 = vmatpush1.bf16.msra.mxu1 %v5380_v36  ;;  %v5467_v35 = vld [vmem:[%s6334_s18 + $0x2e4] ss:$16 sps:$4 sm:$0xff]   ;;  %v5470_v36 = vld [vmem:[%s6334_s18 + $0x2ec] ss:$16 sps:$4 sm:$0xff]  }
  0xc9   : > { %2389 = vmatprep.subr.bf16.mxu0 %v5381_v37  ;;  %2553 = vmatprep.subr.bf16.mxu1 %v5383_v38  ;;  %v5465_v37 = vld [vmem:[%s6334_s18 + $0x2e0] ss:$16 sps:$4 sm:$0xff]   ;;  %v5468_v38 = vld [vmem:[%s6334_s18 + $0x2e8] ss:$16 sps:$4 sm:$0xff]  }
  0xcc   : > { %2390 = vmatpush1.bf16.msra.mxu0 %v5385_v39  ;;  %2554 = vmatpush1.bf16.msra.mxu1 %v5386_v40  ;;  %v5473_v39 = vld [vmem:[%s6334_s18 + $0x304] ss:$16 sps:$4 sm:$0xff]   ;;  %v5476_v40 = vld [vmem:[%s6334_s18 + $0x30c] ss:$16 sps:$4 sm:$0xff]  }
  0xcd   : > { %2391 = vmatprep.subr.bf16.mxu0 %v5387_v41  ;;  %2555 = vmatprep.subr.bf16.mxu1 %v5389_v42  ;;  %v5471_v41 = vld [vmem:[%s6334_s18 + $0x300] ss:$16 sps:$4 sm:$0xff]   ;;  %v5474_v42 = vld [vmem:[%s6334_s18 + $0x308] ss:$16 sps:$4 sm:$0xff]  }
  0xd0   : > { %2392 = vmatpush1.bf16.msra.mxu0 %v5391_v43  ;;  %2556 = vmatpush1.bf16.msra.mxu1 %v5392_v44  ;;  %v5479_v43 = vld [vmem:[%s6334_s18 + $0x324] ss:$16 sps:$4 sm:$0xff]   ;;  %v5482_v44 = vld [vmem:[%s6334_s18 + $0x32c] ss:$16 sps:$4 sm:$0xff]  }
  0xd1   : > { %2393 = vmatprep.subr.bf16.mxu0 %v5393_v45  ;;  %2557 = vmatprep.subr.bf16.mxu1 %v5395_v46  ;;  %v5477_v45 = vld [vmem:[%s6334_s18 + $0x320] ss:$16 sps:$4 sm:$0xff]   ;;  %v5480_v46 = vld [vmem:[%s6334_s18 + $0x328] ss:$16 sps:$4 sm:$0xff]  }
  0xd4   : > { %2394 = vmatpush1.bf16.msra.mxu0 %v5397_v48  ;;  %2558 = vmatpush1.bf16.msra.mxu1 %v5398_v50  ;;  %v5488_v48 = vld [vmem:[%s6334_s18 + $0x34c] ss:$16 sps:$4 sm:$0xff]   ;;  %v5486_v50 = vld [vmem:[%s6334_s18 + $0x348] ss:$16 sps:$4 sm:$0xff]  }
  0xd5   : > { %2395 = vmatprep.subr.bf16.mxu0 %v5399_v51  ;;  %2559 = vmatprep.subr.bf16.mxu1 %v5401_v52  ;;  %v5491_v51 = vld [vmem:[%s6334_s18 + $0x364] ss:$16 sps:$4 sm:$0xff]   ;;  %v5494_v52 = vld [vmem:[%s6334_s18 + $0x36c] ss:$16 sps:$4 sm:$0xff]  }
  0xd8   : > { %2396 = vmatpush1.bf16.msra.mxu0 %v5403_v53  ;;  %2560 = vmatpush1.bf16.msra.mxu1 %v5404_v54  ;;  %v5489_v53 = vld [vmem:[%s6334_s18 + $0x360] ss:$16 sps:$4 sm:$0xff]   ;;  %v5492_v54 = vld [vmem:[%s6334_s18 + $0x368] ss:$16 sps:$4 sm:$0xff]  }
  0xd9   : > { %2397 = vmatprep.subr.bf16.mxu0 %v5405_v55  ;;  %2561 = vmatprep.subr.bf16.mxu1 %v5407_v56  ;;  %v5497_v55 = vld [vmem:[%s6334_s18 + $0x384] ss:$16 sps:$4 sm:$0xff]   ;;  %v5500_v56 = vld [vmem:[%s6334_s18 + $0x38c] ss:$16 sps:$4 sm:$0xff]  }
  0xdc   : > { %2398 = vmatpush1.bf16.msra.mxu0 %v5409_v57  ;;  %2562 = vmatpush1.bf16.msra.mxu1 %v5410_v58  ;;  %v5495_v57 = vld [vmem:[%s6334_s18 + $0x380] ss:$16 sps:$4 sm:$0xff]   ;;  %v5498_v58 = vld [vmem:[%s6334_s18 + $0x388] ss:$16 sps:$4 sm:$0xff]  }
  0xdd   : > { %2399 = vmatprep.subr.bf16.mxu0 %v5411_v59  ;;  %2563 = vmatprep.subr.bf16.mxu1 %v5413_v60  ;;  %v5503_v59 = vld [vmem:[%s6334_s18 + $0x3a4] ss:$16 sps:$4 sm:$0xff]   ;;  %v5506_v60 = vld [vmem:[%s6334_s18 + $0x3ac] ss:$16 sps:$4 sm:$0xff]  }
  0xe0   : > { %2400 = vmatpush1.bf16.msra.mxu0 %v5415_v61  ;;  %2564 = vmatpush1.bf16.msra.mxu1 %v5416_v62  ;;  %v5501_v61 = vld [vmem:[%s6334_s18 + $0x3a0] ss:$16 sps:$4 sm:$0xff]   ;;  %v5504_v62 = vld [vmem:[%s6334_s18 + $0x3a8] ss:$16 sps:$4 sm:$0xff]  }
  0xe1   : > { %2401 = vmatprep.subr.bf16.mxu0 %v5417_v63  ;;  %2565 = vmatprep.subr.bf16.mxu1 %v5419_v0  ;;  %v5509_v63 = vld [vmem:[%s6334_s18 + $0x3c4] ss:$16 sps:$4 sm:$0xff]   ;;  %v5512_v0 = vld [vmem:[%s6334_s18 + $0x3cc] ss:$16 sps:$4 sm:$0xff]  }
  0xe4   : > { %2402 = vmatpush1.bf16.msra.mxu0 %v5421_v1  ;;  %2566 = vmatpush1.bf16.msra.mxu1 %v5422_v2  ;;  %v5507_v1 = vld [vmem:[%s6334_s18 + $0x3c0] ss:$16 sps:$4 sm:$0xff]   ;;  %v5510_v2 = vld [vmem:[%s6334_s18 + $0x3c8] ss:$16 sps:$4 sm:$0xff]  }
  0xe5   : > { %2412 = vmatprep.subr.bf16.mxu0 %v5425_v4  ;;  %2576 = vmatprep.subr.bf16.mxu1 %v5428_v5  ;;  %v5518_v4 = vld [vmem:[%s6334_s18 + $0x3ec] ss:$16 sps:$4 sm:$0xff]   ;;  %v5513_v5 = vld [vmem:[%s6334_s18 + $0x3e0] ss:$16 sps:$4 sm:$0xff]  }
  0xe7   : > { %2404 = vmatmul.mubr.bf16.vlgmr.msra.gmra.mrb[0].mxu0 %v805_v6  ;;  %2568 = vmatmul.mubr.bf16.vlgmr.msra.gmra.mrb[0].mxu1 %v805_v6  ;;  %v5516_v6 = vld [vmem:[%s6334_s18 + $0x3e8] ss:$16 sps:$4 sm:$0xff]  }
  0xe8   : > { %2413 = vmatpush1.bf16.msra.mxu0 %v5423_v7  ;;  %2577 = vmatpush1.bf16.msra.mxu1 %v5426_v8  ;;  %v5521_v7 = vld [vmem:[%s6334_s18 + $0x404] ss:$16 sps:$4 sm:$0xff]  }
  0xe9   : > { %2414 = vmatprep.subr.bf16.mxu0 %v5431_v9  ;;  %2578 = vmatprep.subr.bf16.mxu1 %v5434_v10  ;;  %v799_v8 = vld [vmem:[%s7086_s0 + $0x10] sm:$0xff]  ;;  %v5524_v9 = vld [vmem:[%s6334_s18 + $0x40c] ss:$16 sps:$4 sm:$0xff]  }
  0xea   : > { %2444 = vmatprep.mubr.bf16.mxu0 %v808_v33  ;;  %2608 = vmatprep.mubr.bf16.mxu1 %v808_v33  ;;  %v5519_v10 = vld [vmem:[%s6334_s18 + $0x400] ss:$16 sps:$4 sm:$0xff]  }
  0xeb   : > { %v5549_v33 = vld [vmem:[%s6334_s18 + $0x4a0] ss:$16 sps:$4 sm:$0xff]  }
  0xec   : > { %2415 = vmatpush1.bf16.msra.mxu0 %v5429_v11  ;;  %2579 = vmatpush1.bf16.msra.mxu1 %v5432_v12  ;;  %v5522_v11 = vld [vmem:[%s6334_s18 + $0x408] ss:$16 sps:$4 sm:$0xff]   ;;  %v807_v12 = vpack.c.bf16 %v799_v8, %v799_v8  ;;  %v5614_v8 = vld [vmem:[%s6334_s18 + $0x5ec] ss:$16 sps:$4 sm:$0xff]  }
  0xed   : > { %2416 = vmatprep.subr.bf16.mxu0 %v5437_v13  ;;  %2580 = vmatprep.subr.bf16.mxu1 %v5440_v14  ;;  %v5527_v13 = vld [vmem:[%s6334_s18 + $0x424] ss:$16 sps:$4 sm:$0xff]   ;;  %v5530_v14 = vld [vmem:[%s6334_s18 + $0x42c] ss:$16 sps:$4 sm:$0xff]  }
  0xf0   : > { %2417 = vmatpush1.bf16.msra.mxu0 %v5435_v15  ;;  %2581 = vmatpush1.bf16.msra.mxu1 %v5438_v16  ;;  %v802_v15 = vld [vmem:[%s7086_s0 + $0x28] sm:$0xff] }
  0xf1   : > { %2418 = vmatprep.subr.bf16.mxu0 %v5443_v17  ;;  %2582 = vmatprep.subr.bf16.mxu1 %v5446_v18  ;;  %v810_v16 = vpack.c.bf16 %v802_v15, %v802_v15  ;;  %v5525_v17 = vld [vmem:[%s6334_s18 + $0x420] ss:$16 sps:$4 sm:$0xff]   ;;  %v5528_v18 = vld [vmem:[%s6334_s18 + $0x428] ss:$16 sps:$4 sm:$0xff]  }
  0xf2   : > { %v804_v15 = vld [vmem:[%s7086_s0 + $0x38] sm:$0xff] }
  0xf4   : > { %2419 = vmatpush1.bf16.msra.mxu0 %v5441_v19  ;;  %2583 = vmatpush1.bf16.msra.mxu1 %v5444_v20  ;;  %v5533_v19 = vld [vmem:[%s6334_s18 + $0x444] ss:$16 sps:$4 sm:$0xff]   ;;  %v5536_v20 = vld [vmem:[%s6334_s18 + $0x44c] ss:$16 sps:$4 sm:$0xff]  }
  0xf5   : > { %2420 = vmatprep.subr.bf16.mxu0 %v5449_v21  ;;  %2584 = vmatprep.subr.bf16.mxu1 %v5452_v22  ;;  %v5531_v21 = vld [vmem:[%s6334_s18 + $0x440] ss:$16 sps:$4 sm:$0xff]   ;;  %v5534_v22 = vld [vmem:[%s6334_s18 + $0x448] ss:$16 sps:$4 sm:$0xff]  }
  0xf8   : > { %2421 = vmatpush1.bf16.msra.mxu0 %v5447_v23  ;;  %2585 = vmatpush1.bf16.msra.mxu1 %v5450_v24  ;;  %v5539_v23 = vld [vmem:[%s6334_s18 + $0x464] ss:$16 sps:$4 sm:$0xff]   ;;  %v5542_v24 = vld [vmem:[%s6334_s18 + $0x46c] ss:$16 sps:$4 sm:$0xff]  }
  0xf9   : > { %2422 = vmatprep.subr.bf16.mxu0 %v5455_v25  ;;  %2586 = vmatprep.subr.bf16.mxu1 %v5458_v26  ;;  %v5537_v25 = vld [vmem:[%s6334_s18 + $0x460] ss:$16 sps:$4 sm:$0xff]   ;;  %v5540_v26 = vld [vmem:[%s6334_s18 + $0x468] ss:$16 sps:$4 sm:$0xff]  }
  0xfc   : > { %2423 = vmatpush1.bf16.msra.mxu0 %v5453_v27  ;;  %2587 = vmatpush1.bf16.msra.mxu1 %v5456_v28  ;;  %v5545_v27 = vld [vmem:[%s6334_s18 + $0x484] ss:$16 sps:$4 sm:$0xff]   ;;  %v5548_v28 = vld [vmem:[%s6334_s18 + $0x48c] ss:$16 sps:$4 sm:$0xff]  }
  0xfd   : > { %2424 = vmatprep.subr.bf16.mxu0 %v5461_v29  ;;  %2588 = vmatprep.subr.bf16.mxu1 %v5464_v30  ;;  %v5543_v29 = vld [vmem:[%s6334_s18 + $0x480] ss:$16 sps:$4 sm:$0xff]   ;;  %v5546_v30 = vld [vmem:[%s6334_s18 + $0x488] ss:$16 sps:$4 sm:$0xff]  }
 0x100   : > { %2425 = vmatpush1.bf16.msra.mxu0 %v5459_v32  ;;  %2589 = vmatpush1.bf16.msra.mxu1 %v5462_v34  ;;  %v5554_v32 = vld [vmem:[%s6334_s18 + $0x4ac] ss:$16 sps:$4 sm:$0xff]   ;;  %v5552_v34 = vld [vmem:[%s6334_s18 + $0x4a8] ss:$16 sps:$4 sm:$0xff]  }
 0x101   : > { %2426 = vmatprep.subr.bf16.mxu0 %v5467_v35  ;;  %2590 = vmatprep.subr.bf16.mxu1 %v5470_v36  ;;  %v5557_v35 = vld [vmem:[%s6334_s18 + $0x4c4] ss:$16 sps:$4 sm:$0xff]   ;;  %v5560_v36 = vld [vmem:[%s6334_s18 + $0x4cc] ss:$16 sps:$4 sm:$0xff]  }
 0x104   : > { %2427 = vmatpush1.bf16.msra.mxu0 %v5465_v37  ;;  %2591 = vmatpush1.bf16.msra.mxu1 %v5468_v38  ;;  %v5555_v37 = vld [vmem:[%s6334_s18 + $0x4c0] ss:$16 sps:$4 sm:$0xff]   ;;  %v5558_v38 = vld [vmem:[%s6334_s18 + $0x4c8] ss:$16 sps:$4 sm:$0xff]  }
 0x105   : > { %2428 = vmatprep.subr.bf16.mxu0 %v5473_v39  ;;  %2592 = vmatprep.subr.bf16.mxu1 %v5476_v40  ;;  %v5563_v39 = vld [vmem:[%s6334_s18 + $0x4e4] ss:$16 sps:$4 sm:$0xff]   ;;  %v5566_v40 = vld [vmem:[%s6334_s18 + $0x4ec] ss:$16 sps:$4 sm:$0xff]  }
 0x108   : > { %2429 = vmatpush1.bf16.msra.mxu0 %v5471_v41  ;;  %2593 = vmatpush1.bf16.msra.mxu1 %v5474_v42  ;;  %v5561_v41 = vld [vmem:[%s6334_s18 + $0x4e0] ss:$16 sps:$4 sm:$0xff]   ;;  %v5564_v42 = vld [vmem:[%s6334_s18 + $0x4e8] ss:$16 sps:$4 sm:$0xff]  }
 0x109   : > { %2430 = vmatprep.subr.bf16.mxu0 %v5479_v43  ;;  %2594 = vmatprep.subr.bf16.mxu1 %v5482_v44  ;;  %v5569_v43 = vld [vmem:[%s6334_s18 + $0x504] ss:$16 sps:$4 sm:$0xff]   ;;  %v5572_v44 = vld [vmem:[%s6334_s18 + $0x50c] ss:$16 sps:$4 sm:$0xff]  }
 0x10c   : > { %2431 = vmatpush1.bf16.msra.mxu0 %v5477_v45  ;;  %2595 = vmatpush1.bf16.msra.mxu1 %v5480_v46  ;;  %v5567_v45 = vld [vmem:[%s6334_s18 + $0x500] ss:$16 sps:$4 sm:$0xff]   ;;  %v5570_v46 = vld [vmem:[%s6334_s18 + $0x508] ss:$16 sps:$4 sm:$0xff]  }
 0x10d   : > { %2432 = vmatprep.subr.bf16.mxu0 %v5485_v47  ;;  %2596 = vmatprep.subr.bf16.mxu1 %v5488_v48  ;;  %v5575_v47 = vld [vmem:[%s6334_s18 + $0x524] ss:$16 sps:$4 sm:$0xff]   ;;  %v5578_v48 = vld [vmem:[%s6334_s18 + $0x52c] ss:$16 sps:$4 sm:$0xff]  }
 0x110   : > { %2433 = vmatpush1.bf16.msra.mxu0 %v5483_v49  ;;  %2597 = vmatpush1.bf16.msra.mxu1 %v5486_v50  ;;  %v5573_v49 = vld [vmem:[%s6334_s18 + $0x520] ss:$16 sps:$4 sm:$0xff]   ;;  %v5576_v50 = vld [vmem:[%s6334_s18 + $0x528] ss:$16 sps:$4 sm:$0xff]  }
 0x111   : > { %2434 = vmatprep.subr.bf16.mxu0 %v5491_v51  ;;  %2598 = vmatprep.subr.bf16.mxu1 %v5494_v52  ;;  %v5581_v51 = vld [vmem:[%s6334_s18 + $0x544] ss:$16 sps:$4 sm:$0xff]   ;;  %v5584_v52 = vld [vmem:[%s6334_s18 + $0x54c] ss:$16 sps:$4 sm:$0xff]  }
 0x114   : > { %2435 = vmatpush1.bf16.msra.mxu0 %v5489_v53  ;;  %2599 = vmatpush1.bf16.msra.mxu1 %v5492_v54  ;;  %v5579_v53 = vld [vmem:[%s6334_s18 + $0x540] ss:$16 sps:$4 sm:$0xff]   ;;  %v5582_v54 = vld [vmem:[%s6334_s18 + $0x548] ss:$16 sps:$4 sm:$0xff]  }
 0x115   : > { %2436 = vmatprep.subr.bf16.mxu0 %v5497_v55  ;;  %2600 = vmatprep.subr.bf16.mxu1 %v5500_v56  ;;  %v5587_v55 = vld [vmem:[%s6334_s18 + $0x564] ss:$16 sps:$4 sm:$0xff]   ;;  %v5590_v56 = vld [vmem:[%s6334_s18 + $0x56c] ss:$16 sps:$4 sm:$0xff]  }
 0x118   : > { %2437 = vmatpush1.bf16.msra.mxu0 %v5495_v57  ;;  %2601 = vmatpush1.bf16.msra.mxu1 %v5498_v58  ;;  %v5585_v57 = vld [vmem:[%s6334_s18 + $0x560] ss:$16 sps:$4 sm:$0xff]   ;;  %v5588_v58 = vld [vmem:[%s6334_s18 + $0x568] ss:$16 sps:$4 sm:$0xff]  }
 0x119   : > { %2438 = vmatprep.subr.bf16.mxu0 %v5503_v59  ;;  %2602 = vmatprep.subr.bf16.mxu1 %v5506_v60  ;;  %v5593_v59 = vld [vmem:[%s6334_s18 + $0x584] ss:$16 sps:$4 sm:$0xff]   ;;  %v5596_v60 = vld [vmem:[%s6334_s18 + $0x58c] ss:$16 sps:$4 sm:$0xff]  }
 0x11c   : > { %2439 = vmatpush1.bf16.msra.mxu0 %v5501_v61  ;;  %2603 = vmatpush1.bf16.msra.mxu1 %v5504_v62  ;;  %v5591_v61 = vld [vmem:[%s6334_s18 + $0x580] ss:$16 sps:$4 sm:$0xff]   ;;  %v5594_v62 = vld [vmem:[%s6334_s18 + $0x588] ss:$16 sps:$4 sm:$0xff]  }
 0x11d   : > { %2440 = vmatprep.subr.bf16.mxu0 %v5509_v63  ;;  %2604 = vmatprep.subr.bf16.mxu1 %v5512_v0  ;;  %v5599_v63 = vld [vmem:[%s6334_s18 + $0x5a4] ss:$16 sps:$4 sm:$0xff]   ;;  %v5602_v0 = vld [vmem:[%s6334_s18 + $0x5ac] ss:$16 sps:$4 sm:$0xff]  }
 0x120   : > { %2441 = vmatpush1.bf16.msra.mxu0 %v5507_v1  ;;  %2605 = vmatpush1.bf16.msra.mxu1 %v5510_v2  ;;  %v5597_v1 = vld [vmem:[%s6334_s18 + $0x5a0] ss:$16 sps:$4 sm:$0xff]   ;;  %v5600_v2 = vld [vmem:[%s6334_s18 + $0x5a8] ss:$16 sps:$4 sm:$0xff]  }
 0x121   : > { %2442 = vmatprep.subr.bf16.mxu0 %v5515_v3  ;;  %2606 = vmatprep.subr.bf16.mxu1 %v5518_v4  ;;  %v5605_v3 = vld [vmem:[%s6334_s18 + $0x5c4] ss:$16 sps:$4 sm:$0xff]   ;;  %v5608_v4 = vld [vmem:[%s6334_s18 + $0x5cc] ss:$16 sps:$4 sm:$0xff]  }
 0x124   : > { %2443 = vmatpush1.bf16.msra.mxu0 %v5513_v5  ;;  %2607 = vmatpush1.bf16.msra.mxu1 %v5516_v6  ;;  %v5603_v5 = vld [vmem:[%s6334_s18 + $0x5c0] ss:$16 sps:$4 sm:$0xff]   ;;  %v5606_v6 = vld [vmem:[%s6334_s18 + $0x5c8] ss:$16 sps:$4 sm:$0xff]  }
 0x125   : > { %2453 = vmatprep.subr.bf16.mxu0 %v5521_v7  ;;  %2617 = vmatprep.subr.bf16.mxu1 %v5524_v9  ;;  %v5611_v7 = vld [vmem:[%s6334_s18 + $0x5e4] ss:$16 sps:$4 sm:$0xff]   ;;  %v5609_v9 = vld [vmem:[%s6334_s18 + $0x5e0] ss:$16 sps:$4 sm:$0xff]  }
 0x127   : > { %2445 = vmatmul.mubr.bf16.vlgmr.msra.gmra.mrb[0].mxu0 %v807_v12  ;;  %2609 = vmatmul.mubr.bf16.vlgmr.msra.gmra.mrb[0].mxu1 %v807_v12  ;;  %v5617_v12 = vld [vmem:[%s6334_s18 + $0x604] ss:$16 sps:$4 sm:$0xff]  }
 0x128   : > { %2454 = vmatpush1.bf16.msra.mxu0 %v5519_v10  ;;  %2618 = vmatpush1.bf16.msra.mxu1 %v5522_v11  ;;  %v5612_v10 = vld [vmem:[%s6334_s18 + $0x5e8] ss:$16 sps:$4 sm:$0xff]   ;;  %v801_v11 = vld [vmem:[%s7086_s0 + $0x20] sm:$0xff] }
 0x129   : > { %2455 = vmatprep.subr.bf16.mxu0 %v5527_v13  ;;  %2619 = vmatprep.subr.bf16.mxu1 %v5530_v14  ;;  %v5620_v13 = vld [vmem:[%s6334_s18 + $0x60c] ss:$16 sps:$4 sm:$0xff]   ;;  %v809_v14 = vpack.c.bf16 %v801_v11, %v801_v11  ;;  %v5707_v11 = vld [vmem:[%s6334_s18 + $0x7e4] ss:$16 sps:$4 sm:$0xff]  }
 0x12a   : > { %2485 = vmatprep.mubr.bf16.mxu0 %v810_v16  ;;  %2649 = vmatprep.mubr.bf16.mxu1 %v810_v16  ;;  %v5615_v16 = vld [vmem:[%s6334_s18 + $0x600] ss:$16 sps:$4 sm:$0xff]  }
 0x12c   : > { %2456 = vmatpush1.bf16.msra.mxu0 %v5525_v17  ;;  %2620 = vmatpush1.bf16.msra.mxu1 %v5528_v18  ;;  %v5618_v17 = vld [vmem:[%s6334_s18 + $0x608] ss:$16 sps:$4 sm:$0xff]   ;;  %v5623_v18 = vld [vmem:[%s6334_s18 + $0x624] ss:$16 sps:$4 sm:$0xff]  }
 0x12d   : > { %2457 = vmatprep.subr.bf16.mxu0 %v5533_v19  ;;  %2621 = vmatprep.subr.bf16.mxu1 %v5536_v20  ;;  %v5626_v19 = vld [vmem:[%s6334_s18 + $0x62c] ss:$16 sps:$4 sm:$0xff]   ;;  %v812_v20 = vpack.c.bf16 %v804_v15, %v804_v15  ;;  %v2843_v15 = vld [vmem:[%s6332_s20 + $0x400] sm:$0xff] }
 0x130   : > { %2458 = vmatpush1.bf16.msra.mxu0 %v5531_v21  ;;  %2622 = vmatpush1.bf16.msra.mxu1 %v5534_v22  ;;  %v5621_v21 = vld [vmem:[%s6334_s18 + $0x620] ss:$16 sps:$4 sm:$0xff]   ;;  %v5624_v22 = vld [vmem:[%s6334_s18 + $0x628] ss:$16 sps:$4 sm:$0xff]  }
 0x131   : > { %2459 = vmatprep.subr.bf16.mxu0 %v5539_v23  ;;  %2623 = vmatprep.subr.bf16.mxu1 %v5542_v24  ;;  %v5629_v23 = vld [vmem:[%s6334_s18 + $0x644] ss:$16 sps:$4 sm:$0xff]   ;;  %v5632_v24 = vld [vmem:[%s6334_s18 + $0x64c] ss:$16 sps:$4 sm:$0xff]  }
 0x134   : > { %2460 = vmatpush1.bf16.msra.mxu0 %v5537_v25  ;;  %2624 = vmatpush1.bf16.msra.mxu1 %v5540_v26  ;;  %v5627_v25 = vld [vmem:[%s6334_s18 + $0x640] ss:$16 sps:$4 sm:$0xff]   ;;  %v5630_v26 = vld [vmem:[%s6334_s18 + $0x648] ss:$16 sps:$4 sm:$0xff]  }
 0x135   : > { %2461 = vmatprep.subr.bf16.mxu0 %v5545_v27  ;;  %2625 = vmatprep.subr.bf16.mxu1 %v5548_v28  ;;  %v5635_v27 = vld [vmem:[%s6334_s18 + $0x664] ss:$16 sps:$4 sm:$0xff]   ;;  %v5638_v28 = vld [vmem:[%s6334_s18 + $0x66c] ss:$16 sps:$4 sm:$0xff]  }
 0x138   : > { %2462 = vmatpush1.bf16.msra.mxu0 %v5543_v29  ;;  %2626 = vmatpush1.bf16.msra.mxu1 %v5546_v30  ;;  %v5633_v29 = vld [vmem:[%s6334_s18 + $0x660] ss:$16 sps:$4 sm:$0xff]   ;;  %v5636_v30 = vld [vmem:[%s6334_s18 + $0x668] ss:$16 sps:$4 sm:$0xff]  }
 0x139   : > { %2463 = vmatprep.subr.bf16.mxu0 %v5551_v31  ;;  %2627 = vmatprep.subr.bf16.mxu1 %v5554_v32  ;;  %v5641_v31 = vld [vmem:[%s6334_s18 + $0x684] ss:$16 sps:$4 sm:$0xff]   ;;  %v5644_v32 = vld [vmem:[%s6334_s18 + $0x68c] ss:$16 sps:$4 sm:$0xff]  }
 0x13c   : > { %2464 = vmatpush1.bf16.msra.mxu0 %v5549_v33  ;;  %2628 = vmatpush1.bf16.msra.mxu1 %v5552_v34  ;;  %v5639_v33 = vld [vmem:[%s6334_s18 + $0x680] ss:$16 sps:$4 sm:$0xff]   ;;  %v5642_v34 = vld [vmem:[%s6334_s18 + $0x688] ss:$16 sps:$4 sm:$0xff]  }
 0x13d   : > { %2465 = vmatprep.subr.bf16.mxu0 %v5557_v35  ;;  %2629 = vmatprep.subr.bf16.mxu1 %v5560_v36  ;;  %v5647_v35 = vld [vmem:[%s6334_s18 + $0x6a4] ss:$16 sps:$4 sm:$0xff]   ;;  %v5650_v36 = vld [vmem:[%s6334_s18 + $0x6ac] ss:$16 sps:$4 sm:$0xff]  }
 0x140   : > { %2466 = vmatpush1.bf16.msra.mxu0 %v5555_v37  ;;  %2630 = vmatpush1.bf16.msra.mxu1 %v5558_v38  ;;  %v5645_v37 = vld [vmem:[%s6334_s18 + $0x6a0] ss:$16 sps:$4 sm:$0xff]   ;;  %v5648_v38 = vld [vmem:[%s6334_s18 + $0x6a8] ss:$16 sps:$4 sm:$0xff]  }
 0x141   : > { %2467 = vmatprep.subr.bf16.mxu0 %v5563_v39  ;;  %2631 = vmatprep.subr.bf16.mxu1 %v5566_v40  ;;  %v5653_v39 = vld [vmem:[%s6334_s18 + $0x6c4] ss:$16 sps:$4 sm:$0xff]   ;;  %v5656_v40 = vld [vmem:[%s6334_s18 + $0x6cc] ss:$16 sps:$4 sm:$0xff]  }
 0x144   : > { %2468 = vmatpush1.bf16.msra.mxu0 %v5561_v41  ;;  %2632 = vmatpush1.bf16.msra.mxu1 %v5564_v42  ;;  %v5651_v41 = vld [vmem:[%s6334_s18 + $0x6c0] ss:$16 sps:$4 sm:$0xff]   ;;  %v5654_v42 = vld [vmem:[%s6334_s18 + $0x6c8] ss:$16 sps:$4 sm:$0xff]  }
 0x145   : > { %2469 = vmatprep.subr.bf16.mxu0 %v5569_v43  ;;  %2633 = vmatprep.subr.bf16.mxu1 %v5572_v44  ;;  %v5659_v43 = vld [vmem:[%s6334_s18 + $0x6e4] ss:$16 sps:$4 sm:$0xff]   ;;  %v5662_v44 = vld [vmem:[%s6334_s18 + $0x6ec] ss:$16 sps:$4 sm:$0xff]  }
 0x148   : > { %2470 = vmatpush1.bf16.msra.mxu0 %v5567_v45  ;;  %2634 = vmatpush1.bf16.msra.mxu1 %v5570_v46  ;;  %v5657_v45 = vld [vmem:[%s6334_s18 + $0x6e0] ss:$16 sps:$4 sm:$0xff]   ;;  %v5660_v46 = vld [vmem:[%s6334_s18 + $0x6e8] ss:$16 sps:$4 sm:$0xff]  }
 0x149   : > { %2471 = vmatprep.subr.bf16.mxu0 %v5575_v47  ;;  %2635 = vmatprep.subr.bf16.mxu1 %v5578_v48  ;;  %v5665_v47 = vld [vmem:[%s6334_s18 + $0x704] ss:$16 sps:$4 sm:$0xff]   ;;  %v5668_v48 = vld [vmem:[%s6334_s18 + $0x70c] ss:$16 sps:$4 sm:$0xff]  }
 0x14c   : > { %2472 = vmatpush1.bf16.msra.mxu0 %v5573_v49  ;;  %2636 = vmatpush1.bf16.msra.mxu1 %v5576_v50  ;;  %v5663_v49 = vld [vmem:[%s6334_s18 + $0x700] ss:$16 sps:$4 sm:$0xff]   ;;  %v5666_v50 = vld [vmem:[%s6334_s18 + $0x708] ss:$16 sps:$4 sm:$0xff]  }
 0x14d   : > { %2473 = vmatprep.subr.bf16.mxu0 %v5581_v51  ;;  %2637 = vmatprep.subr.bf16.mxu1 %v5584_v52  ;;  %v5671_v51 = vld [vmem:[%s6334_s18 + $0x724] ss:$16 sps:$4 sm:$0xff]   ;;  %v5674_v52 = vld [vmem:[%s6334_s18 + $0x72c] ss:$16 sps:$4 sm:$0xff]  }
 0x150   : > { %2474 = vmatpush1.bf16.msra.mxu0 %v5579_v53  ;;  %2638 = vmatpush1.bf16.msra.mxu1 %v5582_v54  ;;  %v5669_v53 = vld [vmem:[%s6334_s18 + $0x720] ss:$16 sps:$4 sm:$0xff]   ;;  %v5672_v54 = vld [vmem:[%s6334_s18 + $0x728] ss:$16 sps:$4 sm:$0xff]  }
 0x151   : > { %2475 = vmatprep.subr.bf16.mxu0 %v5587_v55  ;;  %2639 = vmatprep.subr.bf16.mxu1 %v5590_v56  ;;  %v5677_v55 = vld [vmem:[%s6334_s18 + $0x744] ss:$16 sps:$4 sm:$0xff]   ;;  %v5680_v56 = vld [vmem:[%s6334_s18 + $0x74c] ss:$16 sps:$4 sm:$0xff]  }
 0x154   : > { %2476 = vmatpush1.bf16.msra.mxu0 %v5585_v57  ;;  %2640 = vmatpush1.bf16.msra.mxu1 %v5588_v58  ;;  %v5675_v57 = vld [vmem:[%s6334_s18 + $0x740] ss:$16 sps:$4 sm:$0xff]   ;;  %v5678_v58 = vld [vmem:[%s6334_s18 + $0x748] ss:$16 sps:$4 sm:$0xff]  }
 0x155   : > { %2477 = vmatprep.subr.bf16.mxu0 %v5593_v59  ;;  %2641 = vmatprep.subr.bf16.mxu1 %v5596_v60  ;;  %v5683_v59 = vld [vmem:[%s6334_s18 + $0x764] ss:$16 sps:$4 sm:$0xff]   ;;  %v5686_v60 = vld [vmem:[%s6334_s18 + $0x76c] ss:$16 sps:$4 sm:$0xff]  }
 0x158   : > { %2478 = vmatpush1.bf16.msra.mxu0 %v5591_v61  ;;  %2642 = vmatpush1.bf16.msra.mxu1 %v5594_v62  ;;  %v5681_v61 = vld [vmem:[%s6334_s18 + $0x760] ss:$16 sps:$4 sm:$0xff]   ;;  %v5684_v62 = vld [vmem:[%s6334_s18 + $0x768] ss:$16 sps:$4 sm:$0xff]  }
 0x159   : > { %2479 = vmatprep.subr.bf16.mxu0 %v5599_v63  ;;  %2643 = vmatprep.subr.bf16.mxu1 %v5602_v0  ;;  %v5689_v63 = vld [vmem:[%s6334_s18 + $0x784] ss:$16 sps:$4 sm:$0xff]   ;;  %v5692_v0 = vld [vmem:[%s6334_s18 + $0x78c] ss:$16 sps:$4 sm:$0xff]  }
 0x15c   : > { %2480 = vmatpush1.bf16.msra.mxu0 %v5597_v1  ;;  %2644 = vmatpush1.bf16.msra.mxu1 %v5600_v2  ;;  %v5687_v1 = vld [vmem:[%s6334_s18 + $0x780] ss:$16 sps:$4 sm:$0xff]   ;;  %v5690_v2 = vld [vmem:[%s6334_s18 + $0x788] ss:$16 sps:$4 sm:$0xff]  }
 0x15d   : > { %2481 = vmatprep.subr.bf16.mxu0 %v5605_v3  ;;  %2645 = vmatprep.subr.bf16.mxu1 %v5608_v4  ;;  %v5695_v3 = vld [vmem:[%s6334_s18 + $0x7a4] ss:$16 sps:$4 sm:$0xff]   ;;  %v5698_v4 = vld [vmem:[%s6334_s18 + $0x7ac] ss:$16 sps:$4 sm:$0xff]  }
 0x160   : > { %2482 = vmatpush1.bf16.msra.mxu0 %v5603_v5  ;;  %2646 = vmatpush1.bf16.msra.mxu1 %v5606_v6  ;;  %v5693_v5 = vld [vmem:[%s6334_s18 + $0x7a0] ss:$16 sps:$4 sm:$0xff]   ;;  %v5696_v6 = vld [vmem:[%s6334_s18 + $0x7a8] ss:$16 sps:$4 sm:$0xff]  }
 0x161   : > { %2483 = vmatprep.subr.bf16.mxu0 %v5611_v7  ;;  %2647 = vmatprep.subr.bf16.mxu1 %v5614_v8  ;;  %v5701_v7 = vld [vmem:[%s6334_s18 + $0x7c4] ss:$16 sps:$4 sm:$0xff]   ;;  %v5704_v8 = vld [vmem:[%s6334_s18 + $0x7cc] ss:$16 sps:$4 sm:$0xff]  }
 0x164   : > { %2484 = vmatpush1.bf16.msra.mxu0 %v5609_v9  ;;  %2648 = vmatpush1.bf16.msra.mxu1 %v5612_v10  ;;  %v5699_v9 = vld [vmem:[%s6334_s18 + $0x7c0] ss:$16 sps:$4 sm:$0xff]   ;;  %v5702_v10 = vld [vmem:[%s6334_s18 + $0x7c8] ss:$16 sps:$4 sm:$0xff]  }
 0x165   : > { %2494 = vmatprep.subr.bf16.mxu0 %v5617_v12  ;;  %2658 = vmatprep.subr.bf16.mxu1 %v5620_v13  ;;  %v5710_v12 = vld [vmem:[%s6334_s18 + $0x7ec] ss:$16 sps:$4 sm:$0xff]   ;;  %v2715_v13 = vld [vmem:[%s6332_s20] sm:$0xff] }
 0x167   : > { %2486 = vmatmul.mubr.bf16.vlgmr.msra.gmra.mrb[0].mxu0 %v809_v14  ;;  %2650 = vmatmul.mubr.bf16.vlgmr.msra.gmra.mrb[0].mxu1 %v809_v14  ;;  %v2719_v14 = vld [vmem:[%s6332_s20 + $0x20] sm:$0xff] }
 0x168   : > { %2495 = vmatpush1.bf16.msra.mxu0 %v5615_v16  ;;  %2659 = vmatpush1.bf16.msra.mxu1 %v5618_v17  ;;  %v2847_v16 = vld [vmem:[%s6332_s20 + $0x420] sm:$0xff] }
 0x169   : > { %2496 = vmatprep.subr.bf16.mxu0 %v5623_v18  ;;  %2660 = vmatprep.subr.bf16.mxu1 %v5626_v19  ;;  %v5705_v17 = vld [vmem:[%s6334_s18 + $0x7e0] ss:$16 sps:$4 sm:$0xff]   ;;  %v5708_v18 = vld [vmem:[%s6334_s18 + $0x7e8] ss:$16 sps:$4 sm:$0xff]  }
 0x16a   : > { %2526 = vmatprep.mubr.bf16.mxu0 %v812_v20  ;;  %2690 = vmatprep.mubr.bf16.mxu1 %v812_v20  ;;  %v803_v19 = vld [vmem:[%s7086_s0 + $0x30] sm:$0xff]  ;;  %v5014_v20 = vcombine.high %v2715_v13, %v2719_v14 }
 0x16c   : > { %2497 = vmatpush1.bf16.msra.mxu0 %v5621_v21  ;;  %2661 = vmatpush1.bf16.msra.mxu1 %v5624_v22  ;;  %v5142_v21 = vcombine.high %v2843_v15, %v2847_v16  ;;  %v2723_v22 = vld [vmem:[%s6332_s20 + $0x40] sm:$0xff] }
 0x16d   : > { %2498 = vmatprep.subr.bf16.mxu0 %v5629_v23  ;;  %2662 = vmatprep.subr.bf16.mxu1 %v5632_v24  ;;  %v2727_v23 = vld [vmem:[%s6332_s20 + $0x60] sm:$0xff] }
 0x16e   : > { %v2851_v24 = vld [vmem:[%s6332_s20 + $0x440] sm:$0xff] }
 0x170   : > { %2499 = vmatpush1.bf16.msra.mxu0 %v5627_v25  ;;  %2663 = vmatpush1.bf16.msra.mxu1 %v5630_v26  ;;  %v2855_v25 = vld [vmem:[%s6332_s20 + $0x460] sm:$0xff]  ;;  %v811_v26 = vpack.c.bf16 %v803_v19, %v803_v19 }
 0x171   : > { %2500 = vmatprep.subr.bf16.mxu0 %v5635_v27  ;;  %2664 = vmatprep.subr.bf16.mxu1 %v5638_v28  ;;  %v5013_v27 = vcombine.low %v2715_v13, %v2719_v14  ;;  %v5141_v28 = vcombine.low %v2843_v15, %v2847_v16  ;;  %v2779_v15 = vld [vmem:[%s6332_s20 + $0x200] sm:$0xff] }
 0x172   : > { %v2783_v16 = vld [vmem:[%s6332_s20 + $0x220] sm:$0xff] }
 0x174   : > { %2501 = vmatpush1.bf16.msra.mxu0 %v5633_v29  ;;  %2665 = vmatpush1.bf16.msra.mxu1 %v5636_v30  ;;  %v5022_v29 = vcombine.high %v2723_v22, %v2727_v23  ;;  %v5150_v30 = vcombine.high %v2851_v24, %v2855_v25 }
 0x175   : > { %2502 = vmatprep.subr.bf16.mxu0 %v5641_v31  ;;  %2666 = vmatprep.subr.bf16.mxu1 %v5644_v32  ;;  %v2731_v31 = vld [vmem:[%s6332_s20 + $0x80] sm:$0xff] }
 0x176   : > { %v2735_v32 = vld [vmem:[%s6332_s20 + $0xa0] sm:$0xff] }
 0x178   : > { %2503 = vmatpush1.bf16.msra.mxu0 %v5639_v33  ;;  %2667 = vmatpush1.bf16.msra.mxu1 %v5642_v34  ;;  %v2859_v33 = vld [vmem:[%s6332_s20 + $0x480] sm:$0xff] }
 0x179   : > { %2504 = vmatprep.subr.bf16.mxu0 %v5647_v35  ;;  %2668 = vmatprep.subr.bf16.mxu1 %v5650_v36  ;;  %v2863_v34 = vld [vmem:[%s6332_s20 + $0x4a0] sm:$0xff]  ;;  %v5021_v35 = vcombine.low %v2723_v22, %v2727_v23  ;;  %v5149_v36 = vcombine.low %v2851_v24, %v2855_v25 }
 0x17a   : > { %v2787_v23 = vld [vmem:[%s6332_s20 + $0x240] sm:$0xff] }
 0x17b   : > { %v2791_v24 = vld [vmem:[%s6332_s20 + $0x260] sm:$0xff] }
 0x17c   : > { %2505 = vmatpush1.bf16.msra.mxu0 %v5645_v37  ;;  %2669 = vmatpush1.bf16.msra.mxu1 %v5648_v38  ;;  %v5030_v37 = vcombine.high %v2731_v31, %v2735_v32  ;;  %v5158_v38 = vcombine.high %v2859_v33, %v2863_v34  ;;  %v2915_v25 = vld [vmem:[%s6332_s20 + $0x640] sm:$0xff] }
 0x17d   : > { %2506 = vmatprep.subr.bf16.mxu0 %v5653_v39  ;;  %2670 = vmatprep.subr.bf16.mxu1 %v5656_v40  ;;  %v2739_v39 = vld [vmem:[%s6332_s20 + $0xc0] sm:$0xff] }
 0x17e   : > { %v2743_v40 = vld [vmem:[%s6332_s20 + $0xe0] sm:$0xff] }
 0x180   : > { %2507 = vmatpush1.bf16.msra.mxu0 %v5651_v41  ;;  %2671 = vmatpush1.bf16.msra.mxu1 %v5654_v42  ;;  %v2867_v41 = vld [vmem:[%s6332_s20 + $0x4c0] sm:$0xff] }
 0x181   : > { %2508 = vmatprep.subr.bf16.mxu0 %v5659_v43  ;;  %2672 = vmatprep.subr.bf16.mxu1 %v5662_v44  ;;  %v2871_v42 = vld [vmem:[%s6332_s20 + $0x4e0] sm:$0xff]  ;;  %v5029_v43 = vcombine.low %v2731_v31, %v2735_v32  ;;  %v5157_v44 = vcombine.low %v2859_v33, %v2863_v34 }
 0x182   : > { %v2795_v31 = vld [vmem:[%s6332_s20 + $0x280] sm:$0xff] }
 0x183   : > { %v2799_v32 = vld [vmem:[%s6332_s20 + $0x2a0] sm:$0xff] }
 0x184   : > { %2509 = vmatpush1.bf16.msra.mxu0 %v5657_v45  ;;  %2673 = vmatpush1.bf16.msra.mxu1 %v5660_v46  ;;  %v5038_v45 = vcombine.high %v2739_v39, %v2743_v40  ;;  %v5166_v46 = vcombine.high %v2867_v41, %v2871_v42  ;;  %v2923_v33 = vld [vmem:[%s6332_s20 + $0x680] sm:$0xff] }
 0x185   : > { %2510 = vmatprep.subr.bf16.mxu0 %v5665_v47  ;;  %2674 = vmatprep.subr.bf16.mxu1 %v5668_v48  ;;  %v2747_v47 = vld [vmem:[%s6332_s20 + $0x100] sm:$0xff] }
 0x186   : > { %v2751_v48 = vld [vmem:[%s6332_s20 + $0x120] sm:$0xff] }
 0x187   : > { %v2927_v34 = vld [vmem:[%s6332_s20 + $0x6a0] sm:$0xff] }
 0x188   : > { %2511 = vmatpush1.bf16.msra.mxu0 %v5663_v49  ;;  %2675 = vmatpush1.bf16.msra.mxu1 %v5666_v50  ;;  %v2875_v49 = vld [vmem:[%s6332_s20 + $0x500] sm:$0xff] }
 0x189   : > { %2512 = vmatprep.subr.bf16.mxu0 %v5671_v51  ;;  %2676 = vmatprep.subr.bf16.mxu1 %v5674_v52  ;;  %v2879_v50 = vld [vmem:[%s6332_s20 + $0x520] sm:$0xff]  ;;  %v5037_v51 = vcombine.low %v2739_v39, %v2743_v40  ;;  %v5165_v52 = vcombine.low %v2867_v41, %v2871_v42 }
 0x18a   : > { %v2803_v39 = vld [vmem:[%s6332_s20 + $0x2c0] sm:$0xff] }
 0x18b   : > { %v2807_v40 = vld [vmem:[%s6332_s20 + $0x2e0] sm:$0xff] }
 0x18c   : > { %2513 = vmatpush1.bf16.msra.mxu0 %v5669_v53  ;;  %2677 = vmatpush1.bf16.msra.mxu1 %v5672_v54  ;;  %v5046_v53 = vcombine.high %v2747_v47, %v2751_v48  ;;  %v5174_v54 = vcombine.high %v2875_v49, %v2879_v50  ;;  %v2931_v41 = vld [vmem:[%s6332_s20 + $0x6c0] sm:$0xff] }
 0x18d   : > { %2514 = vmatprep.subr.bf16.mxu0 %v5677_v55  ;;  %2678 = vmatprep.subr.bf16.mxu1 %v5680_v56  ;;  %v2755_v55 = vld [vmem:[%s6332_s20 + $0x140] sm:$0xff] }
 0x18e   : > { %v2759_v56 = vld [vmem:[%s6332_s20 + $0x160] sm:$0xff] }
 0x18f   : > { %v2935_v42 = vld [vmem:[%s6332_s20 + $0x6e0] sm:$0xff] }
 0x190   : > { %2515 = vmatpush1.bf16.msra.mxu0 %v5675_v57  ;;  %2679 = vmatpush1.bf16.msra.mxu1 %v5678_v58  ;;  %v2883_v57 = vld [vmem:[%s6332_s20 + $0x540] sm:$0xff] }
 0x191   : > { %2516 = vmatprep.subr.bf16.mxu0 %v5683_v59  ;;  %2680 = vmatprep.subr.bf16.mxu1 %v5686_v60  ;;  %v2887_v58 = vld [vmem:[%s6332_s20 + $0x560] sm:$0xff]  ;;  %v5045_v59 = vcombine.low %v2747_v47, %v2751_v48  ;;  %v5173_v60 = vcombine.low %v2875_v49, %v2879_v50 }
 0x192   : > { %v2811_v47 = vld [vmem:[%s6332_s20 + $0x300] sm:$0xff] }
 0x193   : > { %v2815_v48 = vld [vmem:[%s6332_s20 + $0x320] sm:$0xff] }
 0x194   : > { %2517 = vmatpush1.bf16.msra.mxu0 %v5681_v61  ;;  %2681 = vmatpush1.bf16.msra.mxu1 %v5684_v62  ;;  %v5054_v61 = vcombine.high %v2755_v55, %v2759_v56  ;;  %v5182_v62 = vcombine.high %v2883_v57, %v2887_v58  ;;  %v2939_v49 = vld [vmem:[%s6332_s20 + $0x700] sm:$0xff] }
 0x195   : > { %2518 = vmatprep.subr.bf16.mxu0 %v5689_v63  ;;  %2682 = vmatprep.subr.bf16.mxu1 %v5692_v0  ;;  %v2763_v63 = vld [vmem:[%s6332_s20 + $0x180] sm:$0xff] }
 0x196   : > { %v2767_v0 = vld [vmem:[%s6332_s20 + $0x1a0] sm:$0xff] }
 0x197   : > { %v2943_v50 = vld [vmem:[%s6332_s20 + $0x720] sm:$0xff] }
 0x198   : > { %2519 = vmatpush1.bf16.msra.mxu0 %v5687_v1  ;;  %2683 = vmatpush1.bf16.msra.mxu1 %v5690_v2  ;;  %v2891_v1 = vld [vmem:[%s6332_s20 + $0x580] sm:$0xff] }
 0x199   : > { %2520 = vmatprep.subr.bf16.mxu0 %v5695_v3  ;;  %2684 = vmatprep.subr.bf16.mxu1 %v5698_v4  ;;  %v2895_v2 = vld [vmem:[%s6332_s20 + $0x5a0] sm:$0xff]  ;;  %v5053_v3 = vcombine.low %v2755_v55, %v2759_v56  ;;  %v5181_v4 = vcombine.low %v2883_v57, %v2887_v58 }
 0x19a   : > { %v2819_v55 = vld [vmem:[%s6332_s20 + $0x340] sm:$0xff] }
 0x19b   : > { %v2823_v56 = vld [vmem:[%s6332_s20 + $0x360] sm:$0xff] }
 0x19c   : > { %2521 = vmatpush1.bf16.msra.mxu0 %v5693_v5  ;;  %2685 = vmatpush1.bf16.msra.mxu1 %v5696_v6  ;;  %v5062_v5 = vcombine.high %v2763_v63, %v2767_v0  ;;  %v5190_v6 = vcombine.high %v2891_v1, %v2895_v2  ;;  %v2947_v57 = vld [vmem:[%s6332_s20 + $0x740] sm:$0xff] }
 0x19d   : > { %2522 = vmatprep.subr.bf16.mxu0 %v5701_v7  ;;  %2686 = vmatprep.subr.bf16.mxu1 %v5704_v8  ;;  %v2771_v7 = vld [vmem:[%s6332_s20 + $0x1c0] sm:$0xff] }
 0x19e   : > { %v2775_v8 = vld [vmem:[%s6332_s20 + $0x1e0] sm:$0xff] }
 0x19f   : > { %v5070_v13 = vcombine.high %v2771_v7, %v2775_v8  ;;  %v5069_v19 = vcombine.low %v2771_v7, %v2775_v8  ;;  %v2951_v58 = vld [vmem:[%s6332_s20 + $0x760] sm:$0xff] }
 0x1a0   : > { %2523 = vmatpush1.bf16.msra.mxu0 %v5699_v9  ;;  %2687 = vmatpush1.bf16.msra.mxu1 %v5702_v10  ;;  %v2899_v9 = vld [vmem:[%s6332_s20 + $0x5c0] sm:$0xff] }
 0x1a1   : > { %2524 = vmatprep.subr.bf16.mxu0 %v5707_v11  ;;  %2688 = vmatprep.subr.bf16.mxu1 %v5710_v12  ;;  %v2903_v10 = vld [vmem:[%s6332_s20 + $0x5e0] sm:$0xff]  ;;  %v5061_v11 = vcombine.low %v2763_v63, %v2767_v0  ;;  %v5189_v12 = vcombine.low %v2891_v1, %v2895_v2  ;;  %v5117_v63 = vcombine.low %v2819_v55, %v2823_v56 }
 0x1a2   : > { %v5198_v14 = vcombine.high %v2899_v9, %v2903_v10  ;;  %v5245_v0 = vcombine.low %v2947_v57, %v2951_v58  ;;  %v2827_v1 = vld [vmem:[%s6332_s20 + $0x380] sm:$0xff] }
 0x1a3   : > { %v2831_v2 = vld [vmem:[%s6332_s20 + $0x3a0] sm:$0xff] }
 0x1a4   : > { %2525 = vmatpush1.bf16.msra.mxu0 %v5705_v17  ;;  %2689 = vmatpush1.bf16.msra.mxu1 %v5708_v18  ;;  %v2907_v17 = vld [vmem:[%s6332_s20 + $0x600] sm:$0xff] }
 0x1a5   : > { %4251 = vmatprep.subr.bf16.mxu0 %v5014_v20  ;;  %4292 = vmatprep.subr.bf16.mxu1 %v5142_v21  ;;  %v2911_v18 = vld [vmem:[%s6332_s20 + $0x620] sm:$0xff]  ;;  %v5197_v20 = vcombine.low %v2899_v9, %v2903_v10  ;;  %v5078_v21 = vcombine.high %v2779_v15, %v2783_v16 }
 0x1a6   : > { %v5206_v22 = vcombine.high %v2907_v17, %v2911_v18  ;;  %v2835_v9 = vld [vmem:[%s6332_s20 + $0x3c0] sm:$0xff] }
 0x1a7   : > { %2527 = vmatmul.mubr.bf16.vlgmr.msra.gmra.mrb[0].mxu0 %v811_v26  ;;  %2691 = vmatmul.mubr.bf16.vlgmr.msra.gmra.mrb[0].mxu1 %v811_v26  ;;  %v2919_v26 = vld [vmem:[%s6332_s20 + $0x660] sm:$0xff] }
 0x1a8   : > { %4252 = vmatpush1.bf16.msra.mxu0 %v5013_v27  ;;  %4293 = vmatpush1.bf16.msra.mxu1 %v5141_v28  ;;  %v5077_v27 = vcombine.low %v2779_v15, %v2783_v16  ;;  %v5205_v28 = vcombine.low %v2907_v17, %v2911_v18  ;;  %v2839_v10 = vld [vmem:[%s6332_s20 + $0x3e0] sm:$0xff]  ;;  %v2716_v17 = vld [vmem:[%s6332_s20 + $0x8] sm:$0xff] }
 0x1a9   : > { %4253 = vmatprep.subr.bf16.mxu0 %v5022_v29  ;;  %4294 = vmatprep.subr.bf16.mxu1 %v5150_v30  ;;  %v5086_v29 = vcombine.high %v2787_v23, %v2791_v24  ;;  %v5214_v30 = vcombine.high %v2915_v25, %v2919_v26  ;;  %v2720_v18 = vld [vmem:[%s6332_s20 + $0x28] sm:$0xff] }
 0x1ac   : > { %4254 = vmatpush1.bf16.msra.mxu0 %v5021_v35  ;;  %4295 = vmatpush1.bf16.msra.mxu1 %v5149_v36  ;;  %v5085_v35 = vcombine.low %v2787_v23, %v2791_v24  ;;  %v5213_v36 = vcombine.low %v2915_v25, %v2919_v26  ;;  %v1071_v25 = vlaneseq }
 0x1ad   : > { %4255 = vmatprep.subr.bf16.mxu0 %v5030_v37  ;;  %4296 = vmatprep.subr.bf16.mxu1 %v5158_v38  ;;  %v5094_v37 = vcombine.high %v2795_v31, %v2799_v32  ;;  %v5222_v38 = vcombine.high %v2923_v33, %v2927_v34 }
 0x1ae   : > { %v6709_v26 = vshrl.u32 %v1071_v25, 7  ;;  %v2888_v25 = vld [vmem:[%s6332_s20 + $0x568] sm:$0xff] }
 0x1b0   : > { %4256 = vmatpush1.bf16.msra.mxu0 %v5029_v43  ;;  %4297 = vmatpush1.bf16.msra.mxu1 %v5157_v44  ;;  %v5093_v43 = vcombine.low %v2795_v31, %v2799_v32  ;;  %v5221_v44 = vcombine.low %v2923_v33, %v2927_v34  ;;  %v1085_v31 = vsub.s32 3, %v6709_v26 }
 0x1b1   : > { %4257 = vmatprep.subr.bf16.mxu0 %v5038_v45  ;;  %4298 = vmatprep.subr.bf16.mxu1 %v5166_v46  ;;  %v5102_v45 = vcombine.high %v2803_v39, %v2807_v40  ;;  %v5230_v46 = vcombine.high %v2931_v41, %v2935_v42 }
 0x1b4   : > { %4258 = vmatpush1.bf16.msra.mxu0 %v5037_v51  ;;  %4299 = vmatpush1.bf16.msra.mxu1 %v5165_v52  ;;  %v5101_v51 = vcombine.low %v2803_v39, %v2807_v40  ;;  %v5229_v52 = vcombine.low %v2931_v41, %v2935_v42 }
 0x1b5   : > { %4259 = vmatprep.subr.bf16.mxu0 %v5046_v53  ;;  %4300 = vmatprep.subr.bf16.mxu1 %v5174_v54  ;;  %v5110_v53 = vcombine.high %v2811_v47, %v2815_v48  ;;  %v5238_v54 = vcombine.high %v2939_v49, %v2943_v50 }
 0x1b8   : > { %4260 = vmatpush1.bf16.msra.mxu0 %v5045_v59  ;;  %4301 = vmatpush1.bf16.msra.mxu1 %v5173_v60  ;;  %v5109_v59 = vcombine.low %v2811_v47, %v2815_v48  ;;  %v5237_v60 = vcombine.low %v2939_v49, %v2943_v50 }
 0x1b9   : > { %4261 = vmatprep.subr.bf16.mxu0 %v5054_v61  ;;  %4302 = vmatprep.subr.bf16.mxu1 %v5182_v62  ;;  %v5118_v61 = vcombine.high %v2819_v55, %v2823_v56  ;;  %v5246_v62 = vcombine.high %v2947_v57, %v2951_v58  ;;  %v2856_v55 = vld [vmem:[%s6332_s20 + $0x468] sm:$0xff] }
 0x1bc   : > { %4262 = vmatpush1.bf16.msra.mxu0 %v5053_v3  ;;  %4303 = vmatpush1.bf16.msra.mxu1 %v5181_v4  ;;  %v2955_v3 = vld [vmem:[%s6332_s20 + $0x780] sm:$0xff]  ;;  %v5126_v4 = vcombine.high %v2827_v1, %v2831_v2 }
 0x1bd   : > { %4263 = vmatprep.subr.bf16.mxu0 %v5062_v5  ;;  %4304 = vmatprep.subr.bf16.mxu1 %v5190_v6  ;;  %v2959_v5 = vld [vmem:[%s6332_s20 + $0x7a0] sm:$0xff]  ;;  %v5125_v6 = vcombine.low %v2827_v1, %v2831_v2  ;;  %v2864_v1 = vld [vmem:[%s6332_s20 + $0x4a8] sm:$0xff] }
 0x1be   : > { %v5253_v7 = vcombine.low %v2955_v3, %v2959_v5  ;;  %v5254_v8 = vcombine.high %v2955_v3, %v2959_v5 }
 0x1c0   : > { %4264 = vmatpush1.bf16.msra.mxu0 %v5061_v11  ;;  %4305 = vmatpush1.bf16.msra.mxu1 %v5189_v12  ;;  %v2963_v11 = vld [vmem:[%s6332_s20 + $0x7c0] sm:$0xff]  ;;  %v5134_v12 = vcombine.high %v2835_v9, %v2839_v10 }
 0x1c1   : > { %4265 = vmatprep.subr.bf16.mxu0 %v5070_v13  ;;  %4306 = vmatprep.subr.bf16.mxu1 %v5198_v14  ;;  %v2967_v13 = vld [vmem:[%s6332_s20 + $0x7e0] sm:$0xff]  ;;  %v5133_v14 = vcombine.low %v2835_v9, %v2839_v10  ;;  %v2872_v9 = vld [vmem:[%s6332_s20 + $0x4e8] sm:$0xff] }
 0x1c2   : > { %v5261_v15 = vcombine.low %v2963_v11, %v2967_v13  ;;  %v5262_v16 = vcombine.high %v2963_v11, %v2967_v13 }
 0x1c4   : > { %4266 = vmatpush1.bf16.msra.mxu0 %v5069_v19  ;;  %4307 = vmatpush1.bf16.msra.mxu1 %v5197_v20  ;;  %v2844_v19 = vld [vmem:[%s6332_s20 + $0x408] sm:$0xff]  ;;  %v5016_v20 = vcombine.high %v2716_v17, %v2720_v18 }
 0x1c5   : > { %4267 = vmatprep.subr.bf16.mxu0 %v5078_v21  ;;  %4308 = vmatprep.subr.bf16.mxu1 %v5206_v22  ;;  %v2848_v21 = vld [vmem:[%s6332_s20 + $0x428] sm:$0xff]  ;;  %v5015_v22 = vcombine.low %v2716_v17, %v2720_v18 }
 0x1c6   : > { %v5143_v23 = vcombine.low %v2844_v19, %v2848_v21  ;;  %v5144_v24 = vcombine.high %v2844_v19, %v2848_v21  ;;  %v2880_v17 = vld [vmem:[%s6332_s20 + $0x528] sm:$0xff] }
 0x1c8   : > { %4268 = vmatpush1.bf16.msra.mxu0 %v5077_v27  ;;  %4309 = vmatpush1.bf16.msra.mxu1 %v5205_v28  ;;  %v1073_v27 = vsub.s32 0, %v6709_v26  ;;  %v1081_v28 = vsub.s32 2, %v6709_v26 }
 0x1c9   : > { %4269 = vmatprep.subr.bf16.mxu0 %v5086_v29  ;;  %4310 = vmatprep.subr.bf16.mxu1 %v5214_v30  ;;  %v1069_v29 = vld [vmem:[%s776_s14] sm:$0xf]  ;;  %v1077_v30 = vsub.s32 1, %v6709_v26 }
 0x1ca   : > { %v1074_v32 = vrot.slane %v1069_v29, %v1073_v27  ;;  %v1082_v33 = vrot.slane %v1069_v29, %v1081_v28 }
 0x1cb   : > { %v1078_v34 = vrot.slane %v1069_v29, %v1077_v30 }
 0x1cc   : > { %4270 = vmatpush1.bf16.msra.mxu0 %v5085_v35  ;;  %4311 = vmatpush1.bf16.msra.mxu1 %v5213_v36  ;;  %v1086_v35 = vrot.slane %v1069_v29, %v1085_v31 }
 0x1cd   : > { %4271 = vmatprep.subr.bf16.mxu0 %v5094_v37  ;;  %4312 = vmatprep.subr.bf16.mxu1 %v5222_v38 }
 0x1d0   : > { %4272 = vmatpush1.bf16.msra.mxu0 %v5093_v43  ;;  %4313 = vmatpush1.bf16.msra.mxu1 %v5221_v44 }
 0x1d1   : > { %4273 = vmatprep.subr.bf16.mxu0 %v5102_v45  ;;  %4314 = vmatprep.subr.bf16.mxu1 %v5230_v46 }
 0x1d4   : > { %4274 = vmatpush1.bf16.msra.mxu0 %v5101_v51  ;;  %4315 = vmatpush1.bf16.msra.mxu1 %v5229_v52  ;;  %v2724_v52 = vld [vmem:[%s6332_s20 + $0x48] sm:$0xff] }
 0x1d5   : > { %4275 = vmatprep.subr.bf16.mxu0 %v5110_v53  ;;  %4316 = vmatprep.subr.bf16.mxu1 %v5238_v54  ;;  %v2728_v53 = vld [vmem:[%s6332_s20 + $0x68] sm:$0xff] }
 0x1d6   : > { %v2852_v54 = vld [vmem:[%s6332_s20 + $0x448] sm:$0xff]  ;;  %v5023_v2 = vcombine.low %v2724_v52, %v2728_v53 }
 0x1d7   : > { %v5151_v3 = vcombine.low %v2852_v54, %v2856_v55 }
 0x1d8   : > { %4276 = vmatpush1.bf16.msra.mxu0 %v5109_v59  ;;  %4317 = vmatpush1.bf16.msra.mxu1 %v5237_v60  ;;  %v2732_v60 = vld [vmem:[%s6332_s20 + $0x88] sm:$0xff] }
 0x1d9   : > { %4277 = vmatprep.subr.bf16.mxu0 %v5118_v61  ;;  %4318 = vmatprep.subr.bf16.mxu1 %v5246_v62  ;;  %v5024_v61 = vcombine.high %v2724_v52, %v2728_v53  ;;  %v5152_v62 = vcombine.high %v2852_v54, %v2856_v55  ;;  %v2784_v52 = vld [vmem:[%s6332_s20 + $0x228] sm:$0xff] }
 0x1da   : > { %v2908_v53 = vld [vmem:[%s6332_s20 + $0x608] sm:$0xff] }
 0x1db   : > { %v2912_v54 = vld [vmem:[%s6332_s20 + $0x628] sm:$0xff] }
 0x1dc   : > { %4278 = vmatpush1.bf16.msra.mxu0 %v5117_v63  ;;  %4319 = vmatpush1.bf16.msra.mxu1 %v5245_v0  ;;  %v2736_v63 = vld [vmem:[%s6332_s20 + $0xa8] sm:$0xff] }
 0x1dd   : > { %4279 = vmatprep.subr.bf16.mxu0 %v5126_v4  ;;  %4320 = vmatprep.subr.bf16.mxu1 %v5254_v8  ;;  %v2860_v0 = vld [vmem:[%s6332_s20 + $0x488] sm:$0xff]  ;;  %v5032_v4 = vcombine.high %v2732_v60, %v2736_v63  ;;  %v5031_v10 = vcombine.low %v2732_v60, %v2736_v63 }
 0x1de   : > { %v5160_v5 = vcombine.high %v2860_v0, %v2864_v1  ;;  %v2868_v8 = vld [vmem:[%s6332_s20 + $0x4c8] sm:$0xff]  ;;  %v5159_v11 = vcombine.low %v2860_v0, %v2864_v1 }
 0x1df   : > { %v5168_v13 = vcombine.high %v2868_v8, %v2872_v9  ;;  %v5167_v19 = vcombine.low %v2868_v8, %v2872_v9  ;;  %v2788_v63 = vld [vmem:[%s6332_s20 + $0x248] sm:$0xff] }
 0x1e0   : > { %4280 = vmatpush1.bf16.msra.mxu0 %v5125_v6  ;;  %4321 = vmatpush1.bf16.msra.mxu1 %v5253_v7  ;;  %v2740_v6 = vld [vmem:[%s6332_s20 + $0xc8] sm:$0xff] }
 0x1e1   : > { %4281 = vmatprep.subr.bf16.mxu0 %v5134_v12  ;;  %4322 = vmatprep.subr.bf16.mxu1 %v5262_v16  ;;  %v2744_v7 = vld [vmem:[%s6332_s20 + $0xe8] sm:$0xff] }
 0x1e2   : > { %v5040_v12 = vcombine.high %v2740_v6, %v2744_v7  ;;  %v2876_v16 = vld [vmem:[%s6332_s20 + $0x508] sm:$0xff]  ;;  %v5039_v18 = vcombine.low %v2740_v6, %v2744_v7 }
 0x1e3   : > { %v5176_v21 = vcombine.high %v2876_v16, %v2880_v17  ;;  %v2792_v0 = vld [vmem:[%s6332_s20 + $0x268] sm:$0xff] }
 0x1e4   : > { %4282 = vmatpush1.bf16.msra.mxu0 %v5133_v14  ;;  %4323 = vmatpush1.bf16.msra.mxu1 %v5261_v15  ;;  %v2748_v14 = vld [vmem:[%s6332_s20 + $0x108] sm:$0xff] }
 0x1e5   : > { %4333 = vmatprep.subr.bf16.mxu0 %v5016_v20  ;;  %4374 = vmatprep.subr.bf16.mxu1 %v5144_v24  ;;  %v2752_v15 = vld [vmem:[%s6332_s20 + $0x128] sm:$0xff] }
 0x1e6   : > { %v5048_v20 = vcombine.high %v2748_v14, %v2752_v15  ;;  %v2884_v24 = vld [vmem:[%s6332_s20 + $0x548] sm:$0xff]  ;;  %v5047_v29 = vcombine.low %v2748_v14, %v2752_v15 }
 0x1e7   : > { %v2916_v1 = vld [vmem:[%s6332_s20 + $0x648] sm:$0xff] }
 0x1e8   : > { %v2796_v7 = vld [vmem:[%s6332_s20 + $0x288] sm:$0xff] }
 0x1e9   : > { %v2800_v8 = vld [vmem:[%s6332_s20 + $0x2a8] sm:$0xff] }
 0x1ea   : > { %v2924_v9 = vld [vmem:[%s6332_s20 + $0x688] sm:$0xff] }
 0x1eb   : > { %v2804_v15 = vld [vmem:[%s6332_s20 + $0x2c8] sm:$0xff] }
 0x27a   : > { %v2528_v36 = vpop.f32.mrb[0].mxu0  ;;  %v2692_v37 = vpop.f32.mrb[0].mxu1 }
 0x27b   : > { %v5274_v38 = vadd.f32 %v2528_v36, %v1074_v32  ;;  %v5276_v39 = vadd.f32 %v2692_v37, %v1082_v33  ;;  %v2530_v40 = vpop.f32.mrb[1].mxu0  ;;  %v2694_v41 = vpop.f32.mrb[1].mxu1  ;;  %v5175_v32 = vcombine.low %v2876_v16, %v2880_v17  ;;  %v2768_v36 = vld [vmem:[%s6332_s20 + $0x1a8] sm:$0xff] }
 0x27c   : > { %v5275_v42 = vadd.f32 %v2530_v40, %v1078_v34  ;;  %v5277_v43 = vadd.f32 %v2694_v41, %v1086_v35  ;;  %v2532_v44 = vpop.f32.mrb[2].mxu0  ;;  %v2696_v45 = vpop.f32.mrb[2].mxu1  ;;  %v5184_v34 = vcombine.high %v2884_v24, %v2888_v25  ;;  %v2764_v35 = vld [vmem:[%s6332_s20 + $0x188] sm:$0xff]  ;;  %v5183_v40 = vcombine.low %v2884_v24, %v2888_v25 }
 0x27d   : > { %v2699_v46 = vmax.f32 %v5274_v38, 0.0  ;;  %v2701_v47 = vmax.f32 %v5276_v39, 0.0  ;;  %v2533_v48 = vpop.f32.mrb[3].mxu0  ;;  %v2697_v49 = vpop.f32.mrb[3].mxu1  ;;  %v2892_v37 = vld [vmem:[%s6332_s20 + $0x588] sm:$0xff]  ;;  %v5064_v41 = vcombine.high %v2764_v35, %v2768_v36 }
 0x27e   : > { %v2700_v50 = vmax.f32 %v5275_v42, 0.0  ;;  %v2702_v51 = vmax.f32 %v5277_v43, 0.0  ;;  %v2896_v38 = vld [vmem:[%s6332_s20 + $0x5a8] sm:$0xff] }
 0x27f   : > { %v6736_v58 = vpack.c.bf16 %v2699_v46, %v2699_v46  ;;  %v6738_v59 = vpack.c.bf16 %v2701_v47, %v2701_v47  ;;  %v5192_v42 = vcombine.high %v2892_v37, %v2896_v38  ;;  %v2772_v43 = vld [vmem:[%s6332_s20 + $0x1c8] sm:$0xff]  ;;  %v5063_v47 = vcombine.low %v2764_v35, %v2768_v36 }
 0x280   : > { %v6732_v56 = vpack.c.bf16 %v2700_v50, %v2700_v50  ;;  %v6734_v57 = vpack.c.bf16 %v2702_v51, %v2702_v51  ;;  %v2776_v44 = vld [vmem:[%s6332_s20 + $0x1e8] sm:$0xff]  ;;  %v5191_v48 = vcombine.low %v2892_v37, %v2896_v38 }
 0x281   : > { %v2900_v45 = vld [vmem:[%s6332_s20 + $0x5c8] sm:$0xff]  ;;  %v5072_v49 = vcombine.high %v2772_v43, %v2776_v44  ;;  %v5071_v55 = vcombine.low %v2772_v43, %v2776_v44 }
 0x282   : > { %4283 = vmatprep.mubr.bf16.mxu0 %v6732_v56  ;;  %4324 = vmatprep.mubr.bf16.mxu1 %v6734_v57  ;;  %v2904_v46 = vld [vmem:[%s6332_s20 + $0x5e8] sm:$0xff] }
 0x283   : > { %4284 = vmatmul.mubr.bf16.vlgmr.msra.gmra.mrb[4].mxu0 %v6736_v58  ;;  %4325 = vmatmul.mubr.bf16.vlgmr.msra.gmra.mrb[4].mxu1 %v6738_v59  ;;  %v5200_v50 = vcombine.high %v2900_v45, %v2904_v46  ;;  %v2780_v51 = vld [vmem:[%s6332_s20 + $0x208] sm:$0xff]  ;;  %v5199_v60 = vcombine.low %v2900_v45, %v2904_v46 }
 0x284   : > { %4334 = vmatpush1.bf16.msra.mxu0 %v5015_v22  ;;  %4375 = vmatpush1.bf16.msra.mxu1 %v5143_v23  ;;  %v2756_v22 = vld [vmem:[%s6332_s20 + $0x148] sm:$0xff] }
 0x285   : > { %4365 = vmatprep.mubr.bf16.mxu0 %v6732_v56  ;;  %4406 = vmatprep.mubr.bf16.mxu1 %v6734_v57  ;;  %v2760_v23 = vld [vmem:[%s6332_s20 + $0x168] sm:$0xff] }
 0x286   : > { %4335 = vmatprep.subr.bf16.mxu0 %v5024_v61  ;;  %4376 = vmatprep.subr.bf16.mxu1 %v5152_v62  ;;  %v5056_v33 = vcombine.high %v2756_v22, %v2760_v23  ;;  %v5055_v39 = vcombine.low %v2756_v22, %v2760_v23  ;;  %v5080_v61 = vcombine.high %v2780_v51, %v2784_v52  ;;  %v2808_v16 = vld [vmem:[%s6332_s20 + $0x2e8] sm:$0xff] }
 0x287   : > { %v5208_v62 = vcombine.high %v2908_v53, %v2912_v54  ;;  %v2932_v17 = vld [vmem:[%s6332_s20 + $0x6c8] sm:$0xff] }
 0x288   : > { %4336 = vmatpush1.bf16.msra.mxu0 %v5023_v2  ;;  %4377 = vmatpush1.bf16.msra.mxu1 %v5151_v3  ;;  %v2920_v2 = vld [vmem:[%s6332_s20 + $0x668] sm:$0xff]  ;;  %v5079_v3 = vcombine.low %v2780_v51, %v2784_v52 }
 0x289   : > { %4337 = vmatprep.subr.bf16.mxu0 %v5032_v4  ;;  %4378 = vmatprep.subr.bf16.mxu1 %v5160_v5  ;;  %v5207_v4 = vcombine.low %v2908_v53, %v2912_v54  ;;  %v5088_v5 = vcombine.high %v2788_v63, %v2792_v0  ;;  %v5216_v6 = vcombine.high %v2916_v1, %v2920_v2  ;;  %v2812_v23 = vld [vmem:[%s6332_s20 + $0x308] sm:$0xff] }
 0x28a   : > { %v2816_v24 = vld [vmem:[%s6332_s20 + $0x328] sm:$0xff] }
 0x28b   : > { %v2940_v25 = vld [vmem:[%s6332_s20 + $0x708] sm:$0xff] }
 0x28c   : > { %4338 = vmatpush1.bf16.msra.mxu0 %v5031_v10  ;;  %4379 = vmatpush1.bf16.msra.mxu1 %v5159_v11  ;;  %v2928_v10 = vld [vmem:[%s6332_s20 + $0x6a8] sm:$0xff]  ;;  %v5087_v11 = vcombine.low %v2788_v63, %v2792_v0  ;;  %v2717_v0 = vld [vmem:[%s6332_s20 + $0x10] sm:$0xff] }
 0x28d   : > { %4339 = vmatprep.subr.bf16.mxu0 %v5040_v12  ;;  %4380 = vmatprep.subr.bf16.mxu1 %v5168_v13  ;;  %v5215_v12 = vcombine.low %v2916_v1, %v2920_v2  ;;  %v5096_v13 = vcombine.high %v2796_v7, %v2800_v8  ;;  %v5224_v14 = vcombine.high %v2924_v9, %v2928_v10  ;;  %v2820_v36 = vld [vmem:[%s6332_s20 + $0x348] sm:$0xff]  ;;  %v2721_v1 = vld [vmem:[%s6332_s20 + $0x30] sm:$0xff] }
 0x28e   : > { %v2824_v37 = vld [vmem:[%s6332_s20 + $0x368] sm:$0xff]  ;;  %v2845_v2 = vld [vmem:[%s6332_s20 + $0x410] sm:$0xff] }
 0x28f   : > { %v2948_v38 = vld [vmem:[%s6332_s20 + $0x748] sm:$0xff] }
 0x290   : > { %4340 = vmatpush1.bf16.msra.mxu0 %v5039_v18  ;;  %4381 = vmatpush1.bf16.msra.mxu1 %v5167_v19  ;;  %v2936_v18 = vld [vmem:[%s6332_s20 + $0x6e8] sm:$0xff]  ;;  %v5095_v19 = vcombine.low %v2796_v7, %v2800_v8  ;;  %v2725_v8 = vld [vmem:[%s6332_s20 + $0x50] sm:$0xff] }
 0x291   : > { %4341 = vmatprep.subr.bf16.mxu0 %v5048_v20  ;;  %4382 = vmatprep.subr.bf16.mxu1 %v5176_v21  ;;  %v5223_v20 = vcombine.low %v2924_v9, %v2928_v10  ;;  %v5104_v21 = vcombine.high %v2804_v15, %v2808_v16  ;;  %v5232_v22 = vcombine.high %v2932_v17, %v2936_v18  ;;  %v2828_v44 = vld [vmem:[%s6332_s20 + $0x388] sm:$0xff]  ;;  %v2729_v9 = vld [vmem:[%s6332_s20 + $0x70] sm:$0xff] }
 0x292   : > { %v2832_v45 = vld [vmem:[%s6332_s20 + $0x3a8] sm:$0xff]  ;;  %v2853_v10 = vld [vmem:[%s6332_s20 + $0x450] sm:$0xff] }
 0x293   : > { %v2956_v46 = vld [vmem:[%s6332_s20 + $0x788] sm:$0xff] }
 0x294   : > { %4342 = vmatpush1.bf16.msra.mxu0 %v5047_v29  ;;  %4383 = vmatpush1.bf16.msra.mxu1 %v5175_v32  ;;  %v2944_v29 = vld [vmem:[%s6332_s20 + $0x728] sm:$0xff]  ;;  %v5103_v32 = vcombine.low %v2804_v15, %v2808_v16  ;;  %v2733_v16 = vld [vmem:[%s6332_s20 + $0x90] sm:$0xff] }
 0x295   : > { %4343 = vmatprep.subr.bf16.mxu0 %v5056_v33  ;;  %4384 = vmatprep.subr.bf16.mxu1 %v5184_v34  ;;  %v5231_v33 = vcombine.low %v2932_v17, %v2936_v18  ;;  %v5112_v34 = vcombine.high %v2812_v23, %v2816_v24  ;;  %v5240_v35 = vcombine.high %v2940_v25, %v2944_v29  ;;  %v2836_v52 = vld [vmem:[%s6332_s20 + $0x3c8] sm:$0xff]  ;;  %v2737_v17 = vld [vmem:[%s6332_s20 + $0xb0] sm:$0xff] }
 0x296   : > { %v2840_v53 = vld [vmem:[%s6332_s20 + $0x3e8] sm:$0xff]  ;;  %v2861_v18 = vld [vmem:[%s6332_s20 + $0x490] sm:$0xff] }
 0x297   : > { %v2964_v54 = vld [vmem:[%s6332_s20 + $0x7c8] sm:$0xff] }
 0x298   : > { %4344 = vmatpush1.bf16.msra.mxu0 %v5055_v39  ;;  %4385 = vmatpush1.bf16.msra.mxu1 %v5183_v40  ;;  %v2952_v39 = vld [vmem:[%s6332_s20 + $0x768] sm:$0xff]  ;;  %v5111_v40 = vcombine.low %v2812_v23, %v2816_v24  ;;  %v2741_v24 = vld [vmem:[%s6332_s20 + $0xd0] sm:$0xff] }
 0x299   : > { %4345 = vmatprep.subr.bf16.mxu0 %v5064_v41  ;;  %4386 = vmatprep.subr.bf16.mxu1 %v5192_v42  ;;  %v5239_v41 = vcombine.low %v2940_v25, %v2944_v29  ;;  %v5120_v42 = vcombine.high %v2820_v36, %v2824_v37  ;;  %v5248_v43 = vcombine.high %v2948_v38, %v2952_v39  ;;  %v2745_v25 = vld [vmem:[%s6332_s20 + $0xf0] sm:$0xff] }
 0x29a   : > { %v2869_v29 = vld [vmem:[%s6332_s20 + $0x4d0] sm:$0xff] }
 0x29c   : > { %4346 = vmatpush1.bf16.msra.mxu0 %v5063_v47  ;;  %4387 = vmatpush1.bf16.msra.mxu1 %v5191_v48  ;;  %v2960_v47 = vld [vmem:[%s6332_s20 + $0x7a8] sm:$0xff]  ;;  %v5119_v48 = vcombine.low %v2820_v36, %v2824_v37  ;;  %v2749_v37 = vld [vmem:[%s6332_s20 + $0x110] sm:$0xff] }
 0x29d   : > { %4347 = vmatprep.subr.bf16.mxu0 %v5072_v49  ;;  %4388 = vmatprep.subr.bf16.mxu1 %v5200_v50  ;;  %v5247_v49 = vcombine.low %v2948_v38, %v2952_v39  ;;  %v5128_v50 = vcombine.high %v2828_v44, %v2832_v45  ;;  %v5256_v51 = vcombine.high %v2956_v46, %v2960_v47  ;;  %v2753_v38 = vld [vmem:[%s6332_s20 + $0x130] sm:$0xff] }
 0x29e   : > { %v2877_v39 = vld [vmem:[%s6332_s20 + $0x510] sm:$0xff] }
 0x2a0   : > { %4348 = vmatpush1.bf16.msra.mxu0 %v5071_v55  ;;  %4389 = vmatpush1.bf16.msra.mxu1 %v5199_v60  ;;  %v2968_v55 = vld [vmem:[%s6332_s20 + $0x7e8] sm:$0xff]  ;;  %v5127_v60 = vcombine.low %v2828_v44, %v2832_v45  ;;  %v2757_v45 = vld [vmem:[%s6332_s20 + $0x150] sm:$0xff] }
 0x2a1   : > { %4349 = vmatprep.subr.bf16.mxu0 %v5080_v61  ;;  %4390 = vmatprep.subr.bf16.mxu1 %v5208_v62  ;;  %v5255_v61 = vcombine.low %v2956_v46, %v2960_v47  ;;  %v5136_v62 = vcombine.high %v2836_v52, %v2840_v53  ;;  %v5264_v63 = vcombine.high %v2964_v54, %v2968_v55  ;;  %v2761_v46 = vld [vmem:[%s6332_s20 + $0x170] sm:$0xff] }
 0x2a2   : > { %v2885_v47 = vld [vmem:[%s6332_s20 + $0x550] sm:$0xff] }
 0x2a4   : > { %4350 = vmatpush1.bf16.msra.mxu0 %v5079_v3  ;;  %4391 = vmatpush1.bf16.msra.mxu1 %v5207_v4  ;;  %v2849_v3 = vld [vmem:[%s6332_s20 + $0x430] sm:$0xff]  ;;  %v5135_v4 = vcombine.low %v2836_v52, %v2840_v53 }
 0x2a5   : > { %4351 = vmatprep.subr.bf16.mxu0 %v5088_v5  ;;  %4392 = vmatprep.subr.bf16.mxu1 %v5216_v6  ;;  %v5263_v5 = vcombine.low %v2964_v54, %v2968_v55  ;;  %v5018_v6 = vcombine.high %v2717_v0, %v2721_v1  ;;  %v5146_v7 = vcombine.high %v2845_v2, %v2849_v3  ;;  %v2765_v53 = vld [vmem:[%s6332_s20 + $0x190] sm:$0xff] }
 0x2a6   : > { %v2769_v54 = vld [vmem:[%s6332_s20 + $0x1b0] sm:$0xff] }
 0x2a7   : > { %v2893_v55 = vld [vmem:[%s6332_s20 + $0x590] sm:$0xff] }
 0x2a8   : > { %4352 = vmatpush1.bf16.msra.mxu0 %v5087_v11  ;;  %4393 = vmatpush1.bf16.msra.mxu1 %v5215_v12  ;;  %v2857_v11 = vld [vmem:[%s6332_s20 + $0x470] sm:$0xff]  ;;  %v5017_v12 = vcombine.low %v2717_v0, %v2721_v1 }
 0x2a9   : > { %4353 = vmatprep.subr.bf16.mxu0 %v5096_v13  ;;  %4394 = vmatprep.subr.bf16.mxu1 %v5224_v14  ;;  %v5145_v13 = vcombine.low %v2845_v2, %v2849_v3  ;;  %v5026_v14 = vcombine.high %v2725_v8, %v2729_v9  ;;  %v5154_v15 = vcombine.high %v2853_v10, %v2857_v11  ;;  %v2773_v1 = vld [vmem:[%s6332_s20 + $0x1d0] sm:$0xff] }
 0x2aa   : > { %v2777_v2 = vld [vmem:[%s6332_s20 + $0x1f0] sm:$0xff] }
 0x2ab   : > { %v2901_v3 = vld [vmem:[%s6332_s20 + $0x5d0] sm:$0xff] }
 0x2ac   : > { %4354 = vmatpush1.bf16.msra.mxu0 %v5095_v19  ;;  %4395 = vmatpush1.bf16.msra.mxu1 %v5223_v20  ;;  %v2865_v19 = vld [vmem:[%s6332_s20 + $0x4b0] sm:$0xff]  ;;  %v5025_v20 = vcombine.low %v2725_v8, %v2729_v9 }
 0x2ad   : > { %4355 = vmatprep.subr.bf16.mxu0 %v5104_v21  ;;  %4396 = vmatprep.subr.bf16.mxu1 %v5232_v22  ;;  %v5153_v21 = vcombine.low %v2853_v10, %v2857_v11  ;;  %v5034_v22 = vcombine.high %v2733_v16, %v2737_v17  ;;  %v5162_v23 = vcombine.high %v2861_v18, %v2865_v19  ;;  %v2781_v9 = vld [vmem:[%s6332_s20 + $0x210] sm:$0xff] }
 0x2ae   : > { %v2785_v10 = vld [vmem:[%s6332_s20 + $0x230] sm:$0xff] }
 0x2af   : > { %v2909_v11 = vld [vmem:[%s6332_s20 + $0x610] sm:$0xff] }
 0x2b0   : > { %4356 = vmatpush1.bf16.msra.mxu0 %v5103_v32  ;;  %4397 = vmatpush1.bf16.msra.mxu1 %v5231_v33  ;;  %v2873_v32 = vld [vmem:[%s6332_s20 + $0x4f0] sm:$0xff]  ;;  %v5033_v33 = vcombine.low %v2733_v16, %v2737_v17 }
 0x2b1   : > { %4357 = vmatprep.subr.bf16.mxu0 %v5112_v34  ;;  %4398 = vmatprep.subr.bf16.mxu1 %v5240_v35  ;;  %v5161_v34 = vcombine.low %v2861_v18, %v2865_v19  ;;  %v5042_v35 = vcombine.high %v2741_v24, %v2745_v25  ;;  %v5170_v36 = vcombine.high %v2869_v29, %v2873_v32  ;;  %v2789_v17 = vld [vmem:[%s6332_s20 + $0x250] sm:$0xff] }
 0x2b2   : > { %v2793_v18 = vld [vmem:[%s6332_s20 + $0x270] sm:$0xff] }
 0x2b3   : > { %v2917_v19 = vld [vmem:[%s6332_s20 + $0x650] sm:$0xff] }
 0x2b4   : > { %4358 = vmatpush1.bf16.msra.mxu0 %v5111_v40  ;;  %4399 = vmatpush1.bf16.msra.mxu1 %v5239_v41  ;;  %v2881_v40 = vld [vmem:[%s6332_s20 + $0x530] sm:$0xff]  ;;  %v5041_v41 = vcombine.low %v2741_v24, %v2745_v25 }
 0x2b5   : > { %4359 = vmatprep.subr.bf16.mxu0 %v5120_v42  ;;  %4400 = vmatprep.subr.bf16.mxu1 %v5248_v43  ;;  %v5169_v42 = vcombine.low %v2869_v29, %v2873_v32  ;;  %v5050_v43 = vcombine.high %v2749_v37, %v2753_v38  ;;  %v5178_v44 = vcombine.high %v2877_v39, %v2881_v40  ;;  %v2797_v25 = vld [vmem:[%s6332_s20 + $0x290] sm:$0xff] }
 0x2b6   : > { %v2801_v29 = vld [vmem:[%s6332_s20 + $0x2b0] sm:$0xff] }
 0x2b7   : > { %v2925_v32 = vld [vmem:[%s6332_s20 + $0x690] sm:$0xff] }
 0x2b8   : > { %4360 = vmatpush1.bf16.msra.mxu0 %v5119_v48  ;;  %4401 = vmatpush1.bf16.msra.mxu1 %v5247_v49  ;;  %v2889_v48 = vld [vmem:[%s6332_s20 + $0x570] sm:$0xff]  ;;  %v5049_v49 = vcombine.low %v2749_v37, %v2753_v38 }
 0x2b9   : > { %4361 = vmatprep.subr.bf16.mxu0 %v5128_v50  ;;  %4402 = vmatprep.subr.bf16.mxu1 %v5256_v51  ;;  %v5177_v50 = vcombine.low %v2877_v39, %v2881_v40  ;;  %v5058_v51 = vcombine.high %v2757_v45, %v2761_v46  ;;  %v5186_v52 = vcombine.high %v2885_v47, %v2889_v48  ;;  %v2805_v38 = vld [vmem:[%s6332_s20 + $0x2d0] sm:$0xff] }
 0x2ba   : > { %v2809_v39 = vld [vmem:[%s6332_s20 + $0x2f0] sm:$0xff] }
 0x2bb   : > { %v2933_v40 = vld [vmem:[%s6332_s20 + $0x6d0] sm:$0xff] }
 0x2bc   : > { %4362 = vmatpush1.bf16.msra.mxu0 %v5127_v60  ;;  %4403 = vmatpush1.bf16.msra.mxu1 %v5255_v61  ;;  %v2897_v60 = vld [vmem:[%s6332_s20 + $0x5b0] sm:$0xff]  ;;  %v5057_v61 = vcombine.low %v2757_v45, %v2761_v46 }
 0x2bd   : > { %4363 = vmatprep.subr.bf16.mxu0 %v5136_v62  ;;  %4404 = vmatprep.subr.bf16.mxu1 %v5264_v63  ;;  %v5185_v62 = vcombine.low %v2885_v47, %v2889_v48  ;;  %v5066_v63 = vcombine.high %v2765_v53, %v2769_v54  ;;  %v5194_v0 = vcombine.high %v2893_v55, %v2897_v60  ;;  %v2813_v46 = vld [vmem:[%s6332_s20 + $0x310] sm:$0xff] }
 0x2be   : > { %v2817_v47 = vld [vmem:[%s6332_s20 + $0x330] sm:$0xff] }
 0x2bf   : > { %v2941_v48 = vld [vmem:[%s6332_s20 + $0x710] sm:$0xff] }
 0x2c0   : > { %4364 = vmatpush1.bf16.msra.mxu0 %v5135_v4  ;;  %4405 = vmatpush1.bf16.msra.mxu1 %v5263_v5  ;;  %v2905_v4 = vld [vmem:[%s6332_s20 + $0x5f0] sm:$0xff]  ;;  %v5065_v5 = vcombine.low %v2765_v53, %v2769_v54 }
 0x2c1   : > { %4415 = vmatprep.subr.bf16.mxu0 %v5018_v6  ;;  %4456 = vmatprep.subr.bf16.mxu1 %v5146_v7  ;;  %v5193_v6 = vcombine.low %v2893_v55, %v2897_v60  ;;  %v5074_v7 = vcombine.high %v2773_v1, %v2777_v2  ;;  %v5202_v8 = vcombine.high %v2901_v3, %v2905_v4  ;;  %v2821_v54 = vld [vmem:[%s6332_s20 + $0x350] sm:$0xff] }
 0x2c2   : > { %v2825_v55 = vld [vmem:[%s6332_s20 + $0x370] sm:$0xff] }
 0x2c3   : > { %4366 = vmatmul.mubr.bf16.vlgmr.msra.gmra.mrb[8].mxu0 %v6736_v58  ;;  %4407 = vmatmul.mubr.bf16.vlgmr.msra.gmra.mrb[8].mxu1 %v6738_v59  ;;  %v2949_v60 = vld [vmem:[%s6332_s20 + $0x750] sm:$0xff] }
 0x2c4   : > { %4416 = vmatpush1.bf16.msra.mxu0 %v5017_v12  ;;  %4447 = vmatprep.mubr.bf16.mxu0 %v6732_v56  ;;  %v2913_v12 = vld [vmem:[%s6332_s20 + $0x630] sm:$0xff] }
 0x2c5   : > { %4457 = vmatpush1.bf16.msra.mxu1 %v5145_v13  ;;  %4488 = vmatprep.mubr.bf16.mxu1 %v6734_v57  ;;  %v5073_v13 = vcombine.low %v2773_v1, %v2777_v2  ;;  %v5210_v16 = vcombine.high %v2909_v11, %v2913_v12  ;;  %v2829_v2 = vld [vmem:[%s6332_s20 + $0x390] sm:$0xff] }
 0x2c6   : > { %4417 = vmatprep.subr.bf16.mxu0 %v5026_v14  ;;  %4458 = vmatprep.subr.bf16.mxu1 %v5154_v15  ;;  %v5201_v14 = vcombine.low %v2901_v3, %v2905_v4  ;;  %v5082_v15 = vcombine.high %v2781_v9, %v2785_v10  ;;  %v2833_v3 = vld [vmem:[%s6332_s20 + $0x3b0] sm:$0xff] }
 0x2c7   : > { %v2957_v4 = vld [vmem:[%s6332_s20 + $0x790] sm:$0xff] }
 0x2c8   : > { %4418 = vmatpush1.bf16.msra.mxu0 %v5025_v20  ;;  %v2921_v20 = vld [vmem:[%s6332_s20 + $0x670] sm:$0xff] }
 0x2c9   : > { %4459 = vmatpush1.bf16.msra.mxu1 %v5153_v21  ;;  %4419 = vmatprep.subr.bf16.mxu0 %v5034_v22  ;;  %v5081_v21 = vcombine.low %v2781_v9, %v2785_v10  ;;  %v5209_v22 = vcombine.low %v2909_v11, %v2913_v12  ;;  %v5218_v24 = vcombine.high %v2917_v19, %v2921_v20  ;;  %v2837_v10 = vld [vmem:[%s6332_s20 + $0x3d0] sm:$0xff] }
 0x2ca   : > { %4460 = vmatprep.subr.bf16.mxu1 %v5162_v23  ;;  %v5090_v23 = vcombine.high %v2789_v17, %v2793_v18  ;;  %v2841_v11 = vld [vmem:[%s6332_s20 + $0x3f0] sm:$0xff] }
 0x2cb   : > { %v2965_v12 = vld [vmem:[%s6332_s20 + $0x7d0] sm:$0xff] }
 0x2cc   : > { %4420 = vmatpush1.bf16.msra.mxu0 %v5033_v33  ;;  %v2929_v33 = vld [vmem:[%s6332_s20 + $0x6b0] sm:$0xff] }
 0x2cd   : > { %4461 = vmatpush1.bf16.msra.mxu1 %v5161_v34  ;;  %4421 = vmatprep.subr.bf16.mxu0 %v5042_v35  ;;  %v5089_v34 = vcombine.low %v2789_v17, %v2793_v18  ;;  %v5217_v35 = vcombine.low %v2917_v19, %v2921_v20  ;;  %v5226_v37 = vcombine.high %v2925_v32, %v2929_v33  ;;  %v2718_v18 = vld [vmem:[%s6332_s20 + $0x18] sm:$0xff] }
 0x2ce   : > { %4462 = vmatprep.subr.bf16.mxu1 %v5170_v36  ;;  %v5098_v36 = vcombine.high %v2797_v25, %v2801_v29  ;;  %v2722_v19 = vld [vmem:[%s6332_s20 + $0x38] sm:$0xff] }
 0x2cf   : > { %v2846_v20 = vld [vmem:[%s6332_s20 + $0x418] sm:$0xff] }
 0x2d0   : > { %4422 = vmatpush1.bf16.msra.mxu0 %v5041_v41  ;;  %v2937_v41 = vld [vmem:[%s6332_s20 + $0x6f0] sm:$0xff] }
 0x2d1   : > { %4463 = vmatpush1.bf16.msra.mxu1 %v5169_v42  ;;  %4423 = vmatprep.subr.bf16.mxu0 %v5050_v43  ;;  %v5097_v42 = vcombine.low %v2797_v25, %v2801_v29  ;;  %v5225_v43 = vcombine.low %v2925_v32, %v2929_v33  ;;  %v5234_v45 = vcombine.high %v2933_v40, %v2937_v41  ;;  %v2726_v29 = vld [vmem:[%s6332_s20 + $0x58] sm:$0xff] }
 0x2d2   : > { %4464 = vmatprep.subr.bf16.mxu1 %v5178_v44  ;;  %v5106_v44 = vcombine.high %v2805_v38, %v2809_v39  ;;  %v2730_v32 = vld [vmem:[%s6332_s20 + $0x78] sm:$0xff]  ;;  %v5019_v33 = vcombine.low %v2718_v18, %v2722_v19 }
 0x2d4   : > { %4424 = vmatpush1.bf16.msra.mxu0 %v5049_v49  ;;  %v2945_v49 = vld [vmem:[%s6332_s20 + $0x730] sm:$0xff] }
 0x2d5   : > { %4465 = vmatpush1.bf16.msra.mxu1 %v5177_v50  ;;  %4425 = vmatprep.subr.bf16.mxu0 %v5058_v51  ;;  %v5105_v50 = vcombine.low %v2805_v38, %v2809_v39  ;;  %v5233_v51 = vcombine.low %v2933_v40, %v2937_v41  ;;  %v5242_v53 = vcombine.high %v2941_v48, %v2945_v49  ;;  %v2734_v38 = vld [vmem:[%s6332_s20 + $0x98] sm:$0xff] }
 0x2d6   : > { %4466 = vmatprep.subr.bf16.mxu1 %v5186_v52  ;;  %v5114_v52 = vcombine.high %v2813_v46, %v2817_v47  ;;  %v2738_v39 = vld [vmem:[%s6332_s20 + $0xb8] sm:$0xff] }
 0x2d7   : > { %v2862_v41 = vld [vmem:[%s6332_s20 + $0x498] sm:$0xff] }
 0x2d8   : > { %4426 = vmatpush1.bf16.msra.mxu0 %v5057_v61  ;;  %v2953_v61 = vld [vmem:[%s6332_s20 + $0x770] sm:$0xff] }
 0x2d9   : > { %4467 = vmatpush1.bf16.msra.mxu1 %v5185_v62  ;;  %4427 = vmatprep.subr.bf16.mxu0 %v5066_v63  ;;  %v5113_v62 = vcombine.low %v2813_v46, %v2817_v47  ;;  %v5241_v63 = vcombine.low %v2941_v48, %v2945_v49  ;;  %v5250_v1 = vcombine.high %v2949_v60, %v2953_v61  ;;  %v2742_v47 = vld [vmem:[%s6332_s20 + $0xd8] sm:$0xff] }
 0x2da   : > { %4468 = vmatprep.subr.bf16.mxu1 %v5194_v0  ;;  %v5122_v0 = vcombine.high %v2821_v54, %v2825_v55  ;;  %v2746_v48 = vld [vmem:[%s6332_s20 + $0xf8] sm:$0xff] }
 0x2db   : > { %v2870_v49 = vld [vmem:[%s6332_s20 + $0x4d8] sm:$0xff] }
 0x2dc   : > { %4428 = vmatpush1.bf16.msra.mxu0 %v5065_v5  ;;  %v2961_v5 = vld [vmem:[%s6332_s20 + $0x7b0] sm:$0xff] }
 0x2dd   : > { %4469 = vmatpush1.bf16.msra.mxu1 %v5193_v6  ;;  %4429 = vmatprep.subr.bf16.mxu0 %v5074_v7  ;;  %v5121_v6 = vcombine.low %v2821_v54, %v2825_v55  ;;  %v5249_v7 = vcombine.low %v2949_v60, %v2953_v61  ;;  %v5258_v9 = vcombine.high %v2957_v4, %v2961_v5  ;;  %v2754_v54 = vld [vmem:[%s6332_s20 + $0x138] sm:$0xff] }
 0x2de   : > { %4470 = vmatprep.subr.bf16.mxu1 %v5202_v8  ;;  %v5130_v8 = vcombine.high %v2829_v2, %v2833_v3  ;;  %v2878_v55 = vld [vmem:[%s6332_s20 + $0x518] sm:$0xff]  ;;  %v5043_v61 = vcombine.low %v2742_v47, %v2746_v48 }
 0x2df   : > { %v2882_v60 = vld [vmem:[%s6332_s20 + $0x538] sm:$0xff] }
 0x2e0   : > { %4430 = vmatpush1.bf16.msra.mxu0 %v5073_v13  ;;  %v2969_v13 = vld [vmem:[%s6332_s20 + $0x7f0] sm:$0xff] }
 0x2e1   : > { %4471 = vmatpush1.bf16.msra.mxu1 %v5201_v14  ;;  %4431 = vmatprep.subr.bf16.mxu0 %v5082_v15  ;;  %v5129_v14 = vcombine.low %v2829_v2, %v2833_v3  ;;  %v5257_v15 = vcombine.low %v2957_v4, %v2961_v5  ;;  %v5266_v17 = vcombine.high %v2965_v12, %v2969_v13  ;;  %v2762_v2 = vld [vmem:[%s6332_s20 + $0x178] sm:$0xff] }
 0x2e2   : > { %4472 = vmatprep.subr.bf16.mxu1 %v5210_v16  ;;  %v5138_v16 = vcombine.high %v2837_v10, %v2841_v11  ;;  %v2886_v3 = vld [vmem:[%s6332_s20 + $0x558] sm:$0xff] }
 0x2e3   : > { %v2890_v4 = vld [vmem:[%s6332_s20 + $0x578] sm:$0xff] }
 0x2e4   : > { %4432 = vmatpush1.bf16.msra.mxu0 %v5081_v21  ;;  %v2850_v21 = vld [vmem:[%s6332_s20 + $0x438] sm:$0xff] }
 0x2e5   : > { %4473 = vmatpush1.bf16.msra.mxu1 %v5209_v22  ;;  %4433 = vmatprep.subr.bf16.mxu0 %v5090_v23  ;;  %v5137_v22 = vcombine.low %v2837_v10, %v2841_v11  ;;  %v5265_v23 = vcombine.low %v2965_v12, %v2969_v13  ;;  %v5148_v25 = vcombine.high %v2846_v20, %v2850_v21  ;;  %v2770_v10 = vld [vmem:[%s6332_s20 + $0x1b8] sm:$0xff] }
 0x2e6   : > { %4474 = vmatprep.subr.bf16.mxu1 %v5218_v24  ;;  %v5020_v24 = vcombine.high %v2718_v18, %v2722_v19  ;;  %v2894_v11 = vld [vmem:[%s6332_s20 + $0x598] sm:$0xff] }
 0x2e7   : > { %v2898_v12 = vld [vmem:[%s6332_s20 + $0x5b8] sm:$0xff] }
 0x2e8   : > { %4434 = vmatpush1.bf16.msra.mxu0 %v5089_v34  ;;  %v2854_v34 = vld [vmem:[%s6332_s20 + $0x458] sm:$0xff] }
 0x2e9   : > { %4475 = vmatpush1.bf16.msra.mxu1 %v5217_v35  ;;  %4435 = vmatprep.subr.bf16.mxu0 %v5098_v36  ;;  %v2858_v35 = vld [vmem:[%s6332_s20 + $0x478] sm:$0xff]  ;;  %v5147_v36 = vcombine.low %v2846_v20, %v2850_v21 }
 0x2ea   : > { %4476 = vmatprep.subr.bf16.mxu1 %v5226_v37  ;;  %v5028_v37 = vcombine.high %v2726_v29, %v2730_v32  ;;  %v5156_v40 = vcombine.high %v2854_v34, %v2858_v35  ;;  %v2778_v18 = vld [vmem:[%s6332_s20 + $0x1f8] sm:$0xff] }
 0x2eb   : > { %v2902_v19 = vld [vmem:[%s6332_s20 + $0x5d8] sm:$0xff] }
 0x2ec   : > { %4436 = vmatpush1.bf16.msra.mxu0 %v5097_v42  ;;  %v2866_v42 = vld [vmem:[%s6332_s20 + $0x4b8] sm:$0xff] }
 0x2ed   : > { %4477 = vmatpush1.bf16.msra.mxu1 %v5225_v43  ;;  %4437 = vmatprep.subr.bf16.mxu0 %v5106_v44  ;;  %v5027_v43 = vcombine.low %v2726_v29, %v2730_v32  ;;  %v5155_v44 = vcombine.low %v2854_v34, %v2858_v35  ;;  %v5164_v46 = vcombine.high %v2862_v41, %v2866_v42  ;;  %v2906_v20 = vld [vmem:[%s6332_s20 + $0x5f8] sm:$0xff] }
 0x2ee   : > { %4478 = vmatprep.subr.bf16.mxu1 %v5234_v45  ;;  %v5036_v45 = vcombine.high %v2734_v38, %v2738_v39  ;;  %v2786_v29 = vld [vmem:[%s6332_s20 + $0x238] sm:$0xff]  ;;  %v5203_v35 = vcombine.low %v2902_v19, %v2906_v20 }
 0x2ef   : > { %v2910_v32 = vld [vmem:[%s6332_s20 + $0x618] sm:$0xff] }
 0x2f0   : > { %4438 = vmatpush1.bf16.msra.mxu0 %v5105_v50  ;;  %v2874_v50 = vld [vmem:[%s6332_s20 + $0x4f8] sm:$0xff] }
 0x2f1   : > { %4479 = vmatpush1.bf16.msra.mxu1 %v5233_v51  ;;  %4439 = vmatprep.subr.bf16.mxu0 %v5114_v52  ;;  %v5035_v51 = vcombine.low %v2734_v38, %v2738_v39  ;;  %v5044_v52 = vcombine.high %v2742_v47, %v2746_v48  ;;  %v2790_v38 = vld [vmem:[%s6332_s20 + $0x258] sm:$0xff] }
 0x2f2   : > { %4480 = vmatprep.subr.bf16.mxu1 %v5242_v53  ;;  %v2750_v53 = vld [vmem:[%s6332_s20 + $0x118] sm:$0xff] }
 0x2f3   : > { %v5051_v5 = vcombine.low %v2750_v53, %v2754_v54  ;;  %v2794_v39 = vld [vmem:[%s6332_s20 + $0x278] sm:$0xff] }
 0x2f4   : > { %4440 = vmatpush1.bf16.msra.mxu0 %v5113_v62  ;;  %v5171_v62 = vcombine.low %v2870_v49, %v2874_v50  ;;  %v2802_v47 = vld [vmem:[%s6332_s20 + $0x2b8] sm:$0xff] }
 0x2f5   : > { %4481 = vmatpush1.bf16.msra.mxu1 %v5241_v63  ;;  %4441 = vmatprep.subr.bf16.mxu0 %v5122_v0  ;;  %v5052_v63 = vcombine.high %v2750_v53, %v2754_v54  ;;  %v5180_v0 = vcombine.high %v2878_v55, %v2882_v60  ;;  %v2926_v48 = vld [vmem:[%s6332_s20 + $0x698] sm:$0xff] }
 0x2f6   : > { %4482 = vmatprep.subr.bf16.mxu1 %v5250_v1  ;;  %v2758_v1 = vld [vmem:[%s6332_s20 + $0x158] sm:$0xff] }
 0x2f7   : > { %v5059_v13 = vcombine.low %v2758_v1, %v2762_v2  ;;  %v2810_v53 = vld [vmem:[%s6332_s20 + $0x2f8] sm:$0xff] }
 0x2f8   : > { %4442 = vmatpush1.bf16.msra.mxu0 %v5121_v6  ;;  %v5179_v6 = vcombine.low %v2878_v55, %v2882_v60  ;;  %v2934_v54 = vld [vmem:[%s6332_s20 + $0x6d8] sm:$0xff] }
 0x2f9   : > { %4483 = vmatpush1.bf16.msra.mxu1 %v5249_v7  ;;  %4443 = vmatprep.subr.bf16.mxu0 %v5130_v8  ;;  %v5060_v7 = vcombine.high %v2758_v1, %v2762_v2  ;;  %v5188_v8 = vcombine.high %v2886_v3, %v2890_v4  ;;  %v2938_v55 = vld [vmem:[%s6332_s20 + $0x6f8] sm:$0xff] }
 0x2fa   : > { %4484 = vmatprep.subr.bf16.mxu1 %v5258_v9  ;;  %v2766_v9 = vld [vmem:[%s6332_s20 + $0x198] sm:$0xff] }
 0x2fb   : > { %v5067_v21 = vcombine.low %v2766_v9, %v2770_v10  ;;  %v2818_v1 = vld [vmem:[%s6332_s20 + $0x338] sm:$0xff] }
 0x2fc   : > { %4444 = vmatpush1.bf16.msra.mxu0 %v5129_v14  ;;  %v5187_v14 = vcombine.low %v2886_v3, %v2890_v4  ;;  %v2942_v2 = vld [vmem:[%s6332_s20 + $0x718] sm:$0xff] }
 0x2fd   : > { %4485 = vmatpush1.bf16.msra.mxu1 %v5257_v15  ;;  %4445 = vmatprep.subr.bf16.mxu0 %v5138_v16  ;;  %v5068_v15 = vcombine.high %v2766_v9, %v2770_v10  ;;  %v5196_v16 = vcombine.high %v2894_v11, %v2898_v12  ;;  %v2946_v3 = vld [vmem:[%s6332_s20 + $0x738] sm:$0xff] }
 0x2fe   : > { %4486 = vmatprep.subr.bf16.mxu1 %v5266_v17  ;;  %v2774_v17 = vld [vmem:[%s6332_s20 + $0x1d8] sm:$0xff] }
 0x2ff   : > { %v5075_v34 = vcombine.low %v2774_v17, %v2778_v18  ;;  %v2826_v9 = vld [vmem:[%s6332_s20 + $0x378] sm:$0xff] }
 0x300   : > { %4446 = vmatpush1.bf16.msra.mxu0 %v5137_v22  ;;  %v5195_v22 = vcombine.low %v2894_v11, %v2898_v12  ;;  %v2950_v10 = vld [vmem:[%s6332_s20 + $0x758] sm:$0xff] }
 0x301   : > { %4487 = vmatpush1.bf16.msra.mxu1 %v5265_v23  ;;  %4497 = vmatprep.subr.bf16.mxu0 %v5020_v24  ;;  %v5076_v23 = vcombine.high %v2774_v17, %v2778_v18  ;;  %v5204_v24 = vcombine.high %v2902_v19, %v2906_v20  ;;  %v2954_v11 = vld [vmem:[%s6332_s20 + $0x778] sm:$0xff] }
 0x302   : > { %4538 = vmatprep.subr.bf16.mxu1 %v5148_v25  ;;  %v2782_v25 = vld [vmem:[%s6332_s20 + $0x218] sm:$0xff] }
 0x303   : > { %4448 = vmatmul.mubr.bf16.vlgmr.msra.gmra.mrb[12].mxu0 %v6736_v58  ;;  %v2834_v17 = vld [vmem:[%s6332_s20 + $0x3b8] sm:$0xff] }
 0x304   : > { %4489 = vmatmul.mubr.bf16.vlgmr.msra.gmra.mrb[12].mxu1 %v6738_v59  ;;  %4498 = vmatpush1.bf16.msra.mxu0 %v5019_v33  ;;  %v2914_v33 = vld [vmem:[%s6332_s20 + $0x638] sm:$0xff] }
 0x305   : > { %4529 = vmatprep.mubr.bf16.mxu0 %v6732_v56  ;;  %4539 = vmatpush1.bf16.msra.mxu1 %v5147_v36  ;;  %v5163_v56 = vcombine.low %v2862_v41, %v2866_v42  ;;  %v5084_v36 = vcombine.high %v2782_v25, %v2786_v29  ;;  %v2922_v41 = vld [vmem:[%s6332_s20 + $0x678] sm:$0xff]  ;;  %v5083_v42 = vcombine.low %v2782_v25, %v2786_v29 }
 0x306   : > { %4570 = vmatprep.mubr.bf16.mxu1 %v6734_v57  ;;  %4499 = vmatprep.subr.bf16.mxu0 %v5028_v37  ;;  %v5172_v57 = vcombine.high %v2870_v49, %v2874_v50  ;;  %v5212_v37 = vcombine.high %v2910_v32, %v2914_v33  ;;  %v2930_v49 = vld [vmem:[%s6332_s20 + $0x6b8] sm:$0xff]  ;;  %v5091_v50 = vcombine.low %v2790_v38, %v2794_v39 }
 0x307   : > { %4540 = vmatprep.subr.bf16.mxu1 %v5156_v40  ;;  %v2918_v40 = vld [vmem:[%s6332_s20 + $0x658] sm:$0xff] }
 0x308   : > { %4500 = vmatpush1.bf16.msra.mxu0 %v5027_v43  ;;  %v5211_v43 = vcombine.low %v2910_v32, %v2914_v33  ;;  %v2958_v18 = vld [vmem:[%s6332_s20 + $0x798] sm:$0xff] }
 0x309   : > { %4541 = vmatpush1.bf16.msra.mxu1 %v5155_v44  ;;  %4501 = vmatprep.subr.bf16.mxu0 %v5036_v45  ;;  %v5092_v44 = vcombine.high %v2790_v38, %v2794_v39  ;;  %v5220_v45 = vcombine.high %v2918_v40, %v2922_v41  ;;  %v2962_v19 = vld [vmem:[%s6332_s20 + $0x7b8] sm:$0xff] }
 0x30a   : > { %4542 = vmatprep.subr.bf16.mxu1 %v5164_v46  ;;  %v2798_v46 = vld [vmem:[%s6332_s20 + $0x298] sm:$0xff] }
 0x30b   : > { %v5099_v60 = vcombine.low %v2798_v46, %v2802_v47  ;;  %v2842_v25 = vld [vmem:[%s6332_s20 + $0x3f8] sm:$0xff] }
 0x30c   : > { %4502 = vmatpush1.bf16.msra.mxu0 %v5035_v51  ;;  %v5219_v51 = vcombine.low %v2918_v40, %v2922_v41  ;;  %v2966_v29 = vld [vmem:[%s6332_s20 + $0x7d8] sm:$0xff]  ;;  %v2703_v40 = vld [vmem:[%s7091_s5] sm:$0xff] }
 0x30d   : > { %4543 = vmatpush1.bf16.msra.mxu1 %v5163_v56  ;;  %4503 = vmatprep.subr.bf16.mxu0 %v5044_v52  ;;  %v5100_v56 = vcombine.high %v2798_v46, %v2802_v47  ;;  %v5228_v52 = vcombine.high %v2926_v48, %v2930_v49  ;;  %v2970_v32 = vld [vmem:[%s6332_s20 + $0x7f8] sm:$0xff] }
 0x30e   : > { %4544 = vmatprep.subr.bf16.mxu1 %v5172_v57  ;;  %v2806_v57 = vld [vmem:[%s6332_s20 + $0x2d8] sm:$0xff]  ;;  %v5267_v38 = vcombine.low %v2966_v29, %v2970_v32 }
 0x30f   : > { %v5107_v4 = vcombine.low %v2806_v57, %v2810_v53 }
 0x310   : > { %4504 = vmatpush1.bf16.msra.mxu0 %v5043_v61  ;;  %v5227_v61 = vcombine.low %v2926_v48, %v2930_v49 }
 0x311   : > { %4545 = vmatpush1.bf16.msra.mxu1 %v5171_v62  ;;  %4505 = vmatprep.subr.bf16.mxu0 %v5052_v63  ;;  %v5108_v62 = vcombine.high %v2806_v57, %v2810_v53  ;;  %v5236_v63 = vcombine.high %v2934_v54, %v2938_v55 }
 0x312   : > { %4546 = vmatprep.subr.bf16.mxu1 %v5180_v0  ;;  %v2814_v0 = vld [vmem:[%s6332_s20 + $0x318] sm:$0xff] }
 0x313   : > { %v5115_v12 = vcombine.low %v2814_v0, %v2818_v1 }
 0x314   : > { %4506 = vmatpush1.bf16.msra.mxu0 %v5051_v5  ;;  %v5235_v5 = vcombine.low %v2934_v54, %v2938_v55  ;;  %v2706_v54 = vld [vmem:[%s7091_s5 + $0x18] sm:$0xff] }
 0x315   : > { %4547 = vmatpush1.bf16.msra.mxu1 %v5179_v6  ;;  %4507 = vmatprep.subr.bf16.mxu0 %v5060_v7  ;;  %v5116_v6 = vcombine.high %v2814_v0, %v2818_v1  ;;  %v5244_v7 = vcombine.high %v2942_v2, %v2946_v3 }
 0x316   : > { %4548 = vmatprep.subr.bf16.mxu1 %v5188_v8  ;;  %v2822_v8 = vld [vmem:[%s6332_s20 + $0x358] sm:$0xff] }
 0x317   : > { %v5123_v20 = vcombine.low %v2822_v8, %v2826_v9 }
 0x318   : > { %4508 = vmatpush1.bf16.msra.mxu0 %v5059_v13  ;;  %v5243_v13 = vcombine.low %v2942_v2, %v2946_v3 }
 0x319   : > { %4549 = vmatpush1.bf16.msra.mxu1 %v5187_v14  ;;  %4509 = vmatprep.subr.bf16.mxu0 %v5068_v15  ;;  %v5124_v14 = vcombine.high %v2822_v8, %v2826_v9  ;;  %v5252_v15 = vcombine.high %v2950_v10, %v2954_v11  ;;  %v2708_v8 = vld [vmem:[%s7091_s5 + $0x28] sm:$0xff] }
 0x31a   : > { %4550 = vmatprep.subr.bf16.mxu1 %v5196_v16  ;;  %v2830_v16 = vld [vmem:[%s6332_s20 + $0x398] sm:$0xff] }
 0x31b   : > { %v5131_v33 = vcombine.low %v2830_v16, %v2834_v17 }
 0x31c   : > { %4510 = vmatpush1.bf16.msra.mxu0 %v5067_v21  ;;  %v5251_v21 = vcombine.low %v2950_v10, %v2954_v11 }
 0x31d   : > { %4551 = vmatpush1.bf16.msra.mxu1 %v5195_v22  ;;  %4511 = vmatprep.subr.bf16.mxu0 %v5076_v23  ;;  %v5132_v22 = vcombine.high %v2830_v16, %v2834_v17  ;;  %v5260_v23 = vcombine.high %v2958_v18, %v2962_v19 }
 0x31e   : > { %4552 = vmatprep.subr.bf16.mxu1 %v5204_v24  ;;  %v2838_v24 = vld [vmem:[%s6332_s20 + $0x3d8] sm:$0xff] }
 0x320   : > { %4512 = vmatpush1.bf16.msra.mxu0 %v5075_v34  ;;  %v5259_v34 = vcombine.low %v2958_v18, %v2962_v19  ;;  %v2709_v18 = vld [vmem:[%s7091_s5 + $0x30] sm:$0xff] }
 0x321   : > { %4553 = vmatpush1.bf16.msra.mxu1 %v5203_v35  ;;  %4513 = vmatprep.subr.bf16.mxu0 %v5084_v36  ;;  %v5140_v35 = vcombine.high %v2838_v24, %v2842_v25  ;;  %v5268_v36 = vcombine.high %v2966_v29, %v2970_v32 }
 0x322   : > { %4554 = vmatprep.subr.bf16.mxu1 %v5212_v37  ;;  %v5139_v37 = vcombine.low %v2838_v24, %v2842_v25 }
 0x324   : > { %4514 = vmatpush1.bf16.msra.mxu0 %v5083_v42 }
 0x325   : > { %4555 = vmatpush1.bf16.msra.mxu1 %v5211_v43  ;;  %4515 = vmatprep.subr.bf16.mxu0 %v5092_v44  ;;  %v2704_v44 = vld [vmem:[%s7091_s5 + $0x8] sm:$0xff] }
 0x326   : > { %4556 = vmatprep.subr.bf16.mxu1 %v5220_v45 }
 0x328   : > { %4516 = vmatpush1.bf16.msra.mxu0 %v5091_v50 }
 0x329   : > { %4557 = vmatpush1.bf16.msra.mxu1 %v5219_v51  ;;  %4517 = vmatprep.subr.bf16.mxu0 %v5100_v56  ;;  %v2705_v56 = vld [vmem:[%s7091_s5 + $0x10] sm:$0xff] }
 0x32a   : > { %4558 = vmatprep.subr.bf16.mxu1 %v5228_v52 }
 0x32c   : > { %4518 = vmatpush1.bf16.msra.mxu0 %v5099_v60 }
 0x32d   : > { %4559 = vmatpush1.bf16.msra.mxu1 %v5227_v61  ;;  %4519 = vmatprep.subr.bf16.mxu0 %v5108_v62 }
 0x32e   : > { %4560 = vmatprep.subr.bf16.mxu1 %v5236_v63 }
 0x330   : > { %4520 = vmatpush1.bf16.msra.mxu0 %v5107_v4  ;;  %v2707_v4 = vld [vmem:[%s7091_s5 + $0x20] sm:$0xff] }
 0x331   : > { %4561 = vmatpush1.bf16.msra.mxu1 %v5235_v5  ;;  %4521 = vmatprep.subr.bf16.mxu0 %v5116_v6 }
 0x332   : > { %4562 = vmatprep.subr.bf16.mxu1 %v5244_v7 }
 0x334   : > { %4522 = vmatpush1.bf16.msra.mxu0 %v5115_v12 }
 0x335   : > { %4563 = vmatpush1.bf16.msra.mxu1 %v5243_v13  ;;  %4523 = vmatprep.subr.bf16.mxu0 %v5124_v14 }
 0x336   : > { %4564 = vmatprep.subr.bf16.mxu1 %v5252_v15 }
 0x338   : > { %4524 = vmatpush1.bf16.msra.mxu0 %v5123_v20 }
 0x339   : > { %4565 = vmatpush1.bf16.msra.mxu1 %v5251_v21  ;;  %4525 = vmatprep.subr.bf16.mxu0 %v5132_v22  ;;  %v2710_v22 = vld [vmem:[%s7091_s5 + $0x38] sm:$0xff] }
 0x33a   : > { %4566 = vmatprep.subr.bf16.mxu1 %v5260_v23 }
 0x33c   : > { %4526 = vmatpush1.bf16.msra.mxu0 %v5131_v33 }
 0x33d   : > { %4567 = vmatpush1.bf16.msra.mxu1 %v5259_v34  ;;  %4527 = vmatprep.subr.bf16.mxu0 %v5140_v35 }
 0x33e   : > { %4568 = vmatprep.subr.bf16.mxu1 %v5268_v36 }
 0x340   : > { %4528 = vmatpush1.bf16.msra.mxu0 %v5139_v37  ;;  %v4607_v37 = vld [vmem:[%s7090_s4] sm:$0xff] (!%p5269_p11) }
 0x341   : > { %4569 = vmatpush1.bf16.msra.mxu1 %v5267_v38  ;;  %v4657_v38 = vld [vmem:[%s7086_s0] sm:$0xff] (!%p5269_p11) }
 0x343   : > { %4530 = vmatmul.mubr.bf16.vlgmr.msra.gmra.mrb[16].mxu0 %v6736_v58 }
 0x344   : > { %4571 = vmatmul.mubr.bf16.vlgmr.msra.gmra.mrb[16].mxu1 %v6738_v59 }
 0x356   : > { %v4285_v39 = vpop.f32.mrb[4].mxu0  ;;  %v4326_v41 = vpop.f32.mrb[4].mxu1 }
 0x357   : > { %v4327_v42 = vadd.f32 %v4326_v41, %v4285_v39  ;;  %v4287_v43 = vpop.f32.mrb[5].mxu0  ;;  %v4328_v45 = vpop.f32.mrb[5].mxu1  ;;  %v4627_v39 = vsub.s32 (!%p5269_p11), 4, %v6709_v26  ;;  %v4635_v41 = vsub.s32 (!%p5269_p11), 6, %v6709_v26 }
 0x358   : > { %v4329_v46 = vadd.f32 %v4328_v45, %v4287_v43  ;;  %v4289_v47 = vpop.f32.mrb[6].mxu0  ;;  %v4330_v48 = vpop.f32.mrb[6].mxu1  ;;  %v4658_v45 = vld [vmem:[%s7086_s0 + $0x8] sm:$0xff] (!%p5269_p11) }
 0x359   : > { %v4579_v49 = vadd.f32 %v4327_v42, %v2703_v40  ;;  %v4290_v58 = vpop.f32.mrb[7].mxu0  ;;  %v4331_v50 = vpop.f32.mrb[7].mxu1  ;;  %v4631_v40 = vsub.s32 (!%p5269_p11), 5, %v6709_v26  ;;  %v4612_v42 = vrot.slane (!%p5269_p11), %v4607_v37, %v1073_v27  ;;  %v4620_v47 = vrot.slane (!%p5269_p11), %v4607_v37, %v1081_v28  ;;  %v4659_v48 = vld [vmem:[%s7086_s0 + $0x10] sm:$0xff] (!%p5269_p11) }
 0x35a   : > { %v4580_v59 = vadd.f32 %v4329_v46, %v2704_v44  ;;  %v4616_v44 = vrot.slane (!%p5269_p11), %v4607_v37, %v1077_v30  ;;  %v4624_v27 = vrot.slane (!%p5269_p11), %v4607_v37, %v1085_v31  ;;  %v4628_v58 = vrot.slane (!%p5269_p11), %v4607_v37, %v4627_v39 }
 0x35b   : > { %4587 = vst [vmem:[%s7091_s5] sm:$0xff] %v4579_v49  ;;  %v4660_v49 = vld [vmem:[%s7086_s0 + $0x18] sm:$0xff] (!%p5269_p11)  ;;  %v4632_v50 = vrot.slane (!%p5269_p11), %v4607_v37, %v4631_v40  ;;  %v4639_v28 = vsub.s32 (!%p5269_p11), 7, %v6709_v26  ;;  %v4662_v26 = vld [vmem:[%s7086_s0 + $0x28] sm:$0xff] (!%p5269_p11) }
 0x35c   : > { %4588 = vst [vmem:[%s7091_s5 + $0x8] sm:$0xff] %v4580_v59  ;;  %v4636_v59 = vrot.slane (!%p5269_p11), %v4607_v37, %v4635_v41 }
 0x362   : > { %v4599_v36 = vld [vmem:[%s7091_s5] sm:$0xff] (!%p5269_p11) }
 0x363   : > { %v4600_v43 = vld [vmem:[%s7091_s5 + $0x8] sm:$0xff] (!%p5269_p11) }
 0x396   : > { %v4367_v51 = vpop.f32.mrb[8].mxu0  ;;  %v4408_v52 = vpop.f32.mrb[8].mxu1 }
 0x397   : > { %v4409_v57 = vadd.f32 %v4408_v52, %v4367_v51  ;;  %v4369_v53 = vpop.f32.mrb[9].mxu0  ;;  %v4410_v55 = vpop.f32.mrb[9].mxu1  ;;  %v4649_v51 = vadd.f32 (!%p5269_p11), %v4612_v42, %v4599_v36 }
 0x398   : > { %v4411_v60 = vadd.f32 %v4410_v55, %v4369_v53  ;;  %v4371_v61 = vpop.f32.mrb[10].mxu0  ;;  %v4412_v62 = vpop.f32.mrb[10].mxu1  ;;  %v4661_v53 = vld [vmem:[%s7086_s0 + $0x20] sm:$0xff] (!%p5269_p11) }
 0x399   : > { %v4581_v63 = vadd.f32 %v4409_v57, %v2705_v56  ;;  %v4372_v0 = vpop.f32.mrb[11].mxu0  ;;  %v4413_v1 = vpop.f32.mrb[11].mxu1  ;;  %v4650_v56 = vadd.f32 (!%p5269_p11), %v4616_v44, %v4600_v43  ;;  %v4640_v62 = vrot.slane (!%p5269_p11), %v4607_v37, %v4639_v28 }
 0x39a   : > { %v4582_v2 = vadd.f32 %v4411_v60, %v2706_v54 }
 0x39b   : > { %4589 = vst [vmem:[%s7091_s5 + $0x10] sm:$0xff] %v4581_v63  ;;  %v4665_v63 = vadd.f32 (!%p5269_p11), %v4657_v38, %v4649_v51  ;;  %v4666_v0 = vadd.f32 (!%p5269_p11), %v4658_v45, %v4650_v56 }
 0x39c   : > { %4590 = vst [vmem:[%s7091_s5 + $0x18] sm:$0xff] %v4582_v2 }
 0x3a2   : > { %v4601_v46 = vld [vmem:[%s7091_s5 + $0x10] sm:$0xff] (!%p5269_p11) }
 0x3a3   : > { %v4602_v30 = vld [vmem:[%s7091_s5 + $0x18] sm:$0xff] (!%p5269_p11)  ;;  %v4651_v31 = vadd.f32 (!%p5269_p11), %v4620_v47, %v4601_v46 }
 0x3a4   : > { %v4652_v52 = vadd.f32 (!%p5269_p11), %v4624_v27, %v4602_v30 }
 0x3a5   : > { %v4667_v1 = vadd.f32 (!%p5269_p11), %v4659_v48, %v4651_v31 }
 0x3a6   : > { %v4668_v2 = vadd.f32 (!%p5269_p11), %v4660_v49, %v4652_v52 }
 0x3d6   : > { %v4449_v3 = vpop.f32.mrb[12].mxu0 }
 0x3d7   : > { %v4490_v5 = vpop.f32.mrb[12].mxu1  ;;  %v4451_v6 = vpop.f32.mrb[13].mxu0 }
 0x3d8   : > { %v4491_v7 = vadd.f32 %v4490_v5, %v4449_v3  ;;  %v4492_v9 = vpop.f32.mrb[13].mxu1  ;;  %v4453_v10 = vpop.f32.mrb[14].mxu0  ;;  %v4663_v3 = vld [vmem:[%s7086_s0 + $0x30] sm:$0xff] (!%p5269_p11)  ;;  %v4664_v5 = vld [vmem:[%s7086_s0 + $0x38] sm:$0xff] (!%p5269_p11) }
 0x3d9   : > { %v4493_v11 = vadd.f32 %v4492_v9, %v4451_v6  ;;  %v4494_v12 = vpop.f32.mrb[14].mxu1  ;;  %v4454_v13 = vpop.f32.mrb[15].mxu0  ;;  %v4673_v10 = vmax.f32 (!%p5269_p11), %v4665_v63, 0.0 }
 0x3da   : > { %v4583_v14 = vadd.f32 %v4491_v7, %v2707_v4  ;;  %v4495_v15 = vpop.f32.mrb[15].mxu1  ;;  %v4675_v12 = vmax.f32 (!%p5269_p11), %v4667_v1, 0.0  ;;  %v4676_v13 = vmax.f32 (!%p5269_p11), %v4668_v2, 0.0 }
 0x3db   : > { %v4584_v16 = vadd.f32 %v4493_v11, %v2708_v8  ;;  %v4674_v11 = vmax.f32 (!%p5269_p11), %v4666_v0, 0.0  ;;  %4681 = vst [vmem:[%s7091_s5] sm:$0xff] (!%p5269_p11), %v4673_v10 }
 0x3dc   : > { %4591 = vst [vmem:[%s7091_s5 + $0x20] sm:$0xff] %v4583_v14  ;;  %4683 = vst [vmem:[%s7091_s5 + $0x10] sm:$0xff] (!%p5269_p11), %v4675_v12 }
 0x3dd   : > { %4592 = vst [vmem:[%s7091_s5 + $0x28] sm:$0xff] %v4584_v16  ;;  %4682 = vst [vmem:[%s7091_s5 + $0x8] sm:$0xff] (!%p5269_p11), %v4674_v11 }
 0x3de   : > { %4684 = vst [vmem:[%s7091_s5 + $0x18] sm:$0xff] (!%p5269_p11), %v4676_v13 }
 0x3e3   : > { %v4603_v57 = vld [vmem:[%s7091_s5 + $0x20] sm:$0xff] (!%p5269_p11) }
 0x3e4   : > { %v4604_v54 = vld [vmem:[%s7091_s5 + $0x28] sm:$0xff] (!%p5269_p11)  ;;  %v4653_v55 = vadd.f32 (!%p5269_p11), %v4628_v58, %v4603_v57 }
 0x3e5   : > { %v4654_v60 = vadd.f32 (!%p5269_p11), %v4632_v50, %v4604_v54 }
 0x3e6   : > { %v4669_v6 = vadd.f32 (!%p5269_p11), %v4661_v53, %v4653_v55 }
 0x3e7   : > { %v4670_v7 = vadd.f32 (!%p5269_p11), %v4662_v26, %v4654_v60 }
 0x3e8   : > { %v4677_v14 = vmax.f32 (!%p5269_p11), %v4669_v6, 0.0 }
 0x3e9   : > { %v4678_v15 = vmax.f32 (!%p5269_p11), %v4670_v7, 0.0 }
 0x3ea   : > { %4685 = vst [vmem:[%s7091_s5 + $0x20] sm:$0xff] (!%p5269_p11), %v4677_v14 }
 0x3eb   : > { %4686 = vst [vmem:[%s7091_s5 + $0x28] sm:$0xff] (!%p5269_p11), %v4678_v15 }
 0x416   : > { %v4531_v17 = vpop.f32.mrb[16].mxu0 }
 0x417   : > { %v4572_v19 = vpop.f32.mrb[16].mxu1  ;;  %v4533_v20 = vpop.f32.mrb[17].mxu0  ;;  %4598 = sbr.rel (%p5269_p11) target bundleno = 1068 (0x42c), region = 71 }
 0x418   : > { %v4573_v21 = vadd.f32 %v4572_v19, %v4531_v17  ;;  %v4574_v23 = vpop.f32.mrb[17].mxu1  ;;  %v4535_v24 = vpop.f32.mrb[18].mxu0 }
 0x419   : > { %v4575_v25 = vadd.f32 %v4574_v23, %v4533_v20  ;;  %v4576_v29 = vpop.f32.mrb[18].mxu1  ;;  %v4536_v32 = vpop.f32.mrb[19].mxu0 }
 0x41a   : > { %v4585_v33 = vadd.f32 %v4573_v21, %v2709_v18  ;;  %v4577_v34 = vpop.f32.mrb[19].mxu1 }
 0x41b   : > { %v4586_v35 = vadd.f32 %v4575_v25, %v2710_v22 }
 0x41c   : > { %4593 = vst [vmem:[%s7091_s5 + $0x30] sm:$0xff] %v4585_v33 }
 0x41d   : > { %4594 = vst [vmem:[%s7091_s5 + $0x38] sm:$0xff] %v4586_v35 }
 0x423   : > { %v4605_v61 = vld [vmem:[%s7091_s5 + $0x30] sm:$0xff] }
 0x424   : > { %v4606_v4 = vld [vmem:[%s7091_s5 + $0x38] sm:$0xff]  ;;  %v4655_v8 = vadd.f32 %v4636_v59, %v4605_v61 }
 0x425   : > { %v4656_v9 = vadd.f32 %v4640_v62, %v4606_v4 }
 0x426   : > { %v4671_v16 = vadd.f32 %v4663_v3, %v4655_v8 }
 0x427   : > { %v4672_v17 = vadd.f32 %v4664_v5, %v4656_v9 }
 0x428   : > { %v4679_v18 = vmax.f32 %v4671_v16, 0.0 }
 0x429   : > { %v4680_v19 = vmax.f32 %v4672_v17, 0.0 }
 0x42a   : > { %4687 = vst [vmem:[%s7091_s5 + $0x30] sm:$0xff] %v4679_v18 }
 0x42b   : > { %4688 = vst [vmem:[%s7091_s5 + $0x38] sm:$0xff] %v4680_v19 }
 0x42c PF: > { %p12_p12 = scmp.ge.s32.totalorder %s5785_s22, 6   ;;  %s7092_s18 = smov %s5729_s19 }
 0x42d   : > { %s7093_s19 = smov %s5794_s25  ;;  %s7094_s20 = smov %s5785_s22 }
 0x42e   :  { %14 = sbr.rel (!%p12_p12) target bundleno = 2 (0x2), region = 108 }

// kernel: de_net_forward.13
= control target key start
LH: loop header
LB: loop body
LE: loop exit
PB: predicated region body
PF: predicated region fallthrough
CT: control target
= control target key end

     0   :  { %s1221_s0 = inlined_call_operand.vmem [shape: f32[8,1024], index: 0, kind: input, shape index: {}]   ;;  %s1222_s1 = inlined_call_operand.vmem [shape: bf16[1024,45], index: 1, kind: input, shape index: {}]   ;;  %s1223_s2 = inlined_call_operand.vmem [shape: f32[1,45], index: 2, kind: input, shape index: {}]   ;;  %s1224_s3 = inlined_call_operand.hbm [shape: f32[8,45], index: 3, kind: output, shape index: {}]  }
   0x1   :  { %v881_v0 = vld [vmem:[%s1222_s1 + $0x40] sm:$0xff]   ;;  %v885_v4 = vld [vmem:[%s1222_s1 + $0x48] sm:$0xff]   ;;  %v889_v8 = vld [vmem:[%s1222_s1 + $0x50] sm:$0xff]  }
   0x2   :  { %v882_v1 = vld [vmem:[%s1222_s1 + $0xc0] sm:$0xff]   ;;  %792 = vmatprep.subr.bf16.mxu0 %v881_v0  ;;  %v886_v5 = vld [vmem:[%s1222_s1 + $0xc8] sm:$0xff]   ;;  %v890_v9 = vld [vmem:[%s1222_s1 + $0xd0] sm:$0xff]  }
   0x3   :  { %v883_v2 = vld [vmem:[%s1222_s1] sm:$0xff]   ;;  %814 = vmatprep.subr.bf16.mxu1 %v882_v1  ;;  %v887_v6 = vld [vmem:[%s1222_s1 + $0x8] sm:$0xff]   ;;  %v891_v10 = vld [vmem:[%s1222_s1 + $0x10] sm:$0xff]  }
   0x4   :  { %v884_v3 = vld [vmem:[%s1222_s1 + $0x80] sm:$0xff]   ;;  %793 = vmatpush3.bf16.msra.mxu0 %v883_v2  ;;  %v888_v7 = vld [vmem:[%s1222_s1 + $0x88] sm:$0xff]   ;;  %v892_v11 = vld [vmem:[%s1222_s1 + $0x90] sm:$0xff]  }
   0x5   :  { %815 = vmatpush3.bf16.msra.mxu1 %v884_v3  ;;  %794 = vmatprep.subr.bf16.mxu0 %v885_v4  ;;  %v893_v12 = vld [vmem:[%s1222_s1 + $0x58] sm:$0xff]   ;;  %v897_v16 = vld [vmem:[%s1222_s1 + $0x60] sm:$0xff]   ;;  %v901_v20 = vld [vmem:[%s1222_s1 + $0x68] sm:$0xff]  }
   0x6   :  { %816 = vmatprep.subr.bf16.mxu1 %v886_v5  ;;  %v894_v13 = vld [vmem:[%s1222_s1 + $0xd8] sm:$0xff]   ;;  %v898_v17 = vld [vmem:[%s1222_s1 + $0xe0] sm:$0xff]   ;;  %v902_v21 = vld [vmem:[%s1222_s1 + $0xe8] sm:$0xff]  }
   0x7   :  { %v895_v14 = vld [vmem:[%s1222_s1 + $0x18] sm:$0xff]   ;;  %v899_v18 = vld [vmem:[%s1222_s1 + $0x20] sm:$0xff]   ;;  %v903_v22 = vld [vmem:[%s1222_s1 + $0x28] sm:$0xff]  }
   0x8   :  { %795 = vmatpush3.bf16.msra.mxu0 %v887_v6  ;;  %v896_v15 = vld [vmem:[%s1222_s1 + $0x98] sm:$0xff]   ;;  %v900_v19 = vld [vmem:[%s1222_s1 + $0xa0] sm:$0xff]   ;;  %v904_v23 = vld [vmem:[%s1222_s1 + $0xa8] sm:$0xff]  }
   0x9   :  { %817 = vmatpush3.bf16.msra.mxu1 %v888_v7  ;;  %796 = vmatprep.subr.bf16.mxu0 %v889_v8  ;;  %v905_v24 = vld [vmem:[%s1222_s1 + $0x70] sm:$0xff]   ;;  %v909_v28 = vld [vmem:[%s1222_s1 + $0x78] sm:$0xff]   ;;  %v17_v32 = vld [vmem:[%s1221_s0 + $0x8] sm:$0xff] }
   0xa   :  { %818 = vmatprep.subr.bf16.mxu1 %v890_v9  ;;  %v906_v25 = vld [vmem:[%s1222_s1 + $0xf0] sm:$0xff]   ;;  %v910_v29 = vld [vmem:[%s1222_s1 + $0xf8] sm:$0xff]   ;;  %v16_v34 = vld [vmem:[%s1221_s0] sm:$0xff]  ;;  %v25_v35 = vpack.c.bf16 %v17_v32, %v17_v32 }
   0xb   :  { %v907_v26 = vld [vmem:[%s1222_s1 + $0x30] sm:$0xff]   ;;  %v911_v30 = vld [vmem:[%s1222_s1 + $0x38] sm:$0xff]   ;;  %v24_v37 = vpack.c.bf16 %v16_v34, %v16_v34  ;;  %v913_v40 = vld [vmem:[%s1222_s1 + $0x140] sm:$0xff]  }
   0xc   :  { %797 = vmatpush3.bf16.msra.mxu0 %v891_v10  ;;  %v908_v27 = vld [vmem:[%s1222_s1 + $0xb0] sm:$0xff]   ;;  %v912_v31 = vld [vmem:[%s1222_s1 + $0xb8] sm:$0xff]   ;;  %583 = vmatprep.mubr.bf16.mxu0 %v25_v35  ;;  %v914_v41 = vld [vmem:[%s1222_s1 + $0x1c0] sm:$0xff]  }
   0xd   :  { %819 = vmatpush3.bf16.msra.mxu1 %v892_v11  ;;  %798 = vmatprep.subr.bf16.mxu0 %v893_v12  ;;  %v19_v33 = vld [vmem:[%s1221_s0 + $0x18] sm:$0xff]  ;;  %v18_v38 = vld [vmem:[%s1221_s0 + $0x10] sm:$0xff]  ;;  %v915_v42 = vld [vmem:[%s1222_s1 + $0x100] sm:$0xff]  }
   0xe   :  { %820 = vmatprep.subr.bf16.mxu1 %v894_v13  ;;  %v27_v36 = vpack.c.bf16 %v19_v33, %v19_v33  ;;  %v26_v39 = vpack.c.bf16 %v18_v38, %v18_v38  ;;  %v916_v43 = vld [vmem:[%s1222_s1 + $0x180] sm:$0xff]   ;;  %v917_v44 = vld [vmem:[%s1222_s1 + $0x148] sm:$0xff]   ;;  %v921_v48 = vld [vmem:[%s1222_s1 + $0x150] sm:$0xff]  }
   0xf   :  { %v918_v45 = vld [vmem:[%s1222_s1 + $0x1c8] sm:$0xff]   ;;  %v922_v49 = vld [vmem:[%s1222_s1 + $0x1d0] sm:$0xff]   ;;  %v925_v52 = vld [vmem:[%s1222_s1 + $0x158] sm:$0xff]  }
  0x10   :  { %799 = vmatpush3.bf16.msra.mxu0 %v895_v14  ;;  %623 = vmatprep.mubr.bf16.mxu1 %v27_v36  ;;  %v919_v46 = vld [vmem:[%s1222_s1 + $0x108] sm:$0xff]   ;;  %v923_v50 = vld [vmem:[%s1222_s1 + $0x110] sm:$0xff]   ;;  %v926_v53 = vld [vmem:[%s1222_s1 + $0x1d8] sm:$0xff]  }
  0x11   :  { %821 = vmatpush3.bf16.msra.mxu1 %v896_v15  ;;  %800 = vmatprep.subr.bf16.mxu0 %v897_v16  ;;  %v920_v47 = vld [vmem:[%s1222_s1 + $0x188] sm:$0xff]   ;;  %v924_v51 = vld [vmem:[%s1222_s1 + $0x190] sm:$0xff]   ;;  %v927_v54 = vld [vmem:[%s1222_s1 + $0x118] sm:$0xff]  }
  0x12   :  { %822 = vmatprep.subr.bf16.mxu1 %v898_v17  ;;  %v928_v55 = vld [vmem:[%s1222_s1 + $0x198] sm:$0xff]   ;;  %v929_v56 = vld [vmem:[%s1222_s1 + $0x160] sm:$0xff]   ;;  %v933_v60 = vld [vmem:[%s1222_s1 + $0x168] sm:$0xff]  }
  0x13   :  { %v930_v57 = vld [vmem:[%s1222_s1 + $0x1e0] sm:$0xff]   ;;  %v934_v61 = vld [vmem:[%s1222_s1 + $0x1e8] sm:$0xff]   ;;  %v937_v0 = vld [vmem:[%s1222_s1 + $0x170] sm:$0xff]  }
  0x14   :  { %801 = vmatpush3.bf16.msra.mxu0 %v899_v18  ;;  %v931_v58 = vld [vmem:[%s1222_s1 + $0x120] sm:$0xff]   ;;  %v935_v62 = vld [vmem:[%s1222_s1 + $0x128] sm:$0xff]   ;;  %v938_v1 = vld [vmem:[%s1222_s1 + $0x1f0] sm:$0xff]  }
  0x15   :  { %823 = vmatpush3.bf16.msra.mxu1 %v900_v19  ;;  %802 = vmatprep.subr.bf16.mxu0 %v901_v20  ;;  %v932_v59 = vld [vmem:[%s1222_s1 + $0x1a0] sm:$0xff]   ;;  %v936_v63 = vld [vmem:[%s1222_s1 + $0x1a8] sm:$0xff]   ;;  %v939_v2 = vld [vmem:[%s1222_s1 + $0x130] sm:$0xff]  }
  0x16   :  { %824 = vmatprep.subr.bf16.mxu1 %v902_v21  ;;  %v940_v3 = vld [vmem:[%s1222_s1 + $0x1b0] sm:$0xff]   ;;  %v941_v4 = vld [vmem:[%s1222_s1 + $0x178] sm:$0xff]   ;;  %v21_v8 = vld [vmem:[%s1221_s0 + $0x28] sm:$0xff] }
  0x17   :  { %v942_v5 = vld [vmem:[%s1222_s1 + $0x1f8] sm:$0xff]   ;;  %v29_v10 = vpack.c.bf16 %v21_v8, %v21_v8  ;;  %v20_v12 = vld [vmem:[%s1221_s0 + $0x20] sm:$0xff]  ;;  %v22_v13 = vld [vmem:[%s1221_s0 + $0x30] sm:$0xff] }
  0x18   :  { %803 = vmatpush3.bf16.msra.mxu0 %v903_v22  ;;  %v943_v6 = vld [vmem:[%s1222_s1 + $0x138] sm:$0xff]  }
  0x19   :  { %825 = vmatpush3.bf16.msra.mxu1 %v904_v23  ;;  %804 = vmatprep.subr.bf16.mxu0 %v905_v24  ;;  %v944_v7 = vld [vmem:[%s1222_s1 + $0x1b8] sm:$0xff]  }
  0x1a   :  { %826 = vmatprep.subr.bf16.mxu1 %v906_v25  ;;  %v23_v9 = vld [vmem:[%s1221_s0 + $0x38] sm:$0xff] }
  0x1b   :  { %v31_v11 = vpack.c.bf16 %v23_v9, %v23_v9 }
  0x1c   :  { %805 = vmatpush3.bf16.msra.mxu0 %v907_v26 }
  0x1d   :  { %827 = vmatpush3.bf16.msra.mxu1 %v908_v27  ;;  %806 = vmatprep.subr.bf16.mxu0 %v909_v28 }
  0x1e   :  { %828 = vmatprep.subr.bf16.mxu1 %v910_v29 }
  0x20   :  { %807 = vmatpush3.bf16.msra.mxu0 %v911_v30 }
  0x21   :  { %829 = vmatpush3.bf16.msra.mxu1 %v912_v31  ;;  %836 = vmatprep.subr.bf16.mxu0 %v913_v40 }
  0x22   :  { %858 = vmatprep.subr.bf16.mxu1 %v914_v41 }
  0x23   :  { %584 = vmatmul.mubr.bf16.vlgmr.msra.gmra.mrb[0].mxu0 %v24_v37 }
  0x24   :  { %624 = vmatmul.mubr.bf16.vlgmr.msra.gmra.mrb[0].mxu1 %v26_v39  ;;  %837 = vmatpush3.bf16.msra.mxu0 %v915_v42 }
  0x25   :  { %859 = vmatpush3.bf16.msra.mxu1 %v916_v43  ;;  %838 = vmatprep.subr.bf16.mxu0 %v917_v44 }
  0x26   :  { %860 = vmatprep.subr.bf16.mxu1 %v918_v45 }
  0x28   :  { %839 = vmatpush3.bf16.msra.mxu0 %v919_v46 }
  0x29   :  { %861 = vmatpush3.bf16.msra.mxu1 %v920_v47  ;;  %840 = vmatprep.subr.bf16.mxu0 %v921_v48 }
  0x2a   :  { %862 = vmatprep.subr.bf16.mxu1 %v922_v49 }
  0x2c   :  { %841 = vmatpush3.bf16.msra.mxu0 %v923_v50 }
  0x2d   :  { %863 = vmatpush3.bf16.msra.mxu1 %v924_v51  ;;  %842 = vmatprep.subr.bf16.mxu0 %v925_v52 }
  0x2e   :  { %864 = vmatprep.subr.bf16.mxu1 %v926_v53 }
  0x30   :  { %843 = vmatpush3.bf16.msra.mxu0 %v927_v54 }
  0x31   :  { %865 = vmatpush3.bf16.msra.mxu1 %v928_v55  ;;  %844 = vmatprep.subr.bf16.mxu0 %v929_v56 }
  0x32   :  { %866 = vmatprep.subr.bf16.mxu1 %v930_v57 }
  0x34   :  { %845 = vmatpush3.bf16.msra.mxu0 %v931_v58 }
  0x35   :  { %867 = vmatpush3.bf16.msra.mxu1 %v932_v59  ;;  %846 = vmatprep.subr.bf16.mxu0 %v933_v60 }
  0x36   :  { %868 = vmatprep.subr.bf16.mxu1 %v934_v61 }
  0x38   :  { %847 = vmatpush3.bf16.msra.mxu0 %v935_v62 }
  0x39   :  { %869 = vmatpush3.bf16.msra.mxu1 %v936_v63  ;;  %848 = vmatprep.subr.bf16.mxu0 %v937_v0 }
  0x3a   :  { %870 = vmatprep.subr.bf16.mxu1 %v938_v1 }
  0x3c   :  { %849 = vmatpush3.bf16.msra.mxu0 %v939_v2 }
  0x3d   :  { %871 = vmatpush3.bf16.msra.mxu1 %v940_v3  ;;  %850 = vmatprep.subr.bf16.mxu0 %v941_v4 }
  0x3e   :  { %872 = vmatprep.subr.bf16.mxu1 %v942_v5 }
  0x40   :  { %851 = vmatpush3.bf16.msra.mxu0 %v943_v6 }
  0x41   :  { %8 = vsyncpa [#allocation3], 0  ;;  %873 = vmatpush3.bf16.msra.mxu1 %v944_v7  ;;  %v28_v14 = vpack.c.bf16 %v20_v12, %v20_v12  ;;  %v30_v15 = vpack.c.bf16 %v22_v13, %v22_v13  ;;  %663 = vmatprep.mubr.bf16.mxu0 %v29_v10  ;;  %v727_v18 = vld [vmem:[%s1223_s2] ss:$0 sm:$0xff]  ;;  %s969_s0 = smov [#allocation2]   ;;  %vm711_vm0 = vcmask 367616  }
  0x42   :  { %703 = vmatprep.mubr.bf16.mxu1 %v31_v11  ;;  %s719_s2 = sshll.u32 %s969_s0, 4  ;;  %s720_s2 = int_to_ptr.vmem [resolvable:$true] %s719_s2 }
  0x43   :  { %664 = vmatmul.mubr.bf16.vlgmr.msra.gmra.mrb[4].mxu0 %v28_v14  ;;  %s945_s22 = scalar_lea.vmem %s720_s2, 128  ;;  %p950_p1 = scmp.lt.s32.totalorder %s720_s2, %s720_s2 }
  0x44   :  { %704 = vmatmul.mubr.bf16.vlgmr.msra.gmra.mrb[4].mxu1 %v30_v15  ;;  %p946_p0 = scmp.ne.s32.totalorder %s720_s2, %s945_s22  ;;  %p951_p2 = scmp.lt.s32.totalorder %s945_s22, %s945_s22 }
  0x46   :  { %p952_p3 = por %p951_p2, %p950_p1 }
  0x48   :  { %p953_p4 = pnand %p952_p3, %p946_p0 }
  0xf6   :  { %v808_v16 = vpop.f32.mrb[0].mxu0 }
  0xf7   :  { %v830_v17 = vpop.f32.mrb[0].mxu1  ;;  %v809_v19 = vpop.f32.mrb[1].mxu0 }
  0xf8   :  { %v831_v20 = vpop.f32.mrb[1].mxu1  ;;  %v810_v21 = vadd.f32 %v809_v19, %v808_v16  ;;  %v811_v23 = vpop.f32.mrb[2].mxu0 }
  0xf9   :  { %v832_v22 = vadd.f32 %v831_v20, %v830_v17  ;;  %v833_v24 = vpop.f32.mrb[2].mxu1  ;;  %v812_v25 = vpop.f32.mrb[3].mxu0 }
  0xfa   :  { %v834_v26 = vpop.f32.mrb[3].mxu1  ;;  %v586_v27 = vadd.f32 %v810_v21, %v727_v18 }
  0xfc   :  { %v626_v28 = vadd.f32 %v832_v22, %v586_v27 }
 0x116   :  { %v852_v29 = vpop.f32.mrb[4].mxu0 }
 0x117   :  { %v874_v30 = vpop.f32.mrb[4].mxu1  ;;  %v853_v31 = vpop.f32.mrb[5].mxu0 }
 0x118   :  { %v854_v32 = vadd.f32 %v853_v31, %v852_v29  ;;  %v875_v33 = vpop.f32.mrb[5].mxu1  ;;  %v855_v34 = vpop.f32.mrb[6].mxu0 }
 0x119   :  { %v876_v35 = vadd.f32 %v875_v33, %v874_v30  ;;  %v877_v36 = vpop.f32.mrb[6].mxu1  ;;  %v856_v37 = vpop.f32.mrb[7].mxu0 }
 0x11a   :  { %v666_v38 = vadd.f32 %v854_v32, %v626_v28  ;;  %v878_v39 = vpop.f32.mrb[7].mxu1 }
 0x11c   :  { %v706_v40 = vadd.f32 %v876_v35, %v666_v38 }
 0x11e   :  { %712 = vst.msk [vmem:[#allocation2] sm:$0xff] %vm711_vm0, %v706_v40 }
 0x11f   :  { %956 = shalt.err (!%p953_p4)
}
 0x120   :  { %s957_s25 = scalar_lea.hbm %s1224_s3, 128 }
 0x121   :  { %p958_p5 = scmp.ne.s32.totalorder %s1224_s3, %s957_s25  ;;  %p961_p6 = scmp.lt.u32.totalorder %s957_s25, %s1224_s3 }
 0x123   :  { %p963_p7 = pnand %p961_p6, %p958_p5 }
 0x125   :  { %966 = shalt.err (!%p963_p7)
}
 0x126   :  { %722 = dma.vmem_to_hbm [thread:$0]  %s720_s2, 128, %s1224_s3, [#allocation3]  }
 0x127   :  { %967 = dma.done.wait [#allocation3], 128  }
 0x128   :  { %968 = vsyncadd [#allocation3], 4294967168 }
 0x129   :  { %726 = vsyncpa [#allocation3], 1 }

// kernel: de_net_forward.9
= control target key start
LH: loop header
LB: loop body
LE: loop exit
PB: predicated region body
PF: predicated region fallthrough
CT: control target
= control target key end

     0   :  { %s6503_s0 = inlined_call_operand.vmem [shape: f32[8,1024], index: 0, kind: input, shape index: {}]   ;;  %s6504_s1 = inlined_call_operand.hbm [shape: bf16[1024,2048], index: 1, kind: input, shape index: {}]   ;;  %s6505_s2 = inlined_call_operand.hbm [shape: f32[1,2048], index: 2, kind: input, shape index: {}]   ;;  %s6506_s3 = inlined_call_operand.hbm [shape: bf16[2048,1024], index: 3, kind: input, shape index: {}]   ;;  %s6507_s4 = inlined_call_operand.hbm [shape: f32[1,1024], index: 4, kind: input, shape index: {}]   ;;  %s6508_s5 = inlined_call_operand.vmem [shape: f32[8,1024], index: 5, kind: output, shape index: {}]  }
   0x1   :  { %6517 = sst [smem:[#allocation14_spill]] %s6504_s1 }
   0x2   :  { %6518 = sst [smem:[#allocation15_spill]] %s6505_s2 }
   0x3   :  { %10 = vsyncpa [#allocation3], 0 }
   0x4   :  { %12 = vsyncpa [#allocation3 + $0x1], 0 }
   0x5   :  { %13 = vsyncpa [#allocation5], 0 }
   0x6   :  { %15 = vsyncpa [#allocation5 + $0x1], 0 }
   0x7   :  { %16 = vsyncpa [#allocation8], 0  ;;  %s5537_s18 = smov 0   ;;  %s5539_s19 = smov 0  }
   0x8   :  { %s5541_s20 = smov 0   ;;  %s5543_s21 = smov 0  }
   0x9 LB: > { %6519 = sst [smem:[#allocation12_spill]] %s5491_s20  ;;  %s5558_s22 = sadd.s32 1, %s5495_s21   ;;  %s5495_s21 = sphi %s5543_s21, %s6540_s21   ;;  %s5491_s20 = sphi %s5541_s20, %s6537_s20   ;;  %s5487_s19 = sphi %s5539_s19, %s6539_s19   ;;  %s5483_s18 = sphi %s5537_s18, %s6538_s18  }
   0xa   : > { %s50_s23 = sadd.s32 1, %s5491_s20  ;;  %s47_s24 = ssub.s32 %s5495_s21, %s5558_s22 }
   0xb   : > { %p57_p0 = scmp.ne.s32.totalorder %s5491_s20, %s5487_s19  ;;  %p48_p1 = scmp.eq.s32.totalorder %s47_s24, 0 }
   0xc   : > { %p58_p2 = scmp.eq.s32.totalorder %s5495_s21, 0  ;;  %p4910_p3 = scmp.lt.s32.totalorder %s5495_s21, 4 }
   0xd   : > { %s5568_s25 = scalar_select %p48_p1, %s5491_s20, %s50_s23  }
   0xe   : > { %p59_p4 = por %p58_p2, %p57_p0  ;;  %s5571_s26 = sand.u32 1, %s5491_s20  }
   0xf   : > { %6520 = sst [smem:[#allocation13_spill]] %s5568_s25  ;;  %s4322_s27 = sshll.u32 %s5571_s26, 11 }
  0x10   : > { %p5574_p5 = pnand %p4910_p3, %p59_p4  ;;  %s199_s29 = scalar_lea.vmem [#allocation2], %s4322_s27 }
  0x11   : > { %s206_s30 = sshll.u32 %s199_s29, 4  ;;  %s216_s6 = sand.u32 1, %s5495_s21   ;;  %s5581_s30 = int_to_ptr.vmem [resolvable:$true] %s206_s30 }
  0x12   : > { %s6521_s28 = scalar_select %p5574_p5, 1, 0 }
  0x13   : > { %s4325_s7 = sshll.u32 %s5571_s26, 2  ;;  %s4854_s8 = sshll.u32 %s5495_s21, 6 }
  0x14   : > { %s6522_s2 = sld [smem:[#allocation15_spill]]  ;;  %s220_s12 = scalar_lea.vmem [#allocation4], %s4325_s7 }
  0x15   : > { %s228_s13 = sshll.u32 %s220_s12, 4  ;;  %s5592_s14 = scalar_lea.sflag [#allocation5], %s216_s6  ;;  %s5590_s13 = int_to_ptr.vmem [resolvable:$true] %s228_s13 }
  0x16   : > { %p5598_p7 = pneg %p5574_p5 }
  0x18   : > { %s6523_s16 = scalar_select %p5598_p7, 1, 0 }
  0x1a   : > { %s5588_s11 = scalar_lea.hbm %s6522_s2, %s4854_s8  ;;  %s5340_s24 = scalar_lea.hbm %s6522_s2, 256 }
  0x1b   : > { %s5335_s15 = scalar_lea.hbm %s5588_s11, 64  ;;  %p5341_p10 = scmp.lt.u32.totalorder %s5588_s11, %s6522_s2 }
  0x1c   : > { %p5336_p6 = scmp.ne.s32.totalorder %s5588_s11, %s5335_s15  ;;  %p5342_p11 = scmp.lt.u32.totalorder %s5340_s24, %s5335_s15 }
  0x1d   : > { %p5344_p13 = scmp.lt.u32.totalorder %s5335_s15, %s5588_s11 }
  0x1e   : > { %p5338_p8 = pnand %p5598_p7, %p5336_p6  ;;  %p5343_p12 = por %p5342_p11, %p5341_p10 }
  0x20   : > { %p5339_p9 = pneg %p5338_p8  ;;  %p5345_p0 = por %p5344_p13, %p5343_p12 }
  0x22   : > { %p5346_p1 = pnand %p5345_p0, %p5339_p9 }
  0x24   : > { %5349 = shalt.err (!%p5346_p1)
}
  0x25   : > { %s5350_s6 = scalar_lea.vmem %s5590_s13, 64  ;;  %s5497_s8 = smov [#allocation4]  }
  0x26   : > { %p5351_p2 = scmp.ne.s32.totalorder %s5590_s13, %s5350_s6  ;;  %s5355_s9 = sshll.u32 %s5497_s8, 4  ;;  %s5356_s9 = int_to_ptr.vmem [resolvable:$false] %s5355_s9 }
  0x27   : > { %s5357_s10 = scalar_lea.vmem %s5356_s9, 128  ;;  %p5358_p6 = scmp.lt.s32.totalorder %s5590_s13, %s5356_s9 }
  0x28   : > { %p5353_p3 = pnand %p5351_p2, %p5598_p7  ;;  %p5359_p8 = scmp.lt.s32.totalorder %s5357_s10, %s5350_s6 }
  0x2a   : > { %p5354_p4 = pneg %p5353_p3  ;;  %p5360_p10 = por %p5359_p8, %p5358_p6 }
  0x2c   : > { %p5361_p11 = pnand %p5360_p10, %p5354_p4 }
  0x2e   : > { %5364 = shalt.err (!%p5361_p11)
}
  0x2f   : > { %4905 = dma.hbm_to_vmem [thread:$0]  (!%p5574_p5), %s5588_s11, 64, %s5590_s13, %s5592_s14  }
  0x30   : > { %s239_s12 = scalar_lea.vmem [#allocation6], %s4322_s27  ;;  %s5627_s17 = sadd.s32 4294967295, %s5495_s21  }
  0x31   : > { %s247_s15 = sshll.u32 %s239_s12, 4  ;;  %p63_p9 = scmp.ne.s32.totalorder %s5487_s19, %s5483_s18  ;;  %s5624_s15 = int_to_ptr.vmem [resolvable:$true] %s247_s15 }
  0x32   : > { %p6509_p12 = scmp.eq.s32.totalorder %s5627_s17, 0  ;;  %p4319_p13 = scmp.ge.s32.totalorder %s5495_s21, 1 }
  0x33   : > { %p168_p0 = scmp.lt.s32.totalorder %s5495_s21, 5  ;;  %s5498_s13 = smov [#allocation7]  }
  0x34   : > { %p5637_p2 = por %p6509_p12, %p63_p9  ;;  %s184_s23 = sshll.u32 %s5498_s13, 4  ;;  %s5645_s23 = int_to_ptr.vmem [resolvable:$true] %s184_s23 }
  0x35   : > { %p5641_p3 = pnand %p4319_p13, %p168_p0  ;;  %s4853_s18 = sshll.u32 %s5495_s21, 8 }
  0x36   : > { %s6524_s11 = scalar_select %p5637_p2, 1, 0 }
  0x37   : > { %s6525_s27 = scalar_select %p5641_p3, 1, 0 }
  0x38   : > { %p4895_p4 = pneg %p5641_p3  ;;  %s6526_s1 = sld [smem:[#allocation14_spill]] }
  0x39   : > { %s196_s8 = scalar_lea.sflag [#allocation3], %s5571_s26 }
  0x3a   : > { %p5657_p6 = pnand %p4895_p4, %p6509_p12 }
  0x3c   : > { %s6527_s6 = scalar_select %p5657_p6, 1, 0 }
  0x3e   : > { %s5653_s7 = scalar_lea.hbm %s6526_s1, %s4853_s18  ;;  %s5370_s13 = scalar_lea.hbm %s6526_s1, 131072 }
  0x3f   : > { %s5365_s9 = scalar_lea.hbm %s5653_s7, 32768  ;;  %p5371_p9 = scmp.lt.u32.totalorder %s5653_s7, %s6526_s1 }
  0x40   : > { %p5366_p8 = scmp.ne.s32.totalorder %s5653_s7, %s5365_s9  ;;  %p5372_p13 = scmp.lt.u32.totalorder %s5370_s13, %s5365_s9 }
  0x41   : > { %p5374_p4 = scmp.lt.u32.totalorder %s5365_s9, %s5653_s7 }
  0x42   : > { %p5368_p10 = pnand %p5366_p8, %p5598_p7  ;;  %p5373_p0 = por %p5372_p13, %p5371_p9 }
  0x44   : > { %p5369_p11 = pneg %p5368_p10  ;;  %p5375_p1 = por %p5374_p4, %p5373_p0 }
  0x46   : > { %p5376_p12 = pnand %p5375_p1, %p5369_p11 }
  0x48   : > { %5379 = shalt.err (!%p5376_p12)
}
  0x49   : > { %s5380_s29 = scalar_lea.vmem %s5581_s30, 32768  ;;  %s5499_s10 = smov [#allocation2]  }
  0x4a   : > { %p5381_p8 = scmp.ne.s32.totalorder %s5581_s30, %s5380_s29  ;;  %s5385_s12 = sshll.u32 %s5499_s10, 4  ;;  %s5386_s12 = int_to_ptr.vmem [resolvable:$false] %s5385_s12 }
  0x4b   : > { %s5387_s18 = scalar_lea.vmem %s5386_s12, 65536  ;;  %p5388_p3 = scmp.lt.s32.totalorder %s5581_s30, %s5386_s12 }
  0x4c   : > { %p5383_p10 = pnand %p5381_p8, %p5598_p7  ;;  %p5389_p6 = scmp.lt.s32.totalorder %s5387_s18, %s5380_s29 }
  0x4e   : > { %p5384_p2 = pneg %p5383_p10  ;;  %p5390_p9 = por %p5389_p6, %p5388_p3 }
  0x50   : > { %p5391_p13 = pnand %p5390_p9, %p5384_p2 }
  0x52   : > { %5394 = shalt.err (!%p5391_p13)
}
  0x53   : > { %s5500_s9 = smov 1024   ;;  %s5501_s13 = smov 256  }
  0x54   : > { %s5502_s24 = smov 16   ;;  %s4856_s10 = sshll.u32 %s5495_s21, 15 }
  0x55   : > { %4902 = dma.hbm_to_vmem [thread:$0]  (!%p5574_p5), %s5653_s7, 32768, %s5581_s30, %s196_s8, %s5500_s9, %s5501_s13, %s5502_s24  }
  0x56   : > { %s5395_s29 = scalar_lea.hbm %s6507_s4, 128  ;;  %p6528_p1 = scmp.ne.s32.totalorder %s6527_s6, 0 }
  0x57   : > { %p5396_p12 = scmp.ne.s32.totalorder %s6507_s4, %s5395_s29  ;;  %p5402_p11 = scmp.lt.u32.totalorder %s5395_s29, %s6507_s4 }
  0x58   : > { %p5397_p2 = pneg %p6528_p1 }
  0x5a   : > { %p5398_p3 = pnand %p5397_p2, %p5396_p12 }
  0x5c   : > { %p5399_p6 = pneg %p5398_p3 }
  0x5e   : > { %p5404_p0 = pnand %p5402_p11, %p5399_p6 }
  0x60   : > { %5407 = shalt.err (!%p5404_p0)
}
  0x61   : > { %s5408_s21 = scalar_lea.vmem %s5645_s23, 128  ;;  %p5416_p9 = scmp.lt.s32.totalorder %s5645_s23, %s5645_s23 }
  0x62   : > { %p5409_p4 = scmp.ne.s32.totalorder %s5645_s23, %s5408_s21  ;;  %p5417_p13 = scmp.lt.s32.totalorder %s5408_s21, %s5408_s21 }
  0x64   : > { %p5411_p8 = pnand %p5409_p4, %p5397_p2  ;;  %p5418_p5 = por %p5417_p13, %p5416_p9 }
  0x66   : > { %p5412_p10 = pneg %p5411_p8 }
  0x68   : > { %p5419_p7 = pnand %p5418_p5, %p5412_p10 }
  0x6a   : > { %5422 = shalt.err (!%p5419_p7)
}
  0x6b   : > { %4898 = dma.hbm_to_vmem [thread:$0]  (!%p6528_p1), %s6507_s4, 128, %s5645_s23, [#allocation8]  }
  0x6c   : > { %s5710_s26 = scalar_lea.hbm %s6506_s3, %s4856_s10  ;;  %p6529_p7 = scmp.ne.s32.totalorder %s6523_s16, 0 }
  0x6d   : > { %s5423_s30 = scalar_lea.hbm %s5710_s26, 32768  ;;  %s5428_s8 = scalar_lea.hbm %s6506_s3, 131072 }
  0x6e   : > { %p5424_p5 = scmp.ne.s32.totalorder %s5710_s26, %s5423_s30  ;;  %p5429_p1 = scmp.lt.u32.totalorder %s5710_s26, %s6506_s3 }
  0x6f   : > { %p5430_p3 = scmp.lt.u32.totalorder %s5428_s8, %s5423_s30  ;;  %p5432_p11 = scmp.lt.u32.totalorder %s5423_s30, %s5710_s26 }
  0x70   : > { %p5426_p12 = pnand %p5424_p5, %p6529_p7 }
  0x71   : > { %p5431_p6 = por %p5430_p3, %p5429_p1 }
  0x72   : > { %p5427_p2 = pneg %p5426_p12 }
  0x73   : > { %p5433_p0 = por %p5432_p11, %p5431_p6 }
  0x75   : > { %p5434_p4 = pnand %p5433_p0, %p5427_p2 }
  0x77   : > { %5437 = shalt.err (!%p5434_p4)
}
  0x78   : > { %s5438_s13 = scalar_lea.vmem %s5624_s15, 32768  ;;  %s5503_s24 = smov [#allocation6]  }
  0x79   : > { %p5439_p8 = scmp.ne.s32.totalorder %s5624_s15, %s5438_s13  ;;  %s5443_s10 = sshll.u32 %s5503_s24, 4  ;;  %s5444_s10 = int_to_ptr.vmem [resolvable:$false] %s5443_s10 }
  0x7a   : > { %s5445_s29 = scalar_lea.vmem %s5444_s10, 65536  ;;  %p5446_p13 = scmp.lt.s32.totalorder %s5624_s15, %s5444_s10 }
  0x7b   : > { %p5441_p10 = pnand %p5439_p8, %p6529_p7  ;;  %p5447_p5 = scmp.lt.s32.totalorder %s5445_s29, %s5438_s13 }
  0x7d   : > { %p5442_p9 = pneg %p5441_p10  ;;  %p5448_p12 = por %p5447_p5, %p5446_p13 }
  0x7f   : > { %p5449_p1 = pnand %p5448_p12, %p5442_p9 }
  0x81   : > { %5452 = shalt.err (!%p5449_p1)
}
  0x82   : > { %s5504_s12 = smov 512   ;;  %s5505_s18 = smov 32  }
  0x83   : > { %p6530_p2 = scmp.ne.s32.totalorder %s6521_s28, 0  ;;  %p6531_p7 = scmp.ne.s32.totalorder %s6525_s27, 0 }
  0x84   : > { %s261_s16 = sand.u32 (!%p6531_p7), 1, %s5487_s19   ;;  %p6532_p3 = scmp.ne.s32.totalorder (!%p6531_p7), %s6524_s11, 0 }
  0x85   : > { %4908 = dma.hbm_to_vmem [thread:$0]  (!%p6530_p2), %s5710_s26, 32768, %s5624_s15, %s5592_s14, %s5504_s12, %s5504_s12, %s5505_s18  }
  0x86   : > { %259 = sbr.rel (%p6531_p7) target bundleno = 1059 (0x423), region = 40  ;;  %s4333_s21 = sshll.u32 (!%p6531_p7), %s261_s16, 11 }
  0x87   : > { %s262_s1 = scalar_lea.sflag (!%p6531_p7), [#allocation3], %s261_s16  ;;  %s5737_s2 = scalar_lea.vmem (!%p6531_p7), [#allocation2], %s4333_s21 }
  0x8d   : > { %5470 = dma.done.wait (%p6532_p3), %s262_s1, 32768  }
  0x8e   : > { %5472 = vsyncadd (%p6532_p3), %s262_s1, 4294934528  ;;  %s270_s20 = sand.u32 1, %s5627_s17   ;;  %s4334_s28 = sshll.u32 %s261_s16, 2 }
  0x8f   : > { %s271_s14 = scalar_lea.sflag [#allocation5], %s270_s20  ;;  %s5744_s15 = scalar_lea.vmem [#allocation4], %s4334_s28 }
  0x90   : > { %5474 = dma.done.wait (%p6532_p3), %s271_s14, 32832  }
  0x91   : > { %5476 = vsyncadd (%p6532_p3), %s271_s14, 4294934464  ;;  %s5750_s27 = scalar_lea.vmem [#allocation6], %s4333_s21  ;;  %p6533_p6 = scmp.eq.s32.totalorder %s5627_s17, 0 }
  0x93   : > { %5478 = dma.done.wait (%p6533_p6), [#allocation8], 128   ;;  %p6534_p11 = pmov %p6533_p6 }
  0x94   : > { %p6535_p0 = scmp.ne.s32.totalorder %s5627_s17, 0 }
  0x95   : > { %5480 = vsyncadd (%p6534_p11), [#allocation8], 4294967168  ;;  %v5506_v0 = vmov (!%p6535_p0), 0.0  }
  0x96   : > { %325 = sbr.rel (%p6535_p0) target bundleno = 157 (0x9d), region = 60  ;;  %326 = vst [vmem:[%s6508_s5] sm:$0xff] (!%p6535_p0), %v5506_v0  ;;  %327 = vst [vmem:[%s6508_s5 + $0x8] sm:$0xff] (!%p6535_p0), %v5506_v0 }
  0x97   : > { %328 = vst [vmem:[%s6508_s5 + $0x10] sm:$0xff] (!%p6535_p0), %v5506_v0  ;;  %329 = vst [vmem:[%s6508_s5 + $0x18] sm:$0xff] (!%p6535_p0), %v5506_v0 }
  0x98   : > { %330 = vst [vmem:[%s6508_s5 + $0x20] sm:$0xff] (!%p6535_p0), %v5506_v0  ;;  %331 = vst [vmem:[%s6508_s5 + $0x28] sm:$0xff] (!%p6535_p0), %v5506_v0 }
  0x99   : > { %332 = vst [vmem:[%s6508_s5 + $0x30] sm:$0xff] (!%p6535_p0), %v5506_v0  ;;  %333 = vst [vmem:[%s6508_s5 + $0x38] sm:$0xff] (!%p6535_p0), %v5506_v0 }
  0x9d PF: > { %v4951_v1 = vld [vmem:[%s5737_s2 + $0x4] ss:$16 sps:$4 sm:$0xff]   ;;  %v4953_v2 = vld [vmem:[%s5737_s2 + $0xc] ss:$16 sps:$4 sm:$0xff]   ;;  %v4955_v3 = vld [vmem:[%s5737_s2] ss:$16 sps:$4 sm:$0xff]  }
  0x9e   : > { %1908 = vmatprep.subr.bf16.mxu0 %v4951_v1  ;;  %v4956_v4 = vld [vmem:[%s5737_s2 + $0x8] ss:$16 sps:$4 sm:$0xff]   ;;  %2072 = vmatprep.subr.bf16.mxu1 %v4953_v2  ;;  %v4957_v5 = vld [vmem:[%s5737_s2 + $0x24] ss:$16 sps:$4 sm:$0xff]   ;;  %v4959_v6 = vld [vmem:[%s5737_s2 + $0x2c] ss:$16 sps:$4 sm:$0xff]  }
  0x9f   : > { %1909 = vmatpush1.bf16.msra.mxu0 %v4955_v3  ;;  %2073 = vmatpush1.bf16.msra.mxu1 %v4956_v4  ;;  %v4961_v7 = vld [vmem:[%s5737_s2 + $0x20] ss:$16 sps:$4 sm:$0xff]   ;;  %v4962_v8 = vld [vmem:[%s5737_s2 + $0x28] ss:$16 sps:$4 sm:$0xff]   ;;  %v4963_v9 = vld [vmem:[%s5737_s2 + $0x44] ss:$16 sps:$4 sm:$0xff]  }
  0xa0   : > { %1910 = vmatprep.subr.bf16.mxu0 %v4957_v5  ;;  %2074 = vmatprep.subr.bf16.mxu1 %v4959_v6  ;;  %v4965_v10 = vld [vmem:[%s5737_s2 + $0x4c] ss:$16 sps:$4 sm:$0xff]   ;;  %v4967_v11 = vld [vmem:[%s5737_s2 + $0x40] ss:$16 sps:$4 sm:$0xff]   ;;  %v4968_v12 = vld [vmem:[%s5737_s2 + $0x48] ss:$16 sps:$4 sm:$0xff]  }
  0xa1   : > { %v4969_v13 = vld [vmem:[%s5737_s2 + $0x64] ss:$16 sps:$4 sm:$0xff]   ;;  %v4971_v14 = vld [vmem:[%s5737_s2 + $0x6c] ss:$16 sps:$4 sm:$0xff]   ;;  %v4973_v15 = vld [vmem:[%s5737_s2 + $0x60] ss:$16 sps:$4 sm:$0xff]  }
  0xa2   : > { %v4974_v16 = vld [vmem:[%s5737_s2 + $0x68] ss:$16 sps:$4 sm:$0xff]   ;;  %v4975_v17 = vld [vmem:[%s5737_s2 + $0x84] ss:$16 sps:$4 sm:$0xff]   ;;  %v4977_v18 = vld [vmem:[%s5737_s2 + $0x8c] ss:$16 sps:$4 sm:$0xff]  }
  0xa3   : > { %1911 = vmatpush1.bf16.msra.mxu0 %v4961_v7  ;;  %2075 = vmatpush1.bf16.msra.mxu1 %v4962_v8  ;;  %v4979_v19 = vld [vmem:[%s5737_s2 + $0x80] ss:$16 sps:$4 sm:$0xff]   ;;  %v4980_v20 = vld [vmem:[%s5737_s2 + $0x88] ss:$16 sps:$4 sm:$0xff]   ;;  %v4981_v21 = vld [vmem:[%s5737_s2 + $0xa4] ss:$16 sps:$4 sm:$0xff]  }
  0xa4   : > { %1912 = vmatprep.subr.bf16.mxu0 %v4963_v9  ;;  %2076 = vmatprep.subr.bf16.mxu1 %v4965_v10  ;;  %v4983_v22 = vld [vmem:[%s5737_s2 + $0xac] ss:$16 sps:$4 sm:$0xff]   ;;  %v4985_v23 = vld [vmem:[%s5737_s2 + $0xa0] ss:$16 sps:$4 sm:$0xff]   ;;  %v4986_v24 = vld [vmem:[%s5737_s2 + $0xa8] ss:$16 sps:$4 sm:$0xff]  }
  0xa5   : > { %v4987_v25 = vld [vmem:[%s5737_s2 + $0xc4] ss:$16 sps:$4 sm:$0xff]   ;;  %v4989_v26 = vld [vmem:[%s5737_s2 + $0xcc] ss:$16 sps:$4 sm:$0xff]   ;;  %v4991_v27 = vld [vmem:[%s5737_s2 + $0xc0] ss:$16 sps:$4 sm:$0xff]  }
  0xa6   : > { %v4992_v28 = vld [vmem:[%s5737_s2 + $0xc8] ss:$16 sps:$4 sm:$0xff]   ;;  %v4993_v29 = vld [vmem:[%s5737_s2 + $0xe4] ss:$16 sps:$4 sm:$0xff]   ;;  %v4995_v30 = vld [vmem:[%s5737_s2 + $0xec] ss:$16 sps:$4 sm:$0xff]  }
  0xa7   : > { %1913 = vmatpush1.bf16.msra.mxu0 %v4967_v11  ;;  %2077 = vmatpush1.bf16.msra.mxu1 %v4968_v12  ;;  %v4997_v31 = vld [vmem:[%s5737_s2 + $0xe0] ss:$16 sps:$4 sm:$0xff]   ;;  %v4998_v32 = vld [vmem:[%s5737_s2 + $0xe8] ss:$16 sps:$4 sm:$0xff]   ;;  %v4999_v33 = vld [vmem:[%s5737_s2 + $0x104] ss:$16 sps:$4 sm:$0xff]  }
  0xa8   : > { %1914 = vmatprep.subr.bf16.mxu0 %v4969_v13  ;;  %2078 = vmatprep.subr.bf16.mxu1 %v4971_v14  ;;  %v5001_v34 = vld [vmem:[%s5737_s2 + $0x10c] ss:$16 sps:$4 sm:$0xff]   ;;  %v5003_v35 = vld [vmem:[%s5737_s2 + $0x100] ss:$16 sps:$4 sm:$0xff]   ;;  %v5004_v36 = vld [vmem:[%s5737_s2 + $0x108] ss:$16 sps:$4 sm:$0xff]  }
  0xa9   : > { %v5005_v37 = vld [vmem:[%s5737_s2 + $0x124] ss:$16 sps:$4 sm:$0xff]   ;;  %v5007_v38 = vld [vmem:[%s5737_s2 + $0x12c] ss:$16 sps:$4 sm:$0xff]   ;;  %v5009_v39 = vld [vmem:[%s5737_s2 + $0x120] ss:$16 sps:$4 sm:$0xff]  }
  0xaa   : > { %v5010_v40 = vld [vmem:[%s5737_s2 + $0x128] ss:$16 sps:$4 sm:$0xff]   ;;  %v5011_v41 = vld [vmem:[%s5737_s2 + $0x144] ss:$16 sps:$4 sm:$0xff]   ;;  %v5013_v42 = vld [vmem:[%s5737_s2 + $0x14c] ss:$16 sps:$4 sm:$0xff]  }
  0xab   : > { %1915 = vmatpush1.bf16.msra.mxu0 %v4973_v15  ;;  %2079 = vmatpush1.bf16.msra.mxu1 %v4974_v16  ;;  %v5015_v43 = vld [vmem:[%s5737_s2 + $0x140] ss:$16 sps:$4 sm:$0xff]   ;;  %v5016_v44 = vld [vmem:[%s5737_s2 + $0x148] ss:$16 sps:$4 sm:$0xff]   ;;  %v5017_v45 = vld [vmem:[%s5737_s2 + $0x164] ss:$16 sps:$4 sm:$0xff]  }
  0xac   : > { %1916 = vmatprep.subr.bf16.mxu0 %v4975_v17  ;;  %2080 = vmatprep.subr.bf16.mxu1 %v4977_v18  ;;  %v5019_v46 = vld [vmem:[%s5737_s2 + $0x16c] ss:$16 sps:$4 sm:$0xff]   ;;  %v5021_v48 = vld [vmem:[%s5737_s2 + $0x160] ss:$16 sps:$4 sm:$0xff]   ;;  %v5022_v50 = vld [vmem:[%s5737_s2 + $0x168] ss:$16 sps:$4 sm:$0xff]  }
  0xad   : > { %v335_v47 = vld [vmem:[%s6503_s0 + $0x8] sm:$0xff]  ;;  %v5023_v51 = vld [vmem:[%s5737_s2 + $0x184] ss:$16 sps:$4 sm:$0xff]   ;;  %v5027_v53 = vld [vmem:[%s5737_s2 + $0x180] ss:$16 sps:$4 sm:$0xff]   ;;  %p4850_p4 = scmp.ne.s32.totalorder %s5627_s17, 3 }
  0xae   : > { %v343_v49 = vpack.c.bf16 %v335_v47, %v335_v47  ;;  %v5025_v52 = vld [vmem:[%s5737_s2 + $0x18c] ss:$16 sps:$4 sm:$0xff]   ;;  %v5028_v54 = vld [vmem:[%s5737_s2 + $0x188] ss:$16 sps:$4 sm:$0xff]   ;;  %v5029_v55 = vld [vmem:[%s5737_s2 + $0x1a4] ss:$16 sps:$4 sm:$0xff]  }
  0xaf   : > { %1917 = vmatpush1.bf16.msra.mxu0 %v4979_v19  ;;  %2081 = vmatpush1.bf16.msra.mxu1 %v4980_v20  ;;  %v5031_v56 = vld [vmem:[%s5737_s2 + $0x1ac] ss:$16 sps:$4 sm:$0xff]   ;;  %v5033_v57 = vld [vmem:[%s5737_s2 + $0x1a0] ss:$16 sps:$4 sm:$0xff]   ;;  %v5034_v58 = vld [vmem:[%s5737_s2 + $0x1a8] ss:$16 sps:$4 sm:$0xff]  }
  0xb0   : > { %1918 = vmatprep.subr.bf16.mxu0 %v4981_v21  ;;  %2082 = vmatprep.subr.bf16.mxu1 %v4983_v22  ;;  %v5035_v59 = vld [vmem:[%s5737_s2 + $0x1c4] ss:$16 sps:$4 sm:$0xff]   ;;  %v5037_v60 = vld [vmem:[%s5737_s2 + $0x1cc] ss:$16 sps:$4 sm:$0xff]   ;;  %v5039_v61 = vld [vmem:[%s5737_s2 + $0x1c0] ss:$16 sps:$4 sm:$0xff]  }
  0xb1   : > { %1940 = vmatprep.mubr.bf16.mxu0 %v343_v49  ;;  %2104 = vmatprep.mubr.bf16.mxu1 %v343_v49  ;;  %v5040_v62 = vld [vmem:[%s5737_s2 + $0x1c8] ss:$16 sps:$4 sm:$0xff]   ;;  %v5041_v63 = vld [vmem:[%s5737_s2 + $0x1e4] ss:$16 sps:$4 sm:$0xff]   ;;  %v5043_v0 = vld [vmem:[%s5737_s2 + $0x1ec] ss:$16 sps:$4 sm:$0xff]  }
  0xb2   : > { %v5045_v1 = vld [vmem:[%s5737_s2 + $0x1e0] ss:$16 sps:$4 sm:$0xff]   ;;  %v5046_v2 = vld [vmem:[%s5737_s2 + $0x1e8] ss:$16 sps:$4 sm:$0xff]   ;;  %v5049_v4 = vld [vmem:[%s5737_s2 + $0x204] ss:$16 sps:$4 sm:$0xff]  }
  0xb3   : > { %1919 = vmatpush1.bf16.msra.mxu0 %v4985_v23  ;;  %2083 = vmatpush1.bf16.msra.mxu1 %v4986_v24  ;;  %v334_v3 = vld [vmem:[%s6503_s0] sm:$0xff]  ;;  %v5052_v5 = vld [vmem:[%s5737_s2 + $0x20c] ss:$16 sps:$4 sm:$0xff]   ;;  %v5050_v8 = vld [vmem:[%s5737_s2 + $0x208] ss:$16 sps:$4 sm:$0xff]  }
  0xb4   : > { %1920 = vmatprep.subr.bf16.mxu0 %v4987_v25  ;;  %2084 = vmatprep.subr.bf16.mxu1 %v4989_v26  ;;  %v342_v6 = vpack.c.bf16 %v334_v3, %v334_v3  ;;  %v5047_v7 = vld [vmem:[%s5737_s2 + $0x200] ss:$16 sps:$4 sm:$0xff]   ;;  %v5055_v9 = vld [vmem:[%s5737_s2 + $0x224] ss:$16 sps:$4 sm:$0xff]   ;;  %v5058_v10 = vld [vmem:[%s5737_s2 + $0x22c] ss:$16 sps:$4 sm:$0xff]  }
  0xb5   : > { %v5053_v11 = vld [vmem:[%s5737_s2 + $0x220] ss:$16 sps:$4 sm:$0xff]   ;;  %v5056_v12 = vld [vmem:[%s5737_s2 + $0x228] ss:$16 sps:$4 sm:$0xff]   ;;  %v5061_v13 = vld [vmem:[%s5737_s2 + $0x244] ss:$16 sps:$4 sm:$0xff]  }
  0xb6   : > { %v5064_v14 = vld [vmem:[%s5737_s2 + $0x24c] ss:$16 sps:$4 sm:$0xff]   ;;  %v5059_v15 = vld [vmem:[%s5737_s2 + $0x240] ss:$16 sps:$4 sm:$0xff]   ;;  %v5062_v16 = vld [vmem:[%s5737_s2 + $0x248] ss:$16 sps:$4 sm:$0xff]  }
  0xb7   : > { %1921 = vmatpush1.bf16.msra.mxu0 %v4991_v27  ;;  %2085 = vmatpush1.bf16.msra.mxu1 %v4992_v28  ;;  %v5067_v17 = vld [vmem:[%s5737_s2 + $0x264] ss:$16 sps:$4 sm:$0xff]   ;;  %v5070_v18 = vld [vmem:[%s5737_s2 + $0x26c] ss:$16 sps:$4 sm:$0xff]   ;;  %v5065_v19 = vld [vmem:[%s5737_s2 + $0x260] ss:$16 sps:$4 sm:$0xff]  }
  0xb8   : > { %1922 = vmatprep.subr.bf16.mxu0 %v4993_v29  ;;  %2086 = vmatprep.subr.bf16.mxu1 %v4995_v30  ;;  %v5068_v20 = vld [vmem:[%s5737_s2 + $0x268] ss:$16 sps:$4 sm:$0xff]   ;;  %v5073_v21 = vld [vmem:[%s5737_s2 + $0x284] ss:$16 sps:$4 sm:$0xff]   ;;  %v5076_v22 = vld [vmem:[%s5737_s2 + $0x28c] ss:$16 sps:$4 sm:$0xff]  }
  0xb9   : > { %v5071_v23 = vld [vmem:[%s5737_s2 + $0x280] ss:$16 sps:$4 sm:$0xff]   ;;  %v5074_v24 = vld [vmem:[%s5737_s2 + $0x288] ss:$16 sps:$4 sm:$0xff]   ;;  %v5079_v25 = vld [vmem:[%s5737_s2 + $0x2a4] ss:$16 sps:$4 sm:$0xff]  }
  0xba   : > { %v5082_v26 = vld [vmem:[%s5737_s2 + $0x2ac] ss:$16 sps:$4 sm:$0xff]   ;;  %v5077_v27 = vld [vmem:[%s5737_s2 + $0x2a0] ss:$16 sps:$4 sm:$0xff]   ;;  %v5080_v28 = vld [vmem:[%s5737_s2 + $0x2a8] ss:$16 sps:$4 sm:$0xff]  }
  0xbb   : > { %1923 = vmatpush1.bf16.msra.mxu0 %v4997_v31  ;;  %2087 = vmatpush1.bf16.msra.mxu1 %v4998_v32  ;;  %v5085_v29 = vld [vmem:[%s5737_s2 + $0x2c4] ss:$16 sps:$4 sm:$0xff]   ;;  %v5088_v30 = vld [vmem:[%s5737_s2 + $0x2cc] ss:$16 sps:$4 sm:$0xff]   ;;  %v5083_v32 = vld [vmem:[%s5737_s2 + $0x2c0] ss:$16 sps:$4 sm:$0xff]  }
  0xbc   : > { %1924 = vmatprep.subr.bf16.mxu0 %v4999_v33  ;;  %2088 = vmatprep.subr.bf16.mxu1 %v5001_v34  ;;  %v337_v31 = vld [vmem:[%s6503_s0 + $0x18] sm:$0xff]  ;;  %v5109_v47 = vld [vmem:[%s5737_s2 + $0x344] ss:$16 sps:$4 sm:$0xff]   ;;  %v5107_v49 = vld [vmem:[%s5737_s2 + $0x340] ss:$16 sps:$4 sm:$0xff]  }
  0xbd   : > { %v345_v33 = vpack.c.bf16 %v337_v31, %v337_v31  ;;  %v5086_v34 = vld [vmem:[%s5737_s2 + $0x2c8] ss:$16 sps:$4 sm:$0xff]   ;;  %v5139_v3 = vld [vmem:[%s5737_s2 + $0x3e4] ss:$16 sps:$4 sm:$0xff]  }
  0xbe   : > { %v5175_v31 = vld [vmem:[%s5737_s2 + $0x4a4] ss:$16 sps:$4 sm:$0xff]  }
  0xbf   : > { %1925 = vmatpush1.bf16.msra.mxu0 %v5003_v35  ;;  %2089 = vmatpush1.bf16.msra.mxu1 %v5004_v36  ;;  %v5091_v35 = vld [vmem:[%s5737_s2 + $0x2e4] ss:$16 sps:$4 sm:$0xff]   ;;  %v5094_v36 = vld [vmem:[%s5737_s2 + $0x2ec] ss:$16 sps:$4 sm:$0xff]  }
  0xc0   : > { %1926 = vmatprep.subr.bf16.mxu0 %v5005_v37  ;;  %2090 = vmatprep.subr.bf16.mxu1 %v5007_v38  ;;  %v5089_v37 = vld [vmem:[%s5737_s2 + $0x2e0] ss:$16 sps:$4 sm:$0xff]   ;;  %v5092_v38 = vld [vmem:[%s5737_s2 + $0x2e8] ss:$16 sps:$4 sm:$0xff]  }
  0xc3   : > { %1927 = vmatpush1.bf16.msra.mxu0 %v5009_v39  ;;  %2091 = vmatpush1.bf16.msra.mxu1 %v5010_v40  ;;  %v5097_v39 = vld [vmem:[%s5737_s2 + $0x304] ss:$16 sps:$4 sm:$0xff]   ;;  %v5100_v40 = vld [vmem:[%s5737_s2 + $0x30c] ss:$16 sps:$4 sm:$0xff]  }
  0xc4   : > { %1928 = vmatprep.subr.bf16.mxu0 %v5011_v41  ;;  %2092 = vmatprep.subr.bf16.mxu1 %v5013_v42  ;;  %v5095_v41 = vld [vmem:[%s5737_s2 + $0x300] ss:$16 sps:$4 sm:$0xff]   ;;  %v5098_v42 = vld [vmem:[%s5737_s2 + $0x308] ss:$16 sps:$4 sm:$0xff]  }
  0xc7   : > { %1929 = vmatpush1.bf16.msra.mxu0 %v5015_v43  ;;  %2093 = vmatpush1.bf16.msra.mxu1 %v5016_v44  ;;  %v5103_v43 = vld [vmem:[%s5737_s2 + $0x324] ss:$16 sps:$4 sm:$0xff]   ;;  %v5106_v44 = vld [vmem:[%s5737_s2 + $0x32c] ss:$16 sps:$4 sm:$0xff]  }
  0xc8   : > { %1930 = vmatprep.subr.bf16.mxu0 %v5017_v45  ;;  %2094 = vmatprep.subr.bf16.mxu1 %v5019_v46  ;;  %v5101_v45 = vld [vmem:[%s5737_s2 + $0x320] ss:$16 sps:$4 sm:$0xff]   ;;  %v5104_v46 = vld [vmem:[%s5737_s2 + $0x328] ss:$16 sps:$4 sm:$0xff]  }
  0xcb   : > { %1931 = vmatpush1.bf16.msra.mxu0 %v5021_v48  ;;  %2095 = vmatpush1.bf16.msra.mxu1 %v5022_v50  ;;  %v5112_v48 = vld [vmem:[%s5737_s2 + $0x34c] ss:$16 sps:$4 sm:$0xff]   ;;  %v5110_v50 = vld [vmem:[%s5737_s2 + $0x348] ss:$16 sps:$4 sm:$0xff]  }
  0xcc   : > { %1932 = vmatprep.subr.bf16.mxu0 %v5023_v51  ;;  %2096 = vmatprep.subr.bf16.mxu1 %v5025_v52  ;;  %v5115_v51 = vld [vmem:[%s5737_s2 + $0x364] ss:$16 sps:$4 sm:$0xff]   ;;  %v5118_v52 = vld [vmem:[%s5737_s2 + $0x36c] ss:$16 sps:$4 sm:$0xff]  }
  0xcf   : > { %1933 = vmatpush1.bf16.msra.mxu0 %v5027_v53  ;;  %2097 = vmatpush1.bf16.msra.mxu1 %v5028_v54  ;;  %v5113_v53 = vld [vmem:[%s5737_s2 + $0x360] ss:$16 sps:$4 sm:$0xff]   ;;  %v5116_v54 = vld [vmem:[%s5737_s2 + $0x368] ss:$16 sps:$4 sm:$0xff]  }
  0xd0   : > { %1934 = vmatprep.subr.bf16.mxu0 %v5029_v55  ;;  %2098 = vmatprep.subr.bf16.mxu1 %v5031_v56  ;;  %v5121_v55 = vld [vmem:[%s5737_s2 + $0x384] ss:$16 sps:$4 sm:$0xff]   ;;  %v5124_v56 = vld [vmem:[%s5737_s2 + $0x38c] ss:$16 sps:$4 sm:$0xff]  }
  0xd3   : > { %1935 = vmatpush1.bf16.msra.mxu0 %v5033_v57  ;;  %2099 = vmatpush1.bf16.msra.mxu1 %v5034_v58  ;;  %v5119_v57 = vld [vmem:[%s5737_s2 + $0x380] ss:$16 sps:$4 sm:$0xff]   ;;  %v5122_v58 = vld [vmem:[%s5737_s2 + $0x388] ss:$16 sps:$4 sm:$0xff]  }
  0xd4   : > { %1936 = vmatprep.subr.bf16.mxu0 %v5035_v59  ;;  %2100 = vmatprep.subr.bf16.mxu1 %v5037_v60  ;;  %v5127_v59 = vld [vmem:[%s5737_s2 + $0x3a4] ss:$16 sps:$4 sm:$0xff]   ;;  %v5130_v60 = vld [vmem:[%s5737_s2 + $0x3ac] ss:$16 sps:$4 sm:$0xff]  }
  0xd7   : > { %1937 = vmatpush1.bf16.msra.mxu0 %v5039_v61  ;;  %2101 = vmatpush1.bf16.msra.mxu1 %v5040_v62  ;;  %v5125_v61 = vld [vmem:[%s5737_s2 + $0x3a0] ss:$16 sps:$4 sm:$0xff]   ;;  %v5128_v62 = vld [vmem:[%s5737_s2 + $0x3a8] ss:$16 sps:$4 sm:$0xff]  }
  0xd8   : > { %1938 = vmatprep.subr.bf16.mxu0 %v5041_v63  ;;  %2102 = vmatprep.subr.bf16.mxu1 %v5043_v0  ;;  %v5133_v63 = vld [vmem:[%s5737_s2 + $0x3c4] ss:$16 sps:$4 sm:$0xff]   ;;  %v5136_v0 = vld [vmem:[%s5737_s2 + $0x3cc] ss:$16 sps:$4 sm:$0xff]  }
  0xdb   : > { %1939 = vmatpush1.bf16.msra.mxu0 %v5045_v1  ;;  %2103 = vmatpush1.bf16.msra.mxu1 %v5046_v2  ;;  %v5131_v1 = vld [vmem:[%s5737_s2 + $0x3c0] ss:$16 sps:$4 sm:$0xff]   ;;  %v5134_v2 = vld [vmem:[%s5737_s2 + $0x3c8] ss:$16 sps:$4 sm:$0xff]  }
  0xdc   : > { %1949 = vmatprep.subr.bf16.mxu0 %v5049_v4  ;;  %2113 = vmatprep.subr.bf16.mxu1 %v5052_v5  ;;  %v5142_v4 = vld [vmem:[%s5737_s2 + $0x3ec] ss:$16 sps:$4 sm:$0xff]   ;;  %v5137_v5 = vld [vmem:[%s5737_s2 + $0x3e0] ss:$16 sps:$4 sm:$0xff]  }
  0xde   : > { %1941 = vmatmul.mubr.bf16.vlgmr.msra.gmra.mrb[0].mxu0 %v342_v6  ;;  %2105 = vmatmul.mubr.bf16.vlgmr.msra.gmra.mrb[0].mxu1 %v342_v6  ;;  %v5140_v6 = vld [vmem:[%s5737_s2 + $0x3e8] ss:$16 sps:$4 sm:$0xff]  }
  0xdf   : > { %1950 = vmatpush1.bf16.msra.mxu0 %v5047_v7  ;;  %2114 = vmatpush1.bf16.msra.mxu1 %v5050_v8  ;;  %v5145_v7 = vld [vmem:[%s5737_s2 + $0x404] ss:$16 sps:$4 sm:$0xff]  }
  0xe0   : > { %1951 = vmatprep.subr.bf16.mxu0 %v5055_v9  ;;  %2115 = vmatprep.subr.bf16.mxu1 %v5058_v10  ;;  %v336_v8 = vld [vmem:[%s6503_s0 + $0x10] sm:$0xff]  ;;  %v5148_v9 = vld [vmem:[%s5737_s2 + $0x40c] ss:$16 sps:$4 sm:$0xff]  }
  0xe1   : > { %1981 = vmatprep.mubr.bf16.mxu0 %v345_v33  ;;  %2145 = vmatprep.mubr.bf16.mxu1 %v345_v33  ;;  %v5143_v10 = vld [vmem:[%s5737_s2 + $0x400] ss:$16 sps:$4 sm:$0xff]  }
  0xe2   : > { %v5173_v33 = vld [vmem:[%s5737_s2 + $0x4a0] ss:$16 sps:$4 sm:$0xff]  }
  0xe3   : > { %1952 = vmatpush1.bf16.msra.mxu0 %v5053_v11  ;;  %2116 = vmatpush1.bf16.msra.mxu1 %v5056_v12  ;;  %v5146_v11 = vld [vmem:[%s5737_s2 + $0x408] ss:$16 sps:$4 sm:$0xff]   ;;  %v344_v12 = vpack.c.bf16 %v336_v8, %v336_v8  ;;  %v5238_v8 = vld [vmem:[%s5737_s2 + $0x5ec] ss:$16 sps:$4 sm:$0xff]  }
  0xe4   : > { %1953 = vmatprep.subr.bf16.mxu0 %v5061_v13  ;;  %2117 = vmatprep.subr.bf16.mxu1 %v5064_v14  ;;  %v5151_v13 = vld [vmem:[%s5737_s2 + $0x424] ss:$16 sps:$4 sm:$0xff]   ;;  %v5154_v14 = vld [vmem:[%s5737_s2 + $0x42c] ss:$16 sps:$4 sm:$0xff]  }
  0xe7   : > { %1954 = vmatpush1.bf16.msra.mxu0 %v5059_v15  ;;  %2118 = vmatpush1.bf16.msra.mxu1 %v5062_v16  ;;  %v339_v15 = vld [vmem:[%s6503_s0 + $0x28] sm:$0xff] }
  0xe8   : > { %1955 = vmatprep.subr.bf16.mxu0 %v5067_v17  ;;  %2119 = vmatprep.subr.bf16.mxu1 %v5070_v18  ;;  %v347_v16 = vpack.c.bf16 %v339_v15, %v339_v15  ;;  %v5149_v17 = vld [vmem:[%s5737_s2 + $0x420] ss:$16 sps:$4 sm:$0xff]   ;;  %v5152_v18 = vld [vmem:[%s5737_s2 + $0x428] ss:$16 sps:$4 sm:$0xff]  }
  0xe9   : > { %v341_v15 = vld [vmem:[%s6503_s0 + $0x38] sm:$0xff] }
  0xeb   : > { %1956 = vmatpush1.bf16.msra.mxu0 %v5065_v19  ;;  %2120 = vmatpush1.bf16.msra.mxu1 %v5068_v20  ;;  %v5157_v19 = vld [vmem:[%s5737_s2 + $0x444] ss:$16 sps:$4 sm:$0xff]   ;;  %v5160_v20 = vld [vmem:[%s5737_s2 + $0x44c] ss:$16 sps:$4 sm:$0xff]  }
  0xec   : > { %1957 = vmatprep.subr.bf16.mxu0 %v5073_v21  ;;  %2121 = vmatprep.subr.bf16.mxu1 %v5076_v22  ;;  %v5155_v21 = vld [vmem:[%s5737_s2 + $0x440] ss:$16 sps:$4 sm:$0xff]   ;;  %v5158_v22 = vld [vmem:[%s5737_s2 + $0x448] ss:$16 sps:$4 sm:$0xff]  }
  0xef   : > { %1958 = vmatpush1.bf16.msra.mxu0 %v5071_v23  ;;  %2122 = vmatpush1.bf16.msra.mxu1 %v5074_v24  ;;  %v5163_v23 = vld [vmem:[%s5737_s2 + $0x464] ss:$16 sps:$4 sm:$0xff]   ;;  %v5166_v24 = vld [vmem:[%s5737_s2 + $0x46c] ss:$16 sps:$4 sm:$0xff]  }
  0xf0   : > { %1959 = vmatprep.subr.bf16.mxu0 %v5079_v25  ;;  %2123 = vmatprep.subr.bf16.mxu1 %v5082_v26  ;;  %v5161_v25 = vld [vmem:[%s5737_s2 + $0x460] ss:$16 sps:$4 sm:$0xff]   ;;  %v5164_v26 = vld [vmem:[%s5737_s2 + $0x468] ss:$16 sps:$4 sm:$0xff]  }
  0xf3   : > { %1960 = vmatpush1.bf16.msra.mxu0 %v5077_v27  ;;  %2124 = vmatpush1.bf16.msra.mxu1 %v5080_v28  ;;  %v5169_v27 = vld [vmem:[%s5737_s2 + $0x484] ss:$16 sps:$4 sm:$0xff]   ;;  %v5172_v28 = vld [vmem:[%s5737_s2 + $0x48c] ss:$16 sps:$4 sm:$0xff]  }
  0xf4   : > { %1961 = vmatprep.subr.bf16.mxu0 %v5085_v29  ;;  %2125 = vmatprep.subr.bf16.mxu1 %v5088_v30  ;;  %v5167_v29 = vld [vmem:[%s5737_s2 + $0x480] ss:$16 sps:$4 sm:$0xff]   ;;  %v5170_v30 = vld [vmem:[%s5737_s2 + $0x488] ss:$16 sps:$4 sm:$0xff]  }
  0xf7   : > { %1962 = vmatpush1.bf16.msra.mxu0 %v5083_v32  ;;  %2126 = vmatpush1.bf16.msra.mxu1 %v5086_v34  ;;  %v5178_v32 = vld [vmem:[%s5737_s2 + $0x4ac] ss:$16 sps:$4 sm:$0xff]   ;;  %v5176_v34 = vld [vmem:[%s5737_s2 + $0x4a8] ss:$16 sps:$4 sm:$0xff]  }
  0xf8   : > { %1963 = vmatprep.subr.bf16.mxu0 %v5091_v35  ;;  %2127 = vmatprep.subr.bf16.mxu1 %v5094_v36  ;;  %v5181_v35 = vld [vmem:[%s5737_s2 + $0x4c4] ss:$16 sps:$4 sm:$0xff]   ;;  %v5184_v36 = vld [vmem:[%s5737_s2 + $0x4cc] ss:$16 sps:$4 sm:$0xff]  }
  0xfb   : > { %1964 = vmatpush1.bf16.msra.mxu0 %v5089_v37  ;;  %2128 = vmatpush1.bf16.msra.mxu1 %v5092_v38  ;;  %v5179_v37 = vld [vmem:[%s5737_s2 + $0x4c0] ss:$16 sps:$4 sm:$0xff]   ;;  %v5182_v38 = vld [vmem:[%s5737_s2 + $0x4c8] ss:$16 sps:$4 sm:$0xff]  }
  0xfc   : > { %1965 = vmatprep.subr.bf16.mxu0 %v5097_v39  ;;  %2129 = vmatprep.subr.bf16.mxu1 %v5100_v40  ;;  %v5187_v39 = vld [vmem:[%s5737_s2 + $0x4e4] ss:$16 sps:$4 sm:$0xff]   ;;  %v5190_v40 = vld [vmem:[%s5737_s2 + $0x4ec] ss:$16 sps:$4 sm:$0xff]  }
  0xff   : > { %1966 = vmatpush1.bf16.msra.mxu0 %v5095_v41  ;;  %2130 = vmatpush1.bf16.msra.mxu1 %v5098_v42  ;;  %v5185_v41 = vld [vmem:[%s5737_s2 + $0x4e0] ss:$16 sps:$4 sm:$0xff]   ;;  %v5188_v42 = vld [vmem:[%s5737_s2 + $0x4e8] ss:$16 sps:$4 sm:$0xff]  }
 0x100   : > { %1967 = vmatprep.subr.bf16.mxu0 %v5103_v43  ;;  %2131 = vmatprep.subr.bf16.mxu1 %v5106_v44  ;;  %v5193_v43 = vld [vmem:[%s5737_s2 + $0x504] ss:$16 sps:$4 sm:$0xff]   ;;  %v5196_v44 = vld [vmem:[%s5737_s2 + $0x50c] ss:$16 sps:$4 sm:$0xff]  }
 0x103   : > { %1968 = vmatpush1.bf16.msra.mxu0 %v5101_v45  ;;  %2132 = vmatpush1.bf16.msra.mxu1 %v5104_v46  ;;  %v5191_v45 = vld [vmem:[%s5737_s2 + $0x500] ss:$16 sps:$4 sm:$0xff]   ;;  %v5194_v46 = vld [vmem:[%s5737_s2 + $0x508] ss:$16 sps:$4 sm:$0xff]  }
 0x104   : > { %1969 = vmatprep.subr.bf16.mxu0 %v5109_v47  ;;  %2133 = vmatprep.subr.bf16.mxu1 %v5112_v48  ;;  %v5199_v47 = vld [vmem:[%s5737_s2 + $0x524] ss:$16 sps:$4 sm:$0xff]   ;;  %v5202_v48 = vld [vmem:[%s5737_s2 + $0x52c] ss:$16 sps:$4 sm:$0xff]  }
 0x107   : > { %1970 = vmatpush1.bf16.msra.mxu0 %v5107_v49  ;;  %2134 = vmatpush1.bf16.msra.mxu1 %v5110_v50  ;;  %v5197_v49 = vld [vmem:[%s5737_s2 + $0x520] ss:$16 sps:$4 sm:$0xff]   ;;  %v5200_v50 = vld [vmem:[%s5737_s2 + $0x528] ss:$16 sps:$4 sm:$0xff]  }
 0x108   : > { %1971 = vmatprep.subr.bf16.mxu0 %v5115_v51  ;;  %2135 = vmatprep.subr.bf16.mxu1 %v5118_v52  ;;  %v5205_v51 = vld [vmem:[%s5737_s2 + $0x544] ss:$16 sps:$4 sm:$0xff]   ;;  %v5208_v52 = vld [vmem:[%s5737_s2 + $0x54c] ss:$16 sps:$4 sm:$0xff]  }
 0x10b   : > { %1972 = vmatpush1.bf16.msra.mxu0 %v5113_v53  ;;  %2136 = vmatpush1.bf16.msra.mxu1 %v5116_v54  ;;  %v5203_v53 = vld [vmem:[%s5737_s2 + $0x540] ss:$16 sps:$4 sm:$0xff]   ;;  %v5206_v54 = vld [vmem:[%s5737_s2 + $0x548] ss:$16 sps:$4 sm:$0xff]  }
 0x10c   : > { %1973 = vmatprep.subr.bf16.mxu0 %v5121_v55  ;;  %2137 = vmatprep.subr.bf16.mxu1 %v5124_v56  ;;  %v5211_v55 = vld [vmem:[%s5737_s2 + $0x564] ss:$16 sps:$4 sm:$0xff]   ;;  %v5214_v56 = vld [vmem:[%s5737_s2 + $0x56c] ss:$16 sps:$4 sm:$0xff]  }
 0x10f   : > { %1974 = vmatpush1.bf16.msra.mxu0 %v5119_v57  ;;  %2138 = vmatpush1.bf16.msra.mxu1 %v5122_v58  ;;  %v5209_v57 = vld [vmem:[%s5737_s2 + $0x560] ss:$16 sps:$4 sm:$0xff]   ;;  %v5212_v58 = vld [vmem:[%s5737_s2 + $0x568] ss:$16 sps:$4 sm:$0xff]  }
 0x110   : > { %1975 = vmatprep.subr.bf16.mxu0 %v5127_v59  ;;  %2139 = vmatprep.subr.bf16.mxu1 %v5130_v60  ;;  %v5217_v59 = vld [vmem:[%s5737_s2 + $0x584] ss:$16 sps:$4 sm:$0xff]   ;;  %v5220_v60 = vld [vmem:[%s5737_s2 + $0x58c] ss:$16 sps:$4 sm:$0xff]  }
 0x113   : > { %1976 = vmatpush1.bf16.msra.mxu0 %v5125_v61  ;;  %2140 = vmatpush1.bf16.msra.mxu1 %v5128_v62  ;;  %v5215_v61 = vld [vmem:[%s5737_s2 + $0x580] ss:$16 sps:$4 sm:$0xff]   ;;  %v5218_v62 = vld [vmem:[%s5737_s2 + $0x588] ss:$16 sps:$4 sm:$0xff]  }
 0x114   : > { %1977 = vmatprep.subr.bf16.mxu0 %v5133_v63  ;;  %2141 = vmatprep.subr.bf16.mxu1 %v5136_v0  ;;  %v5223_v63 = vld [vmem:[%s5737_s2 + $0x5a4] ss:$16 sps:$4 sm:$0xff]   ;;  %v5226_v0 = vld [vmem:[%s5737_s2 + $0x5ac] ss:$16 sps:$4 sm:$0xff]  }
 0x117   : > { %1978 = vmatpush1.bf16.msra.mxu0 %v5131_v1  ;;  %2142 = vmatpush1.bf16.msra.mxu1 %v5134_v2  ;;  %v5221_v1 = vld [vmem:[%s5737_s2 + $0x5a0] ss:$16 sps:$4 sm:$0xff]   ;;  %v5224_v2 = vld [vmem:[%s5737_s2 + $0x5a8] ss:$16 sps:$4 sm:$0xff]  }
 0x118   : > { %1979 = vmatprep.subr.bf16.mxu0 %v5139_v3  ;;  %2143 = vmatprep.subr.bf16.mxu1 %v5142_v4  ;;  %v5229_v3 = vld [vmem:[%s5737_s2 + $0x5c4] ss:$16 sps:$4 sm:$0xff]   ;;  %v5232_v4 = vld [vmem:[%s5737_s2 + $0x5cc] ss:$16 sps:$4 sm:$0xff]  }
 0x11b   : > { %1980 = vmatpush1.bf16.msra.mxu0 %v5137_v5  ;;  %2144 = vmatpush1.bf16.msra.mxu1 %v5140_v6  ;;  %v5227_v5 = vld [vmem:[%s5737_s2 + $0x5c0] ss:$16 sps:$4 sm:$0xff]   ;;  %v5230_v6 = vld [vmem:[%s5737_s2 + $0x5c8] ss:$16 sps:$4 sm:$0xff]  }
 0x11c   : > { %1990 = vmatprep.subr.bf16.mxu0 %v5145_v7  ;;  %2154 = vmatprep.subr.bf16.mxu1 %v5148_v9  ;;  %v5235_v7 = vld [vmem:[%s5737_s2 + $0x5e4] ss:$16 sps:$4 sm:$0xff]   ;;  %v5233_v9 = vld [vmem:[%s5737_s2 + $0x5e0] ss:$16 sps:$4 sm:$0xff]  }
 0x11e   : > { %1982 = vmatmul.mubr.bf16.vlgmr.msra.gmra.mrb[0].mxu0 %v344_v12  ;;  %2146 = vmatmul.mubr.bf16.vlgmr.msra.gmra.mrb[0].mxu1 %v344_v12  ;;  %v5241_v12 = vld [vmem:[%s5737_s2 + $0x604] ss:$16 sps:$4 sm:$0xff]  }
 0x11f   : > { %1991 = vmatpush1.bf16.msra.mxu0 %v5143_v10  ;;  %2155 = vmatpush1.bf16.msra.mxu1 %v5146_v11  ;;  %v5236_v10 = vld [vmem:[%s5737_s2 + $0x5e8] ss:$16 sps:$4 sm:$0xff]   ;;  %v338_v11 = vld [vmem:[%s6503_s0 + $0x20] sm:$0xff] }
 0x120   : > { %1992 = vmatprep.subr.bf16.mxu0 %v5151_v13  ;;  %2156 = vmatprep.subr.bf16.mxu1 %v5154_v14  ;;  %v5244_v13 = vld [vmem:[%s5737_s2 + $0x60c] ss:$16 sps:$4 sm:$0xff]   ;;  %v346_v14 = vpack.c.bf16 %v338_v11, %v338_v11  ;;  %v5331_v11 = vld [vmem:[%s5737_s2 + $0x7e4] ss:$16 sps:$4 sm:$0xff]  }
 0x121   : > { %2022 = vmatprep.mubr.bf16.mxu0 %v347_v16  ;;  %2186 = vmatprep.mubr.bf16.mxu1 %v347_v16  ;;  %v5239_v16 = vld [vmem:[%s5737_s2 + $0x600] ss:$16 sps:$4 sm:$0xff]  }
 0x123   : > { %1993 = vmatpush1.bf16.msra.mxu0 %v5149_v17  ;;  %2157 = vmatpush1.bf16.msra.mxu1 %v5152_v18  ;;  %v5242_v17 = vld [vmem:[%s5737_s2 + $0x608] ss:$16 sps:$4 sm:$0xff]   ;;  %v5247_v18 = vld [vmem:[%s5737_s2 + $0x624] ss:$16 sps:$4 sm:$0xff]  }
 0x124   : > { %1994 = vmatprep.subr.bf16.mxu0 %v5157_v19  ;;  %2158 = vmatprep.subr.bf16.mxu1 %v5160_v20  ;;  %v5250_v19 = vld [vmem:[%s5737_s2 + $0x62c] ss:$16 sps:$4 sm:$0xff]   ;;  %v349_v20 = vpack.c.bf16 %v341_v15, %v341_v15 }
 0x125   : > { %v2380_v15 = vld [vmem:[%s5750_s27 + $0x400] sm:$0xff] }
 0x127   : > { %1995 = vmatpush1.bf16.msra.mxu0 %v5155_v21  ;;  %2159 = vmatpush1.bf16.msra.mxu1 %v5158_v22  ;;  %v5245_v21 = vld [vmem:[%s5737_s2 + $0x620] ss:$16 sps:$4 sm:$0xff]   ;;  %v5248_v22 = vld [vmem:[%s5737_s2 + $0x628] ss:$16 sps:$4 sm:$0xff]  }
 0x128   : > { %1996 = vmatprep.subr.bf16.mxu0 %v5163_v23  ;;  %2160 = vmatprep.subr.bf16.mxu1 %v5166_v24  ;;  %v5253_v23 = vld [vmem:[%s5737_s2 + $0x644] ss:$16 sps:$4 sm:$0xff]   ;;  %v5256_v24 = vld [vmem:[%s5737_s2 + $0x64c] ss:$16 sps:$4 sm:$0xff]  }
 0x12b   : > { %1997 = vmatpush1.bf16.msra.mxu0 %v5161_v25  ;;  %2161 = vmatpush1.bf16.msra.mxu1 %v5164_v26  ;;  %v5251_v25 = vld [vmem:[%s5737_s2 + $0x640] ss:$16 sps:$4 sm:$0xff]   ;;  %v5254_v26 = vld [vmem:[%s5737_s2 + $0x648] ss:$16 sps:$4 sm:$0xff]  }
 0x12c   : > { %1998 = vmatprep.subr.bf16.mxu0 %v5169_v27  ;;  %2162 = vmatprep.subr.bf16.mxu1 %v5172_v28  ;;  %v5259_v27 = vld [vmem:[%s5737_s2 + $0x664] ss:$16 sps:$4 sm:$0xff]   ;;  %v5262_v28 = vld [vmem:[%s5737_s2 + $0x66c] ss:$16 sps:$4 sm:$0xff]  }
 0x12f   : > { %1999 = vmatpush1.bf16.msra.mxu0 %v5167_v29  ;;  %2163 = vmatpush1.bf16.msra.mxu1 %v5170_v30  ;;  %v5257_v29 = vld [vmem:[%s5737_s2 + $0x660] ss:$16 sps:$4 sm:$0xff]   ;;  %v5260_v30 = vld [vmem:[%s5737_s2 + $0x668] ss:$16 sps:$4 sm:$0xff]  }
 0x130   : > { %2000 = vmatprep.subr.bf16.mxu0 %v5175_v31  ;;  %2164 = vmatprep.subr.bf16.mxu1 %v5178_v32  ;;  %v5265_v31 = vld [vmem:[%s5737_s2 + $0x684] ss:$16 sps:$4 sm:$0xff]   ;;  %v5268_v32 = vld [vmem:[%s5737_s2 + $0x68c] ss:$16 sps:$4 sm:$0xff]  }
 0x133   : > { %2001 = vmatpush1.bf16.msra.mxu0 %v5173_v33  ;;  %2165 = vmatpush1.bf16.msra.mxu1 %v5176_v34  ;;  %v5263_v33 = vld [vmem:[%s5737_s2 + $0x680] ss:$16 sps:$4 sm:$0xff]   ;;  %v5266_v34 = vld [vmem:[%s5737_s2 + $0x688] ss:$16 sps:$4 sm:$0xff]  }
 0x134   : > { %2002 = vmatprep.subr.bf16.mxu0 %v5181_v35  ;;  %2166 = vmatprep.subr.bf16.mxu1 %v5184_v36  ;;  %v5271_v35 = vld [vmem:[%s5737_s2 + $0x6a4] ss:$16 sps:$4 sm:$0xff]   ;;  %v5274_v36 = vld [vmem:[%s5737_s2 + $0x6ac] ss:$16 sps:$4 sm:$0xff]  }
 0x137   : > { %2003 = vmatpush1.bf16.msra.mxu0 %v5179_v37  ;;  %2167 = vmatpush1.bf16.msra.mxu1 %v5182_v38  ;;  %v5269_v37 = vld [vmem:[%s5737_s2 + $0x6a0] ss:$16 sps:$4 sm:$0xff]   ;;  %v5272_v38 = vld [vmem:[%s5737_s2 + $0x6a8] ss:$16 sps:$4 sm:$0xff]  }
 0x138   : > { %2004 = vmatprep.subr.bf16.mxu0 %v5187_v39  ;;  %2168 = vmatprep.subr.bf16.mxu1 %v5190_v40  ;;  %v5277_v39 = vld [vmem:[%s5737_s2 + $0x6c4] ss:$16 sps:$4 sm:$0xff]   ;;  %v5280_v40 = vld [vmem:[%s5737_s2 + $0x6cc] ss:$16 sps:$4 sm:$0xff]  }
 0x13b   : > { %2005 = vmatpush1.bf16.msra.mxu0 %v5185_v41  ;;  %2169 = vmatpush1.bf16.msra.mxu1 %v5188_v42  ;;  %v5275_v41 = vld [vmem:[%s5737_s2 + $0x6c0] ss:$16 sps:$4 sm:$0xff]   ;;  %v5278_v42 = vld [vmem:[%s5737_s2 + $0x6c8] ss:$16 sps:$4 sm:$0xff]  }
 0x13c   : > { %2006 = vmatprep.subr.bf16.mxu0 %v5193_v43  ;;  %2170 = vmatprep.subr.bf16.mxu1 %v5196_v44  ;;  %v5283_v43 = vld [vmem:[%s5737_s2 + $0x6e4] ss:$16 sps:$4 sm:$0xff]   ;;  %v5286_v44 = vld [vmem:[%s5737_s2 + $0x6ec] ss:$16 sps:$4 sm:$0xff]  }
 0x13f   : > { %2007 = vmatpush1.bf16.msra.mxu0 %v5191_v45  ;;  %2171 = vmatpush1.bf16.msra.mxu1 %v5194_v46  ;;  %v5281_v45 = vld [vmem:[%s5737_s2 + $0x6e0] ss:$16 sps:$4 sm:$0xff]   ;;  %v5284_v46 = vld [vmem:[%s5737_s2 + $0x6e8] ss:$16 sps:$4 sm:$0xff]  }
 0x140   : > { %2008 = vmatprep.subr.bf16.mxu0 %v5199_v47  ;;  %2172 = vmatprep.subr.bf16.mxu1 %v5202_v48  ;;  %v5289_v47 = vld [vmem:[%s5737_s2 + $0x704] ss:$16 sps:$4 sm:$0xff]   ;;  %v5292_v48 = vld [vmem:[%s5737_s2 + $0x70c] ss:$16 sps:$4 sm:$0xff]  }
 0x143   : > { %2009 = vmatpush1.bf16.msra.mxu0 %v5197_v49  ;;  %2173 = vmatpush1.bf16.msra.mxu1 %v5200_v50  ;;  %v5287_v49 = vld [vmem:[%s5737_s2 + $0x700] ss:$16 sps:$4 sm:$0xff]   ;;  %v5290_v50 = vld [vmem:[%s5737_s2 + $0x708] ss:$16 sps:$4 sm:$0xff]  }
 0x144   : > { %2010 = vmatprep.subr.bf16.mxu0 %v5205_v51  ;;  %2174 = vmatprep.subr.bf16.mxu1 %v5208_v52  ;;  %v5295_v51 = vld [vmem:[%s5737_s2 + $0x724] ss:$16 sps:$4 sm:$0xff]   ;;  %v5298_v52 = vld [vmem:[%s5737_s2 + $0x72c] ss:$16 sps:$4 sm:$0xff]  }
 0x147   : > { %2011 = vmatpush1.bf16.msra.mxu0 %v5203_v53  ;;  %2175 = vmatpush1.bf16.msra.mxu1 %v5206_v54  ;;  %v5293_v53 = vld [vmem:[%s5737_s2 + $0x720] ss:$16 sps:$4 sm:$0xff]   ;;  %v5296_v54 = vld [vmem:[%s5737_s2 + $0x728] ss:$16 sps:$4 sm:$0xff]  }
 0x148   : > { %2012 = vmatprep.subr.bf16.mxu0 %v5211_v55  ;;  %2176 = vmatprep.subr.bf16.mxu1 %v5214_v56  ;;  %v5301_v55 = vld [vmem:[%s5737_s2 + $0x744] ss:$16 sps:$4 sm:$0xff]   ;;  %v5304_v56 = vld [vmem:[%s5737_s2 + $0x74c] ss:$16 sps:$4 sm:$0xff]  }
 0x14b   : > { %2013 = vmatpush1.bf16.msra.mxu0 %v5209_v57  ;;  %2177 = vmatpush1.bf16.msra.mxu1 %v5212_v58  ;;  %v5299_v57 = vld [vmem:[%s5737_s2 + $0x740] ss:$16 sps:$4 sm:$0xff]   ;;  %v5302_v58 = vld [vmem:[%s5737_s2 + $0x748] ss:$16 sps:$4 sm:$0xff]  }
 0x14c   : > { %2014 = vmatprep.subr.bf16.mxu0 %v5217_v59  ;;  %2178 = vmatprep.subr.bf16.mxu1 %v5220_v60  ;;  %v5307_v59 = vld [vmem:[%s5737_s2 + $0x764] ss:$16 sps:$4 sm:$0xff]   ;;  %v5310_v60 = vld [vmem:[%s5737_s2 + $0x76c] ss:$16 sps:$4 sm:$0xff]  }
 0x14f   : > { %2015 = vmatpush1.bf16.msra.mxu0 %v5215_v61  ;;  %2179 = vmatpush1.bf16.msra.mxu1 %v5218_v62  ;;  %v5305_v61 = vld [vmem:[%s5737_s2 + $0x760] ss:$16 sps:$4 sm:$0xff]   ;;  %v5308_v62 = vld [vmem:[%s5737_s2 + $0x768] ss:$16 sps:$4 sm:$0xff]  }
 0x150   : > { %2016 = vmatprep.subr.bf16.mxu0 %v5223_v63  ;;  %2180 = vmatprep.subr.bf16.mxu1 %v5226_v0  ;;  %v5313_v63 = vld [vmem:[%s5737_s2 + $0x784] ss:$16 sps:$4 sm:$0xff]   ;;  %v5316_v0 = vld [vmem:[%s5737_s2 + $0x78c] ss:$16 sps:$4 sm:$0xff]  }
 0x153   : > { %2017 = vmatpush1.bf16.msra.mxu0 %v5221_v1  ;;  %2181 = vmatpush1.bf16.msra.mxu1 %v5224_v2  ;;  %v5311_v1 = vld [vmem:[%s5737_s2 + $0x780] ss:$16 sps:$4 sm:$0xff]   ;;  %v5314_v2 = vld [vmem:[%s5737_s2 + $0x788] ss:$16 sps:$4 sm:$0xff]  }
 0x154   : > { %2018 = vmatprep.subr.bf16.mxu0 %v5229_v3  ;;  %2182 = vmatprep.subr.bf16.mxu1 %v5232_v4  ;;  %v5319_v3 = vld [vmem:[%s5737_s2 + $0x7a4] ss:$16 sps:$4 sm:$0xff]   ;;  %v5322_v4 = vld [vmem:[%s5737_s2 + $0x7ac] ss:$16 sps:$4 sm:$0xff]  }
 0x157   : > { %2019 = vmatpush1.bf16.msra.mxu0 %v5227_v5  ;;  %2183 = vmatpush1.bf16.msra.mxu1 %v5230_v6  ;;  %v5317_v5 = vld [vmem:[%s5737_s2 + $0x7a0] ss:$16 sps:$4 sm:$0xff]   ;;  %v5320_v6 = vld [vmem:[%s5737_s2 + $0x7a8] ss:$16 sps:$4 sm:$0xff]  }
 0x158   : > { %2020 = vmatprep.subr.bf16.mxu0 %v5235_v7  ;;  %2184 = vmatprep.subr.bf16.mxu1 %v5238_v8  ;;  %v5325_v7 = vld [vmem:[%s5737_s2 + $0x7c4] ss:$16 sps:$4 sm:$0xff]   ;;  %v5328_v8 = vld [vmem:[%s5737_s2 + $0x7cc] ss:$16 sps:$4 sm:$0xff]  }
 0x15b   : > { %2021 = vmatpush1.bf16.msra.mxu0 %v5233_v9  ;;  %2185 = vmatpush1.bf16.msra.mxu1 %v5236_v10  ;;  %v5323_v9 = vld [vmem:[%s5737_s2 + $0x7c0] ss:$16 sps:$4 sm:$0xff]   ;;  %v5326_v10 = vld [vmem:[%s5737_s2 + $0x7c8] ss:$16 sps:$4 sm:$0xff]  }
 0x15c   : > { %2031 = vmatprep.subr.bf16.mxu0 %v5241_v12  ;;  %2195 = vmatprep.subr.bf16.mxu1 %v5244_v13  ;;  %v5334_v12 = vld [vmem:[%s5737_s2 + $0x7ec] ss:$16 sps:$4 sm:$0xff]  }
 0x15d   : > { %v2252_v13 = vld [vmem:[%s5750_s27] sm:$0xff] }
 0x15e   : > { %2023 = vmatmul.mubr.bf16.vlgmr.msra.gmra.mrb[0].mxu0 %v346_v14  ;;  %2187 = vmatmul.mubr.bf16.vlgmr.msra.gmra.mrb[0].mxu1 %v346_v14  ;;  %v2256_v14 = vld [vmem:[%s5750_s27 + $0x20] sm:$0xff] }
 0x15f   : > { %2032 = vmatpush1.bf16.msra.mxu0 %v5239_v16  ;;  %2196 = vmatpush1.bf16.msra.mxu1 %v5242_v17  ;;  %v2384_v16 = vld [vmem:[%s5750_s27 + $0x420] sm:$0xff]  ;;  %v5329_v17 = vld [vmem:[%s5737_s2 + $0x7e0] ss:$16 sps:$4 sm:$0xff]  }
 0x160   : > { %2033 = vmatprep.subr.bf16.mxu0 %v5247_v18  ;;  %2197 = vmatprep.subr.bf16.mxu1 %v5250_v19  ;;  %v5332_v18 = vld [vmem:[%s5737_s2 + $0x7e8] ss:$16 sps:$4 sm:$0xff]   ;;  %v340_v19 = vld [vmem:[%s6503_s0 + $0x30] sm:$0xff] }
 0x161   : > { %2063 = vmatprep.mubr.bf16.mxu0 %v349_v20  ;;  %2227 = vmatprep.mubr.bf16.mxu1 %v349_v20  ;;  %v4595_v20 = vcombine.high %v2252_v13, %v2256_v14 }
 0x163   : > { %2034 = vmatpush1.bf16.msra.mxu0 %v5245_v21  ;;  %2198 = vmatpush1.bf16.msra.mxu1 %v5248_v22  ;;  %v4723_v21 = vcombine.high %v2380_v15, %v2384_v16  ;;  %v2260_v22 = vld [vmem:[%s5750_s27 + $0x40] sm:$0xff] }
 0x164   : > { %2035 = vmatprep.subr.bf16.mxu0 %v5253_v23  ;;  %2199 = vmatprep.subr.bf16.mxu1 %v5256_v24  ;;  %v2264_v23 = vld [vmem:[%s5750_s27 + $0x60] sm:$0xff] }
 0x165   : > { %v2388_v24 = vld [vmem:[%s5750_s27 + $0x440] sm:$0xff] }
 0x167   : > { %2036 = vmatpush1.bf16.msra.mxu0 %v5251_v25  ;;  %2200 = vmatpush1.bf16.msra.mxu1 %v5254_v26  ;;  %v2392_v25 = vld [vmem:[%s5750_s27 + $0x460] sm:$0xff]  ;;  %v348_v26 = vpack.c.bf16 %v340_v19, %v340_v19 }
 0x168   : > { %2037 = vmatprep.subr.bf16.mxu0 %v5259_v27  ;;  %2201 = vmatprep.subr.bf16.mxu1 %v5262_v28  ;;  %v4594_v27 = vcombine.low %v2252_v13, %v2256_v14  ;;  %v4722_v28 = vcombine.low %v2380_v15, %v2384_v16  ;;  %v2316_v15 = vld [vmem:[%s5750_s27 + $0x200] sm:$0xff] }
 0x169   : > { %v2320_v16 = vld [vmem:[%s5750_s27 + $0x220] sm:$0xff] }
 0x16b   : > { %2038 = vmatpush1.bf16.msra.mxu0 %v5257_v29  ;;  %2202 = vmatpush1.bf16.msra.mxu1 %v5260_v30  ;;  %v4603_v29 = vcombine.high %v2260_v22, %v2264_v23  ;;  %v4731_v30 = vcombine.high %v2388_v24, %v2392_v25 }
 0x16c   : > { %2039 = vmatprep.subr.bf16.mxu0 %v5265_v31  ;;  %2203 = vmatprep.subr.bf16.mxu1 %v5268_v32  ;;  %v2268_v31 = vld [vmem:[%s5750_s27 + $0x80] sm:$0xff] }
 0x16d   : > { %v2272_v32 = vld [vmem:[%s5750_s27 + $0xa0] sm:$0xff] }
 0x16f   : > { %2040 = vmatpush1.bf16.msra.mxu0 %v5263_v33  ;;  %2204 = vmatpush1.bf16.msra.mxu1 %v5266_v34  ;;  %v2396_v33 = vld [vmem:[%s5750_s27 + $0x480] sm:$0xff] }
 0x170   : > { %2041 = vmatprep.subr.bf16.mxu0 %v5271_v35  ;;  %2205 = vmatprep.subr.bf16.mxu1 %v5274_v36  ;;  %v2400_v34 = vld [vmem:[%s5750_s27 + $0x4a0] sm:$0xff]  ;;  %v4602_v35 = vcombine.low %v2260_v22, %v2264_v23  ;;  %v4730_v36 = vcombine.low %v2388_v24, %v2392_v25 }
 0x171   : > { %v2324_v23 = vld [vmem:[%s5750_s27 + $0x240] sm:$0xff] }
 0x172   : > { %v2328_v24 = vld [vmem:[%s5750_s27 + $0x260] sm:$0xff] }
 0x173   : > { %2042 = vmatpush1.bf16.msra.mxu0 %v5269_v37  ;;  %2206 = vmatpush1.bf16.msra.mxu1 %v5272_v38  ;;  %v4611_v37 = vcombine.high %v2268_v31, %v2272_v32  ;;  %v4739_v38 = vcombine.high %v2396_v33, %v2400_v34  ;;  %v2452_v25 = vld [vmem:[%s5750_s27 + $0x640] sm:$0xff] }
 0x174   : > { %2043 = vmatprep.subr.bf16.mxu0 %v5277_v39  ;;  %2207 = vmatprep.subr.bf16.mxu1 %v5280_v40  ;;  %v2276_v39 = vld [vmem:[%s5750_s27 + $0xc0] sm:$0xff] }
 0x175   : > { %v2280_v40 = vld [vmem:[%s5750_s27 + $0xe0] sm:$0xff] }
 0x177   : > { %2044 = vmatpush1.bf16.msra.mxu0 %v5275_v41  ;;  %2208 = vmatpush1.bf16.msra.mxu1 %v5278_v42  ;;  %v2404_v41 = vld [vmem:[%s5750_s27 + $0x4c0] sm:$0xff] }
 0x178   : > { %2045 = vmatprep.subr.bf16.mxu0 %v5283_v43  ;;  %2209 = vmatprep.subr.bf16.mxu1 %v5286_v44  ;;  %v2408_v42 = vld [vmem:[%s5750_s27 + $0x4e0] sm:$0xff]  ;;  %v4610_v43 = vcombine.low %v2268_v31, %v2272_v32  ;;  %v4738_v44 = vcombine.low %v2396_v33, %v2400_v34 }
 0x179   : > { %v2332_v31 = vld [vmem:[%s5750_s27 + $0x280] sm:$0xff] }
 0x17a   : > { %v2336_v32 = vld [vmem:[%s5750_s27 + $0x2a0] sm:$0xff] }
 0x17b   : > { %2046 = vmatpush1.bf16.msra.mxu0 %v5281_v45  ;;  %2210 = vmatpush1.bf16.msra.mxu1 %v5284_v46  ;;  %v4619_v45 = vcombine.high %v2276_v39, %v2280_v40  ;;  %v4747_v46 = vcombine.high %v2404_v41, %v2408_v42  ;;  %v2460_v33 = vld [vmem:[%s5750_s27 + $0x680] sm:$0xff] }
 0x17c   : > { %2047 = vmatprep.subr.bf16.mxu0 %v5289_v47  ;;  %2211 = vmatprep.subr.bf16.mxu1 %v5292_v48  ;;  %v2284_v47 = vld [vmem:[%s5750_s27 + $0x100] sm:$0xff] }
 0x17d   : > { %v2288_v48 = vld [vmem:[%s5750_s27 + $0x120] sm:$0xff] }
 0x17e   : > { %v2464_v34 = vld [vmem:[%s5750_s27 + $0x6a0] sm:$0xff] }
 0x17f   : > { %2048 = vmatpush1.bf16.msra.mxu0 %v5287_v49  ;;  %2212 = vmatpush1.bf16.msra.mxu1 %v5290_v50  ;;  %v2412_v49 = vld [vmem:[%s5750_s27 + $0x500] sm:$0xff] }
 0x180   : > { %2049 = vmatprep.subr.bf16.mxu0 %v5295_v51  ;;  %2213 = vmatprep.subr.bf16.mxu1 %v5298_v52  ;;  %v2416_v50 = vld [vmem:[%s5750_s27 + $0x520] sm:$0xff]  ;;  %v4618_v51 = vcombine.low %v2276_v39, %v2280_v40  ;;  %v4746_v52 = vcombine.low %v2404_v41, %v2408_v42 }
 0x181   : > { %v2340_v39 = vld [vmem:[%s5750_s27 + $0x2c0] sm:$0xff] }
 0x182   : > { %v2344_v40 = vld [vmem:[%s5750_s27 + $0x2e0] sm:$0xff] }
 0x183   : > { %2050 = vmatpush1.bf16.msra.mxu0 %v5293_v53  ;;  %2214 = vmatpush1.bf16.msra.mxu1 %v5296_v54  ;;  %v4627_v53 = vcombine.high %v2284_v47, %v2288_v48  ;;  %v4755_v54 = vcombine.high %v2412_v49, %v2416_v50  ;;  %v2468_v41 = vld [vmem:[%s5750_s27 + $0x6c0] sm:$0xff] }
 0x184   : > { %2051 = vmatprep.subr.bf16.mxu0 %v5301_v55  ;;  %2215 = vmatprep.subr.bf16.mxu1 %v5304_v56  ;;  %v2292_v55 = vld [vmem:[%s5750_s27 + $0x140] sm:$0xff] }
 0x185   : > { %v2296_v56 = vld [vmem:[%s5750_s27 + $0x160] sm:$0xff] }
 0x186   : > { %v2472_v42 = vld [vmem:[%s5750_s27 + $0x6e0] sm:$0xff] }
 0x187   : > { %2052 = vmatpush1.bf16.msra.mxu0 %v5299_v57  ;;  %2216 = vmatpush1.bf16.msra.mxu1 %v5302_v58  ;;  %v2420_v57 = vld [vmem:[%s5750_s27 + $0x540] sm:$0xff] }
 0x188   : > { %2053 = vmatprep.subr.bf16.mxu0 %v5307_v59  ;;  %2217 = vmatprep.subr.bf16.mxu1 %v5310_v60  ;;  %v2424_v58 = vld [vmem:[%s5750_s27 + $0x560] sm:$0xff]  ;;  %v4626_v59 = vcombine.low %v2284_v47, %v2288_v48  ;;  %v4754_v60 = vcombine.low %v2412_v49, %v2416_v50 }
 0x189   : > { %v2348_v47 = vld [vmem:[%s5750_s27 + $0x300] sm:$0xff] }
 0x18a   : > { %v2352_v48 = vld [vmem:[%s5750_s27 + $0x320] sm:$0xff] }
 0x18b   : > { %2054 = vmatpush1.bf16.msra.mxu0 %v5305_v61  ;;  %2218 = vmatpush1.bf16.msra.mxu1 %v5308_v62  ;;  %v4635_v61 = vcombine.high %v2292_v55, %v2296_v56  ;;  %v4763_v62 = vcombine.high %v2420_v57, %v2424_v58  ;;  %v2476_v49 = vld [vmem:[%s5750_s27 + $0x700] sm:$0xff] }
 0x18c   : > { %2055 = vmatprep.subr.bf16.mxu0 %v5313_v63  ;;  %2219 = vmatprep.subr.bf16.mxu1 %v5316_v0  ;;  %v2300_v63 = vld [vmem:[%s5750_s27 + $0x180] sm:$0xff] }
 0x18d   : > { %v2304_v0 = vld [vmem:[%s5750_s27 + $0x1a0] sm:$0xff] }
 0x18e   : > { %v2480_v50 = vld [vmem:[%s5750_s27 + $0x720] sm:$0xff] }
 0x18f   : > { %2056 = vmatpush1.bf16.msra.mxu0 %v5311_v1  ;;  %2220 = vmatpush1.bf16.msra.mxu1 %v5314_v2  ;;  %v2428_v1 = vld [vmem:[%s5750_s27 + $0x580] sm:$0xff] }
 0x190   : > { %2057 = vmatprep.subr.bf16.mxu0 %v5319_v3  ;;  %2221 = vmatprep.subr.bf16.mxu1 %v5322_v4  ;;  %v2432_v2 = vld [vmem:[%s5750_s27 + $0x5a0] sm:$0xff]  ;;  %v4634_v3 = vcombine.low %v2292_v55, %v2296_v56  ;;  %v4762_v4 = vcombine.low %v2420_v57, %v2424_v58 }
 0x191   : > { %v2356_v55 = vld [vmem:[%s5750_s27 + $0x340] sm:$0xff] }
 0x192   : > { %v2360_v56 = vld [vmem:[%s5750_s27 + $0x360] sm:$0xff] }
 0x193   : > { %2058 = vmatpush1.bf16.msra.mxu0 %v5317_v5  ;;  %2222 = vmatpush1.bf16.msra.mxu1 %v5320_v6  ;;  %v4643_v5 = vcombine.high %v2300_v63, %v2304_v0  ;;  %v4771_v6 = vcombine.high %v2428_v1, %v2432_v2  ;;  %v2484_v57 = vld [vmem:[%s5750_s27 + $0x740] sm:$0xff] }
 0x194   : > { %2059 = vmatprep.subr.bf16.mxu0 %v5325_v7  ;;  %2223 = vmatprep.subr.bf16.mxu1 %v5328_v8  ;;  %v2308_v7 = vld [vmem:[%s5750_s27 + $0x1c0] sm:$0xff] }
 0x195   : > { %v2312_v8 = vld [vmem:[%s5750_s27 + $0x1e0] sm:$0xff] }
 0x196   : > { %v4651_v13 = vcombine.high %v2308_v7, %v2312_v8  ;;  %v4650_v19 = vcombine.low %v2308_v7, %v2312_v8  ;;  %v2488_v58 = vld [vmem:[%s5750_s27 + $0x760] sm:$0xff] }
 0x197   : > { %2060 = vmatpush1.bf16.msra.mxu0 %v5323_v9  ;;  %2224 = vmatpush1.bf16.msra.mxu1 %v5326_v10  ;;  %v2436_v9 = vld [vmem:[%s5750_s27 + $0x5c0] sm:$0xff] }
 0x198   : > { %2061 = vmatprep.subr.bf16.mxu0 %v5331_v11  ;;  %2225 = vmatprep.subr.bf16.mxu1 %v5334_v12  ;;  %v2440_v10 = vld [vmem:[%s5750_s27 + $0x5e0] sm:$0xff]  ;;  %v4642_v11 = vcombine.low %v2300_v63, %v2304_v0  ;;  %v4770_v12 = vcombine.low %v2428_v1, %v2432_v2  ;;  %v4698_v63 = vcombine.low %v2356_v55, %v2360_v56 }
 0x199   : > { %v4779_v14 = vcombine.high %v2436_v9, %v2440_v10  ;;  %v4826_v0 = vcombine.low %v2484_v57, %v2488_v58  ;;  %v2364_v1 = vld [vmem:[%s5750_s27 + $0x380] sm:$0xff] }
 0x19a   : > { %v2368_v2 = vld [vmem:[%s5750_s27 + $0x3a0] sm:$0xff] }
 0x19b   : > { %2062 = vmatpush1.bf16.msra.mxu0 %v5329_v17  ;;  %2226 = vmatpush1.bf16.msra.mxu1 %v5332_v18  ;;  %v2444_v17 = vld [vmem:[%s5750_s27 + $0x600] sm:$0xff] }
 0x19c   : > { %3788 = vmatprep.subr.bf16.mxu0 %v4595_v20  ;;  %3829 = vmatprep.subr.bf16.mxu1 %v4723_v21  ;;  %v2448_v18 = vld [vmem:[%s5750_s27 + $0x620] sm:$0xff]  ;;  %v4778_v20 = vcombine.low %v2436_v9, %v2440_v10  ;;  %v4659_v21 = vcombine.high %v2316_v15, %v2320_v16 }
 0x19d   : > { %v4787_v22 = vcombine.high %v2444_v17, %v2448_v18  ;;  %v2372_v9 = vld [vmem:[%s5750_s27 + $0x3c0] sm:$0xff] }
 0x19e   : > { %2064 = vmatmul.mubr.bf16.vlgmr.msra.gmra.mrb[0].mxu0 %v348_v26  ;;  %2228 = vmatmul.mubr.bf16.vlgmr.msra.gmra.mrb[0].mxu1 %v348_v26  ;;  %v2456_v26 = vld [vmem:[%s5750_s27 + $0x660] sm:$0xff] }
 0x19f   : > { %3789 = vmatpush1.bf16.msra.mxu0 %v4594_v27  ;;  %3830 = vmatpush1.bf16.msra.mxu1 %v4722_v28  ;;  %v4658_v27 = vcombine.low %v2316_v15, %v2320_v16  ;;  %v4786_v28 = vcombine.low %v2444_v17, %v2448_v18  ;;  %v2376_v10 = vld [vmem:[%s5750_s27 + $0x3e0] sm:$0xff]  ;;  %v2253_v17 = vld [vmem:[%s5750_s27 + $0x8] sm:$0xff] }
 0x1a0   : > { %3790 = vmatprep.subr.bf16.mxu0 %v4603_v29  ;;  %3831 = vmatprep.subr.bf16.mxu1 %v4731_v30  ;;  %v4667_v29 = vcombine.high %v2324_v23, %v2328_v24  ;;  %v4795_v30 = vcombine.high %v2452_v25, %v2456_v26  ;;  %v2257_v18 = vld [vmem:[%s5750_s27 + $0x28] sm:$0xff] }
 0x1a3   : > { %3791 = vmatpush1.bf16.msra.mxu0 %v4602_v35  ;;  %3832 = vmatpush1.bf16.msra.mxu1 %v4730_v36  ;;  %v4666_v35 = vcombine.low %v2324_v23, %v2328_v24  ;;  %v4794_v36 = vcombine.low %v2452_v25, %v2456_v26  ;;  %v608_v25 = vlaneseq }
 0x1a4   : > { %3792 = vmatprep.subr.bf16.mxu0 %v4611_v37  ;;  %3833 = vmatprep.subr.bf16.mxu1 %v4739_v38  ;;  %v4675_v37 = vcombine.high %v2332_v31, %v2336_v32  ;;  %v4803_v38 = vcombine.high %v2460_v33, %v2464_v34 }
 0x1a5   : > { %v6130_v26 = vshrl.u32 %v608_v25, 7  ;;  %v2425_v25 = vld [vmem:[%s5750_s27 + $0x568] sm:$0xff] }
 0x1a7   : > { %3793 = vmatpush1.bf16.msra.mxu0 %v4610_v43  ;;  %3834 = vmatpush1.bf16.msra.mxu1 %v4738_v44  ;;  %v4674_v43 = vcombine.low %v2332_v31, %v2336_v32  ;;  %v4802_v44 = vcombine.low %v2460_v33, %v2464_v34  ;;  %v622_v31 = vsub.s32 3, %v6130_v26 }
 0x1a8   : > { %3794 = vmatprep.subr.bf16.mxu0 %v4619_v45  ;;  %3835 = vmatprep.subr.bf16.mxu1 %v4747_v46  ;;  %v4683_v45 = vcombine.high %v2340_v39, %v2344_v40  ;;  %v4811_v46 = vcombine.high %v2468_v41, %v2472_v42 }
 0x1ab   : > { %3795 = vmatpush1.bf16.msra.mxu0 %v4618_v51  ;;  %3836 = vmatpush1.bf16.msra.mxu1 %v4746_v52  ;;  %v4682_v51 = vcombine.low %v2340_v39, %v2344_v40  ;;  %v4810_v52 = vcombine.low %v2468_v41, %v2472_v42 }
 0x1ac   : > { %3796 = vmatprep.subr.bf16.mxu0 %v4627_v53  ;;  %3837 = vmatprep.subr.bf16.mxu1 %v4755_v54  ;;  %v4691_v53 = vcombine.high %v2348_v47, %v2352_v48  ;;  %v4819_v54 = vcombine.high %v2476_v49, %v2480_v50 }
 0x1af   : > { %3797 = vmatpush1.bf16.msra.mxu0 %v4626_v59  ;;  %3838 = vmatpush1.bf16.msra.mxu1 %v4754_v60  ;;  %v4690_v59 = vcombine.low %v2348_v47, %v2352_v48  ;;  %v4818_v60 = vcombine.low %v2476_v49, %v2480_v50 }
 0x1b0   : > { %3798 = vmatprep.subr.bf16.mxu0 %v4635_v61  ;;  %3839 = vmatprep.subr.bf16.mxu1 %v4763_v62  ;;  %v4699_v61 = vcombine.high %v2356_v55, %v2360_v56  ;;  %v4827_v62 = vcombine.high %v2484_v57, %v2488_v58  ;;  %v2393_v55 = vld [vmem:[%s5750_s27 + $0x468] sm:$0xff] }
 0x1b3   : > { %3799 = vmatpush1.bf16.msra.mxu0 %v4634_v3  ;;  %3840 = vmatpush1.bf16.msra.mxu1 %v4762_v4  ;;  %v2492_v3 = vld [vmem:[%s5750_s27 + $0x780] sm:$0xff]  ;;  %v4707_v4 = vcombine.high %v2364_v1, %v2368_v2 }
 0x1b4   : > { %3800 = vmatprep.subr.bf16.mxu0 %v4643_v5  ;;  %3841 = vmatprep.subr.bf16.mxu1 %v4771_v6  ;;  %v2496_v5 = vld [vmem:[%s5750_s27 + $0x7a0] sm:$0xff]  ;;  %v4706_v6 = vcombine.low %v2364_v1, %v2368_v2  ;;  %v2401_v1 = vld [vmem:[%s5750_s27 + $0x4a8] sm:$0xff] }
 0x1b5   : > { %v4834_v7 = vcombine.low %v2492_v3, %v2496_v5  ;;  %v4835_v8 = vcombine.high %v2492_v3, %v2496_v5 }
 0x1b7   : > { %3801 = vmatpush1.bf16.msra.mxu0 %v4642_v11  ;;  %3842 = vmatpush1.bf16.msra.mxu1 %v4770_v12  ;;  %v2500_v11 = vld [vmem:[%s5750_s27 + $0x7c0] sm:$0xff]  ;;  %v4715_v12 = vcombine.high %v2372_v9, %v2376_v10 }
 0x1b8   : > { %3802 = vmatprep.subr.bf16.mxu0 %v4651_v13  ;;  %3843 = vmatprep.subr.bf16.mxu1 %v4779_v14  ;;  %v2504_v13 = vld [vmem:[%s5750_s27 + $0x7e0] sm:$0xff]  ;;  %v4714_v14 = vcombine.low %v2372_v9, %v2376_v10  ;;  %v2409_v9 = vld [vmem:[%s5750_s27 + $0x4e8] sm:$0xff] }
 0x1b9   : > { %v4842_v15 = vcombine.low %v2500_v11, %v2504_v13  ;;  %v4843_v16 = vcombine.high %v2500_v11, %v2504_v13 }
 0x1bb   : > { %3803 = vmatpush1.bf16.msra.mxu0 %v4650_v19  ;;  %3844 = vmatpush1.bf16.msra.mxu1 %v4778_v20  ;;  %v2381_v19 = vld [vmem:[%s5750_s27 + $0x408] sm:$0xff]  ;;  %v4597_v20 = vcombine.high %v2253_v17, %v2257_v18 }
 0x1bc   : > { %3804 = vmatprep.subr.bf16.mxu0 %v4659_v21  ;;  %3845 = vmatprep.subr.bf16.mxu1 %v4787_v22  ;;  %v2385_v21 = vld [vmem:[%s5750_s27 + $0x428] sm:$0xff]  ;;  %v4596_v22 = vcombine.low %v2253_v17, %v2257_v18 }
 0x1bd   : > { %v4724_v23 = vcombine.low %v2381_v19, %v2385_v21  ;;  %v4725_v24 = vcombine.high %v2381_v19, %v2385_v21  ;;  %v2417_v17 = vld [vmem:[%s5750_s27 + $0x528] sm:$0xff] }
 0x1bf   : > { %3805 = vmatpush1.bf16.msra.mxu0 %v4658_v27  ;;  %3846 = vmatpush1.bf16.msra.mxu1 %v4786_v28  ;;  %v610_v27 = vsub.s32 0, %v6130_v26  ;;  %v618_v28 = vsub.s32 2, %v6130_v26 }
 0x1c0   : > { %3806 = vmatprep.subr.bf16.mxu0 %v4667_v29  ;;  %3847 = vmatprep.subr.bf16.mxu1 %v4795_v30  ;;  %v606_v29 = vld [vmem:[%s5744_s15] sm:$0xf]  ;;  %v614_v30 = vsub.s32 1, %v6130_v26 }
 0x1c1   : > { %v611_v32 = vrot.slane %v606_v29, %v610_v27  ;;  %v619_v33 = vrot.slane %v606_v29, %v618_v28 }
 0x1c2   : > { %v615_v34 = vrot.slane %v606_v29, %v614_v30 }
 0x1c3   : > { %3807 = vmatpush1.bf16.msra.mxu0 %v4666_v35  ;;  %3848 = vmatpush1.bf16.msra.mxu1 %v4794_v36  ;;  %v623_v35 = vrot.slane %v606_v29, %v622_v31 }
 0x1c4   : > { %3808 = vmatprep.subr.bf16.mxu0 %v4675_v37  ;;  %3849 = vmatprep.subr.bf16.mxu1 %v4803_v38 }
 0x1c7   : > { %3809 = vmatpush1.bf16.msra.mxu0 %v4674_v43  ;;  %3850 = vmatpush1.bf16.msra.mxu1 %v4802_v44 }
 0x1c8   : > { %3810 = vmatprep.subr.bf16.mxu0 %v4683_v45  ;;  %3851 = vmatprep.subr.bf16.mxu1 %v4811_v46 }
 0x1cb   : > { %3811 = vmatpush1.bf16.msra.mxu0 %v4682_v51  ;;  %3852 = vmatpush1.bf16.msra.mxu1 %v4810_v52  ;;  %v2261_v52 = vld [vmem:[%s5750_s27 + $0x48] sm:$0xff] }
 0x1cc   : > { %3812 = vmatprep.subr.bf16.mxu0 %v4691_v53  ;;  %3853 = vmatprep.subr.bf16.mxu1 %v4819_v54  ;;  %v2265_v53 = vld [vmem:[%s5750_s27 + $0x68] sm:$0xff] }
 0x1cd   : > { %v2389_v54 = vld [vmem:[%s5750_s27 + $0x448] sm:$0xff]  ;;  %v4604_v2 = vcombine.low %v2261_v52, %v2265_v53 }
 0x1ce   : > { %v4732_v3 = vcombine.low %v2389_v54, %v2393_v55 }
 0x1cf   : > { %3813 = vmatpush1.bf16.msra.mxu0 %v4690_v59  ;;  %3854 = vmatpush1.bf16.msra.mxu1 %v4818_v60  ;;  %v2269_v60 = vld [vmem:[%s5750_s27 + $0x88] sm:$0xff] }
 0x1d0   : > { %3814 = vmatprep.subr.bf16.mxu0 %v4699_v61  ;;  %3855 = vmatprep.subr.bf16.mxu1 %v4827_v62  ;;  %v4605_v61 = vcombine.high %v2261_v52, %v2265_v53  ;;  %v4733_v62 = vcombine.high %v2389_v54, %v2393_v55  ;;  %v2321_v52 = vld [vmem:[%s5750_s27 + $0x228] sm:$0xff] }
 0x1d1   : > { %v2445_v53 = vld [vmem:[%s5750_s27 + $0x608] sm:$0xff] }
 0x1d2   : > { %v2449_v54 = vld [vmem:[%s5750_s27 + $0x628] sm:$0xff] }
 0x1d3   : > { %3815 = vmatpush1.bf16.msra.mxu0 %v4698_v63  ;;  %3856 = vmatpush1.bf16.msra.mxu1 %v4826_v0  ;;  %v2273_v63 = vld [vmem:[%s5750_s27 + $0xa8] sm:$0xff] }
 0x1d4   : > { %3816 = vmatprep.subr.bf16.mxu0 %v4707_v4  ;;  %3857 = vmatprep.subr.bf16.mxu1 %v4835_v8  ;;  %v2397_v0 = vld [vmem:[%s5750_s27 + $0x488] sm:$0xff]  ;;  %v4613_v4 = vcombine.high %v2269_v60, %v2273_v63  ;;  %v4612_v10 = vcombine.low %v2269_v60, %v2273_v63 }
 0x1d5   : > { %v4741_v5 = vcombine.high %v2397_v0, %v2401_v1  ;;  %v2405_v8 = vld [vmem:[%s5750_s27 + $0x4c8] sm:$0xff]  ;;  %v4740_v11 = vcombine.low %v2397_v0, %v2401_v1 }
 0x1d6   : > { %v4749_v13 = vcombine.high %v2405_v8, %v2409_v9  ;;  %v4748_v19 = vcombine.low %v2405_v8, %v2409_v9  ;;  %v2325_v63 = vld [vmem:[%s5750_s27 + $0x248] sm:$0xff] }
 0x1d7   : > { %3817 = vmatpush1.bf16.msra.mxu0 %v4706_v6  ;;  %3858 = vmatpush1.bf16.msra.mxu1 %v4834_v7  ;;  %v2277_v6 = vld [vmem:[%s5750_s27 + $0xc8] sm:$0xff] }
 0x1d8   : > { %3818 = vmatprep.subr.bf16.mxu0 %v4715_v12  ;;  %3859 = vmatprep.subr.bf16.mxu1 %v4843_v16  ;;  %v2281_v7 = vld [vmem:[%s5750_s27 + $0xe8] sm:$0xff] }
 0x1d9   : > { %v4621_v12 = vcombine.high %v2277_v6, %v2281_v7  ;;  %v2413_v16 = vld [vmem:[%s5750_s27 + $0x508] sm:$0xff]  ;;  %v4620_v18 = vcombine.low %v2277_v6, %v2281_v7 }
 0x1da   : > { %v4757_v21 = vcombine.high %v2413_v16, %v2417_v17  ;;  %v2329_v0 = vld [vmem:[%s5750_s27 + $0x268] sm:$0xff] }
 0x1db   : > { %3819 = vmatpush1.bf16.msra.mxu0 %v4714_v14  ;;  %3860 = vmatpush1.bf16.msra.mxu1 %v4842_v15  ;;  %v2285_v14 = vld [vmem:[%s5750_s27 + $0x108] sm:$0xff] }
 0x1dc   : > { %3870 = vmatprep.subr.bf16.mxu0 %v4597_v20  ;;  %3911 = vmatprep.subr.bf16.mxu1 %v4725_v24  ;;  %v2289_v15 = vld [vmem:[%s5750_s27 + $0x128] sm:$0xff] }
 0x1dd   : > { %v4629_v20 = vcombine.high %v2285_v14, %v2289_v15  ;;  %v2421_v24 = vld [vmem:[%s5750_s27 + $0x548] sm:$0xff]  ;;  %v4628_v29 = vcombine.low %v2285_v14, %v2289_v15 }
 0x1de   : > { %v2453_v1 = vld [vmem:[%s5750_s27 + $0x648] sm:$0xff] }
 0x1df   : > { %v2333_v7 = vld [vmem:[%s5750_s27 + $0x288] sm:$0xff] }
 0x1e0   : > { %v2337_v8 = vld [vmem:[%s5750_s27 + $0x2a8] sm:$0xff] }
 0x1e1   : > { %v2461_v9 = vld [vmem:[%s5750_s27 + $0x688] sm:$0xff] }
 0x1e2   : > { %v2341_v15 = vld [vmem:[%s5750_s27 + $0x2c8] sm:$0xff] }
 0x271   : > { %v2065_v36 = vpop.f32.mrb[0].mxu0  ;;  %v2229_v37 = vpop.f32.mrb[0].mxu1 }
 0x272   : > { %v4857_v38 = vadd.f32 %v2065_v36, %v611_v32  ;;  %v4859_v39 = vadd.f32 %v2229_v37, %v619_v33  ;;  %v2067_v40 = vpop.f32.mrb[1].mxu0  ;;  %v2231_v41 = vpop.f32.mrb[1].mxu1  ;;  %v4756_v32 = vcombine.low %v2413_v16, %v2417_v17  ;;  %v2305_v36 = vld [vmem:[%s5750_s27 + $0x1a8] sm:$0xff] }
 0x273   : > { %v4858_v42 = vadd.f32 %v2067_v40, %v615_v34  ;;  %v4860_v43 = vadd.f32 %v2231_v41, %v623_v35  ;;  %v2069_v44 = vpop.f32.mrb[2].mxu0  ;;  %v2233_v45 = vpop.f32.mrb[2].mxu1  ;;  %v4765_v34 = vcombine.high %v2421_v24, %v2425_v25  ;;  %v2301_v35 = vld [vmem:[%s5750_s27 + $0x188] sm:$0xff]  ;;  %v4764_v40 = vcombine.low %v2421_v24, %v2425_v25 }
 0x274   : > { %v2236_v46 = vmax.f32 %v4857_v38, 0.0  ;;  %v2238_v47 = vmax.f32 %v4859_v39, 0.0  ;;  %v2070_v48 = vpop.f32.mrb[3].mxu0  ;;  %v2234_v49 = vpop.f32.mrb[3].mxu1  ;;  %v2429_v37 = vld [vmem:[%s5750_s27 + $0x588] sm:$0xff]  ;;  %v4645_v41 = vcombine.high %v2301_v35, %v2305_v36 }
 0x275   : > { %v2237_v50 = vmax.f32 %v4858_v42, 0.0  ;;  %v2239_v51 = vmax.f32 %v4860_v43, 0.0  ;;  %v2433_v38 = vld [vmem:[%s5750_s27 + $0x5a8] sm:$0xff] }
 0x276   : > { %v6153_v58 = vpack.c.bf16 %v2236_v46, %v2236_v46  ;;  %v6155_v59 = vpack.c.bf16 %v2238_v47, %v2238_v47  ;;  %v4773_v42 = vcombine.high %v2429_v37, %v2433_v38  ;;  %v2309_v43 = vld [vmem:[%s5750_s27 + $0x1c8] sm:$0xff]  ;;  %v4644_v47 = vcombine.low %v2301_v35, %v2305_v36 }
 0x277   : > { %v6149_v56 = vpack.c.bf16 %v2237_v50, %v2237_v50  ;;  %v6151_v57 = vpack.c.bf16 %v2239_v51, %v2239_v51  ;;  %v2313_v44 = vld [vmem:[%s5750_s27 + $0x1e8] sm:$0xff]  ;;  %v4772_v48 = vcombine.low %v2429_v37, %v2433_v38 }
 0x278   : > { %v2437_v45 = vld [vmem:[%s5750_s27 + $0x5c8] sm:$0xff]  ;;  %v4653_v49 = vcombine.high %v2309_v43, %v2313_v44  ;;  %v4652_v55 = vcombine.low %v2309_v43, %v2313_v44 }
 0x279   : > { %3820 = vmatprep.mubr.bf16.mxu0 %v6149_v56  ;;  %3861 = vmatprep.mubr.bf16.mxu1 %v6151_v57  ;;  %v2441_v46 = vld [vmem:[%s5750_s27 + $0x5e8] sm:$0xff] }
 0x27a   : > { %3821 = vmatmul.mubr.bf16.vlgmr.msra.gmra.mrb[4].mxu0 %v6153_v58  ;;  %3862 = vmatmul.mubr.bf16.vlgmr.msra.gmra.mrb[4].mxu1 %v6155_v59  ;;  %v4781_v50 = vcombine.high %v2437_v45, %v2441_v46  ;;  %v2317_v51 = vld [vmem:[%s5750_s27 + $0x208] sm:$0xff]  ;;  %v4780_v60 = vcombine.low %v2437_v45, %v2441_v46 }
 0x27b   : > { %3871 = vmatpush1.bf16.msra.mxu0 %v4596_v22  ;;  %3912 = vmatpush1.bf16.msra.mxu1 %v4724_v23  ;;  %v2293_v22 = vld [vmem:[%s5750_s27 + $0x148] sm:$0xff] }
 0x27c   : > { %3902 = vmatprep.mubr.bf16.mxu0 %v6149_v56  ;;  %3943 = vmatprep.mubr.bf16.mxu1 %v6151_v57  ;;  %v2297_v23 = vld [vmem:[%s5750_s27 + $0x168] sm:$0xff] }
 0x27d   : > { %3872 = vmatprep.subr.bf16.mxu0 %v4605_v61  ;;  %3913 = vmatprep.subr.bf16.mxu1 %v4733_v62  ;;  %v4637_v33 = vcombine.high %v2293_v22, %v2297_v23  ;;  %v4636_v39 = vcombine.low %v2293_v22, %v2297_v23  ;;  %v4661_v61 = vcombine.high %v2317_v51, %v2321_v52  ;;  %v2345_v16 = vld [vmem:[%s5750_s27 + $0x2e8] sm:$0xff] }
 0x27e   : > { %v4789_v62 = vcombine.high %v2445_v53, %v2449_v54  ;;  %v2469_v17 = vld [vmem:[%s5750_s27 + $0x6c8] sm:$0xff] }
 0x27f   : > { %3873 = vmatpush1.bf16.msra.mxu0 %v4604_v2  ;;  %3914 = vmatpush1.bf16.msra.mxu1 %v4732_v3  ;;  %v2457_v2 = vld [vmem:[%s5750_s27 + $0x668] sm:$0xff]  ;;  %v4660_v3 = vcombine.low %v2317_v51, %v2321_v52 }
 0x280   : > { %3874 = vmatprep.subr.bf16.mxu0 %v4613_v4  ;;  %3915 = vmatprep.subr.bf16.mxu1 %v4741_v5  ;;  %v4788_v4 = vcombine.low %v2445_v53, %v2449_v54  ;;  %v4669_v5 = vcombine.high %v2325_v63, %v2329_v0  ;;  %v4797_v6 = vcombine.high %v2453_v1, %v2457_v2  ;;  %v2349_v23 = vld [vmem:[%s5750_s27 + $0x308] sm:$0xff] }
 0x281   : > { %v2353_v24 = vld [vmem:[%s5750_s27 + $0x328] sm:$0xff] }
 0x282   : > { %v2477_v25 = vld [vmem:[%s5750_s27 + $0x708] sm:$0xff] }
 0x283   : > { %3875 = vmatpush1.bf16.msra.mxu0 %v4612_v10  ;;  %3916 = vmatpush1.bf16.msra.mxu1 %v4740_v11  ;;  %v2465_v10 = vld [vmem:[%s5750_s27 + $0x6a8] sm:$0xff]  ;;  %v4668_v11 = vcombine.low %v2325_v63, %v2329_v0  ;;  %v2254_v0 = vld [vmem:[%s5750_s27 + $0x10] sm:$0xff] }
 0x284   : > { %3876 = vmatprep.subr.bf16.mxu0 %v4621_v12  ;;  %3917 = vmatprep.subr.bf16.mxu1 %v4749_v13  ;;  %v4796_v12 = vcombine.low %v2453_v1, %v2457_v2  ;;  %v4677_v13 = vcombine.high %v2333_v7, %v2337_v8  ;;  %v4805_v14 = vcombine.high %v2461_v9, %v2465_v10  ;;  %v2357_v36 = vld [vmem:[%s5750_s27 + $0x348] sm:$0xff]  ;;  %v2258_v1 = vld [vmem:[%s5750_s27 + $0x30] sm:$0xff] }
 0x285   : > { %v2361_v37 = vld [vmem:[%s5750_s27 + $0x368] sm:$0xff]  ;;  %v2382_v2 = vld [vmem:[%s5750_s27 + $0x410] sm:$0xff] }
 0x286   : > { %v2485_v38 = vld [vmem:[%s5750_s27 + $0x748] sm:$0xff] }
 0x287   : > { %3877 = vmatpush1.bf16.msra.mxu0 %v4620_v18  ;;  %3918 = vmatpush1.bf16.msra.mxu1 %v4748_v19  ;;  %v2473_v18 = vld [vmem:[%s5750_s27 + $0x6e8] sm:$0xff]  ;;  %v4676_v19 = vcombine.low %v2333_v7, %v2337_v8  ;;  %v2262_v8 = vld [vmem:[%s5750_s27 + $0x50] sm:$0xff] }
 0x288   : > { %3878 = vmatprep.subr.bf16.mxu0 %v4629_v20  ;;  %3919 = vmatprep.subr.bf16.mxu1 %v4757_v21  ;;  %v4804_v20 = vcombine.low %v2461_v9, %v2465_v10  ;;  %v4685_v21 = vcombine.high %v2341_v15, %v2345_v16  ;;  %v4813_v22 = vcombine.high %v2469_v17, %v2473_v18  ;;  %v2365_v44 = vld [vmem:[%s5750_s27 + $0x388] sm:$0xff]  ;;  %v2266_v9 = vld [vmem:[%s5750_s27 + $0x70] sm:$0xff] }
 0x289   : > { %v2369_v45 = vld [vmem:[%s5750_s27 + $0x3a8] sm:$0xff]  ;;  %v2390_v10 = vld [vmem:[%s5750_s27 + $0x450] sm:$0xff] }
 0x28a   : > { %v2493_v46 = vld [vmem:[%s5750_s27 + $0x788] sm:$0xff] }
 0x28b   : > { %3879 = vmatpush1.bf16.msra.mxu0 %v4628_v29  ;;  %3920 = vmatpush1.bf16.msra.mxu1 %v4756_v32  ;;  %v2481_v29 = vld [vmem:[%s5750_s27 + $0x728] sm:$0xff]  ;;  %v4684_v32 = vcombine.low %v2341_v15, %v2345_v16  ;;  %v2270_v16 = vld [vmem:[%s5750_s27 + $0x90] sm:$0xff] }
 0x28c   : > { %3880 = vmatprep.subr.bf16.mxu0 %v4637_v33  ;;  %3921 = vmatprep.subr.bf16.mxu1 %v4765_v34  ;;  %v4812_v33 = vcombine.low %v2469_v17, %v2473_v18  ;;  %v4693_v34 = vcombine.high %v2349_v23, %v2353_v24  ;;  %v4821_v35 = vcombine.high %v2477_v25, %v2481_v29  ;;  %v2373_v52 = vld [vmem:[%s5750_s27 + $0x3c8] sm:$0xff]  ;;  %v2274_v17 = vld [vmem:[%s5750_s27 + $0xb0] sm:$0xff] }
 0x28d   : > { %v2377_v53 = vld [vmem:[%s5750_s27 + $0x3e8] sm:$0xff]  ;;  %v2398_v18 = vld [vmem:[%s5750_s27 + $0x490] sm:$0xff] }
 0x28e   : > { %v2501_v54 = vld [vmem:[%s5750_s27 + $0x7c8] sm:$0xff] }
 0x28f   : > { %3881 = vmatpush1.bf16.msra.mxu0 %v4636_v39  ;;  %3922 = vmatpush1.bf16.msra.mxu1 %v4764_v40  ;;  %v2489_v39 = vld [vmem:[%s5750_s27 + $0x768] sm:$0xff]  ;;  %v4692_v40 = vcombine.low %v2349_v23, %v2353_v24  ;;  %v2278_v24 = vld [vmem:[%s5750_s27 + $0xd0] sm:$0xff] }
 0x290   : > { %3882 = vmatprep.subr.bf16.mxu0 %v4645_v41  ;;  %3923 = vmatprep.subr.bf16.mxu1 %v4773_v42  ;;  %v4820_v41 = vcombine.low %v2477_v25, %v2481_v29  ;;  %v4701_v42 = vcombine.high %v2357_v36, %v2361_v37  ;;  %v4829_v43 = vcombine.high %v2485_v38, %v2489_v39  ;;  %v2282_v25 = vld [vmem:[%s5750_s27 + $0xf0] sm:$0xff] }
 0x291   : > { %v2406_v29 = vld [vmem:[%s5750_s27 + $0x4d0] sm:$0xff] }
 0x293   : > { %3883 = vmatpush1.bf16.msra.mxu0 %v4644_v47  ;;  %3924 = vmatpush1.bf16.msra.mxu1 %v4772_v48  ;;  %v2497_v47 = vld [vmem:[%s5750_s27 + $0x7a8] sm:$0xff]  ;;  %v4700_v48 = vcombine.low %v2357_v36, %v2361_v37  ;;  %v2286_v37 = vld [vmem:[%s5750_s27 + $0x110] sm:$0xff] }
 0x294   : > { %3884 = vmatprep.subr.bf16.mxu0 %v4653_v49  ;;  %3925 = vmatprep.subr.bf16.mxu1 %v4781_v50  ;;  %v4828_v49 = vcombine.low %v2485_v38, %v2489_v39  ;;  %v4709_v50 = vcombine.high %v2365_v44, %v2369_v45  ;;  %v4837_v51 = vcombine.high %v2493_v46, %v2497_v47  ;;  %v2290_v38 = vld [vmem:[%s5750_s27 + $0x130] sm:$0xff] }
 0x295   : > { %v2414_v39 = vld [vmem:[%s5750_s27 + $0x510] sm:$0xff] }
 0x297   : > { %3885 = vmatpush1.bf16.msra.mxu0 %v4652_v55  ;;  %3926 = vmatpush1.bf16.msra.mxu1 %v4780_v60  ;;  %v2505_v55 = vld [vmem:[%s5750_s27 + $0x7e8] sm:$0xff]  ;;  %v4708_v60 = vcombine.low %v2365_v44, %v2369_v45  ;;  %v2294_v45 = vld [vmem:[%s5750_s27 + $0x150] sm:$0xff] }
 0x298   : > { %3886 = vmatprep.subr.bf16.mxu0 %v4661_v61  ;;  %3927 = vmatprep.subr.bf16.mxu1 %v4789_v62  ;;  %v4836_v61 = vcombine.low %v2493_v46, %v2497_v47  ;;  %v4717_v62 = vcombine.high %v2373_v52, %v2377_v53  ;;  %v4845_v63 = vcombine.high %v2501_v54, %v2505_v55  ;;  %v2298_v46 = vld [vmem:[%s5750_s27 + $0x170] sm:$0xff] }
 0x299   : > { %v2422_v47 = vld [vmem:[%s5750_s27 + $0x550] sm:$0xff] }
 0x29b   : > { %3887 = vmatpush1.bf16.msra.mxu0 %v4660_v3  ;;  %3928 = vmatpush1.bf16.msra.mxu1 %v4788_v4  ;;  %v2386_v3 = vld [vmem:[%s5750_s27 + $0x430] sm:$0xff]  ;;  %v4716_v4 = vcombine.low %v2373_v52, %v2377_v53 }
 0x29c   : > { %3888 = vmatprep.subr.bf16.mxu0 %v4669_v5  ;;  %3929 = vmatprep.subr.bf16.mxu1 %v4797_v6  ;;  %v4844_v5 = vcombine.low %v2501_v54, %v2505_v55  ;;  %v4599_v6 = vcombine.high %v2254_v0, %v2258_v1  ;;  %v4727_v7 = vcombine.high %v2382_v2, %v2386_v3  ;;  %v2302_v53 = vld [vmem:[%s5750_s27 + $0x190] sm:$0xff] }
 0x29d   : > { %v2306_v54 = vld [vmem:[%s5750_s27 + $0x1b0] sm:$0xff] }
 0x29e   : > { %v2430_v55 = vld [vmem:[%s5750_s27 + $0x590] sm:$0xff] }
 0x29f   : > { %3889 = vmatpush1.bf16.msra.mxu0 %v4668_v11  ;;  %3930 = vmatpush1.bf16.msra.mxu1 %v4796_v12  ;;  %v2394_v11 = vld [vmem:[%s5750_s27 + $0x470] sm:$0xff]  ;;  %v4598_v12 = vcombine.low %v2254_v0, %v2258_v1 }
 0x2a0   : > { %3890 = vmatprep.subr.bf16.mxu0 %v4677_v13  ;;  %3931 = vmatprep.subr.bf16.mxu1 %v4805_v14  ;;  %v4726_v13 = vcombine.low %v2382_v2, %v2386_v3  ;;  %v4607_v14 = vcombine.high %v2262_v8, %v2266_v9  ;;  %v4735_v15 = vcombine.high %v2390_v10, %v2394_v11  ;;  %v2310_v1 = vld [vmem:[%s5750_s27 + $0x1d0] sm:$0xff] }
 0x2a1   : > { %v2314_v2 = vld [vmem:[%s5750_s27 + $0x1f0] sm:$0xff] }
 0x2a2   : > { %v2438_v3 = vld [vmem:[%s5750_s27 + $0x5d0] sm:$0xff] }
 0x2a3   : > { %3891 = vmatpush1.bf16.msra.mxu0 %v4676_v19  ;;  %3932 = vmatpush1.bf16.msra.mxu1 %v4804_v20  ;;  %v2402_v19 = vld [vmem:[%s5750_s27 + $0x4b0] sm:$0xff]  ;;  %v4606_v20 = vcombine.low %v2262_v8, %v2266_v9 }
 0x2a4   : > { %3892 = vmatprep.subr.bf16.mxu0 %v4685_v21  ;;  %3933 = vmatprep.subr.bf16.mxu1 %v4813_v22  ;;  %v4734_v21 = vcombine.low %v2390_v10, %v2394_v11  ;;  %v4615_v22 = vcombine.high %v2270_v16, %v2274_v17  ;;  %v4743_v23 = vcombine.high %v2398_v18, %v2402_v19  ;;  %v2318_v9 = vld [vmem:[%s5750_s27 + $0x210] sm:$0xff] }
 0x2a5   : > { %v2322_v10 = vld [vmem:[%s5750_s27 + $0x230] sm:$0xff] }
 0x2a6   : > { %v2446_v11 = vld [vmem:[%s5750_s27 + $0x610] sm:$0xff] }
 0x2a7   : > { %3893 = vmatpush1.bf16.msra.mxu0 %v4684_v32  ;;  %3934 = vmatpush1.bf16.msra.mxu1 %v4812_v33  ;;  %v2410_v32 = vld [vmem:[%s5750_s27 + $0x4f0] sm:$0xff]  ;;  %v4614_v33 = vcombine.low %v2270_v16, %v2274_v17 }
 0x2a8   : > { %3894 = vmatprep.subr.bf16.mxu0 %v4693_v34  ;;  %3935 = vmatprep.subr.bf16.mxu1 %v4821_v35  ;;  %v4742_v34 = vcombine.low %v2398_v18, %v2402_v19  ;;  %v4623_v35 = vcombine.high %v2278_v24, %v2282_v25  ;;  %v4751_v36 = vcombine.high %v2406_v29, %v2410_v32  ;;  %v2326_v17 = vld [vmem:[%s5750_s27 + $0x250] sm:$0xff] }
 0x2a9   : > { %v2330_v18 = vld [vmem:[%s5750_s27 + $0x270] sm:$0xff] }
 0x2aa   : > { %v2454_v19 = vld [vmem:[%s5750_s27 + $0x650] sm:$0xff] }
 0x2ab   : > { %3895 = vmatpush1.bf16.msra.mxu0 %v4692_v40  ;;  %3936 = vmatpush1.bf16.msra.mxu1 %v4820_v41  ;;  %v2418_v40 = vld [vmem:[%s5750_s27 + $0x530] sm:$0xff]  ;;  %v4622_v41 = vcombine.low %v2278_v24, %v2282_v25 }
 0x2ac   : > { %3896 = vmatprep.subr.bf16.mxu0 %v4701_v42  ;;  %3937 = vmatprep.subr.bf16.mxu1 %v4829_v43  ;;  %v4750_v42 = vcombine.low %v2406_v29, %v2410_v32  ;;  %v4631_v43 = vcombine.high %v2286_v37, %v2290_v38  ;;  %v4759_v44 = vcombine.high %v2414_v39, %v2418_v40  ;;  %v2334_v25 = vld [vmem:[%s5750_s27 + $0x290] sm:$0xff] }
 0x2ad   : > { %v2338_v29 = vld [vmem:[%s5750_s27 + $0x2b0] sm:$0xff] }
 0x2ae   : > { %v2462_v32 = vld [vmem:[%s5750_s27 + $0x690] sm:$0xff] }
 0x2af   : > { %3897 = vmatpush1.bf16.msra.mxu0 %v4700_v48  ;;  %3938 = vmatpush1.bf16.msra.mxu1 %v4828_v49  ;;  %v2426_v48 = vld [vmem:[%s5750_s27 + $0x570] sm:$0xff]  ;;  %v4630_v49 = vcombine.low %v2286_v37, %v2290_v38 }
 0x2b0   : > { %3898 = vmatprep.subr.bf16.mxu0 %v4709_v50  ;;  %3939 = vmatprep.subr.bf16.mxu1 %v4837_v51  ;;  %v4758_v50 = vcombine.low %v2414_v39, %v2418_v40  ;;  %v4639_v51 = vcombine.high %v2294_v45, %v2298_v46  ;;  %v4767_v52 = vcombine.high %v2422_v47, %v2426_v48  ;;  %v2342_v38 = vld [vmem:[%s5750_s27 + $0x2d0] sm:$0xff] }
 0x2b1   : > { %v2346_v39 = vld [vmem:[%s5750_s27 + $0x2f0] sm:$0xff] }
 0x2b2   : > { %v2470_v40 = vld [vmem:[%s5750_s27 + $0x6d0] sm:$0xff] }
 0x2b3   : > { %3899 = vmatpush1.bf16.msra.mxu0 %v4708_v60  ;;  %3940 = vmatpush1.bf16.msra.mxu1 %v4836_v61  ;;  %v2434_v60 = vld [vmem:[%s5750_s27 + $0x5b0] sm:$0xff]  ;;  %v4638_v61 = vcombine.low %v2294_v45, %v2298_v46 }
 0x2b4   : > { %3900 = vmatprep.subr.bf16.mxu0 %v4717_v62  ;;  %3941 = vmatprep.subr.bf16.mxu1 %v4845_v63  ;;  %v4766_v62 = vcombine.low %v2422_v47, %v2426_v48  ;;  %v4647_v63 = vcombine.high %v2302_v53, %v2306_v54  ;;  %v4775_v0 = vcombine.high %v2430_v55, %v2434_v60  ;;  %v2350_v46 = vld [vmem:[%s5750_s27 + $0x310] sm:$0xff] }
 0x2b5   : > { %v2354_v47 = vld [vmem:[%s5750_s27 + $0x330] sm:$0xff] }
 0x2b6   : > { %v2478_v48 = vld [vmem:[%s5750_s27 + $0x710] sm:$0xff] }
 0x2b7   : > { %3901 = vmatpush1.bf16.msra.mxu0 %v4716_v4  ;;  %3942 = vmatpush1.bf16.msra.mxu1 %v4844_v5  ;;  %v2442_v4 = vld [vmem:[%s5750_s27 + $0x5f0] sm:$0xff]  ;;  %v4646_v5 = vcombine.low %v2302_v53, %v2306_v54 }
 0x2b8   : > { %3952 = vmatprep.subr.bf16.mxu0 %v4599_v6  ;;  %3993 = vmatprep.subr.bf16.mxu1 %v4727_v7  ;;  %v4774_v6 = vcombine.low %v2430_v55, %v2434_v60  ;;  %v4655_v7 = vcombine.high %v2310_v1, %v2314_v2  ;;  %v4783_v8 = vcombine.high %v2438_v3, %v2442_v4  ;;  %v2358_v54 = vld [vmem:[%s5750_s27 + $0x350] sm:$0xff] }
 0x2b9   : > { %v2362_v55 = vld [vmem:[%s5750_s27 + $0x370] sm:$0xff] }
 0x2ba   : > { %3903 = vmatmul.mubr.bf16.vlgmr.msra.gmra.mrb[8].mxu0 %v6153_v58  ;;  %3944 = vmatmul.mubr.bf16.vlgmr.msra.gmra.mrb[8].mxu1 %v6155_v59  ;;  %v2486_v60 = vld [vmem:[%s5750_s27 + $0x750] sm:$0xff] }
 0x2bb   : > { %3953 = vmatpush1.bf16.msra.mxu0 %v4598_v12  ;;  %3984 = vmatprep.mubr.bf16.mxu0 %v6149_v56  ;;  %v2450_v12 = vld [vmem:[%s5750_s27 + $0x630] sm:$0xff] }
 0x2bc   : > { %3994 = vmatpush1.bf16.msra.mxu1 %v4726_v13  ;;  %4025 = vmatprep.mubr.bf16.mxu1 %v6151_v57  ;;  %v4654_v13 = vcombine.low %v2310_v1, %v2314_v2  ;;  %v4791_v16 = vcombine.high %v2446_v11, %v2450_v12  ;;  %v2366_v2 = vld [vmem:[%s5750_s27 + $0x390] sm:$0xff] }
 0x2bd   : > { %3954 = vmatprep.subr.bf16.mxu0 %v4607_v14  ;;  %3995 = vmatprep.subr.bf16.mxu1 %v4735_v15  ;;  %v4782_v14 = vcombine.low %v2438_v3, %v2442_v4  ;;  %v4663_v15 = vcombine.high %v2318_v9, %v2322_v10  ;;  %v2370_v3 = vld [vmem:[%s5750_s27 + $0x3b0] sm:$0xff] }
 0x2be   : > { %v2494_v4 = vld [vmem:[%s5750_s27 + $0x790] sm:$0xff] }
 0x2bf   : > { %3955 = vmatpush1.bf16.msra.mxu0 %v4606_v20  ;;  %v2458_v20 = vld [vmem:[%s5750_s27 + $0x670] sm:$0xff] }
 0x2c0   : > { %3996 = vmatpush1.bf16.msra.mxu1 %v4734_v21  ;;  %3956 = vmatprep.subr.bf16.mxu0 %v4615_v22  ;;  %v4662_v21 = vcombine.low %v2318_v9, %v2322_v10  ;;  %v4790_v22 = vcombine.low %v2446_v11, %v2450_v12  ;;  %v4799_v24 = vcombine.high %v2454_v19, %v2458_v20  ;;  %v2374_v10 = vld [vmem:[%s5750_s27 + $0x3d0] sm:$0xff] }
 0x2c1   : > { %3997 = vmatprep.subr.bf16.mxu1 %v4743_v23  ;;  %v4671_v23 = vcombine.high %v2326_v17, %v2330_v18  ;;  %v2378_v11 = vld [vmem:[%s5750_s27 + $0x3f0] sm:$0xff] }
 0x2c2   : > { %v2502_v12 = vld [vmem:[%s5750_s27 + $0x7d0] sm:$0xff] }
 0x2c3   : > { %3957 = vmatpush1.bf16.msra.mxu0 %v4614_v33  ;;  %v2466_v33 = vld [vmem:[%s5750_s27 + $0x6b0] sm:$0xff] }
 0x2c4   : > { %3998 = vmatpush1.bf16.msra.mxu1 %v4742_v34  ;;  %3958 = vmatprep.subr.bf16.mxu0 %v4623_v35  ;;  %v4670_v34 = vcombine.low %v2326_v17, %v2330_v18  ;;  %v4798_v35 = vcombine.low %v2454_v19, %v2458_v20  ;;  %v4807_v37 = vcombine.high %v2462_v32, %v2466_v33  ;;  %v2255_v18 = vld [vmem:[%s5750_s27 + $0x18] sm:$0xff] }
 0x2c5   : > { %3999 = vmatprep.subr.bf16.mxu1 %v4751_v36  ;;  %v4679_v36 = vcombine.high %v2334_v25, %v2338_v29  ;;  %v2259_v19 = vld [vmem:[%s5750_s27 + $0x38] sm:$0xff] }
 0x2c6   : > { %v2383_v20 = vld [vmem:[%s5750_s27 + $0x418] sm:$0xff] }
 0x2c7   : > { %3959 = vmatpush1.bf16.msra.mxu0 %v4622_v41  ;;  %v2474_v41 = vld [vmem:[%s5750_s27 + $0x6f0] sm:$0xff] }
 0x2c8   : > { %4000 = vmatpush1.bf16.msra.mxu1 %v4750_v42  ;;  %3960 = vmatprep.subr.bf16.mxu0 %v4631_v43  ;;  %v4678_v42 = vcombine.low %v2334_v25, %v2338_v29  ;;  %v4806_v43 = vcombine.low %v2462_v32, %v2466_v33  ;;  %v4815_v45 = vcombine.high %v2470_v40, %v2474_v41  ;;  %v2263_v29 = vld [vmem:[%s5750_s27 + $0x58] sm:$0xff] }
 0x2c9   : > { %4001 = vmatprep.subr.bf16.mxu1 %v4759_v44  ;;  %v4687_v44 = vcombine.high %v2342_v38, %v2346_v39  ;;  %v2267_v32 = vld [vmem:[%s5750_s27 + $0x78] sm:$0xff]  ;;  %v4600_v33 = vcombine.low %v2255_v18, %v2259_v19 }
 0x2cb   : > { %3961 = vmatpush1.bf16.msra.mxu0 %v4630_v49  ;;  %v2482_v49 = vld [vmem:[%s5750_s27 + $0x730] sm:$0xff] }
 0x2cc   : > { %4002 = vmatpush1.bf16.msra.mxu1 %v4758_v50  ;;  %3962 = vmatprep.subr.bf16.mxu0 %v4639_v51  ;;  %v4686_v50 = vcombine.low %v2342_v38, %v2346_v39  ;;  %v4814_v51 = vcombine.low %v2470_v40, %v2474_v41  ;;  %v4823_v53 = vcombine.high %v2478_v48, %v2482_v49  ;;  %v2271_v38 = vld [vmem:[%s5750_s27 + $0x98] sm:$0xff] }
 0x2cd   : > { %4003 = vmatprep.subr.bf16.mxu1 %v4767_v52  ;;  %v4695_v52 = vcombine.high %v2350_v46, %v2354_v47  ;;  %v2275_v39 = vld [vmem:[%s5750_s27 + $0xb8] sm:$0xff] }
 0x2ce   : > { %v2399_v41 = vld [vmem:[%s5750_s27 + $0x498] sm:$0xff] }
 0x2cf   : > { %3963 = vmatpush1.bf16.msra.mxu0 %v4638_v61  ;;  %v2490_v61 = vld [vmem:[%s5750_s27 + $0x770] sm:$0xff] }
 0x2d0   : > { %4004 = vmatpush1.bf16.msra.mxu1 %v4766_v62  ;;  %3964 = vmatprep.subr.bf16.mxu0 %v4647_v63  ;;  %v4694_v62 = vcombine.low %v2350_v46, %v2354_v47  ;;  %v4822_v63 = vcombine.low %v2478_v48, %v2482_v49  ;;  %v4831_v1 = vcombine.high %v2486_v60, %v2490_v61  ;;  %v2279_v47 = vld [vmem:[%s5750_s27 + $0xd8] sm:$0xff] }
 0x2d1   : > { %4005 = vmatprep.subr.bf16.mxu1 %v4775_v0  ;;  %v4703_v0 = vcombine.high %v2358_v54, %v2362_v55  ;;  %v2283_v48 = vld [vmem:[%s5750_s27 + $0xf8] sm:$0xff] }
 0x2d2   : > { %v2407_v49 = vld [vmem:[%s5750_s27 + $0x4d8] sm:$0xff] }
 0x2d3   : > { %3965 = vmatpush1.bf16.msra.mxu0 %v4646_v5  ;;  %v2498_v5 = vld [vmem:[%s5750_s27 + $0x7b0] sm:$0xff] }
 0x2d4   : > { %4006 = vmatpush1.bf16.msra.mxu1 %v4774_v6  ;;  %3966 = vmatprep.subr.bf16.mxu0 %v4655_v7  ;;  %v4702_v6 = vcombine.low %v2358_v54, %v2362_v55  ;;  %v4830_v7 = vcombine.low %v2486_v60, %v2490_v61  ;;  %v4839_v9 = vcombine.high %v2494_v4, %v2498_v5  ;;  %v2291_v54 = vld [vmem:[%s5750_s27 + $0x138] sm:$0xff] }
 0x2d5   : > { %4007 = vmatprep.subr.bf16.mxu1 %v4783_v8  ;;  %v4711_v8 = vcombine.high %v2366_v2, %v2370_v3  ;;  %v2415_v55 = vld [vmem:[%s5750_s27 + $0x518] sm:$0xff]  ;;  %v4624_v61 = vcombine.low %v2279_v47, %v2283_v48 }
 0x2d6   : > { %v2419_v60 = vld [vmem:[%s5750_s27 + $0x538] sm:$0xff] }
 0x2d7   : > { %3967 = vmatpush1.bf16.msra.mxu0 %v4654_v13  ;;  %v2506_v13 = vld [vmem:[%s5750_s27 + $0x7f0] sm:$0xff] }
 0x2d8   : > { %4008 = vmatpush1.bf16.msra.mxu1 %v4782_v14  ;;  %3968 = vmatprep.subr.bf16.mxu0 %v4663_v15  ;;  %v4710_v14 = vcombine.low %v2366_v2, %v2370_v3  ;;  %v4838_v15 = vcombine.low %v2494_v4, %v2498_v5  ;;  %v4847_v17 = vcombine.high %v2502_v12, %v2506_v13  ;;  %v2299_v2 = vld [vmem:[%s5750_s27 + $0x178] sm:$0xff] }
 0x2d9   : > { %4009 = vmatprep.subr.bf16.mxu1 %v4791_v16  ;;  %v4719_v16 = vcombine.high %v2374_v10, %v2378_v11  ;;  %v2423_v3 = vld [vmem:[%s5750_s27 + $0x558] sm:$0xff] }
 0x2da   : > { %v2427_v4 = vld [vmem:[%s5750_s27 + $0x578] sm:$0xff] }
 0x2db   : > { %3969 = vmatpush1.bf16.msra.mxu0 %v4662_v21  ;;  %v2387_v21 = vld [vmem:[%s5750_s27 + $0x438] sm:$0xff] }
 0x2dc   : > { %4010 = vmatpush1.bf16.msra.mxu1 %v4790_v22  ;;  %3970 = vmatprep.subr.bf16.mxu0 %v4671_v23  ;;  %v4718_v22 = vcombine.low %v2374_v10, %v2378_v11  ;;  %v4846_v23 = vcombine.low %v2502_v12, %v2506_v13  ;;  %v4729_v25 = vcombine.high %v2383_v20, %v2387_v21  ;;  %v2307_v10 = vld [vmem:[%s5750_s27 + $0x1b8] sm:$0xff] }
 0x2dd   : > { %4011 = vmatprep.subr.bf16.mxu1 %v4799_v24  ;;  %v4601_v24 = vcombine.high %v2255_v18, %v2259_v19  ;;  %v2431_v11 = vld [vmem:[%s5750_s27 + $0x598] sm:$0xff] }
 0x2de   : > { %v2435_v12 = vld [vmem:[%s5750_s27 + $0x5b8] sm:$0xff] }
 0x2df   : > { %3971 = vmatpush1.bf16.msra.mxu0 %v4670_v34  ;;  %v2391_v34 = vld [vmem:[%s5750_s27 + $0x458] sm:$0xff] }
 0x2e0   : > { %4012 = vmatpush1.bf16.msra.mxu1 %v4798_v35  ;;  %3972 = vmatprep.subr.bf16.mxu0 %v4679_v36  ;;  %v2395_v35 = vld [vmem:[%s5750_s27 + $0x478] sm:$0xff]  ;;  %v4728_v36 = vcombine.low %v2383_v20, %v2387_v21 }
 0x2e1   : > { %4013 = vmatprep.subr.bf16.mxu1 %v4807_v37  ;;  %v4609_v37 = vcombine.high %v2263_v29, %v2267_v32  ;;  %v4737_v40 = vcombine.high %v2391_v34, %v2395_v35  ;;  %v2315_v18 = vld [vmem:[%s5750_s27 + $0x1f8] sm:$0xff] }
 0x2e2   : > { %v2439_v19 = vld [vmem:[%s5750_s27 + $0x5d8] sm:$0xff] }
 0x2e3   : > { %3973 = vmatpush1.bf16.msra.mxu0 %v4678_v42  ;;  %v2403_v42 = vld [vmem:[%s5750_s27 + $0x4b8] sm:$0xff] }
 0x2e4   : > { %4014 = vmatpush1.bf16.msra.mxu1 %v4806_v43  ;;  %3974 = vmatprep.subr.bf16.mxu0 %v4687_v44  ;;  %v4608_v43 = vcombine.low %v2263_v29, %v2267_v32  ;;  %v4736_v44 = vcombine.low %v2391_v34, %v2395_v35  ;;  %v4745_v46 = vcombine.high %v2399_v41, %v2403_v42  ;;  %v2443_v20 = vld [vmem:[%s5750_s27 + $0x5f8] sm:$0xff] }
 0x2e5   : > { %4015 = vmatprep.subr.bf16.mxu1 %v4815_v45  ;;  %v4617_v45 = vcombine.high %v2271_v38, %v2275_v39  ;;  %v2323_v29 = vld [vmem:[%s5750_s27 + $0x238] sm:$0xff]  ;;  %v4784_v35 = vcombine.low %v2439_v19, %v2443_v20 }
 0x2e6   : > { %v2447_v32 = vld [vmem:[%s5750_s27 + $0x618] sm:$0xff] }
 0x2e7   : > { %3975 = vmatpush1.bf16.msra.mxu0 %v4686_v50  ;;  %v2411_v50 = vld [vmem:[%s5750_s27 + $0x4f8] sm:$0xff] }
 0x2e8   : > { %4016 = vmatpush1.bf16.msra.mxu1 %v4814_v51  ;;  %3976 = vmatprep.subr.bf16.mxu0 %v4695_v52  ;;  %v4616_v51 = vcombine.low %v2271_v38, %v2275_v39  ;;  %v4625_v52 = vcombine.high %v2279_v47, %v2283_v48  ;;  %v2327_v38 = vld [vmem:[%s5750_s27 + $0x258] sm:$0xff] }
 0x2e9   : > { %4017 = vmatprep.subr.bf16.mxu1 %v4823_v53  ;;  %v2287_v53 = vld [vmem:[%s5750_s27 + $0x118] sm:$0xff] }
 0x2ea   : > { %v4632_v5 = vcombine.low %v2287_v53, %v2291_v54  ;;  %v2331_v39 = vld [vmem:[%s5750_s27 + $0x278] sm:$0xff] }
 0x2eb   : > { %3977 = vmatpush1.bf16.msra.mxu0 %v4694_v62  ;;  %v4752_v62 = vcombine.low %v2407_v49, %v2411_v50  ;;  %v2339_v47 = vld [vmem:[%s5750_s27 + $0x2b8] sm:$0xff] }
 0x2ec   : > { %4018 = vmatpush1.bf16.msra.mxu1 %v4822_v63  ;;  %3978 = vmatprep.subr.bf16.mxu0 %v4703_v0  ;;  %v4633_v63 = vcombine.high %v2287_v53, %v2291_v54  ;;  %v4761_v0 = vcombine.high %v2415_v55, %v2419_v60  ;;  %v2463_v48 = vld [vmem:[%s5750_s27 + $0x698] sm:$0xff] }
 0x2ed   : > { %4019 = vmatprep.subr.bf16.mxu1 %v4831_v1  ;;  %v2295_v1 = vld [vmem:[%s5750_s27 + $0x158] sm:$0xff] }
 0x2ee   : > { %v4640_v13 = vcombine.low %v2295_v1, %v2299_v2  ;;  %v2347_v53 = vld [vmem:[%s5750_s27 + $0x2f8] sm:$0xff] }
 0x2ef   : > { %3979 = vmatpush1.bf16.msra.mxu0 %v4702_v6  ;;  %v4760_v6 = vcombine.low %v2415_v55, %v2419_v60  ;;  %v2471_v54 = vld [vmem:[%s5750_s27 + $0x6d8] sm:$0xff] }
 0x2f0   : > { %4020 = vmatpush1.bf16.msra.mxu1 %v4830_v7  ;;  %3980 = vmatprep.subr.bf16.mxu0 %v4711_v8  ;;  %v4641_v7 = vcombine.high %v2295_v1, %v2299_v2  ;;  %v4769_v8 = vcombine.high %v2423_v3, %v2427_v4  ;;  %v2475_v55 = vld [vmem:[%s5750_s27 + $0x6f8] sm:$0xff] }
 0x2f1   : > { %4021 = vmatprep.subr.bf16.mxu1 %v4839_v9  ;;  %v2303_v9 = vld [vmem:[%s5750_s27 + $0x198] sm:$0xff] }
 0x2f2   : > { %v4648_v21 = vcombine.low %v2303_v9, %v2307_v10  ;;  %v2355_v1 = vld [vmem:[%s5750_s27 + $0x338] sm:$0xff] }
 0x2f3   : > { %3981 = vmatpush1.bf16.msra.mxu0 %v4710_v14  ;;  %v4768_v14 = vcombine.low %v2423_v3, %v2427_v4  ;;  %v2479_v2 = vld [vmem:[%s5750_s27 + $0x718] sm:$0xff] }
 0x2f4   : > { %4022 = vmatpush1.bf16.msra.mxu1 %v4838_v15  ;;  %3982 = vmatprep.subr.bf16.mxu0 %v4719_v16  ;;  %v4649_v15 = vcombine.high %v2303_v9, %v2307_v10  ;;  %v4777_v16 = vcombine.high %v2431_v11, %v2435_v12  ;;  %v2483_v3 = vld [vmem:[%s5750_s27 + $0x738] sm:$0xff] }
 0x2f5   : > { %4023 = vmatprep.subr.bf16.mxu1 %v4847_v17  ;;  %v2311_v17 = vld [vmem:[%s5750_s27 + $0x1d8] sm:$0xff] }
 0x2f6   : > { %v4656_v34 = vcombine.low %v2311_v17, %v2315_v18  ;;  %v2363_v9 = vld [vmem:[%s5750_s27 + $0x378] sm:$0xff] }
 0x2f7   : > { %3983 = vmatpush1.bf16.msra.mxu0 %v4718_v22  ;;  %v4776_v22 = vcombine.low %v2431_v11, %v2435_v12  ;;  %v2487_v10 = vld [vmem:[%s5750_s27 + $0x758] sm:$0xff] }
 0x2f8   : > { %4024 = vmatpush1.bf16.msra.mxu1 %v4846_v23  ;;  %4034 = vmatprep.subr.bf16.mxu0 %v4601_v24  ;;  %v4657_v23 = vcombine.high %v2311_v17, %v2315_v18  ;;  %v4785_v24 = vcombine.high %v2439_v19, %v2443_v20  ;;  %v2491_v11 = vld [vmem:[%s5750_s27 + $0x778] sm:$0xff] }
 0x2f9   : > { %4075 = vmatprep.subr.bf16.mxu1 %v4729_v25  ;;  %v2319_v25 = vld [vmem:[%s5750_s27 + $0x218] sm:$0xff] }
 0x2fa   : > { %3985 = vmatmul.mubr.bf16.vlgmr.msra.gmra.mrb[12].mxu0 %v6153_v58  ;;  %v2371_v17 = vld [vmem:[%s5750_s27 + $0x3b8] sm:$0xff] }
 0x2fb   : > { %4026 = vmatmul.mubr.bf16.vlgmr.msra.gmra.mrb[12].mxu1 %v6155_v59  ;;  %4035 = vmatpush1.bf16.msra.mxu0 %v4600_v33  ;;  %v2451_v33 = vld [vmem:[%s5750_s27 + $0x638] sm:$0xff] }
 0x2fc   : > { %4066 = vmatprep.mubr.bf16.mxu0 %v6149_v56  ;;  %4076 = vmatpush1.bf16.msra.mxu1 %v4728_v36  ;;  %v4744_v56 = vcombine.low %v2399_v41, %v2403_v42  ;;  %v4665_v36 = vcombine.high %v2319_v25, %v2323_v29  ;;  %v2459_v41 = vld [vmem:[%s5750_s27 + $0x678] sm:$0xff]  ;;  %v4664_v42 = vcombine.low %v2319_v25, %v2323_v29 }
 0x2fd   : > { %4107 = vmatprep.mubr.bf16.mxu1 %v6151_v57  ;;  %4036 = vmatprep.subr.bf16.mxu0 %v4609_v37  ;;  %v4753_v57 = vcombine.high %v2407_v49, %v2411_v50  ;;  %v4793_v37 = vcombine.high %v2447_v32, %v2451_v33  ;;  %v2467_v49 = vld [vmem:[%s5750_s27 + $0x6b8] sm:$0xff]  ;;  %v4672_v50 = vcombine.low %v2327_v38, %v2331_v39 }
 0x2fe   : > { %4077 = vmatprep.subr.bf16.mxu1 %v4737_v40  ;;  %v2455_v40 = vld [vmem:[%s5750_s27 + $0x658] sm:$0xff] }
 0x2ff   : > { %4037 = vmatpush1.bf16.msra.mxu0 %v4608_v43  ;;  %v4792_v43 = vcombine.low %v2447_v32, %v2451_v33  ;;  %v2495_v18 = vld [vmem:[%s5750_s27 + $0x798] sm:$0xff] }
 0x300   : > { %4078 = vmatpush1.bf16.msra.mxu1 %v4736_v44  ;;  %4038 = vmatprep.subr.bf16.mxu0 %v4617_v45  ;;  %v4673_v44 = vcombine.high %v2327_v38, %v2331_v39  ;;  %v4801_v45 = vcombine.high %v2455_v40, %v2459_v41  ;;  %v2499_v19 = vld [vmem:[%s5750_s27 + $0x7b8] sm:$0xff] }
 0x301   : > { %4079 = vmatprep.subr.bf16.mxu1 %v4745_v46  ;;  %v2335_v46 = vld [vmem:[%s5750_s27 + $0x298] sm:$0xff] }
 0x302   : > { %v4680_v60 = vcombine.low %v2335_v46, %v2339_v47  ;;  %v2379_v25 = vld [vmem:[%s5750_s27 + $0x3f8] sm:$0xff] }
 0x303   : > { %4039 = vmatpush1.bf16.msra.mxu0 %v4616_v51  ;;  %v4800_v51 = vcombine.low %v2455_v40, %v2459_v41  ;;  %v2503_v29 = vld [vmem:[%s5750_s27 + $0x7d8] sm:$0xff] }
 0x304   : > { %4080 = vmatpush1.bf16.msra.mxu1 %v4744_v56  ;;  %4040 = vmatprep.subr.bf16.mxu0 %v4625_v52  ;;  %v4681_v56 = vcombine.high %v2335_v46, %v2339_v47  ;;  %v4809_v52 = vcombine.high %v2463_v48, %v2467_v49  ;;  %v2507_v32 = vld [vmem:[%s5750_s27 + $0x7f8] sm:$0xff] }
 0x305   : > { %4081 = vmatprep.subr.bf16.mxu1 %v4753_v57  ;;  %v2343_v57 = vld [vmem:[%s5750_s27 + $0x2d8] sm:$0xff]  ;;  %v4848_v38 = vcombine.low %v2503_v29, %v2507_v32 }
 0x306   : > { %v4688_v4 = vcombine.low %v2343_v57, %v2347_v53  ;;  %v2240_v40 = vld [vmem:[%s6508_s5] sm:$0xff] }
 0x307   : > { %4041 = vmatpush1.bf16.msra.mxu0 %v4624_v61  ;;  %v4808_v61 = vcombine.low %v2463_v48, %v2467_v49 }
 0x308   : > { %4082 = vmatpush1.bf16.msra.mxu1 %v4752_v62  ;;  %4042 = vmatprep.subr.bf16.mxu0 %v4633_v63  ;;  %v4689_v62 = vcombine.high %v2343_v57, %v2347_v53  ;;  %v4817_v63 = vcombine.high %v2471_v54, %v2475_v55 }
 0x309   : > { %4083 = vmatprep.subr.bf16.mxu1 %v4761_v0  ;;  %v2351_v0 = vld [vmem:[%s5750_s27 + $0x318] sm:$0xff] }
 0x30a   : > { %v4696_v12 = vcombine.low %v2351_v0, %v2355_v1 }
 0x30b   : > { %4043 = vmatpush1.bf16.msra.mxu0 %v4632_v5  ;;  %v4816_v5 = vcombine.low %v2471_v54, %v2475_v55  ;;  %v2243_v54 = vld [vmem:[%s6508_s5 + $0x18] sm:$0xff] }
 0x30c   : > { %4084 = vmatpush1.bf16.msra.mxu1 %v4760_v6  ;;  %4044 = vmatprep.subr.bf16.mxu0 %v4641_v7  ;;  %v4697_v6 = vcombine.high %v2351_v0, %v2355_v1  ;;  %v4825_v7 = vcombine.high %v2479_v2, %v2483_v3 }
 0x30d   : > { %4085 = vmatprep.subr.bf16.mxu1 %v4769_v8  ;;  %v2359_v8 = vld [vmem:[%s5750_s27 + $0x358] sm:$0xff] }
 0x30e   : > { %v4704_v20 = vcombine.low %v2359_v8, %v2363_v9 }
 0x30f   : > { %4045 = vmatpush1.bf16.msra.mxu0 %v4640_v13  ;;  %v4824_v13 = vcombine.low %v2479_v2, %v2483_v3 }
 0x310   : > { %4086 = vmatpush1.bf16.msra.mxu1 %v4768_v14  ;;  %4046 = vmatprep.subr.bf16.mxu0 %v4649_v15  ;;  %v4705_v14 = vcombine.high %v2359_v8, %v2363_v9  ;;  %v4833_v15 = vcombine.high %v2487_v10, %v2491_v11  ;;  %v2245_v8 = vld [vmem:[%s6508_s5 + $0x28] sm:$0xff] }
 0x311   : > { %4087 = vmatprep.subr.bf16.mxu1 %v4777_v16  ;;  %v2367_v16 = vld [vmem:[%s5750_s27 + $0x398] sm:$0xff] }
 0x312   : > { %v4712_v33 = vcombine.low %v2367_v16, %v2371_v17 }
 0x313   : > { %4047 = vmatpush1.bf16.msra.mxu0 %v4648_v21  ;;  %v4832_v21 = vcombine.low %v2487_v10, %v2491_v11 }
 0x314   : > { %4088 = vmatpush1.bf16.msra.mxu1 %v4776_v22  ;;  %4048 = vmatprep.subr.bf16.mxu0 %v4657_v23  ;;  %v4713_v22 = vcombine.high %v2367_v16, %v2371_v17  ;;  %v4841_v23 = vcombine.high %v2495_v18, %v2499_v19 }
 0x315   : > { %4089 = vmatprep.subr.bf16.mxu1 %v4785_v24  ;;  %v2375_v24 = vld [vmem:[%s5750_s27 + $0x3d8] sm:$0xff] }
 0x317   : > { %4049 = vmatpush1.bf16.msra.mxu0 %v4656_v34  ;;  %v4840_v34 = vcombine.low %v2495_v18, %v2499_v19  ;;  %v2246_v18 = vld [vmem:[%s6508_s5 + $0x30] sm:$0xff] }
 0x318   : > { %4090 = vmatpush1.bf16.msra.mxu1 %v4784_v35  ;;  %4050 = vmatprep.subr.bf16.mxu0 %v4665_v36  ;;  %v4721_v35 = vcombine.high %v2375_v24, %v2379_v25  ;;  %v4849_v36 = vcombine.high %v2503_v29, %v2507_v32 }
 0x319   : > { %4091 = vmatprep.subr.bf16.mxu1 %v4793_v37  ;;  %v4720_v37 = vcombine.low %v2375_v24, %v2379_v25 }
 0x31b   : > { %4051 = vmatpush1.bf16.msra.mxu0 %v4664_v42 }
 0x31c   : > { %4092 = vmatpush1.bf16.msra.mxu1 %v4792_v43  ;;  %4052 = vmatprep.subr.bf16.mxu0 %v4673_v44  ;;  %v2241_v44 = vld [vmem:[%s6508_s5 + $0x8] sm:$0xff] }
 0x31d   : > { %4093 = vmatprep.subr.bf16.mxu1 %v4801_v45 }
 0x31f   : > { %4053 = vmatpush1.bf16.msra.mxu0 %v4672_v50 }
 0x320   : > { %4094 = vmatpush1.bf16.msra.mxu1 %v4800_v51  ;;  %4054 = vmatprep.subr.bf16.mxu0 %v4681_v56  ;;  %v2242_v56 = vld [vmem:[%s6508_s5 + $0x10] sm:$0xff] }
 0x321   : > { %4095 = vmatprep.subr.bf16.mxu1 %v4809_v52 }
 0x323   : > { %4055 = vmatpush1.bf16.msra.mxu0 %v4680_v60 }
 0x324   : > { %4096 = vmatpush1.bf16.msra.mxu1 %v4808_v61  ;;  %4056 = vmatprep.subr.bf16.mxu0 %v4689_v62 }
 0x325   : > { %4097 = vmatprep.subr.bf16.mxu1 %v4817_v63 }
 0x327   : > { %4057 = vmatpush1.bf16.msra.mxu0 %v4688_v4  ;;  %v2244_v4 = vld [vmem:[%s6508_s5 + $0x20] sm:$0xff] }
 0x328   : > { %4098 = vmatpush1.bf16.msra.mxu1 %v4816_v5  ;;  %4058 = vmatprep.subr.bf16.mxu0 %v4697_v6 }
 0x329   : > { %4099 = vmatprep.subr.bf16.mxu1 %v4825_v7 }
 0x32b   : > { %4059 = vmatpush1.bf16.msra.mxu0 %v4696_v12 }
 0x32c   : > { %4100 = vmatpush1.bf16.msra.mxu1 %v4824_v13  ;;  %4060 = vmatprep.subr.bf16.mxu0 %v4705_v14 }
 0x32d   : > { %4101 = vmatprep.subr.bf16.mxu1 %v4833_v15 }
 0x32f   : > { %4061 = vmatpush1.bf16.msra.mxu0 %v4704_v20 }
 0x330   : > { %4102 = vmatpush1.bf16.msra.mxu1 %v4832_v21  ;;  %4062 = vmatprep.subr.bf16.mxu0 %v4713_v22  ;;  %v2247_v22 = vld [vmem:[%s6508_s5 + $0x38] sm:$0xff] }
 0x331   : > { %4103 = vmatprep.subr.bf16.mxu1 %v4841_v23 }
 0x333   : > { %4063 = vmatpush1.bf16.msra.mxu0 %v4712_v33 }
 0x334   : > { %4104 = vmatpush1.bf16.msra.mxu1 %v4840_v34  ;;  %4064 = vmatprep.subr.bf16.mxu0 %v4721_v35 }
 0x335   : > { %4105 = vmatprep.subr.bf16.mxu1 %v4849_v36 }
 0x337   : > { %4065 = vmatpush1.bf16.msra.mxu0 %v4720_v37  ;;  %v4144_v37 = vld [vmem:[#allocation7] sm:$0xff] (!%p4850_p4) }
 0x338   : > { %4106 = vmatpush1.bf16.msra.mxu1 %v4848_v38  ;;  %v4194_v38 = vld [vmem:[%s6503_s0] sm:$0xff] (!%p4850_p4) }
 0x33a   : > { %4067 = vmatmul.mubr.bf16.vlgmr.msra.gmra.mrb[16].mxu0 %v6153_v58 }
 0x33b   : > { %4108 = vmatmul.mubr.bf16.vlgmr.msra.gmra.mrb[16].mxu1 %v6155_v59 }
 0x34d   : > { %v3822_v39 = vpop.f32.mrb[4].mxu0  ;;  %v3863_v41 = vpop.f32.mrb[4].mxu1 }
 0x34e   : > { %v3864_v42 = vadd.f32 %v3863_v41, %v3822_v39  ;;  %v3824_v43 = vpop.f32.mrb[5].mxu0  ;;  %v3865_v45 = vpop.f32.mrb[5].mxu1  ;;  %v4164_v39 = vsub.s32 (!%p4850_p4), 4, %v6130_v26  ;;  %v4172_v41 = vsub.s32 (!%p4850_p4), 6, %v6130_v26 }
 0x34f   : > { %v3866_v46 = vadd.f32 %v3865_v45, %v3824_v43  ;;  %v3826_v47 = vpop.f32.mrb[6].mxu0  ;;  %v3867_v48 = vpop.f32.mrb[6].mxu1  ;;  %v4195_v45 = vld [vmem:[%s6503_s0 + $0x8] sm:$0xff] (!%p4850_p4) }
 0x350   : > { %v4116_v49 = vadd.f32 %v3864_v42, %v2240_v40  ;;  %v3827_v58 = vpop.f32.mrb[7].mxu0  ;;  %v3868_v50 = vpop.f32.mrb[7].mxu1  ;;  %v4168_v40 = vsub.s32 (!%p4850_p4), 5, %v6130_v26  ;;  %v4149_v42 = vrot.slane (!%p4850_p4), %v4144_v37, %v610_v27  ;;  %v4157_v47 = vrot.slane (!%p4850_p4), %v4144_v37, %v618_v28  ;;  %v4196_v48 = vld [vmem:[%s6503_s0 + $0x10] sm:$0xff] (!%p4850_p4) }
 0x351   : > { %v4117_v59 = vadd.f32 %v3866_v46, %v2241_v44  ;;  %v4153_v44 = vrot.slane (!%p4850_p4), %v4144_v37, %v614_v30  ;;  %v4161_v27 = vrot.slane (!%p4850_p4), %v4144_v37, %v622_v31  ;;  %v4165_v58 = vrot.slane (!%p4850_p4), %v4144_v37, %v4164_v39 }
 0x352   : > { %4124 = vst [vmem:[%s6508_s5] sm:$0xff] %v4116_v49  ;;  %v4197_v49 = vld [vmem:[%s6503_s0 + $0x18] sm:$0xff] (!%p4850_p4)  ;;  %v4169_v50 = vrot.slane (!%p4850_p4), %v4144_v37, %v4168_v40  ;;  %v4176_v28 = vsub.s32 (!%p4850_p4), 7, %v6130_v26  ;;  %v4199_v26 = vld [vmem:[%s6503_s0 + $0x28] sm:$0xff] (!%p4850_p4) }
 0x353   : > { %4125 = vst [vmem:[%s6508_s5 + $0x8] sm:$0xff] %v4117_v59  ;;  %v4173_v59 = vrot.slane (!%p4850_p4), %v4144_v37, %v4172_v41 }
 0x359   : > { %v4136_v36 = vld [vmem:[%s6508_s5] sm:$0xff] (!%p4850_p4) }
 0x35a   : > { %v4137_v43 = vld [vmem:[%s6508_s5 + $0x8] sm:$0xff] (!%p4850_p4) }
 0x38d   : > { %v3904_v51 = vpop.f32.mrb[8].mxu0  ;;  %v3945_v52 = vpop.f32.mrb[8].mxu1 }
 0x38e   : > { %v3946_v57 = vadd.f32 %v3945_v52, %v3904_v51  ;;  %v3906_v53 = vpop.f32.mrb[9].mxu0  ;;  %v3947_v55 = vpop.f32.mrb[9].mxu1  ;;  %v4186_v51 = vadd.f32 (!%p4850_p4), %v4149_v42, %v4136_v36 }
 0x38f   : > { %v3948_v60 = vadd.f32 %v3947_v55, %v3906_v53  ;;  %v3908_v61 = vpop.f32.mrb[10].mxu0  ;;  %v3949_v62 = vpop.f32.mrb[10].mxu1  ;;  %v4198_v53 = vld [vmem:[%s6503_s0 + $0x20] sm:$0xff] (!%p4850_p4) }
 0x390   : > { %v4118_v63 = vadd.f32 %v3946_v57, %v2242_v56  ;;  %v3909_v0 = vpop.f32.mrb[11].mxu0  ;;  %v3950_v1 = vpop.f32.mrb[11].mxu1  ;;  %v4187_v56 = vadd.f32 (!%p4850_p4), %v4153_v44, %v4137_v43  ;;  %v4177_v62 = vrot.slane (!%p4850_p4), %v4144_v37, %v4176_v28 }
 0x391   : > { %v4119_v2 = vadd.f32 %v3948_v60, %v2243_v54 }
 0x392   : > { %4126 = vst [vmem:[%s6508_s5 + $0x10] sm:$0xff] %v4118_v63  ;;  %v4202_v63 = vadd.f32 (!%p4850_p4), %v4194_v38, %v4186_v51  ;;  %v4203_v0 = vadd.f32 (!%p4850_p4), %v4195_v45, %v4187_v56 }
 0x393   : > { %4127 = vst [vmem:[%s6508_s5 + $0x18] sm:$0xff] %v4119_v2 }
 0x399   : > { %v4138_v46 = vld [vmem:[%s6508_s5 + $0x10] sm:$0xff] (!%p4850_p4) }
 0x39a   : > { %v4139_v30 = vld [vmem:[%s6508_s5 + $0x18] sm:$0xff] (!%p4850_p4)  ;;  %v4188_v31 = vadd.f32 (!%p4850_p4), %v4157_v47, %v4138_v46 }
 0x39b   : > { %v4189_v52 = vadd.f32 (!%p4850_p4), %v4161_v27, %v4139_v30 }
 0x39c   : > { %v4204_v1 = vadd.f32 (!%p4850_p4), %v4196_v48, %v4188_v31 }
 0x39d   : > { %v4205_v2 = vadd.f32 (!%p4850_p4), %v4197_v49, %v4189_v52 }
 0x3cd   : > { %v3986_v3 = vpop.f32.mrb[12].mxu0 }
 0x3ce   : > { %v4027_v5 = vpop.f32.mrb[12].mxu1  ;;  %v3988_v6 = vpop.f32.mrb[13].mxu0 }
 0x3cf   : > { %v4028_v7 = vadd.f32 %v4027_v5, %v3986_v3  ;;  %v4029_v9 = vpop.f32.mrb[13].mxu1  ;;  %v3990_v10 = vpop.f32.mrb[14].mxu0  ;;  %v4200_v3 = vld [vmem:[%s6503_s0 + $0x30] sm:$0xff] (!%p4850_p4)  ;;  %v4201_v5 = vld [vmem:[%s6503_s0 + $0x38] sm:$0xff] (!%p4850_p4) }
 0x3d0   : > { %v4030_v11 = vadd.f32 %v4029_v9, %v3988_v6  ;;  %v4031_v12 = vpop.f32.mrb[14].mxu1  ;;  %v3991_v13 = vpop.f32.mrb[15].mxu0  ;;  %v4210_v10 = vmax.f32 (!%p4850_p4), %v4202_v63, 0.0 }
 0x3d1   : > { %v4120_v14 = vadd.f32 %v4028_v7, %v2244_v4  ;;  %v4032_v15 = vpop.f32.mrb[15].mxu1  ;;  %v4212_v12 = vmax.f32 (!%p4850_p4), %v4204_v1, 0.0  ;;  %v4213_v13 = vmax.f32 (!%p4850_p4), %v4205_v2, 0.0 }
 0x3d2   : > { %v4121_v16 = vadd.f32 %v4030_v11, %v2245_v8  ;;  %v4211_v11 = vmax.f32 (!%p4850_p4), %v4203_v0, 0.0  ;;  %4218 = vst [vmem:[%s6508_s5] sm:$0xff] (!%p4850_p4), %v4210_v10 }
 0x3d3   : > { %4128 = vst [vmem:[%s6508_s5 + $0x20] sm:$0xff] %v4120_v14  ;;  %4220 = vst [vmem:[%s6508_s5 + $0x10] sm:$0xff] (!%p4850_p4), %v4212_v12 }
 0x3d4   : > { %4129 = vst [vmem:[%s6508_s5 + $0x28] sm:$0xff] %v4121_v16  ;;  %4219 = vst [vmem:[%s6508_s5 + $0x8] sm:$0xff] (!%p4850_p4), %v4211_v11 }
 0x3d5   : > { %4221 = vst [vmem:[%s6508_s5 + $0x18] sm:$0xff] (!%p4850_p4), %v4213_v13 }
 0x3da   : > { %v4140_v57 = vld [vmem:[%s6508_s5 + $0x20] sm:$0xff] (!%p4850_p4) }
 0x3db   : > { %v4141_v54 = vld [vmem:[%s6508_s5 + $0x28] sm:$0xff] (!%p4850_p4)  ;;  %v4190_v55 = vadd.f32 (!%p4850_p4), %v4165_v58, %v4140_v57 }
 0x3dc   : > { %v4191_v60 = vadd.f32 (!%p4850_p4), %v4169_v50, %v4141_v54 }
 0x3dd   : > { %v4206_v6 = vadd.f32 (!%p4850_p4), %v4198_v53, %v4190_v55 }
 0x3de   : > { %v4207_v7 = vadd.f32 (!%p4850_p4), %v4199_v26, %v4191_v60 }
 0x3df   : > { %v4214_v14 = vmax.f32 (!%p4850_p4), %v4206_v6, 0.0 }
 0x3e0   : > { %v4215_v15 = vmax.f32 (!%p4850_p4), %v4207_v7, 0.0 }
 0x3e1   : > { %4222 = vst [vmem:[%s6508_s5 + $0x20] sm:$0xff] (!%p4850_p4), %v4214_v14 }
 0x3e2   : > { %4223 = vst [vmem:[%s6508_s5 + $0x28] sm:$0xff] (!%p4850_p4), %v4215_v15 }
 0x40d   : > { %v4068_v17 = vpop.f32.mrb[16].mxu0 }
 0x40e   : > { %v4109_v19 = vpop.f32.mrb[16].mxu1  ;;  %v4070_v20 = vpop.f32.mrb[17].mxu0  ;;  %4135 = sbr.rel (%p4850_p4) target bundleno = 1059 (0x423), region = 64 }
 0x40f   : > { %v4110_v21 = vadd.f32 %v4109_v19, %v4068_v17  ;;  %v4111_v23 = vpop.f32.mrb[17].mxu1  ;;  %v4072_v24 = vpop.f32.mrb[18].mxu0 }
 0x410   : > { %v4112_v25 = vadd.f32 %v4111_v23, %v4070_v20  ;;  %v4113_v29 = vpop.f32.mrb[18].mxu1  ;;  %v4073_v32 = vpop.f32.mrb[19].mxu0 }
 0x411   : > { %v4122_v33 = vadd.f32 %v4110_v21, %v2246_v18  ;;  %v4114_v34 = vpop.f32.mrb[19].mxu1 }
 0x412   : > { %v4123_v35 = vadd.f32 %v4112_v25, %v2247_v22 }
 0x413   : > { %4130 = vst [vmem:[%s6508_s5 + $0x30] sm:$0xff] %v4122_v33 }
 0x414   : > { %4131 = vst [vmem:[%s6508_s5 + $0x38] sm:$0xff] %v4123_v35 }
 0x41a   : > { %v4142_v61 = vld [vmem:[%s6508_s5 + $0x30] sm:$0xff] }
 0x41b   : > { %v4143_v4 = vld [vmem:[%s6508_s5 + $0x38] sm:$0xff]  ;;  %v4192_v8 = vadd.f32 %v4173_v59, %v4142_v61 }
 0x41c   : > { %v4193_v9 = vadd.f32 %v4177_v62, %v4143_v4 }
 0x41d   : > { %v4208_v16 = vadd.f32 %v4200_v3, %v4192_v8 }
 0x41e   : > { %v4209_v17 = vadd.f32 %v4201_v5, %v4193_v9 }
 0x41f   : > { %v4216_v18 = vmax.f32 %v4208_v16, 0.0 }
 0x420   : > { %v4217_v19 = vmax.f32 %v4209_v17, 0.0 }
 0x421   : > { %4224 = vst [vmem:[%s6508_s5 + $0x30] sm:$0xff] %v4216_v18 }
 0x422   : > { %4225 = vst [vmem:[%s6508_s5 + $0x38] sm:$0xff] %v4217_v19 }
 0x423 PF: > { %s6536_s16 = sld [smem:[#allocation12_spill]]  ;;  %s6537_s20 = sld [smem:[#allocation13_spill]] }
 0x424   : > { %p19_p8 = scmp.ge.s32.totalorder %s5558_s22, 6   ;;  %s6538_s18 = smov %s5487_s19 }
 0x425   : > { %s6540_s21 = smov %s5558_s22 }
 0x426   :  { %21 = sbr.rel (!%p19_p8) target bundleno = 9 (0x9), region = 112 }
 0x429   : > { %s6539_s19 = smov %s6536_s16 }
 0x42d   :  { %4237 = vsyncpa [#allocation3], 1 }
 0x42e   :  { %4239 = vsyncpa [#allocation3 + $0x1], 1 }
 0x42f   :  { %4240 = vsyncpa [#allocation5], 1 }
 0x430   :  { %4242 = vsyncpa [#allocation5 + $0x1], 1 }
 0x431   :  { %4243 = vsyncpa [#allocation8], 1 }

// kernel: de_net_forward.12
= control target key start
LH: loop header
LB: loop body
LE: loop exit
PB: predicated region body
PF: predicated region fallthrough
CT: control target
= control target key end

     0   :  { %s5814_s21 = smov 0   ;;  %s5816_s22 = smov 0   ;;  %s7158_s0 = inlined_call_operand.vmem [shape: f32[8,1024], index: 0, kind: input, shape index: {}]   ;;  %s7159_s1 = inlined_call_operand.vmem [shape: bf16[1024,2048], index: 1, kind: input, shape index: {}]   ;;  %s7160_s2 = inlined_call_operand.vmem [shape: f32[1,2048], index: 2, kind: input, shape index: {}]   ;;  %s7161_s3 = inlined_call_operand.vmem [shape: bf16[2048,1024], index: 3, kind: input, shape index: {}]   ;;  %s7162_s4 = inlined_call_operand.vmem [shape: f32[1,1024], index: 4, kind: input, shape index: {}]   ;;  %s7163_s5 = inlined_call_operand.vmem [shape: f32[8,1024], index: 5, kind: input, shape index: {}]   ;;  %s7164_s6 = inlined_call_operand.vmem [shape: f32[8,1024], index: 6, kind: output, shape index: {}]  }
   0x1   :  { %s5818_s23 = smov 0  }
   0x2 LB: > { %s5830_s24 = sadd.s32 4294967295, %s5776_s23   ;;  %s5833_s25 = sadd.s32 1, %s5776_s23   ;;  %s5776_s23 = sphi %s5818_s23, %s7167_s23   ;;  %s5772_s22 = sphi %s5816_s22, %s7166_s22   ;;  %s5768_s21 = sphi %s5814_s21, %s7165_s21  }
   0x3   : > { %s41_s26 = ssub.s32 %s5776_s23, %s5833_s25  ;;  %s44_s27 = sadd.s32 1, %s5772_s22 }
   0x4   : > { %p42_p0 = scmp.eq.s32.totalorder %s41_s26, 0  ;;  %p51_p1 = scmp.ne.s32.totalorder %s5772_s22, %s5768_s21 }
   0x5   : > { %p52_p2 = scmp.eq.s32.totalorder %s5776_s23, 0  ;;  %p4789_p4 = scmp.ge.s32.totalorder %s5776_s23, 4 }
   0x6   : > { %s5842_s28 = scalar_select %p42_p0, %s5772_s22, %s44_s27  }
   0x7   : > { %p53_p3 = por %p52_p2, %p51_p1  ;;  %201 = sbr.rel (%p4789_p4) target bundleno = 146 (0x92), region = 28 }
   0xe   : > { %204 = sbr.rel (!%p53_p3) target bundleno = 146 (0x92), region = 32  ;;  %s206_s29 = sand.u32 (%p53_p3), 1, %s5772_s22  }
   0xf   : > { %s5315_s30 = sshll.u32 (%p53_p3), %s5776_s23, 4  ;;  %s4790_s7 = sshll.u32 (%p53_p3), %s206_s29, 11 }
  0x10   : > { %s5850_s10 = scalar_lea.vmem (%p53_p3), %s7159_s1, %s5315_s30  ;;  %s5855_s11 = scalar_lea.vmem (%p53_p3), [#allocation2], %s4790_s7 }
  0x11   : > { %v224_v0 = vld [vmem:[%s5850_s10] sm:$0xff] (%p53_p3)  ;;  %v226_v1 = vld [vmem:[%s5850_s10 + $0x8] sm:$0xff] (%p53_p3) }
  0x12   : > { %v228_v2 = vld [vmem:[%s5850_s10 + $0x40] sm:$0xff] (%p53_p3)  ;;  %225 = vst [vmem:[%s5855_s11] sm:$0xff] (%p53_p3), %v224_v0  ;;  %227 = vst [vmem:[%s5855_s11 + $0x8] sm:$0xff] (%p53_p3), %v226_v1  ;;  %v230_v3 = vld [vmem:[%s5850_s10 + $0x48] sm:$0xff] (%p53_p3) }
  0x13   : > { %229 = vst [vmem:[%s5855_s11 + $0x10] sm:$0xff] (%p53_p3), %v228_v2  ;;  %v232_v4 = vld [vmem:[%s5850_s10 + $0x80] sm:$0xff] (%p53_p3)  ;;  %v234_v5 = vld [vmem:[%s5850_s10 + $0x88] sm:$0xff] (%p53_p3)  ;;  %231 = vst [vmem:[%s5855_s11 + $0x18] sm:$0xff] (%p53_p3), %v230_v3 }
  0x14   : > { %233 = vst [vmem:[%s5855_s11 + $0x20] sm:$0xff] (%p53_p3), %v232_v4  ;;  %235 = vst [vmem:[%s5855_s11 + $0x28] sm:$0xff] (%p53_p3), %v234_v5  ;;  %v236_v6 = vld [vmem:[%s5850_s10 + $0xc0] sm:$0xff] (%p53_p3)  ;;  %v238_v7 = vld [vmem:[%s5850_s10 + $0xc8] sm:$0xff] (%p53_p3) }
  0x15   : > { %v240_v8 = vld [vmem:[%s5850_s10 + $0x100] sm:$0xff]  ;;  %237 = vst [vmem:[%s5855_s11 + $0x30] sm:$0xff] %v236_v6  ;;  %239 = vst [vmem:[%s5855_s11 + $0x38] sm:$0xff] %v238_v7  ;;  %v242_v9 = vld [vmem:[%s5850_s10 + $0x108] sm:$0xff] }
  0x16   : > { %241 = vst [vmem:[%s5855_s11 + $0x40] sm:$0xff] %v240_v8  ;;  %v244_v10 = vld [vmem:[%s5850_s10 + $0x140] sm:$0xff]  ;;  %v246_v11 = vld [vmem:[%s5850_s10 + $0x148] sm:$0xff]  ;;  %243 = vst [vmem:[%s5855_s11 + $0x48] sm:$0xff] %v242_v9 }
  0x17   : > { %245 = vst [vmem:[%s5855_s11 + $0x50] sm:$0xff] %v244_v10  ;;  %247 = vst [vmem:[%s5855_s11 + $0x58] sm:$0xff] %v246_v11  ;;  %v248_v12 = vld [vmem:[%s5850_s10 + $0x180] sm:$0xff]  ;;  %v250_v13 = vld [vmem:[%s5850_s10 + $0x188] sm:$0xff] }
  0x18   : > { %v252_v14 = vld [vmem:[%s5850_s10 + $0x1c0] sm:$0xff]  ;;  %249 = vst [vmem:[%s5855_s11 + $0x60] sm:$0xff] %v248_v12  ;;  %251 = vst [vmem:[%s5855_s11 + $0x68] sm:$0xff] %v250_v13  ;;  %v254_v15 = vld [vmem:[%s5850_s10 + $0x1c8] sm:$0xff] }
  0x19   : > { %253 = vst [vmem:[%s5855_s11 + $0x70] sm:$0xff] %v252_v14  ;;  %v256_v16 = vld [vmem:[%s5850_s10 + $0x200] sm:$0xff]  ;;  %v258_v17 = vld [vmem:[%s5850_s10 + $0x208] sm:$0xff]  ;;  %255 = vst [vmem:[%s5855_s11 + $0x78] sm:$0xff] %v254_v15 }
  0x1a   : > { %257 = vst [vmem:[%s5855_s11 + $0x80] sm:$0xff] %v256_v16  ;;  %259 = vst [vmem:[%s5855_s11 + $0x88] sm:$0xff] %v258_v17  ;;  %v260_v18 = vld [vmem:[%s5850_s10 + $0x240] sm:$0xff]  ;;  %v262_v19 = vld [vmem:[%s5850_s10 + $0x248] sm:$0xff] }
  0x1b   : > { %v264_v20 = vld [vmem:[%s5850_s10 + $0x280] sm:$0xff]  ;;  %261 = vst [vmem:[%s5855_s11 + $0x90] sm:$0xff] %v260_v18  ;;  %263 = vst [vmem:[%s5855_s11 + $0x98] sm:$0xff] %v262_v19  ;;  %v266_v21 = vld [vmem:[%s5850_s10 + $0x288] sm:$0xff] }
  0x1c   : > { %265 = vst [vmem:[%s5855_s11 + $0xa0] sm:$0xff] %v264_v20  ;;  %v268_v22 = vld [vmem:[%s5850_s10 + $0x2c0] sm:$0xff]  ;;  %v270_v23 = vld [vmem:[%s5850_s10 + $0x2c8] sm:$0xff]  ;;  %267 = vst [vmem:[%s5855_s11 + $0xa8] sm:$0xff] %v266_v21 }
  0x1d   : > { %269 = vst [vmem:[%s5855_s11 + $0xb0] sm:$0xff] %v268_v22  ;;  %271 = vst [vmem:[%s5855_s11 + $0xb8] sm:$0xff] %v270_v23  ;;  %v272_v24 = vld [vmem:[%s5850_s10 + $0x300] sm:$0xff]  ;;  %v274_v25 = vld [vmem:[%s5850_s10 + $0x308] sm:$0xff] }
  0x1e   : > { %v276_v26 = vld [vmem:[%s5850_s10 + $0x340] sm:$0xff]  ;;  %273 = vst [vmem:[%s5855_s11 + $0xc0] sm:$0xff] %v272_v24  ;;  %275 = vst [vmem:[%s5855_s11 + $0xc8] sm:$0xff] %v274_v25  ;;  %v278_v27 = vld [vmem:[%s5850_s10 + $0x348] sm:$0xff] }
  0x1f   : > { %277 = vst [vmem:[%s5855_s11 + $0xd0] sm:$0xff] %v276_v26  ;;  %v280_v28 = vld [vmem:[%s5850_s10 + $0x380] sm:$0xff]  ;;  %v282_v29 = vld [vmem:[%s5850_s10 + $0x388] sm:$0xff]  ;;  %279 = vst [vmem:[%s5855_s11 + $0xd8] sm:$0xff] %v278_v27 }
  0x20   : > { %281 = vst [vmem:[%s5855_s11 + $0xe0] sm:$0xff] %v280_v28  ;;  %283 = vst [vmem:[%s5855_s11 + $0xe8] sm:$0xff] %v282_v29  ;;  %v284_v30 = vld [vmem:[%s5850_s10 + $0x3c0] sm:$0xff]  ;;  %v286_v31 = vld [vmem:[%s5850_s10 + $0x3c8] sm:$0xff] }
  0x21   : > { %v288_v32 = vld [vmem:[%s5850_s10 + $0x400] sm:$0xff]  ;;  %285 = vst [vmem:[%s5855_s11 + $0xf0] sm:$0xff] %v284_v30  ;;  %287 = vst [vmem:[%s5855_s11 + $0xf8] sm:$0xff] %v286_v31  ;;  %v290_v33 = vld [vmem:[%s5850_s10 + $0x408] sm:$0xff] }
  0x22   : > { %289 = vst [vmem:[%s5855_s11 + $0x100] sm:$0xff] %v288_v32  ;;  %v292_v34 = vld [vmem:[%s5850_s10 + $0x440] sm:$0xff]  ;;  %v294_v35 = vld [vmem:[%s5850_s10 + $0x448] sm:$0xff]  ;;  %291 = vst [vmem:[%s5855_s11 + $0x108] sm:$0xff] %v290_v33 }
  0x23   : > { %293 = vst [vmem:[%s5855_s11 + $0x110] sm:$0xff] %v292_v34  ;;  %295 = vst [vmem:[%s5855_s11 + $0x118] sm:$0xff] %v294_v35  ;;  %v296_v36 = vld [vmem:[%s5850_s10 + $0x480] sm:$0xff]  ;;  %v298_v37 = vld [vmem:[%s5850_s10 + $0x488] sm:$0xff] }
  0x24   : > { %v300_v38 = vld [vmem:[%s5850_s10 + $0x4c0] sm:$0xff]  ;;  %297 = vst [vmem:[%s5855_s11 + $0x120] sm:$0xff] %v296_v36  ;;  %299 = vst [vmem:[%s5855_s11 + $0x128] sm:$0xff] %v298_v37  ;;  %v302_v39 = vld [vmem:[%s5850_s10 + $0x4c8] sm:$0xff] }
  0x25   : > { %301 = vst [vmem:[%s5855_s11 + $0x130] sm:$0xff] %v300_v38  ;;  %v304_v40 = vld [vmem:[%s5850_s10 + $0x500] sm:$0xff]  ;;  %v306_v41 = vld [vmem:[%s5850_s10 + $0x508] sm:$0xff]  ;;  %303 = vst [vmem:[%s5855_s11 + $0x138] sm:$0xff] %v302_v39 }
  0x26   : > { %305 = vst [vmem:[%s5855_s11 + $0x140] sm:$0xff] %v304_v40  ;;  %307 = vst [vmem:[%s5855_s11 + $0x148] sm:$0xff] %v306_v41  ;;  %v308_v42 = vld [vmem:[%s5850_s10 + $0x540] sm:$0xff]  ;;  %v310_v43 = vld [vmem:[%s5850_s10 + $0x548] sm:$0xff] }
  0x27   : > { %v312_v44 = vld [vmem:[%s5850_s10 + $0x580] sm:$0xff]  ;;  %309 = vst [vmem:[%s5855_s11 + $0x150] sm:$0xff] %v308_v42  ;;  %311 = vst [vmem:[%s5855_s11 + $0x158] sm:$0xff] %v310_v43  ;;  %v314_v45 = vld [vmem:[%s5850_s10 + $0x588] sm:$0xff] }
  0x28   : > { %313 = vst [vmem:[%s5855_s11 + $0x160] sm:$0xff] %v312_v44  ;;  %v316_v46 = vld [vmem:[%s5850_s10 + $0x5c0] sm:$0xff]  ;;  %v318_v47 = vld [vmem:[%s5850_s10 + $0x5c8] sm:$0xff]  ;;  %315 = vst [vmem:[%s5855_s11 + $0x168] sm:$0xff] %v314_v45 }
  0x29   : > { %317 = vst [vmem:[%s5855_s11 + $0x170] sm:$0xff] %v316_v46  ;;  %319 = vst [vmem:[%s5855_s11 + $0x178] sm:$0xff] %v318_v47  ;;  %v320_v48 = vld [vmem:[%s5850_s10 + $0x600] sm:$0xff]  ;;  %v322_v49 = vld [vmem:[%s5850_s10 + $0x608] sm:$0xff] }
  0x2a   : > { %v324_v50 = vld [vmem:[%s5850_s10 + $0x640] sm:$0xff]  ;;  %321 = vst [vmem:[%s5855_s11 + $0x180] sm:$0xff] %v320_v48  ;;  %323 = vst [vmem:[%s5855_s11 + $0x188] sm:$0xff] %v322_v49  ;;  %v326_v51 = vld [vmem:[%s5850_s10 + $0x648] sm:$0xff] }
  0x2b   : > { %325 = vst [vmem:[%s5855_s11 + $0x190] sm:$0xff] %v324_v50  ;;  %v328_v52 = vld [vmem:[%s5850_s10 + $0x680] sm:$0xff]  ;;  %v330_v53 = vld [vmem:[%s5850_s10 + $0x688] sm:$0xff]  ;;  %327 = vst [vmem:[%s5855_s11 + $0x198] sm:$0xff] %v326_v51 }
  0x2c   : > { %329 = vst [vmem:[%s5855_s11 + $0x1a0] sm:$0xff] %v328_v52  ;;  %331 = vst [vmem:[%s5855_s11 + $0x1a8] sm:$0xff] %v330_v53  ;;  %v332_v54 = vld [vmem:[%s5850_s10 + $0x6c0] sm:$0xff]  ;;  %v334_v55 = vld [vmem:[%s5850_s10 + $0x6c8] sm:$0xff] }
  0x2d   : > { %v336_v56 = vld [vmem:[%s5850_s10 + $0x700] sm:$0xff]  ;;  %333 = vst [vmem:[%s5855_s11 + $0x1b0] sm:$0xff] %v332_v54  ;;  %335 = vst [vmem:[%s5855_s11 + $0x1b8] sm:$0xff] %v334_v55  ;;  %v338_v57 = vld [vmem:[%s5850_s10 + $0x708] sm:$0xff] }
  0x2e   : > { %337 = vst [vmem:[%s5855_s11 + $0x1c0] sm:$0xff] %v336_v56  ;;  %v340_v58 = vld [vmem:[%s5850_s10 + $0x740] sm:$0xff]  ;;  %v342_v59 = vld [vmem:[%s5850_s10 + $0x748] sm:$0xff]  ;;  %339 = vst [vmem:[%s5855_s11 + $0x1c8] sm:$0xff] %v338_v57 }
  0x2f   : > { %341 = vst [vmem:[%s5855_s11 + $0x1d0] sm:$0xff] %v340_v58  ;;  %343 = vst [vmem:[%s5855_s11 + $0x1d8] sm:$0xff] %v342_v59  ;;  %v344_v60 = vld [vmem:[%s5850_s10 + $0x780] sm:$0xff]  ;;  %v346_v61 = vld [vmem:[%s5850_s10 + $0x788] sm:$0xff] }
  0x30   : > { %v348_v62 = vld [vmem:[%s5850_s10 + $0x7c0] sm:$0xff]  ;;  %345 = vst [vmem:[%s5855_s11 + $0x1e0] sm:$0xff] %v344_v60  ;;  %347 = vst [vmem:[%s5855_s11 + $0x1e8] sm:$0xff] %v346_v61  ;;  %v350_v63 = vld [vmem:[%s5850_s10 + $0x7c8] sm:$0xff] }
  0x31   : > { %349 = vst [vmem:[%s5855_s11 + $0x1f0] sm:$0xff] %v348_v62  ;;  %v352_v0 = vld [vmem:[%s5850_s10 + $0x800] sm:$0xff]  ;;  %v354_v1 = vld [vmem:[%s5850_s10 + $0x808] sm:$0xff]  ;;  %351 = vst [vmem:[%s5855_s11 + $0x1f8] sm:$0xff] %v350_v63 }
  0x32   : > { %353 = vst [vmem:[%s5855_s11 + $0x200] sm:$0xff] %v352_v0  ;;  %355 = vst [vmem:[%s5855_s11 + $0x208] sm:$0xff] %v354_v1  ;;  %v356_v2 = vld [vmem:[%s5850_s10 + $0x840] sm:$0xff]  ;;  %v358_v3 = vld [vmem:[%s5850_s10 + $0x848] sm:$0xff] }
  0x33   : > { %v360_v4 = vld [vmem:[%s5850_s10 + $0x880] sm:$0xff]  ;;  %357 = vst [vmem:[%s5855_s11 + $0x210] sm:$0xff] %v356_v2  ;;  %359 = vst [vmem:[%s5855_s11 + $0x218] sm:$0xff] %v358_v3  ;;  %v362_v5 = vld [vmem:[%s5850_s10 + $0x888] sm:$0xff] }
  0x34   : > { %361 = vst [vmem:[%s5855_s11 + $0x220] sm:$0xff] %v360_v4  ;;  %v364_v6 = vld [vmem:[%s5850_s10 + $0x8c0] sm:$0xff]  ;;  %v366_v7 = vld [vmem:[%s5850_s10 + $0x8c8] sm:$0xff]  ;;  %363 = vst [vmem:[%s5855_s11 + $0x228] sm:$0xff] %v362_v5 }
  0x35   : > { %365 = vst [vmem:[%s5855_s11 + $0x230] sm:$0xff] %v364_v6  ;;  %367 = vst [vmem:[%s5855_s11 + $0x238] sm:$0xff] %v366_v7  ;;  %v368_v8 = vld [vmem:[%s5850_s10 + $0x900] sm:$0xff]  ;;  %v370_v9 = vld [vmem:[%s5850_s10 + $0x908] sm:$0xff] }
  0x36   : > { %v372_v10 = vld [vmem:[%s5850_s10 + $0x940] sm:$0xff]  ;;  %369 = vst [vmem:[%s5855_s11 + $0x240] sm:$0xff] %v368_v8  ;;  %371 = vst [vmem:[%s5855_s11 + $0x248] sm:$0xff] %v370_v9  ;;  %v374_v11 = vld [vmem:[%s5850_s10 + $0x948] sm:$0xff] }
  0x37   : > { %373 = vst [vmem:[%s5855_s11 + $0x250] sm:$0xff] %v372_v10  ;;  %v376_v12 = vld [vmem:[%s5850_s10 + $0x980] sm:$0xff]  ;;  %v378_v13 = vld [vmem:[%s5850_s10 + $0x988] sm:$0xff]  ;;  %375 = vst [vmem:[%s5855_s11 + $0x258] sm:$0xff] %v374_v11 }
  0x38   : > { %377 = vst [vmem:[%s5855_s11 + $0x260] sm:$0xff] %v376_v12  ;;  %379 = vst [vmem:[%s5855_s11 + $0x268] sm:$0xff] %v378_v13  ;;  %v380_v14 = vld [vmem:[%s5850_s10 + $0x9c0] sm:$0xff]  ;;  %v382_v15 = vld [vmem:[%s5850_s10 + $0x9c8] sm:$0xff] }
  0x39   : > { %v384_v16 = vld [vmem:[%s5850_s10 + $0xa00] sm:$0xff]  ;;  %381 = vst [vmem:[%s5855_s11 + $0x270] sm:$0xff] %v380_v14  ;;  %383 = vst [vmem:[%s5855_s11 + $0x278] sm:$0xff] %v382_v15  ;;  %v386_v17 = vld [vmem:[%s5850_s10 + $0xa08] sm:$0xff] }
  0x3a   : > { %385 = vst [vmem:[%s5855_s11 + $0x280] sm:$0xff] %v384_v16  ;;  %v388_v18 = vld [vmem:[%s5850_s10 + $0xa40] sm:$0xff]  ;;  %v390_v19 = vld [vmem:[%s5850_s10 + $0xa48] sm:$0xff]  ;;  %387 = vst [vmem:[%s5855_s11 + $0x288] sm:$0xff] %v386_v17 }
  0x3b   : > { %389 = vst [vmem:[%s5855_s11 + $0x290] sm:$0xff] %v388_v18  ;;  %391 = vst [vmem:[%s5855_s11 + $0x298] sm:$0xff] %v390_v19  ;;  %v392_v20 = vld [vmem:[%s5850_s10 + $0xa80] sm:$0xff]  ;;  %v394_v21 = vld [vmem:[%s5850_s10 + $0xa88] sm:$0xff] }
  0x3c   : > { %v396_v22 = vld [vmem:[%s5850_s10 + $0xac0] sm:$0xff]  ;;  %393 = vst [vmem:[%s5855_s11 + $0x2a0] sm:$0xff] %v392_v20  ;;  %395 = vst [vmem:[%s5855_s11 + $0x2a8] sm:$0xff] %v394_v21  ;;  %v398_v23 = vld [vmem:[%s5850_s10 + $0xac8] sm:$0xff] }
  0x3d   : > { %397 = vst [vmem:[%s5855_s11 + $0x2b0] sm:$0xff] %v396_v22  ;;  %v400_v24 = vld [vmem:[%s5850_s10 + $0xb00] sm:$0xff]  ;;  %v402_v25 = vld [vmem:[%s5850_s10 + $0xb08] sm:$0xff]  ;;  %399 = vst [vmem:[%s5855_s11 + $0x2b8] sm:$0xff] %v398_v23 }
  0x3e   : > { %401 = vst [vmem:[%s5855_s11 + $0x2c0] sm:$0xff] %v400_v24  ;;  %403 = vst [vmem:[%s5855_s11 + $0x2c8] sm:$0xff] %v402_v25  ;;  %v404_v26 = vld [vmem:[%s5850_s10 + $0xb40] sm:$0xff]  ;;  %v406_v27 = vld [vmem:[%s5850_s10 + $0xb48] sm:$0xff] }
  0x3f   : > { %v408_v28 = vld [vmem:[%s5850_s10 + $0xb80] sm:$0xff]  ;;  %405 = vst [vmem:[%s5855_s11 + $0x2d0] sm:$0xff] %v404_v26  ;;  %407 = vst [vmem:[%s5855_s11 + $0x2d8] sm:$0xff] %v406_v27  ;;  %v410_v29 = vld [vmem:[%s5850_s10 + $0xb88] sm:$0xff] }
  0x40   : > { %409 = vst [vmem:[%s5855_s11 + $0x2e0] sm:$0xff] %v408_v28  ;;  %v412_v30 = vld [vmem:[%s5850_s10 + $0xbc0] sm:$0xff]  ;;  %v414_v31 = vld [vmem:[%s5850_s10 + $0xbc8] sm:$0xff]  ;;  %411 = vst [vmem:[%s5855_s11 + $0x2e8] sm:$0xff] %v410_v29 }
  0x41   : > { %413 = vst [vmem:[%s5855_s11 + $0x2f0] sm:$0xff] %v412_v30  ;;  %415 = vst [vmem:[%s5855_s11 + $0x2f8] sm:$0xff] %v414_v31  ;;  %v416_v32 = vld [vmem:[%s5850_s10 + $0xc00] sm:$0xff]  ;;  %v418_v33 = vld [vmem:[%s5850_s10 + $0xc08] sm:$0xff] }
  0x42   : > { %v420_v34 = vld [vmem:[%s5850_s10 + $0xc40] sm:$0xff]  ;;  %417 = vst [vmem:[%s5855_s11 + $0x300] sm:$0xff] %v416_v32  ;;  %419 = vst [vmem:[%s5855_s11 + $0x308] sm:$0xff] %v418_v33  ;;  %v422_v35 = vld [vmem:[%s5850_s10 + $0xc48] sm:$0xff] }
  0x43   : > { %421 = vst [vmem:[%s5855_s11 + $0x310] sm:$0xff] %v420_v34  ;;  %v424_v36 = vld [vmem:[%s5850_s10 + $0xc80] sm:$0xff]  ;;  %v426_v37 = vld [vmem:[%s5850_s10 + $0xc88] sm:$0xff]  ;;  %423 = vst [vmem:[%s5855_s11 + $0x318] sm:$0xff] %v422_v35 }
  0x44   : > { %425 = vst [vmem:[%s5855_s11 + $0x320] sm:$0xff] %v424_v36  ;;  %427 = vst [vmem:[%s5855_s11 + $0x328] sm:$0xff] %v426_v37  ;;  %v428_v38 = vld [vmem:[%s5850_s10 + $0xcc0] sm:$0xff]  ;;  %v430_v39 = vld [vmem:[%s5850_s10 + $0xcc8] sm:$0xff] }
  0x45   : > { %v432_v40 = vld [vmem:[%s5850_s10 + $0xd00] sm:$0xff]  ;;  %429 = vst [vmem:[%s5855_s11 + $0x330] sm:$0xff] %v428_v38  ;;  %431 = vst [vmem:[%s5855_s11 + $0x338] sm:$0xff] %v430_v39  ;;  %v434_v41 = vld [vmem:[%s5850_s10 + $0xd08] sm:$0xff] }
  0x46   : > { %433 = vst [vmem:[%s5855_s11 + $0x340] sm:$0xff] %v432_v40  ;;  %v436_v42 = vld [vmem:[%s5850_s10 + $0xd40] sm:$0xff]  ;;  %v438_v43 = vld [vmem:[%s5850_s10 + $0xd48] sm:$0xff]  ;;  %435 = vst [vmem:[%s5855_s11 + $0x348] sm:$0xff] %v434_v41 }
  0x47   : > { %437 = vst [vmem:[%s5855_s11 + $0x350] sm:$0xff] %v436_v42  ;;  %439 = vst [vmem:[%s5855_s11 + $0x358] sm:$0xff] %v438_v43  ;;  %v440_v44 = vld [vmem:[%s5850_s10 + $0xd80] sm:$0xff]  ;;  %v442_v45 = vld [vmem:[%s5850_s10 + $0xd88] sm:$0xff] }
  0x48   : > { %v444_v46 = vld [vmem:[%s5850_s10 + $0xdc0] sm:$0xff]  ;;  %441 = vst [vmem:[%s5855_s11 + $0x360] sm:$0xff] %v440_v44  ;;  %443 = vst [vmem:[%s5855_s11 + $0x368] sm:$0xff] %v442_v45  ;;  %v446_v47 = vld [vmem:[%s5850_s10 + $0xdc8] sm:$0xff] }
  0x49   : > { %445 = vst [vmem:[%s5855_s11 + $0x370] sm:$0xff] %v444_v46  ;;  %v448_v48 = vld [vmem:[%s5850_s10 + $0xe00] sm:$0xff]  ;;  %v450_v49 = vld [vmem:[%s5850_s10 + $0xe08] sm:$0xff]  ;;  %447 = vst [vmem:[%s5855_s11 + $0x378] sm:$0xff] %v446_v47 }
  0x4a   : > { %449 = vst [vmem:[%s5855_s11 + $0x380] sm:$0xff] %v448_v48  ;;  %451 = vst [vmem:[%s5855_s11 + $0x388] sm:$0xff] %v450_v49  ;;  %v452_v50 = vld [vmem:[%s5850_s10 + $0xe40] sm:$0xff]  ;;  %v454_v51 = vld [vmem:[%s5850_s10 + $0xe48] sm:$0xff] }
  0x4b   : > { %v456_v52 = vld [vmem:[%s5850_s10 + $0xe80] sm:$0xff]  ;;  %453 = vst [vmem:[%s5855_s11 + $0x390] sm:$0xff] %v452_v50  ;;  %455 = vst [vmem:[%s5855_s11 + $0x398] sm:$0xff] %v454_v51  ;;  %v458_v53 = vld [vmem:[%s5850_s10 + $0xe88] sm:$0xff] }
  0x4c   : > { %457 = vst [vmem:[%s5855_s11 + $0x3a0] sm:$0xff] %v456_v52  ;;  %v460_v54 = vld [vmem:[%s5850_s10 + $0xec0] sm:$0xff]  ;;  %v462_v55 = vld [vmem:[%s5850_s10 + $0xec8] sm:$0xff]  ;;  %459 = vst [vmem:[%s5855_s11 + $0x3a8] sm:$0xff] %v458_v53 }
  0x4d   : > { %461 = vst [vmem:[%s5855_s11 + $0x3b0] sm:$0xff] %v460_v54  ;;  %463 = vst [vmem:[%s5855_s11 + $0x3b8] sm:$0xff] %v462_v55  ;;  %v464_v56 = vld [vmem:[%s5850_s10 + $0xf00] sm:$0xff]  ;;  %v466_v57 = vld [vmem:[%s5850_s10 + $0xf08] sm:$0xff] }
  0x4e   : > { %v468_v58 = vld [vmem:[%s5850_s10 + $0xf40] sm:$0xff]  ;;  %465 = vst [vmem:[%s5855_s11 + $0x3c0] sm:$0xff] %v464_v56  ;;  %467 = vst [vmem:[%s5855_s11 + $0x3c8] sm:$0xff] %v466_v57  ;;  %v470_v59 = vld [vmem:[%s5850_s10 + $0xf48] sm:$0xff] }
  0x4f   : > { %469 = vst [vmem:[%s5855_s11 + $0x3d0] sm:$0xff] %v468_v58  ;;  %v472_v60 = vld [vmem:[%s5850_s10 + $0xf80] sm:$0xff]  ;;  %v474_v61 = vld [vmem:[%s5850_s10 + $0xf88] sm:$0xff]  ;;  %471 = vst [vmem:[%s5855_s11 + $0x3d8] sm:$0xff] %v470_v59 }
  0x50   : > { %473 = vst [vmem:[%s5855_s11 + $0x3e0] sm:$0xff] %v472_v60  ;;  %475 = vst [vmem:[%s5855_s11 + $0x3e8] sm:$0xff] %v474_v61  ;;  %v476_v62 = vld [vmem:[%s5850_s10 + $0xfc0] sm:$0xff]  ;;  %v478_v63 = vld [vmem:[%s5850_s10 + $0xfc8] sm:$0xff] }
  0x51   : > { %v480_v0 = vld [vmem:[%s5850_s10 + $0x1000] sm:$0xff]  ;;  %477 = vst [vmem:[%s5855_s11 + $0x3f0] sm:$0xff] %v476_v62  ;;  %479 = vst [vmem:[%s5855_s11 + $0x3f8] sm:$0xff] %v478_v63  ;;  %v482_v1 = vld [vmem:[%s5850_s10 + $0x1008] sm:$0xff] }
  0x52   : > { %481 = vst [vmem:[%s5855_s11 + $0x400] sm:$0xff] %v480_v0  ;;  %v484_v2 = vld [vmem:[%s5850_s10 + $0x1040] sm:$0xff]  ;;  %v486_v3 = vld [vmem:[%s5850_s10 + $0x1048] sm:$0xff]  ;;  %483 = vst [vmem:[%s5855_s11 + $0x408] sm:$0xff] %v482_v1 }
  0x53   : > { %485 = vst [vmem:[%s5855_s11 + $0x410] sm:$0xff] %v484_v2  ;;  %487 = vst [vmem:[%s5855_s11 + $0x418] sm:$0xff] %v486_v3  ;;  %v488_v4 = vld [vmem:[%s5850_s10 + $0x1080] sm:$0xff]  ;;  %v490_v5 = vld [vmem:[%s5850_s10 + $0x1088] sm:$0xff] }
  0x54   : > { %v492_v6 = vld [vmem:[%s5850_s10 + $0x10c0] sm:$0xff]  ;;  %489 = vst [vmem:[%s5855_s11 + $0x420] sm:$0xff] %v488_v4  ;;  %491 = vst [vmem:[%s5855_s11 + $0x428] sm:$0xff] %v490_v5  ;;  %v494_v7 = vld [vmem:[%s5850_s10 + $0x10c8] sm:$0xff] }
  0x55   : > { %493 = vst [vmem:[%s5855_s11 + $0x430] sm:$0xff] %v492_v6  ;;  %v496_v8 = vld [vmem:[%s5850_s10 + $0x1100] sm:$0xff]  ;;  %v498_v9 = vld [vmem:[%s5850_s10 + $0x1108] sm:$0xff]  ;;  %495 = vst [vmem:[%s5855_s11 + $0x438] sm:$0xff] %v494_v7 }
  0x56   : > { %497 = vst [vmem:[%s5855_s11 + $0x440] sm:$0xff] %v496_v8  ;;  %499 = vst [vmem:[%s5855_s11 + $0x448] sm:$0xff] %v498_v9  ;;  %v500_v10 = vld [vmem:[%s5850_s10 + $0x1140] sm:$0xff]  ;;  %v502_v11 = vld [vmem:[%s5850_s10 + $0x1148] sm:$0xff] }
  0x57   : > { %v504_v12 = vld [vmem:[%s5850_s10 + $0x1180] sm:$0xff]  ;;  %501 = vst [vmem:[%s5855_s11 + $0x450] sm:$0xff] %v500_v10  ;;  %503 = vst [vmem:[%s5855_s11 + $0x458] sm:$0xff] %v502_v11  ;;  %v506_v13 = vld [vmem:[%s5850_s10 + $0x1188] sm:$0xff] }
  0x58   : > { %505 = vst [vmem:[%s5855_s11 + $0x460] sm:$0xff] %v504_v12  ;;  %v508_v14 = vld [vmem:[%s5850_s10 + $0x11c0] sm:$0xff]  ;;  %v510_v15 = vld [vmem:[%s5850_s10 + $0x11c8] sm:$0xff]  ;;  %507 = vst [vmem:[%s5855_s11 + $0x468] sm:$0xff] %v506_v13 }
  0x59   : > { %509 = vst [vmem:[%s5855_s11 + $0x470] sm:$0xff] %v508_v14  ;;  %511 = vst [vmem:[%s5855_s11 + $0x478] sm:$0xff] %v510_v15  ;;  %v512_v16 = vld [vmem:[%s5850_s10 + $0x1200] sm:$0xff]  ;;  %v514_v17 = vld [vmem:[%s5850_s10 + $0x1208] sm:$0xff] }
  0x5a   : > { %v516_v18 = vld [vmem:[%s5850_s10 + $0x1240] sm:$0xff]  ;;  %513 = vst [vmem:[%s5855_s11 + $0x480] sm:$0xff] %v512_v16  ;;  %515 = vst [vmem:[%s5855_s11 + $0x488] sm:$0xff] %v514_v17  ;;  %v518_v19 = vld [vmem:[%s5850_s10 + $0x1248] sm:$0xff] }
  0x5b   : > { %517 = vst [vmem:[%s5855_s11 + $0x490] sm:$0xff] %v516_v18  ;;  %v520_v20 = vld [vmem:[%s5850_s10 + $0x1280] sm:$0xff]  ;;  %v522_v21 = vld [vmem:[%s5850_s10 + $0x1288] sm:$0xff]  ;;  %519 = vst [vmem:[%s5855_s11 + $0x498] sm:$0xff] %v518_v19 }
  0x5c   : > { %521 = vst [vmem:[%s5855_s11 + $0x4a0] sm:$0xff] %v520_v20  ;;  %523 = vst [vmem:[%s5855_s11 + $0x4a8] sm:$0xff] %v522_v21  ;;  %v524_v22 = vld [vmem:[%s5850_s10 + $0x12c0] sm:$0xff]  ;;  %v526_v23 = vld [vmem:[%s5850_s10 + $0x12c8] sm:$0xff] }
  0x5d   : > { %v528_v24 = vld [vmem:[%s5850_s10 + $0x1300] sm:$0xff]  ;;  %525 = vst [vmem:[%s5855_s11 + $0x4b0] sm:$0xff] %v524_v22  ;;  %527 = vst [vmem:[%s5855_s11 + $0x4b8] sm:$0xff] %v526_v23  ;;  %v530_v25 = vld [vmem:[%s5850_s10 + $0x1308] sm:$0xff] }
  0x5e   : > { %529 = vst [vmem:[%s5855_s11 + $0x4c0] sm:$0xff] %v528_v24  ;;  %v532_v26 = vld [vmem:[%s5850_s10 + $0x1340] sm:$0xff]  ;;  %v534_v27 = vld [vmem:[%s5850_s10 + $0x1348] sm:$0xff]  ;;  %531 = vst [vmem:[%s5855_s11 + $0x4c8] sm:$0xff] %v530_v25 }
  0x5f   : > { %533 = vst [vmem:[%s5855_s11 + $0x4d0] sm:$0xff] %v532_v26  ;;  %535 = vst [vmem:[%s5855_s11 + $0x4d8] sm:$0xff] %v534_v27  ;;  %v536_v28 = vld [vmem:[%s5850_s10 + $0x1380] sm:$0xff]  ;;  %v538_v29 = vld [vmem:[%s5850_s10 + $0x1388] sm:$0xff] }
  0x60   : > { %v540_v30 = vld [vmem:[%s5850_s10 + $0x13c0] sm:$0xff]  ;;  %537 = vst [vmem:[%s5855_s11 + $0x4e0] sm:$0xff] %v536_v28  ;;  %539 = vst [vmem:[%s5855_s11 + $0x4e8] sm:$0xff] %v538_v29  ;;  %v542_v31 = vld [vmem:[%s5850_s10 + $0x13c8] sm:$0xff] }
  0x61   : > { %541 = vst [vmem:[%s5855_s11 + $0x4f0] sm:$0xff] %v540_v30  ;;  %v544_v32 = vld [vmem:[%s5850_s10 + $0x1400] sm:$0xff]  ;;  %v546_v33 = vld [vmem:[%s5850_s10 + $0x1408] sm:$0xff]  ;;  %543 = vst [vmem:[%s5855_s11 + $0x4f8] sm:$0xff] %v542_v31 }
  0x62   : > { %545 = vst [vmem:[%s5855_s11 + $0x500] sm:$0xff] %v544_v32  ;;  %547 = vst [vmem:[%s5855_s11 + $0x508] sm:$0xff] %v546_v33  ;;  %v548_v34 = vld [vmem:[%s5850_s10 + $0x1440] sm:$0xff]  ;;  %v550_v35 = vld [vmem:[%s5850_s10 + $0x1448] sm:$0xff] }
  0x63   : > { %v552_v36 = vld [vmem:[%s5850_s10 + $0x1480] sm:$0xff]  ;;  %549 = vst [vmem:[%s5855_s11 + $0x510] sm:$0xff] %v548_v34  ;;  %551 = vst [vmem:[%s5855_s11 + $0x518] sm:$0xff] %v550_v35  ;;  %v554_v37 = vld [vmem:[%s5850_s10 + $0x1488] sm:$0xff] }
  0x64   : > { %553 = vst [vmem:[%s5855_s11 + $0x520] sm:$0xff] %v552_v36  ;;  %v556_v38 = vld [vmem:[%s5850_s10 + $0x14c0] sm:$0xff]  ;;  %v558_v39 = vld [vmem:[%s5850_s10 + $0x14c8] sm:$0xff]  ;;  %555 = vst [vmem:[%s5855_s11 + $0x528] sm:$0xff] %v554_v37 }
  0x65   : > { %557 = vst [vmem:[%s5855_s11 + $0x530] sm:$0xff] %v556_v38  ;;  %559 = vst [vmem:[%s5855_s11 + $0x538] sm:$0xff] %v558_v39  ;;  %v560_v40 = vld [vmem:[%s5850_s10 + $0x1500] sm:$0xff]  ;;  %v562_v41 = vld [vmem:[%s5850_s10 + $0x1508] sm:$0xff] }
  0x66   : > { %v564_v42 = vld [vmem:[%s5850_s10 + $0x1540] sm:$0xff]  ;;  %561 = vst [vmem:[%s5855_s11 + $0x540] sm:$0xff] %v560_v40  ;;  %563 = vst [vmem:[%s5855_s11 + $0x548] sm:$0xff] %v562_v41  ;;  %v566_v43 = vld [vmem:[%s5850_s10 + $0x1548] sm:$0xff] }
  0x67   : > { %565 = vst [vmem:[%s5855_s11 + $0x550] sm:$0xff] %v564_v42  ;;  %v568_v44 = vld [vmem:[%s5850_s10 + $0x1580] sm:$0xff]  ;;  %v570_v45 = vld [vmem:[%s5850_s10 + $0x1588] sm:$0xff]  ;;  %567 = vst [vmem:[%s5855_s11 + $0x558] sm:$0xff] %v566_v43 }
  0x68   : > { %569 = vst [vmem:[%s5855_s11 + $0x560] sm:$0xff] %v568_v44  ;;  %571 = vst [vmem:[%s5855_s11 + $0x568] sm:$0xff] %v570_v45  ;;  %v572_v46 = vld [vmem:[%s5850_s10 + $0x15c0] sm:$0xff]  ;;  %v574_v47 = vld [vmem:[%s5850_s10 + $0x15c8] sm:$0xff] }
  0x69   : > { %v576_v48 = vld [vmem:[%s5850_s10 + $0x1600] sm:$0xff]  ;;  %573 = vst [vmem:[%s5855_s11 + $0x570] sm:$0xff] %v572_v46  ;;  %575 = vst [vmem:[%s5855_s11 + $0x578] sm:$0xff] %v574_v47  ;;  %v578_v49 = vld [vmem:[%s5850_s10 + $0x1608] sm:$0xff] }
  0x6a   : > { %577 = vst [vmem:[%s5855_s11 + $0x580] sm:$0xff] %v576_v48  ;;  %v580_v50 = vld [vmem:[%s5850_s10 + $0x1640] sm:$0xff]  ;;  %v582_v51 = vld [vmem:[%s5850_s10 + $0x1648] sm:$0xff]  ;;  %579 = vst [vmem:[%s5855_s11 + $0x588] sm:$0xff] %v578_v49 }
  0x6b   : > { %581 = vst [vmem:[%s5855_s11 + $0x590] sm:$0xff] %v580_v50  ;;  %583 = vst [vmem:[%s5855_s11 + $0x598] sm:$0xff] %v582_v51  ;;  %v584_v52 = vld [vmem:[%s5850_s10 + $0x1680] sm:$0xff]  ;;  %v586_v53 = vld [vmem:[%s5850_s10 + $0x1688] sm:$0xff] }
  0x6c   : > { %v588_v54 = vld [vmem:[%s5850_s10 + $0x16c0] sm:$0xff]  ;;  %585 = vst [vmem:[%s5855_s11 + $0x5a0] sm:$0xff] %v584_v52  ;;  %587 = vst [vmem:[%s5855_s11 + $0x5a8] sm:$0xff] %v586_v53  ;;  %v590_v55 = vld [vmem:[%s5850_s10 + $0x16c8] sm:$0xff] }
  0x6d   : > { %589 = vst [vmem:[%s5855_s11 + $0x5b0] sm:$0xff] %v588_v54  ;;  %v592_v56 = vld [vmem:[%s5850_s10 + $0x1700] sm:$0xff]  ;;  %v594_v57 = vld [vmem:[%s5850_s10 + $0x1708] sm:$0xff]  ;;  %591 = vst [vmem:[%s5855_s11 + $0x5b8] sm:$0xff] %v590_v55 }
  0x6e   : > { %593 = vst [vmem:[%s5855_s11 + $0x5c0] sm:$0xff] %v592_v56  ;;  %595 = vst [vmem:[%s5855_s11 + $0x5c8] sm:$0xff] %v594_v57  ;;  %v596_v58 = vld [vmem:[%s5850_s10 + $0x1740] sm:$0xff]  ;;  %v598_v59 = vld [vmem:[%s5850_s10 + $0x1748] sm:$0xff] }
  0x6f   : > { %v600_v60 = vld [vmem:[%s5850_s10 + $0x1780] sm:$0xff]  ;;  %597 = vst [vmem:[%s5855_s11 + $0x5d0] sm:$0xff] %v596_v58  ;;  %599 = vst [vmem:[%s5855_s11 + $0x5d8] sm:$0xff] %v598_v59  ;;  %v602_v61 = vld [vmem:[%s5850_s10 + $0x1788] sm:$0xff] }
  0x70   : > { %601 = vst [vmem:[%s5855_s11 + $0x5e0] sm:$0xff] %v600_v60  ;;  %v604_v62 = vld [vmem:[%s5850_s10 + $0x17c0] sm:$0xff]  ;;  %v606_v63 = vld [vmem:[%s5850_s10 + $0x17c8] sm:$0xff]  ;;  %603 = vst [vmem:[%s5855_s11 + $0x5e8] sm:$0xff] %v602_v61 }
  0x71   : > { %605 = vst [vmem:[%s5855_s11 + $0x5f0] sm:$0xff] %v604_v62  ;;  %607 = vst [vmem:[%s5855_s11 + $0x5f8] sm:$0xff] %v606_v63  ;;  %v608_v0 = vld [vmem:[%s5850_s10 + $0x1800] sm:$0xff]  ;;  %v610_v1 = vld [vmem:[%s5850_s10 + $0x1808] sm:$0xff] }
  0x72   : > { %v612_v2 = vld [vmem:[%s5850_s10 + $0x1840] sm:$0xff]  ;;  %609 = vst [vmem:[%s5855_s11 + $0x600] sm:$0xff] %v608_v0  ;;  %611 = vst [vmem:[%s5855_s11 + $0x608] sm:$0xff] %v610_v1  ;;  %v614_v3 = vld [vmem:[%s5850_s10 + $0x1848] sm:$0xff] }
  0x73   : > { %613 = vst [vmem:[%s5855_s11 + $0x610] sm:$0xff] %v612_v2  ;;  %v616_v4 = vld [vmem:[%s5850_s10 + $0x1880] sm:$0xff]  ;;  %v618_v5 = vld [vmem:[%s5850_s10 + $0x1888] sm:$0xff]  ;;  %615 = vst [vmem:[%s5855_s11 + $0x618] sm:$0xff] %v614_v3 }
  0x74   : > { %617 = vst [vmem:[%s5855_s11 + $0x620] sm:$0xff] %v616_v4  ;;  %619 = vst [vmem:[%s5855_s11 + $0x628] sm:$0xff] %v618_v5  ;;  %v620_v6 = vld [vmem:[%s5850_s10 + $0x18c0] sm:$0xff]  ;;  %v622_v7 = vld [vmem:[%s5850_s10 + $0x18c8] sm:$0xff] }
  0x75   : > { %v624_v8 = vld [vmem:[%s5850_s10 + $0x1900] sm:$0xff]  ;;  %621 = vst [vmem:[%s5855_s11 + $0x630] sm:$0xff] %v620_v6  ;;  %623 = vst [vmem:[%s5855_s11 + $0x638] sm:$0xff] %v622_v7  ;;  %v626_v9 = vld [vmem:[%s5850_s10 + $0x1908] sm:$0xff] }
  0x76   : > { %625 = vst [vmem:[%s5855_s11 + $0x640] sm:$0xff] %v624_v8  ;;  %v628_v10 = vld [vmem:[%s5850_s10 + $0x1940] sm:$0xff]  ;;  %v630_v11 = vld [vmem:[%s5850_s10 + $0x1948] sm:$0xff]  ;;  %627 = vst [vmem:[%s5855_s11 + $0x648] sm:$0xff] %v626_v9 }
  0x77   : > { %629 = vst [vmem:[%s5855_s11 + $0x650] sm:$0xff] %v628_v10  ;;  %631 = vst [vmem:[%s5855_s11 + $0x658] sm:$0xff] %v630_v11  ;;  %v632_v12 = vld [vmem:[%s5850_s10 + $0x1980] sm:$0xff]  ;;  %v634_v13 = vld [vmem:[%s5850_s10 + $0x1988] sm:$0xff] }
  0x78   : > { %v636_v14 = vld [vmem:[%s5850_s10 + $0x19c0] sm:$0xff]  ;;  %633 = vst [vmem:[%s5855_s11 + $0x660] sm:$0xff] %v632_v12  ;;  %635 = vst [vmem:[%s5855_s11 + $0x668] sm:$0xff] %v634_v13  ;;  %v638_v15 = vld [vmem:[%s5850_s10 + $0x19c8] sm:$0xff] }
  0x79   : > { %637 = vst [vmem:[%s5855_s11 + $0x670] sm:$0xff] %v636_v14  ;;  %v640_v16 = vld [vmem:[%s5850_s10 + $0x1a00] sm:$0xff]  ;;  %v642_v17 = vld [vmem:[%s5850_s10 + $0x1a08] sm:$0xff]  ;;  %639 = vst [vmem:[%s5855_s11 + $0x678] sm:$0xff] %v638_v15 }
  0x7a   : > { %641 = vst [vmem:[%s5855_s11 + $0x680] sm:$0xff] %v640_v16  ;;  %643 = vst [vmem:[%s5855_s11 + $0x688] sm:$0xff] %v642_v17  ;;  %v644_v18 = vld [vmem:[%s5850_s10 + $0x1a40] sm:$0xff]  ;;  %v646_v19 = vld [vmem:[%s5850_s10 + $0x1a48] sm:$0xff] }
  0x7b   : > { %v648_v20 = vld [vmem:[%s5850_s10 + $0x1a80] sm:$0xff]  ;;  %645 = vst [vmem:[%s5855_s11 + $0x690] sm:$0xff] %v644_v18  ;;  %647 = vst [vmem:[%s5855_s11 + $0x698] sm:$0xff] %v646_v19  ;;  %v650_v21 = vld [vmem:[%s5850_s10 + $0x1a88] sm:$0xff] }
  0x7c   : > { %649 = vst [vmem:[%s5855_s11 + $0x6a0] sm:$0xff] %v648_v20  ;;  %v652_v22 = vld [vmem:[%s5850_s10 + $0x1ac0] sm:$0xff]  ;;  %v654_v23 = vld [vmem:[%s5850_s10 + $0x1ac8] sm:$0xff]  ;;  %651 = vst [vmem:[%s5855_s11 + $0x6a8] sm:$0xff] %v650_v21 }
  0x7d   : > { %653 = vst [vmem:[%s5855_s11 + $0x6b0] sm:$0xff] %v652_v22  ;;  %655 = vst [vmem:[%s5855_s11 + $0x6b8] sm:$0xff] %v654_v23  ;;  %v656_v24 = vld [vmem:[%s5850_s10 + $0x1b00] sm:$0xff]  ;;  %v658_v25 = vld [vmem:[%s5850_s10 + $0x1b08] sm:$0xff] }
  0x7e   : > { %v660_v26 = vld [vmem:[%s5850_s10 + $0x1b40] sm:$0xff]  ;;  %657 = vst [vmem:[%s5855_s11 + $0x6c0] sm:$0xff] %v656_v24  ;;  %659 = vst [vmem:[%s5855_s11 + $0x6c8] sm:$0xff] %v658_v25  ;;  %v662_v27 = vld [vmem:[%s5850_s10 + $0x1b48] sm:$0xff] }
  0x7f   : > { %661 = vst [vmem:[%s5855_s11 + $0x6d0] sm:$0xff] %v660_v26  ;;  %v664_v28 = vld [vmem:[%s5850_s10 + $0x1b80] sm:$0xff]  ;;  %v666_v29 = vld [vmem:[%s5850_s10 + $0x1b88] sm:$0xff]  ;;  %663 = vst [vmem:[%s5855_s11 + $0x6d8] sm:$0xff] %v662_v27 }
  0x80   : > { %665 = vst [vmem:[%s5855_s11 + $0x6e0] sm:$0xff] %v664_v28  ;;  %667 = vst [vmem:[%s5855_s11 + $0x6e8] sm:$0xff] %v666_v29  ;;  %v668_v30 = vld [vmem:[%s5850_s10 + $0x1bc0] sm:$0xff]  ;;  %v670_v31 = vld [vmem:[%s5850_s10 + $0x1bc8] sm:$0xff] }
  0x81   : > { %v672_v32 = vld [vmem:[%s5850_s10 + $0x1c00] sm:$0xff]  ;;  %669 = vst [vmem:[%s5855_s11 + $0x6f0] sm:$0xff] %v668_v30  ;;  %671 = vst [vmem:[%s5855_s11 + $0x6f8] sm:$0xff] %v670_v31  ;;  %v674_v33 = vld [vmem:[%s5850_s10 + $0x1c08] sm:$0xff] }
  0x82   : > { %673 = vst [vmem:[%s5855_s11 + $0x700] sm:$0xff] %v672_v32  ;;  %v676_v34 = vld [vmem:[%s5850_s10 + $0x1c40] sm:$0xff]  ;;  %v678_v35 = vld [vmem:[%s5850_s10 + $0x1c48] sm:$0xff]  ;;  %675 = vst [vmem:[%s5855_s11 + $0x708] sm:$0xff] %v674_v33 }
  0x83   : > { %677 = vst [vmem:[%s5855_s11 + $0x710] sm:$0xff] %v676_v34  ;;  %679 = vst [vmem:[%s5855_s11 + $0x718] sm:$0xff] %v678_v35  ;;  %v680_v36 = vld [vmem:[%s5850_s10 + $0x1c80] sm:$0xff]  ;;  %v682_v37 = vld [vmem:[%s5850_s10 + $0x1c88] sm:$0xff] }
  0x84   : > { %v684_v38 = vld [vmem:[%s5850_s10 + $0x1cc0] sm:$0xff]  ;;  %681 = vst [vmem:[%s5855_s11 + $0x720] sm:$0xff] %v680_v36  ;;  %683 = vst [vmem:[%s5855_s11 + $0x728] sm:$0xff] %v682_v37  ;;  %v686_v39 = vld [vmem:[%s5850_s10 + $0x1cc8] sm:$0xff] }
  0x85   : > { %685 = vst [vmem:[%s5855_s11 + $0x730] sm:$0xff] %v684_v38  ;;  %v688_v40 = vld [vmem:[%s5850_s10 + $0x1d00] sm:$0xff]  ;;  %v690_v41 = vld [vmem:[%s5850_s10 + $0x1d08] sm:$0xff]  ;;  %687 = vst [vmem:[%s5855_s11 + $0x738] sm:$0xff] %v686_v39 }
  0x86   : > { %689 = vst [vmem:[%s5855_s11 + $0x740] sm:$0xff] %v688_v40  ;;  %691 = vst [vmem:[%s5855_s11 + $0x748] sm:$0xff] %v690_v41  ;;  %v692_v42 = vld [vmem:[%s5850_s10 + $0x1d40] sm:$0xff]  ;;  %v694_v43 = vld [vmem:[%s5850_s10 + $0x1d48] sm:$0xff] }
  0x87   : > { %v696_v44 = vld [vmem:[%s5850_s10 + $0x1d80] sm:$0xff]  ;;  %693 = vst [vmem:[%s5855_s11 + $0x750] sm:$0xff] %v692_v42  ;;  %695 = vst [vmem:[%s5855_s11 + $0x758] sm:$0xff] %v694_v43  ;;  %v698_v45 = vld [vmem:[%s5850_s10 + $0x1d88] sm:$0xff] }
  0x88   : > { %697 = vst [vmem:[%s5855_s11 + $0x760] sm:$0xff] %v696_v44  ;;  %v700_v46 = vld [vmem:[%s5850_s10 + $0x1dc0] sm:$0xff]  ;;  %v702_v47 = vld [vmem:[%s5850_s10 + $0x1dc8] sm:$0xff]  ;;  %699 = vst [vmem:[%s5855_s11 + $0x768] sm:$0xff] %v698_v45 }
  0x89   : > { %701 = vst [vmem:[%s5855_s11 + $0x770] sm:$0xff] %v700_v46  ;;  %703 = vst [vmem:[%s5855_s11 + $0x778] sm:$0xff] %v702_v47  ;;  %v704_v48 = vld [vmem:[%s5850_s10 + $0x1e00] sm:$0xff]  ;;  %v706_v49 = vld [vmem:[%s5850_s10 + $0x1e08] sm:$0xff] }
  0x8a   : > { %v708_v50 = vld [vmem:[%s5850_s10 + $0x1e40] sm:$0xff]  ;;  %705 = vst [vmem:[%s5855_s11 + $0x780] sm:$0xff] %v704_v48  ;;  %707 = vst [vmem:[%s5855_s11 + $0x788] sm:$0xff] %v706_v49  ;;  %v710_v51 = vld [vmem:[%s5850_s10 + $0x1e48] sm:$0xff] }
  0x8b   : > { %709 = vst [vmem:[%s5855_s11 + $0x790] sm:$0xff] %v708_v50  ;;  %v712_v52 = vld [vmem:[%s5850_s10 + $0x1e80] sm:$0xff]  ;;  %v714_v53 = vld [vmem:[%s5850_s10 + $0x1e88] sm:$0xff]  ;;  %711 = vst [vmem:[%s5855_s11 + $0x798] sm:$0xff] %v710_v51 }
  0x8c   : > { %713 = vst [vmem:[%s5855_s11 + $0x7a0] sm:$0xff] %v712_v52  ;;  %715 = vst [vmem:[%s5855_s11 + $0x7a8] sm:$0xff] %v714_v53  ;;  %v716_v54 = vld [vmem:[%s5850_s10 + $0x1ec0] sm:$0xff]  ;;  %v718_v55 = vld [vmem:[%s5850_s10 + $0x1ec8] sm:$0xff] }
  0x8d   : > { %v720_v56 = vld [vmem:[%s5850_s10 + $0x1f00] sm:$0xff]  ;;  %717 = vst [vmem:[%s5855_s11 + $0x7b0] sm:$0xff] %v716_v54  ;;  %719 = vst [vmem:[%s5855_s11 + $0x7b8] sm:$0xff] %v718_v55  ;;  %v722_v57 = vld [vmem:[%s5850_s10 + $0x1f08] sm:$0xff] }
  0x8e   : > { %721 = vst [vmem:[%s5855_s11 + $0x7c0] sm:$0xff] %v720_v56  ;;  %v724_v58 = vld [vmem:[%s5850_s10 + $0x1f40] sm:$0xff]  ;;  %v726_v59 = vld [vmem:[%s5850_s10 + $0x1f48] sm:$0xff]  ;;  %723 = vst [vmem:[%s5855_s11 + $0x7c8] sm:$0xff] %v722_v57 }
  0x8f   : > { %725 = vst [vmem:[%s5855_s11 + $0x7d0] sm:$0xff] %v724_v58  ;;  %727 = vst [vmem:[%s5855_s11 + $0x7d8] sm:$0xff] %v726_v59  ;;  %v728_v60 = vld [vmem:[%s5850_s10 + $0x1f80] sm:$0xff]  ;;  %v730_v61 = vld [vmem:[%s5850_s10 + $0x1f88] sm:$0xff] }
  0x90   : > { %v732_v62 = vld [vmem:[%s5850_s10 + $0x1fc0] sm:$0xff]  ;;  %729 = vst [vmem:[%s5855_s11 + $0x7e0] sm:$0xff] %v728_v60  ;;  %731 = vst [vmem:[%s5855_s11 + $0x7e8] sm:$0xff] %v730_v61  ;;  %v734_v63 = vld [vmem:[%s5850_s10 + $0x1fc8] sm:$0xff] }
  0x91   : > { %733 = vst [vmem:[%s5855_s11 + $0x7f0] sm:$0xff] %v732_v62  ;;  %735 = vst [vmem:[%s5855_s11 + $0x7f8] sm:$0xff] %v734_v63 }
  0x92 PF: > { %p4793_p5 = scmp.ge.s32.totalorder %s5776_s23, 1  ;;  %p758_p6 = scmp.lt.s32.totalorder %s5776_s23, 5 }
  0x94   : > { %p759_p7 = pnand %p4793_p5, %p758_p6 }
  0x95   : > { %s765_s12 = sand.u32 (!%p759_p7), 1, %s5768_s21   ;;  %s4795_s13 = sshll.u32 (!%p759_p7), %s5830_s24, 2 }
  0x96   : > { %762 = sbr.rel (%p759_p7) target bundleno = 1070 (0x42e), region = 63  ;;  %s4794_s14 = sshll.u32 (!%p759_p7), %s765_s12, 11 }
  0x97   : > { %p801_p8 = scmp.lt.s32.totalorder (!%p759_p7), %s4795_s13, 15  ;;  %s4796_s15 = sshll.u32 (!%p759_p7), %s5830_s24, 6 }
  0x98   : > { %p806_p9 = scmp.lt.s32.totalorder (!%p759_p7), %s4796_s15, 255  ;;  %s6382_s21 = scalar_lea.vmem (!%p759_p7), [#allocation2], %s4794_s14 }
  0x99   : > { %p4799_p10 = scmp.ne.s32.totalorder (!%p759_p7), %s5830_s24, 0 }
  0x9d   : > { %s7169_s13 = smov (!%p801_p8, %s4795_s13), 15  ;;  %s7171_s15 = smov (!%p806_p9, %s4796_s15), 255 }
  0x9e   : > { %s803_s18 = scalar_lea.vmem %s7160_s2, %s7169_s13  ;;  %s5316_s19 = sshll.u32 %s7171_s15, 5  ;;  %v5778_v0 = vmov (!%p4799_p10), 0.0  }
  0x9f   : > { %s6380_s26 = scalar_lea.vmem %s7161_s3, %s5316_s19  ;;  %815 = sbr.rel (%p4799_p10) target bundleno = 166 (0xa6), region = 71  ;;  %816 = vst [vmem:[%s7164_s6] sm:$0xff] (!%p4799_p10), %v5778_v0  ;;  %817 = vst [vmem:[%s7164_s6 + $0x8] sm:$0xff] (!%p4799_p10), %v5778_v0 }
  0xa0   : > { %818 = vst [vmem:[%s7164_s6 + $0x10] sm:$0xff] (!%p4799_p10), %v5778_v0  ;;  %819 = vst [vmem:[%s7164_s6 + $0x18] sm:$0xff] (!%p4799_p10), %v5778_v0 }
  0xa1   : > { %820 = vst [vmem:[%s7164_s6 + $0x20] sm:$0xff] (!%p4799_p10), %v5778_v0  ;;  %821 = vst [vmem:[%s7164_s6 + $0x28] sm:$0xff] (!%p4799_p10), %v5778_v0 }
  0xa2   : > { %822 = vst [vmem:[%s7164_s6 + $0x30] sm:$0xff] (!%p4799_p10), %v5778_v0  ;;  %823 = vst [vmem:[%s7164_s6 + $0x38] sm:$0xff] (!%p4799_p10), %v5778_v0 }
  0xa6 PF: > { %v5370_v1 = vld [vmem:[%s6382_s21 + $0x4] ss:$16 sps:$4 sm:$0xff]   ;;  %v5372_v2 = vld [vmem:[%s6382_s21 + $0xc] ss:$16 sps:$4 sm:$0xff]   ;;  %v5374_v3 = vld [vmem:[%s6382_s21] ss:$16 sps:$4 sm:$0xff]  }
  0xa7   : > { %2398 = vmatprep.subr.bf16.mxu0 %v5370_v1  ;;  %v5375_v4 = vld [vmem:[%s6382_s21 + $0x8] ss:$16 sps:$4 sm:$0xff]   ;;  %2562 = vmatprep.subr.bf16.mxu1 %v5372_v2  ;;  %v5376_v5 = vld [vmem:[%s6382_s21 + $0x24] ss:$16 sps:$4 sm:$0xff]   ;;  %v5378_v6 = vld [vmem:[%s6382_s21 + $0x2c] ss:$16 sps:$4 sm:$0xff]  }
  0xa8   : > { %2399 = vmatpush1.bf16.msra.mxu0 %v5374_v3  ;;  %2563 = vmatpush1.bf16.msra.mxu1 %v5375_v4  ;;  %v5380_v7 = vld [vmem:[%s6382_s21 + $0x20] ss:$16 sps:$4 sm:$0xff]   ;;  %v5381_v8 = vld [vmem:[%s6382_s21 + $0x28] ss:$16 sps:$4 sm:$0xff]   ;;  %v5382_v9 = vld [vmem:[%s6382_s21 + $0x44] ss:$16 sps:$4 sm:$0xff]  }
  0xa9   : > { %2400 = vmatprep.subr.bf16.mxu0 %v5376_v5  ;;  %2564 = vmatprep.subr.bf16.mxu1 %v5378_v6  ;;  %v5384_v10 = vld [vmem:[%s6382_s21 + $0x4c] ss:$16 sps:$4 sm:$0xff]   ;;  %v5386_v11 = vld [vmem:[%s6382_s21 + $0x40] ss:$16 sps:$4 sm:$0xff]   ;;  %v5387_v12 = vld [vmem:[%s6382_s21 + $0x48] ss:$16 sps:$4 sm:$0xff]  }
  0xaa   : > { %v5388_v13 = vld [vmem:[%s6382_s21 + $0x64] ss:$16 sps:$4 sm:$0xff]   ;;  %v5390_v14 = vld [vmem:[%s6382_s21 + $0x6c] ss:$16 sps:$4 sm:$0xff]   ;;  %v5392_v15 = vld [vmem:[%s6382_s21 + $0x60] ss:$16 sps:$4 sm:$0xff]  }
  0xab   : > { %v5393_v16 = vld [vmem:[%s6382_s21 + $0x68] ss:$16 sps:$4 sm:$0xff]   ;;  %v5394_v17 = vld [vmem:[%s6382_s21 + $0x84] ss:$16 sps:$4 sm:$0xff]   ;;  %v5396_v18 = vld [vmem:[%s6382_s21 + $0x8c] ss:$16 sps:$4 sm:$0xff]  }
  0xac   : > { %2401 = vmatpush1.bf16.msra.mxu0 %v5380_v7  ;;  %2565 = vmatpush1.bf16.msra.mxu1 %v5381_v8  ;;  %v5398_v19 = vld [vmem:[%s6382_s21 + $0x80] ss:$16 sps:$4 sm:$0xff]   ;;  %v5399_v20 = vld [vmem:[%s6382_s21 + $0x88] ss:$16 sps:$4 sm:$0xff]   ;;  %v5400_v21 = vld [vmem:[%s6382_s21 + $0xa4] ss:$16 sps:$4 sm:$0xff]  }
  0xad   : > { %2402 = vmatprep.subr.bf16.mxu0 %v5382_v9  ;;  %2566 = vmatprep.subr.bf16.mxu1 %v5384_v10  ;;  %v5402_v22 = vld [vmem:[%s6382_s21 + $0xac] ss:$16 sps:$4 sm:$0xff]   ;;  %v5404_v23 = vld [vmem:[%s6382_s21 + $0xa0] ss:$16 sps:$4 sm:$0xff]   ;;  %v5405_v24 = vld [vmem:[%s6382_s21 + $0xa8] ss:$16 sps:$4 sm:$0xff]  }
  0xae   : > { %v5406_v25 = vld [vmem:[%s6382_s21 + $0xc4] ss:$16 sps:$4 sm:$0xff]   ;;  %v5408_v26 = vld [vmem:[%s6382_s21 + $0xcc] ss:$16 sps:$4 sm:$0xff]   ;;  %v5410_v27 = vld [vmem:[%s6382_s21 + $0xc0] ss:$16 sps:$4 sm:$0xff]  }
  0xaf   : > { %v5411_v28 = vld [vmem:[%s6382_s21 + $0xc8] ss:$16 sps:$4 sm:$0xff]   ;;  %v5412_v29 = vld [vmem:[%s6382_s21 + $0xe4] ss:$16 sps:$4 sm:$0xff]   ;;  %v5414_v30 = vld [vmem:[%s6382_s21 + $0xec] ss:$16 sps:$4 sm:$0xff]  }
  0xb0   : > { %2403 = vmatpush1.bf16.msra.mxu0 %v5386_v11  ;;  %2567 = vmatpush1.bf16.msra.mxu1 %v5387_v12  ;;  %v5416_v31 = vld [vmem:[%s6382_s21 + $0xe0] ss:$16 sps:$4 sm:$0xff]   ;;  %v5417_v32 = vld [vmem:[%s6382_s21 + $0xe8] ss:$16 sps:$4 sm:$0xff]   ;;  %v5418_v33 = vld [vmem:[%s6382_s21 + $0x104] ss:$16 sps:$4 sm:$0xff]  }
  0xb1   : > { %2404 = vmatprep.subr.bf16.mxu0 %v5388_v13  ;;  %2568 = vmatprep.subr.bf16.mxu1 %v5390_v14  ;;  %v5420_v34 = vld [vmem:[%s6382_s21 + $0x10c] ss:$16 sps:$4 sm:$0xff]   ;;  %v5422_v35 = vld [vmem:[%s6382_s21 + $0x100] ss:$16 sps:$4 sm:$0xff]   ;;  %v5423_v36 = vld [vmem:[%s6382_s21 + $0x108] ss:$16 sps:$4 sm:$0xff]  }
  0xb2   : > { %v5424_v37 = vld [vmem:[%s6382_s21 + $0x124] ss:$16 sps:$4 sm:$0xff]   ;;  %v5426_v38 = vld [vmem:[%s6382_s21 + $0x12c] ss:$16 sps:$4 sm:$0xff]   ;;  %v5428_v39 = vld [vmem:[%s6382_s21 + $0x120] ss:$16 sps:$4 sm:$0xff]  }
  0xb3   : > { %v5429_v40 = vld [vmem:[%s6382_s21 + $0x128] ss:$16 sps:$4 sm:$0xff]   ;;  %v5430_v41 = vld [vmem:[%s6382_s21 + $0x144] ss:$16 sps:$4 sm:$0xff]   ;;  %v5432_v42 = vld [vmem:[%s6382_s21 + $0x14c] ss:$16 sps:$4 sm:$0xff]  }
  0xb4   : > { %2405 = vmatpush1.bf16.msra.mxu0 %v5392_v15  ;;  %2569 = vmatpush1.bf16.msra.mxu1 %v5393_v16  ;;  %v5434_v43 = vld [vmem:[%s6382_s21 + $0x140] ss:$16 sps:$4 sm:$0xff]   ;;  %v5435_v44 = vld [vmem:[%s6382_s21 + $0x148] ss:$16 sps:$4 sm:$0xff]   ;;  %v5436_v45 = vld [vmem:[%s6382_s21 + $0x164] ss:$16 sps:$4 sm:$0xff]  }
  0xb5   : > { %2406 = vmatprep.subr.bf16.mxu0 %v5394_v17  ;;  %2570 = vmatprep.subr.bf16.mxu1 %v5396_v18  ;;  %v5438_v46 = vld [vmem:[%s6382_s21 + $0x16c] ss:$16 sps:$4 sm:$0xff]   ;;  %v5440_v48 = vld [vmem:[%s6382_s21 + $0x160] ss:$16 sps:$4 sm:$0xff]   ;;  %v5441_v50 = vld [vmem:[%s6382_s21 + $0x168] ss:$16 sps:$4 sm:$0xff]  }
  0xb6   : > { %v825_v47 = vld [vmem:[%s7158_s0 + $0x8] sm:$0xff]  ;;  %v5442_v51 = vld [vmem:[%s6382_s21 + $0x184] ss:$16 sps:$4 sm:$0xff]   ;;  %v5446_v53 = vld [vmem:[%s6382_s21 + $0x180] ss:$16 sps:$4 sm:$0xff]   ;;  %p5312_p11 = scmp.ne.s32.totalorder %s5830_s24, 3 }
  0xb7   : > { %v833_v49 = vpack.c.bf16 %v825_v47, %v825_v47  ;;  %v5444_v52 = vld [vmem:[%s6382_s21 + $0x18c] ss:$16 sps:$4 sm:$0xff]   ;;  %v5447_v54 = vld [vmem:[%s6382_s21 + $0x188] ss:$16 sps:$4 sm:$0xff]   ;;  %v5448_v55 = vld [vmem:[%s6382_s21 + $0x1a4] ss:$16 sps:$4 sm:$0xff]  }
  0xb8   : > { %2407 = vmatpush1.bf16.msra.mxu0 %v5398_v19  ;;  %2571 = vmatpush1.bf16.msra.mxu1 %v5399_v20  ;;  %v5450_v56 = vld [vmem:[%s6382_s21 + $0x1ac] ss:$16 sps:$4 sm:$0xff]   ;;  %v5452_v57 = vld [vmem:[%s6382_s21 + $0x1a0] ss:$16 sps:$4 sm:$0xff]   ;;  %v5453_v58 = vld [vmem:[%s6382_s21 + $0x1a8] ss:$16 sps:$4 sm:$0xff]  }
  0xb9   : > { %2408 = vmatprep.subr.bf16.mxu0 %v5400_v21  ;;  %2572 = vmatprep.subr.bf16.mxu1 %v5402_v22  ;;  %v5454_v59 = vld [vmem:[%s6382_s21 + $0x1c4] ss:$16 sps:$4 sm:$0xff]   ;;  %v5456_v60 = vld [vmem:[%s6382_s21 + $0x1cc] ss:$16 sps:$4 sm:$0xff]   ;;  %v5458_v61 = vld [vmem:[%s6382_s21 + $0x1c0] ss:$16 sps:$4 sm:$0xff]  }
  0xba   : > { %2430 = vmatprep.mubr.bf16.mxu0 %v833_v49  ;;  %2594 = vmatprep.mubr.bf16.mxu1 %v833_v49  ;;  %v5459_v62 = vld [vmem:[%s6382_s21 + $0x1c8] ss:$16 sps:$4 sm:$0xff]   ;;  %v5460_v63 = vld [vmem:[%s6382_s21 + $0x1e4] ss:$16 sps:$4 sm:$0xff]   ;;  %v5462_v0 = vld [vmem:[%s6382_s21 + $0x1ec] ss:$16 sps:$4 sm:$0xff]  }
  0xbb   : > { %v5464_v1 = vld [vmem:[%s6382_s21 + $0x1e0] ss:$16 sps:$4 sm:$0xff]   ;;  %v5465_v2 = vld [vmem:[%s6382_s21 + $0x1e8] ss:$16 sps:$4 sm:$0xff]   ;;  %v5468_v4 = vld [vmem:[%s6382_s21 + $0x204] ss:$16 sps:$4 sm:$0xff]  }
  0xbc   : > { %2409 = vmatpush1.bf16.msra.mxu0 %v5404_v23  ;;  %2573 = vmatpush1.bf16.msra.mxu1 %v5405_v24  ;;  %v824_v3 = vld [vmem:[%s7158_s0] sm:$0xff]  ;;  %v5471_v5 = vld [vmem:[%s6382_s21 + $0x20c] ss:$16 sps:$4 sm:$0xff]   ;;  %v5469_v8 = vld [vmem:[%s6382_s21 + $0x208] ss:$16 sps:$4 sm:$0xff]  }
  0xbd   : > { %2410 = vmatprep.subr.bf16.mxu0 %v5406_v25  ;;  %2574 = vmatprep.subr.bf16.mxu1 %v5408_v26  ;;  %v832_v6 = vpack.c.bf16 %v824_v3, %v824_v3  ;;  %v5466_v7 = vld [vmem:[%s6382_s21 + $0x200] ss:$16 sps:$4 sm:$0xff]   ;;  %v5474_v9 = vld [vmem:[%s6382_s21 + $0x224] ss:$16 sps:$4 sm:$0xff]   ;;  %v5477_v10 = vld [vmem:[%s6382_s21 + $0x22c] ss:$16 sps:$4 sm:$0xff]  }
  0xbe   : > { %v5472_v11 = vld [vmem:[%s6382_s21 + $0x220] ss:$16 sps:$4 sm:$0xff]   ;;  %v5475_v12 = vld [vmem:[%s6382_s21 + $0x228] ss:$16 sps:$4 sm:$0xff]   ;;  %v5480_v13 = vld [vmem:[%s6382_s21 + $0x244] ss:$16 sps:$4 sm:$0xff]  }
  0xbf   : > { %v5483_v14 = vld [vmem:[%s6382_s21 + $0x24c] ss:$16 sps:$4 sm:$0xff]   ;;  %v5478_v15 = vld [vmem:[%s6382_s21 + $0x240] ss:$16 sps:$4 sm:$0xff]   ;;  %v5481_v16 = vld [vmem:[%s6382_s21 + $0x248] ss:$16 sps:$4 sm:$0xff]  }
  0xc0   : > { %2411 = vmatpush1.bf16.msra.mxu0 %v5410_v27  ;;  %2575 = vmatpush1.bf16.msra.mxu1 %v5411_v28  ;;  %v5486_v17 = vld [vmem:[%s6382_s21 + $0x264] ss:$16 sps:$4 sm:$0xff]   ;;  %v5489_v18 = vld [vmem:[%s6382_s21 + $0x26c] ss:$16 sps:$4 sm:$0xff]   ;;  %v5484_v19 = vld [vmem:[%s6382_s21 + $0x260] ss:$16 sps:$4 sm:$0xff]  }
  0xc1   : > { %2412 = vmatprep.subr.bf16.mxu0 %v5412_v29  ;;  %2576 = vmatprep.subr.bf16.mxu1 %v5414_v30  ;;  %v5487_v20 = vld [vmem:[%s6382_s21 + $0x268] ss:$16 sps:$4 sm:$0xff]   ;;  %v5492_v21 = vld [vmem:[%s6382_s21 + $0x284] ss:$16 sps:$4 sm:$0xff]   ;;  %v5495_v22 = vld [vmem:[%s6382_s21 + $0x28c] ss:$16 sps:$4 sm:$0xff]  }
  0xc2   : > { %v5490_v23 = vld [vmem:[%s6382_s21 + $0x280] ss:$16 sps:$4 sm:$0xff]   ;;  %v5493_v24 = vld [vmem:[%s6382_s21 + $0x288] ss:$16 sps:$4 sm:$0xff]   ;;  %v5498_v25 = vld [vmem:[%s6382_s21 + $0x2a4] ss:$16 sps:$4 sm:$0xff]  }
  0xc3   : > { %v5501_v26 = vld [vmem:[%s6382_s21 + $0x2ac] ss:$16 sps:$4 sm:$0xff]   ;;  %v5496_v27 = vld [vmem:[%s6382_s21 + $0x2a0] ss:$16 sps:$4 sm:$0xff]   ;;  %v5499_v28 = vld [vmem:[%s6382_s21 + $0x2a8] ss:$16 sps:$4 sm:$0xff]  }
  0xc4   : > { %2413 = vmatpush1.bf16.msra.mxu0 %v5416_v31  ;;  %2577 = vmatpush1.bf16.msra.mxu1 %v5417_v32  ;;  %v5504_v29 = vld [vmem:[%s6382_s21 + $0x2c4] ss:$16 sps:$4 sm:$0xff]   ;;  %v5507_v30 = vld [vmem:[%s6382_s21 + $0x2cc] ss:$16 sps:$4 sm:$0xff]   ;;  %v5502_v32 = vld [vmem:[%s6382_s21 + $0x2c0] ss:$16 sps:$4 sm:$0xff]  }
  0xc5   : > { %2414 = vmatprep.subr.bf16.mxu0 %v5418_v33  ;;  %2578 = vmatprep.subr.bf16.mxu1 %v5420_v34  ;;  %v827_v31 = vld [vmem:[%s7158_s0 + $0x18] sm:$0xff]  ;;  %v5528_v47 = vld [vmem:[%s6382_s21 + $0x344] ss:$16 sps:$4 sm:$0xff]   ;;  %v5526_v49 = vld [vmem:[%s6382_s21 + $0x340] ss:$16 sps:$4 sm:$0xff]  }
  0xc6   : > { %v835_v33 = vpack.c.bf16 %v827_v31, %v827_v31  ;;  %v5505_v34 = vld [vmem:[%s6382_s21 + $0x2c8] ss:$16 sps:$4 sm:$0xff]   ;;  %v5558_v3 = vld [vmem:[%s6382_s21 + $0x3e4] ss:$16 sps:$4 sm:$0xff]  }
  0xc7   : > { %v5594_v31 = vld [vmem:[%s6382_s21 + $0x4a4] ss:$16 sps:$4 sm:$0xff]  }
  0xc8   : > { %2415 = vmatpush1.bf16.msra.mxu0 %v5422_v35  ;;  %2579 = vmatpush1.bf16.msra.mxu1 %v5423_v36  ;;  %v5510_v35 = vld [vmem:[%s6382_s21 + $0x2e4] ss:$16 sps:$4 sm:$0xff]   ;;  %v5513_v36 = vld [vmem:[%s6382_s21 + $0x2ec] ss:$16 sps:$4 sm:$0xff]  }
  0xc9   : > { %2416 = vmatprep.subr.bf16.mxu0 %v5424_v37  ;;  %2580 = vmatprep.subr.bf16.mxu1 %v5426_v38  ;;  %v5508_v37 = vld [vmem:[%s6382_s21 + $0x2e0] ss:$16 sps:$4 sm:$0xff]   ;;  %v5511_v38 = vld [vmem:[%s6382_s21 + $0x2e8] ss:$16 sps:$4 sm:$0xff]  }
  0xcc   : > { %2417 = vmatpush1.bf16.msra.mxu0 %v5428_v39  ;;  %2581 = vmatpush1.bf16.msra.mxu1 %v5429_v40  ;;  %v5516_v39 = vld [vmem:[%s6382_s21 + $0x304] ss:$16 sps:$4 sm:$0xff]   ;;  %v5519_v40 = vld [vmem:[%s6382_s21 + $0x30c] ss:$16 sps:$4 sm:$0xff]  }
  0xcd   : > { %2418 = vmatprep.subr.bf16.mxu0 %v5430_v41  ;;  %2582 = vmatprep.subr.bf16.mxu1 %v5432_v42  ;;  %v5514_v41 = vld [vmem:[%s6382_s21 + $0x300] ss:$16 sps:$4 sm:$0xff]   ;;  %v5517_v42 = vld [vmem:[%s6382_s21 + $0x308] ss:$16 sps:$4 sm:$0xff]  }
  0xd0   : > { %2419 = vmatpush1.bf16.msra.mxu0 %v5434_v43  ;;  %2583 = vmatpush1.bf16.msra.mxu1 %v5435_v44  ;;  %v5522_v43 = vld [vmem:[%s6382_s21 + $0x324] ss:$16 sps:$4 sm:$0xff]   ;;  %v5525_v44 = vld [vmem:[%s6382_s21 + $0x32c] ss:$16 sps:$4 sm:$0xff]  }
  0xd1   : > { %2420 = vmatprep.subr.bf16.mxu0 %v5436_v45  ;;  %2584 = vmatprep.subr.bf16.mxu1 %v5438_v46  ;;  %v5520_v45 = vld [vmem:[%s6382_s21 + $0x320] ss:$16 sps:$4 sm:$0xff]   ;;  %v5523_v46 = vld [vmem:[%s6382_s21 + $0x328] ss:$16 sps:$4 sm:$0xff]  }
  0xd4   : > { %2421 = vmatpush1.bf16.msra.mxu0 %v5440_v48  ;;  %2585 = vmatpush1.bf16.msra.mxu1 %v5441_v50  ;;  %v5531_v48 = vld [vmem:[%s6382_s21 + $0x34c] ss:$16 sps:$4 sm:$0xff]   ;;  %v5529_v50 = vld [vmem:[%s6382_s21 + $0x348] ss:$16 sps:$4 sm:$0xff]  }
  0xd5   : > { %2422 = vmatprep.subr.bf16.mxu0 %v5442_v51  ;;  %2586 = vmatprep.subr.bf16.mxu1 %v5444_v52  ;;  %v5534_v51 = vld [vmem:[%s6382_s21 + $0x364] ss:$16 sps:$4 sm:$0xff]   ;;  %v5537_v52 = vld [vmem:[%s6382_s21 + $0x36c] ss:$16 sps:$4 sm:$0xff]  }
  0xd8   : > { %2423 = vmatpush1.bf16.msra.mxu0 %v5446_v53  ;;  %2587 = vmatpush1.bf16.msra.mxu1 %v5447_v54  ;;  %v5532_v53 = vld [vmem:[%s6382_s21 + $0x360] ss:$16 sps:$4 sm:$0xff]   ;;  %v5535_v54 = vld [vmem:[%s6382_s21 + $0x368] ss:$16 sps:$4 sm:$0xff]  }
  0xd9   : > { %2424 = vmatprep.subr.bf16.mxu0 %v5448_v55  ;;  %2588 = vmatprep.subr.bf16.mxu1 %v5450_v56  ;;  %v5540_v55 = vld [vmem:[%s6382_s21 + $0x384] ss:$16 sps:$4 sm:$0xff]   ;;  %v5543_v56 = vld [vmem:[%s6382_s21 + $0x38c] ss:$16 sps:$4 sm:$0xff]  }
  0xdc   : > { %2425 = vmatpush1.bf16.msra.mxu0 %v5452_v57  ;;  %2589 = vmatpush1.bf16.msra.mxu1 %v5453_v58  ;;  %v5538_v57 = vld [vmem:[%s6382_s21 + $0x380] ss:$16 sps:$4 sm:$0xff]   ;;  %v5541_v58 = vld [vmem:[%s6382_s21 + $0x388] ss:$16 sps:$4 sm:$0xff]  }
  0xdd   : > { %2426 = vmatprep.subr.bf16.mxu0 %v5454_v59  ;;  %2590 = vmatprep.subr.bf16.mxu1 %v5456_v60  ;;  %v5546_v59 = vld [vmem:[%s6382_s21 + $0x3a4] ss:$16 sps:$4 sm:$0xff]   ;;  %v5549_v60 = vld [vmem:[%s6382_s21 + $0x3ac] ss:$16 sps:$4 sm:$0xff]  }
  0xe0   : > { %2427 = vmatpush1.bf16.msra.mxu0 %v5458_v61  ;;  %2591 = vmatpush1.bf16.msra.mxu1 %v5459_v62  ;;  %v5544_v61 = vld [vmem:[%s6382_s21 + $0x3a0] ss:$16 sps:$4 sm:$0xff]   ;;  %v5547_v62 = vld [vmem:[%s6382_s21 + $0x3a8] ss:$16 sps:$4 sm:$0xff]  }
  0xe1   : > { %2428 = vmatprep.subr.bf16.mxu0 %v5460_v63  ;;  %2592 = vmatprep.subr.bf16.mxu1 %v5462_v0  ;;  %v5552_v63 = vld [vmem:[%s6382_s21 + $0x3c4] ss:$16 sps:$4 sm:$0xff]   ;;  %v5555_v0 = vld [vmem:[%s6382_s21 + $0x3cc] ss:$16 sps:$4 sm:$0xff]  }
  0xe4   : > { %2429 = vmatpush1.bf16.msra.mxu0 %v5464_v1  ;;  %2593 = vmatpush1.bf16.msra.mxu1 %v5465_v2  ;;  %v5550_v1 = vld [vmem:[%s6382_s21 + $0x3c0] ss:$16 sps:$4 sm:$0xff]   ;;  %v5553_v2 = vld [vmem:[%s6382_s21 + $0x3c8] ss:$16 sps:$4 sm:$0xff]  }
  0xe5   : > { %2439 = vmatprep.subr.bf16.mxu0 %v5468_v4  ;;  %2603 = vmatprep.subr.bf16.mxu1 %v5471_v5  ;;  %v5561_v4 = vld [vmem:[%s6382_s21 + $0x3ec] ss:$16 sps:$4 sm:$0xff]   ;;  %v5556_v5 = vld [vmem:[%s6382_s21 + $0x3e0] ss:$16 sps:$4 sm:$0xff]  }
  0xe7   : > { %2431 = vmatmul.mubr.bf16.vlgmr.msra.gmra.mrb[0].mxu0 %v832_v6  ;;  %2595 = vmatmul.mubr.bf16.vlgmr.msra.gmra.mrb[0].mxu1 %v832_v6  ;;  %v5559_v6 = vld [vmem:[%s6382_s21 + $0x3e8] ss:$16 sps:$4 sm:$0xff]  }
  0xe8   : > { %2440 = vmatpush1.bf16.msra.mxu0 %v5466_v7  ;;  %2604 = vmatpush1.bf16.msra.mxu1 %v5469_v8  ;;  %v5564_v7 = vld [vmem:[%s6382_s21 + $0x404] ss:$16 sps:$4 sm:$0xff]  }
  0xe9   : > { %2441 = vmatprep.subr.bf16.mxu0 %v5474_v9  ;;  %2605 = vmatprep.subr.bf16.mxu1 %v5477_v10  ;;  %v826_v8 = vld [vmem:[%s7158_s0 + $0x10] sm:$0xff]  ;;  %v5567_v9 = vld [vmem:[%s6382_s21 + $0x40c] ss:$16 sps:$4 sm:$0xff]  }
  0xea   : > { %2471 = vmatprep.mubr.bf16.mxu0 %v835_v33  ;;  %2635 = vmatprep.mubr.bf16.mxu1 %v835_v33  ;;  %v5562_v10 = vld [vmem:[%s6382_s21 + $0x400] ss:$16 sps:$4 sm:$0xff]  }
  0xeb   : > { %v5592_v33 = vld [vmem:[%s6382_s21 + $0x4a0] ss:$16 sps:$4 sm:$0xff]  }
  0xec   : > { %2442 = vmatpush1.bf16.msra.mxu0 %v5472_v11  ;;  %2606 = vmatpush1.bf16.msra.mxu1 %v5475_v12  ;;  %v5565_v11 = vld [vmem:[%s6382_s21 + $0x408] ss:$16 sps:$4 sm:$0xff]   ;;  %v834_v12 = vpack.c.bf16 %v826_v8, %v826_v8  ;;  %v5657_v8 = vld [vmem:[%s6382_s21 + $0x5ec] ss:$16 sps:$4 sm:$0xff]  }
  0xed   : > { %2443 = vmatprep.subr.bf16.mxu0 %v5480_v13  ;;  %2607 = vmatprep.subr.bf16.mxu1 %v5483_v14  ;;  %v5570_v13 = vld [vmem:[%s6382_s21 + $0x424] ss:$16 sps:$4 sm:$0xff]   ;;  %v5573_v14 = vld [vmem:[%s6382_s21 + $0x42c] ss:$16 sps:$4 sm:$0xff]  }
  0xf0   : > { %2444 = vmatpush1.bf16.msra.mxu0 %v5478_v15  ;;  %2608 = vmatpush1.bf16.msra.mxu1 %v5481_v16  ;;  %v829_v15 = vld [vmem:[%s7158_s0 + $0x28] sm:$0xff] }
  0xf1   : > { %2445 = vmatprep.subr.bf16.mxu0 %v5486_v17  ;;  %2609 = vmatprep.subr.bf16.mxu1 %v5489_v18  ;;  %v837_v16 = vpack.c.bf16 %v829_v15, %v829_v15  ;;  %v5568_v17 = vld [vmem:[%s6382_s21 + $0x420] ss:$16 sps:$4 sm:$0xff]   ;;  %v5571_v18 = vld [vmem:[%s6382_s21 + $0x428] ss:$16 sps:$4 sm:$0xff]  }
  0xf2   : > { %v831_v15 = vld [vmem:[%s7158_s0 + $0x38] sm:$0xff] }
  0xf4   : > { %2446 = vmatpush1.bf16.msra.mxu0 %v5484_v19  ;;  %2610 = vmatpush1.bf16.msra.mxu1 %v5487_v20  ;;  %v5576_v19 = vld [vmem:[%s6382_s21 + $0x444] ss:$16 sps:$4 sm:$0xff]   ;;  %v5579_v20 = vld [vmem:[%s6382_s21 + $0x44c] ss:$16 sps:$4 sm:$0xff]  }
  0xf5   : > { %2447 = vmatprep.subr.bf16.mxu0 %v5492_v21  ;;  %2611 = vmatprep.subr.bf16.mxu1 %v5495_v22  ;;  %v5574_v21 = vld [vmem:[%s6382_s21 + $0x440] ss:$16 sps:$4 sm:$0xff]   ;;  %v5577_v22 = vld [vmem:[%s6382_s21 + $0x448] ss:$16 sps:$4 sm:$0xff]  }
  0xf8   : > { %2448 = vmatpush1.bf16.msra.mxu0 %v5490_v23  ;;  %2612 = vmatpush1.bf16.msra.mxu1 %v5493_v24  ;;  %v5582_v23 = vld [vmem:[%s6382_s21 + $0x464] ss:$16 sps:$4 sm:$0xff]   ;;  %v5585_v24 = vld [vmem:[%s6382_s21 + $0x46c] ss:$16 sps:$4 sm:$0xff]  }
  0xf9   : > { %2449 = vmatprep.subr.bf16.mxu0 %v5498_v25  ;;  %2613 = vmatprep.subr.bf16.mxu1 %v5501_v26  ;;  %v5580_v25 = vld [vmem:[%s6382_s21 + $0x460] ss:$16 sps:$4 sm:$0xff]   ;;  %v5583_v26 = vld [vmem:[%s6382_s21 + $0x468] ss:$16 sps:$4 sm:$0xff]  }
  0xfc   : > { %2450 = vmatpush1.bf16.msra.mxu0 %v5496_v27  ;;  %2614 = vmatpush1.bf16.msra.mxu1 %v5499_v28  ;;  %v5588_v27 = vld [vmem:[%s6382_s21 + $0x484] ss:$16 sps:$4 sm:$0xff]   ;;  %v5591_v28 = vld [vmem:[%s6382_s21 + $0x48c] ss:$16 sps:$4 sm:$0xff]  }
  0xfd   : > { %2451 = vmatprep.subr.bf16.mxu0 %v5504_v29  ;;  %2615 = vmatprep.subr.bf16.mxu1 %v5507_v30  ;;  %v5586_v29 = vld [vmem:[%s6382_s21 + $0x480] ss:$16 sps:$4 sm:$0xff]   ;;  %v5589_v30 = vld [vmem:[%s6382_s21 + $0x488] ss:$16 sps:$4 sm:$0xff]  }
 0x100   : > { %2452 = vmatpush1.bf16.msra.mxu0 %v5502_v32  ;;  %2616 = vmatpush1.bf16.msra.mxu1 %v5505_v34  ;;  %v5597_v32 = vld [vmem:[%s6382_s21 + $0x4ac] ss:$16 sps:$4 sm:$0xff]   ;;  %v5595_v34 = vld [vmem:[%s6382_s21 + $0x4a8] ss:$16 sps:$4 sm:$0xff]  }
 0x101   : > { %2453 = vmatprep.subr.bf16.mxu0 %v5510_v35  ;;  %2617 = vmatprep.subr.bf16.mxu1 %v5513_v36  ;;  %v5600_v35 = vld [vmem:[%s6382_s21 + $0x4c4] ss:$16 sps:$4 sm:$0xff]   ;;  %v5603_v36 = vld [vmem:[%s6382_s21 + $0x4cc] ss:$16 sps:$4 sm:$0xff]  }
 0x104   : > { %2454 = vmatpush1.bf16.msra.mxu0 %v5508_v37  ;;  %2618 = vmatpush1.bf16.msra.mxu1 %v5511_v38  ;;  %v5598_v37 = vld [vmem:[%s6382_s21 + $0x4c0] ss:$16 sps:$4 sm:$0xff]   ;;  %v5601_v38 = vld [vmem:[%s6382_s21 + $0x4c8] ss:$16 sps:$4 sm:$0xff]  }
 0x105   : > { %2455 = vmatprep.subr.bf16.mxu0 %v5516_v39  ;;  %2619 = vmatprep.subr.bf16.mxu1 %v5519_v40  ;;  %v5606_v39 = vld [vmem:[%s6382_s21 + $0x4e4] ss:$16 sps:$4 sm:$0xff]   ;;  %v5609_v40 = vld [vmem:[%s6382_s21 + $0x4ec] ss:$16 sps:$4 sm:$0xff]  }
 0x108   : > { %2456 = vmatpush1.bf16.msra.mxu0 %v5514_v41  ;;  %2620 = vmatpush1.bf16.msra.mxu1 %v5517_v42  ;;  %v5604_v41 = vld [vmem:[%s6382_s21 + $0x4e0] ss:$16 sps:$4 sm:$0xff]   ;;  %v5607_v42 = vld [vmem:[%s6382_s21 + $0x4e8] ss:$16 sps:$4 sm:$0xff]  }
 0x109   : > { %2457 = vmatprep.subr.bf16.mxu0 %v5522_v43  ;;  %2621 = vmatprep.subr.bf16.mxu1 %v5525_v44  ;;  %v5612_v43 = vld [vmem:[%s6382_s21 + $0x504] ss:$16 sps:$4 sm:$0xff]   ;;  %v5615_v44 = vld [vmem:[%s6382_s21 + $0x50c] ss:$16 sps:$4 sm:$0xff]  }
 0x10c   : > { %2458 = vmatpush1.bf16.msra.mxu0 %v5520_v45  ;;  %2622 = vmatpush1.bf16.msra.mxu1 %v5523_v46  ;;  %v5610_v45 = vld [vmem:[%s6382_s21 + $0x500] ss:$16 sps:$4 sm:$0xff]   ;;  %v5613_v46 = vld [vmem:[%s6382_s21 + $0x508] ss:$16 sps:$4 sm:$0xff]  }
 0x10d   : > { %2459 = vmatprep.subr.bf16.mxu0 %v5528_v47  ;;  %2623 = vmatprep.subr.bf16.mxu1 %v5531_v48  ;;  %v5618_v47 = vld [vmem:[%s6382_s21 + $0x524] ss:$16 sps:$4 sm:$0xff]   ;;  %v5621_v48 = vld [vmem:[%s6382_s21 + $0x52c] ss:$16 sps:$4 sm:$0xff]  }
 0x110   : > { %2460 = vmatpush1.bf16.msra.mxu0 %v5526_v49  ;;  %2624 = vmatpush1.bf16.msra.mxu1 %v5529_v50  ;;  %v5616_v49 = vld [vmem:[%s6382_s21 + $0x520] ss:$16 sps:$4 sm:$0xff]   ;;  %v5619_v50 = vld [vmem:[%s6382_s21 + $0x528] ss:$16 sps:$4 sm:$0xff]  }
 0x111   : > { %2461 = vmatprep.subr.bf16.mxu0 %v5534_v51  ;;  %2625 = vmatprep.subr.bf16.mxu1 %v5537_v52  ;;  %v5624_v51 = vld [vmem:[%s6382_s21 + $0x544] ss:$16 sps:$4 sm:$0xff]   ;;  %v5627_v52 = vld [vmem:[%s6382_s21 + $0x54c] ss:$16 sps:$4 sm:$0xff]  }
 0x114   : > { %2462 = vmatpush1.bf16.msra.mxu0 %v5532_v53  ;;  %2626 = vmatpush1.bf16.msra.mxu1 %v5535_v54  ;;  %v5622_v53 = vld [vmem:[%s6382_s21 + $0x540] ss:$16 sps:$4 sm:$0xff]   ;;  %v5625_v54 = vld [vmem:[%s6382_s21 + $0x548] ss:$16 sps:$4 sm:$0xff]  }
 0x115   : > { %2463 = vmatprep.subr.bf16.mxu0 %v5540_v55  ;;  %2627 = vmatprep.subr.bf16.mxu1 %v5543_v56  ;;  %v5630_v55 = vld [vmem:[%s6382_s21 + $0x564] ss:$16 sps:$4 sm:$0xff]   ;;  %v5633_v56 = vld [vmem:[%s6382_s21 + $0x56c] ss:$16 sps:$4 sm:$0xff]  }
 0x118   : > { %2464 = vmatpush1.bf16.msra.mxu0 %v5538_v57  ;;  %2628 = vmatpush1.bf16.msra.mxu1 %v5541_v58  ;;  %v5628_v57 = vld [vmem:[%s6382_s21 + $0x560] ss:$16 sps:$4 sm:$0xff]   ;;  %v5631_v58 = vld [vmem:[%s6382_s21 + $0x568] ss:$16 sps:$4 sm:$0xff]  }
 0x119   : > { %2465 = vmatprep.subr.bf16.mxu0 %v5546_v59  ;;  %2629 = vmatprep.subr.bf16.mxu1 %v5549_v60  ;;  %v5636_v59 = vld [vmem:[%s6382_s21 + $0x584] ss:$16 sps:$4 sm:$0xff]   ;;  %v5639_v60 = vld [vmem:[%s6382_s21 + $0x58c] ss:$16 sps:$4 sm:$0xff]  }
 0x11c   : > { %2466 = vmatpush1.bf16.msra.mxu0 %v5544_v61  ;;  %2630 = vmatpush1.bf16.msra.mxu1 %v5547_v62  ;;  %v5634_v61 = vld [vmem:[%s6382_s21 + $0x580] ss:$16 sps:$4 sm:$0xff]   ;;  %v5637_v62 = vld [vmem:[%s6382_s21 + $0x588] ss:$16 sps:$4 sm:$0xff]  }
 0x11d   : > { %2467 = vmatprep.subr.bf16.mxu0 %v5552_v63  ;;  %2631 = vmatprep.subr.bf16.mxu1 %v5555_v0  ;;  %v5642_v63 = vld [vmem:[%s6382_s21 + $0x5a4] ss:$16 sps:$4 sm:$0xff]   ;;  %v5645_v0 = vld [vmem:[%s6382_s21 + $0x5ac] ss:$16 sps:$4 sm:$0xff]  }
 0x120   : > { %2468 = vmatpush1.bf16.msra.mxu0 %v5550_v1  ;;  %2632 = vmatpush1.bf16.msra.mxu1 %v5553_v2  ;;  %v5640_v1 = vld [vmem:[%s6382_s21 + $0x5a0] ss:$16 sps:$4 sm:$0xff]   ;;  %v5643_v2 = vld [vmem:[%s6382_s21 + $0x5a8] ss:$16 sps:$4 sm:$0xff]  }
 0x121   : > { %2469 = vmatprep.subr.bf16.mxu0 %v5558_v3  ;;  %2633 = vmatprep.subr.bf16.mxu1 %v5561_v4  ;;  %v5648_v3 = vld [vmem:[%s6382_s21 + $0x5c4] ss:$16 sps:$4 sm:$0xff]   ;;  %v5651_v4 = vld [vmem:[%s6382_s21 + $0x5cc] ss:$16 sps:$4 sm:$0xff]  }
 0x124   : > { %2470 = vmatpush1.bf16.msra.mxu0 %v5556_v5  ;;  %2634 = vmatpush1.bf16.msra.mxu1 %v5559_v6  ;;  %v5646_v5 = vld [vmem:[%s6382_s21 + $0x5c0] ss:$16 sps:$4 sm:$0xff]   ;;  %v5649_v6 = vld [vmem:[%s6382_s21 + $0x5c8] ss:$16 sps:$4 sm:$0xff]  }
 0x125   : > { %2480 = vmatprep.subr.bf16.mxu0 %v5564_v7  ;;  %2644 = vmatprep.subr.bf16.mxu1 %v5567_v9  ;;  %v5654_v7 = vld [vmem:[%s6382_s21 + $0x5e4] ss:$16 sps:$4 sm:$0xff]   ;;  %v5652_v9 = vld [vmem:[%s6382_s21 + $0x5e0] ss:$16 sps:$4 sm:$0xff]  }
 0x127   : > { %2472 = vmatmul.mubr.bf16.vlgmr.msra.gmra.mrb[0].mxu0 %v834_v12  ;;  %2636 = vmatmul.mubr.bf16.vlgmr.msra.gmra.mrb[0].mxu1 %v834_v12  ;;  %v5660_v12 = vld [vmem:[%s6382_s21 + $0x604] ss:$16 sps:$4 sm:$0xff]  }
 0x128   : > { %2481 = vmatpush1.bf16.msra.mxu0 %v5562_v10  ;;  %2645 = vmatpush1.bf16.msra.mxu1 %v5565_v11  ;;  %v5655_v10 = vld [vmem:[%s6382_s21 + $0x5e8] ss:$16 sps:$4 sm:$0xff]   ;;  %v828_v11 = vld [vmem:[%s7158_s0 + $0x20] sm:$0xff] }
 0x129   : > { %2482 = vmatprep.subr.bf16.mxu0 %v5570_v13  ;;  %2646 = vmatprep.subr.bf16.mxu1 %v5573_v14  ;;  %v5663_v13 = vld [vmem:[%s6382_s21 + $0x60c] ss:$16 sps:$4 sm:$0xff]   ;;  %v836_v14 = vpack.c.bf16 %v828_v11, %v828_v11  ;;  %v5750_v11 = vld [vmem:[%s6382_s21 + $0x7e4] ss:$16 sps:$4 sm:$0xff]  }
 0x12a   : > { %2512 = vmatprep.mubr.bf16.mxu0 %v837_v16  ;;  %2676 = vmatprep.mubr.bf16.mxu1 %v837_v16  ;;  %v5658_v16 = vld [vmem:[%s6382_s21 + $0x600] ss:$16 sps:$4 sm:$0xff]  }
 0x12c   : > { %2483 = vmatpush1.bf16.msra.mxu0 %v5568_v17  ;;  %2647 = vmatpush1.bf16.msra.mxu1 %v5571_v18  ;;  %v5661_v17 = vld [vmem:[%s6382_s21 + $0x608] ss:$16 sps:$4 sm:$0xff]   ;;  %v5666_v18 = vld [vmem:[%s6382_s21 + $0x624] ss:$16 sps:$4 sm:$0xff]  }
 0x12d   : > { %2484 = vmatprep.subr.bf16.mxu0 %v5576_v19  ;;  %2648 = vmatprep.subr.bf16.mxu1 %v5579_v20  ;;  %v5669_v19 = vld [vmem:[%s6382_s21 + $0x62c] ss:$16 sps:$4 sm:$0xff]   ;;  %v839_v20 = vpack.c.bf16 %v831_v15, %v831_v15  ;;  %v2870_v15 = vld [vmem:[%s6380_s26 + $0x400] sm:$0xff] }
 0x130   : > { %2485 = vmatpush1.bf16.msra.mxu0 %v5574_v21  ;;  %2649 = vmatpush1.bf16.msra.mxu1 %v5577_v22  ;;  %v5664_v21 = vld [vmem:[%s6382_s21 + $0x620] ss:$16 sps:$4 sm:$0xff]   ;;  %v5667_v22 = vld [vmem:[%s6382_s21 + $0x628] ss:$16 sps:$4 sm:$0xff]  }
 0x131   : > { %2486 = vmatprep.subr.bf16.mxu0 %v5582_v23  ;;  %2650 = vmatprep.subr.bf16.mxu1 %v5585_v24  ;;  %v5672_v23 = vld [vmem:[%s6382_s21 + $0x644] ss:$16 sps:$4 sm:$0xff]   ;;  %v5675_v24 = vld [vmem:[%s6382_s21 + $0x64c] ss:$16 sps:$4 sm:$0xff]  }
 0x134   : > { %2487 = vmatpush1.bf16.msra.mxu0 %v5580_v25  ;;  %2651 = vmatpush1.bf16.msra.mxu1 %v5583_v26  ;;  %v5670_v25 = vld [vmem:[%s6382_s21 + $0x640] ss:$16 sps:$4 sm:$0xff]   ;;  %v5673_v26 = vld [vmem:[%s6382_s21 + $0x648] ss:$16 sps:$4 sm:$0xff]  }
 0x135   : > { %2488 = vmatprep.subr.bf16.mxu0 %v5588_v27  ;;  %2652 = vmatprep.subr.bf16.mxu1 %v5591_v28  ;;  %v5678_v27 = vld [vmem:[%s6382_s21 + $0x664] ss:$16 sps:$4 sm:$0xff]   ;;  %v5681_v28 = vld [vmem:[%s6382_s21 + $0x66c] ss:$16 sps:$4 sm:$0xff]  }
 0x138   : > { %2489 = vmatpush1.bf16.msra.mxu0 %v5586_v29  ;;  %2653 = vmatpush1.bf16.msra.mxu1 %v5589_v30  ;;  %v5676_v29 = vld [vmem:[%s6382_s21 + $0x660] ss:$16 sps:$4 sm:$0xff]   ;;  %v5679_v30 = vld [vmem:[%s6382_s21 + $0x668] ss:$16 sps:$4 sm:$0xff]  }
 0x139   : > { %2490 = vmatprep.subr.bf16.mxu0 %v5594_v31  ;;  %2654 = vmatprep.subr.bf16.mxu1 %v5597_v32  ;;  %v5684_v31 = vld [vmem:[%s6382_s21 + $0x684] ss:$16 sps:$4 sm:$0xff]   ;;  %v5687_v32 = vld [vmem:[%s6382_s21 + $0x68c] ss:$16 sps:$4 sm:$0xff]  }
 0x13c   : > { %2491 = vmatpush1.bf16.msra.mxu0 %v5592_v33  ;;  %2655 = vmatpush1.bf16.msra.mxu1 %v5595_v34  ;;  %v5682_v33 = vld [vmem:[%s6382_s21 + $0x680] ss:$16 sps:$4 sm:$0xff]   ;;  %v5685_v34 = vld [vmem:[%s6382_s21 + $0x688] ss:$16 sps:$4 sm:$0xff]  }
 0x13d   : > { %2492 = vmatprep.subr.bf16.mxu0 %v5600_v35  ;;  %2656 = vmatprep.subr.bf16.mxu1 %v5603_v36  ;;  %v5690_v35 = vld [vmem:[%s6382_s21 + $0x6a4] ss:$16 sps:$4 sm:$0xff]   ;;  %v5693_v36 = vld [vmem:[%s6382_s21 + $0x6ac] ss:$16 sps:$4 sm:$0xff]  }
 0x140   : > { %2493 = vmatpush1.bf16.msra.mxu0 %v5598_v37  ;;  %2657 = vmatpush1.bf16.msra.mxu1 %v5601_v38  ;;  %v5688_v37 = vld [vmem:[%s6382_s21 + $0x6a0] ss:$16 sps:$4 sm:$0xff]   ;;  %v5691_v38 = vld [vmem:[%s6382_s21 + $0x6a8] ss:$16 sps:$4 sm:$0xff]  }
 0x141   : > { %2494 = vmatprep.subr.bf16.mxu0 %v5606_v39  ;;  %2658 = vmatprep.subr.bf16.mxu1 %v5609_v40  ;;  %v5696_v39 = vld [vmem:[%s6382_s21 + $0x6c4] ss:$16 sps:$4 sm:$0xff]   ;;  %v5699_v40 = vld [vmem:[%s6382_s21 + $0x6cc] ss:$16 sps:$4 sm:$0xff]  }
 0x144   : > { %2495 = vmatpush1.bf16.msra.mxu0 %v5604_v41  ;;  %2659 = vmatpush1.bf16.msra.mxu1 %v5607_v42  ;;  %v5694_v41 = vld [vmem:[%s6382_s21 + $0x6c0] ss:$16 sps:$4 sm:$0xff]   ;;  %v5697_v42 = vld [vmem:[%s6382_s21 + $0x6c8] ss:$16 sps:$4 sm:$0xff]  }
 0x145   : > { %2496 = vmatprep.subr.bf16.mxu0 %v5612_v43  ;;  %2660 = vmatprep.subr.bf16.mxu1 %v5615_v44  ;;  %v5702_v43 = vld [vmem:[%s6382_s21 + $0x6e4] ss:$16 sps:$4 sm:$0xff]   ;;  %v5705_v44 = vld [vmem:[%s6382_s21 + $0x6ec] ss:$16 sps:$4 sm:$0xff]  }
 0x148   : > { %2497 = vmatpush1.bf16.msra.mxu0 %v5610_v45  ;;  %2661 = vmatpush1.bf16.msra.mxu1 %v5613_v46  ;;  %v5700_v45 = vld [vmem:[%s6382_s21 + $0x6e0] ss:$16 sps:$4 sm:$0xff]   ;;  %v5703_v46 = vld [vmem:[%s6382_s21 + $0x6e8] ss:$16 sps:$4 sm:$0xff]  }
 0x149   : > { %2498 = vmatprep.subr.bf16.mxu0 %v5618_v47  ;;  %2662 = vmatprep.subr.bf16.mxu1 %v5621_v48  ;;  %v5708_v47 = vld [vmem:[%s6382_s21 + $0x704] ss:$16 sps:$4 sm:$0xff]   ;;  %v5711_v48 = vld [vmem:[%s6382_s21 + $0x70c] ss:$16 sps:$4 sm:$0xff]  }
 0x14c   : > { %2499 = vmatpush1.bf16.msra.mxu0 %v5616_v49  ;;  %2663 = vmatpush1.bf16.msra.mxu1 %v5619_v50  ;;  %v5706_v49 = vld [vmem:[%s6382_s21 + $0x700] ss:$16 sps:$4 sm:$0xff]   ;;  %v5709_v50 = vld [vmem:[%s6382_s21 + $0x708] ss:$16 sps:$4 sm:$0xff]  }
 0x14d   : > { %2500 = vmatprep.subr.bf16.mxu0 %v5624_v51  ;;  %2664 = vmatprep.subr.bf16.mxu1 %v5627_v52  ;;  %v5714_v51 = vld [vmem:[%s6382_s21 + $0x724] ss:$16 sps:$4 sm:$0xff]   ;;  %v5717_v52 = vld [vmem:[%s6382_s21 + $0x72c] ss:$16 sps:$4 sm:$0xff]  }
 0x150   : > { %2501 = vmatpush1.bf16.msra.mxu0 %v5622_v53  ;;  %2665 = vmatpush1.bf16.msra.mxu1 %v5625_v54  ;;  %v5712_v53 = vld [vmem:[%s6382_s21 + $0x720] ss:$16 sps:$4 sm:$0xff]   ;;  %v5715_v54 = vld [vmem:[%s6382_s21 + $0x728] ss:$16 sps:$4 sm:$0xff]  }
 0x151   : > { %2502 = vmatprep.subr.bf16.mxu0 %v5630_v55  ;;  %2666 = vmatprep.subr.bf16.mxu1 %v5633_v56  ;;  %v5720_v55 = vld [vmem:[%s6382_s21 + $0x744] ss:$16 sps:$4 sm:$0xff]   ;;  %v5723_v56 = vld [vmem:[%s6382_s21 + $0x74c] ss:$16 sps:$4 sm:$0xff]  }
 0x154   : > { %2503 = vmatpush1.bf16.msra.mxu0 %v5628_v57  ;;  %2667 = vmatpush1.bf16.msra.mxu1 %v5631_v58  ;;  %v5718_v57 = vld [vmem:[%s6382_s21 + $0x740] ss:$16 sps:$4 sm:$0xff]   ;;  %v5721_v58 = vld [vmem:[%s6382_s21 + $0x748] ss:$16 sps:$4 sm:$0xff]  }
 0x155   : > { %2504 = vmatprep.subr.bf16.mxu0 %v5636_v59  ;;  %2668 = vmatprep.subr.bf16.mxu1 %v5639_v60  ;;  %v5726_v59 = vld [vmem:[%s6382_s21 + $0x764] ss:$16 sps:$4 sm:$0xff]   ;;  %v5729_v60 = vld [vmem:[%s6382_s21 + $0x76c] ss:$16 sps:$4 sm:$0xff]  }
 0x158   : > { %2505 = vmatpush1.bf16.msra.mxu0 %v5634_v61  ;;  %2669 = vmatpush1.bf16.msra.mxu1 %v5637_v62  ;;  %v5724_v61 = vld [vmem:[%s6382_s21 + $0x760] ss:$16 sps:$4 sm:$0xff]   ;;  %v5727_v62 = vld [vmem:[%s6382_s21 + $0x768] ss:$16 sps:$4 sm:$0xff]  }
 0x159   : > { %2506 = vmatprep.subr.bf16.mxu0 %v5642_v63  ;;  %2670 = vmatprep.subr.bf16.mxu1 %v5645_v0  ;;  %v5732_v63 = vld [vmem:[%s6382_s21 + $0x784] ss:$16 sps:$4 sm:$0xff]   ;;  %v5735_v0 = vld [vmem:[%s6382_s21 + $0x78c] ss:$16 sps:$4 sm:$0xff]  }
 0x15c   : > { %2507 = vmatpush1.bf16.msra.mxu0 %v5640_v1  ;;  %2671 = vmatpush1.bf16.msra.mxu1 %v5643_v2  ;;  %v5730_v1 = vld [vmem:[%s6382_s21 + $0x780] ss:$16 sps:$4 sm:$0xff]   ;;  %v5733_v2 = vld [vmem:[%s6382_s21 + $0x788] ss:$16 sps:$4 sm:$0xff]  }
 0x15d   : > { %2508 = vmatprep.subr.bf16.mxu0 %v5648_v3  ;;  %2672 = vmatprep.subr.bf16.mxu1 %v5651_v4  ;;  %v5738_v3 = vld [vmem:[%s6382_s21 + $0x7a4] ss:$16 sps:$4 sm:$0xff]   ;;  %v5741_v4 = vld [vmem:[%s6382_s21 + $0x7ac] ss:$16 sps:$4 sm:$0xff]  }
 0x160   : > { %2509 = vmatpush1.bf16.msra.mxu0 %v5646_v5  ;;  %2673 = vmatpush1.bf16.msra.mxu1 %v5649_v6  ;;  %v5736_v5 = vld [vmem:[%s6382_s21 + $0x7a0] ss:$16 sps:$4 sm:$0xff]   ;;  %v5739_v6 = vld [vmem:[%s6382_s21 + $0x7a8] ss:$16 sps:$4 sm:$0xff]  }
 0x161   : > { %2510 = vmatprep.subr.bf16.mxu0 %v5654_v7  ;;  %2674 = vmatprep.subr.bf16.mxu1 %v5657_v8  ;;  %v5744_v7 = vld [vmem:[%s6382_s21 + $0x7c4] ss:$16 sps:$4 sm:$0xff]   ;;  %v5747_v8 = vld [vmem:[%s6382_s21 + $0x7cc] ss:$16 sps:$4 sm:$0xff]  }
 0x164   : > { %2511 = vmatpush1.bf16.msra.mxu0 %v5652_v9  ;;  %2675 = vmatpush1.bf16.msra.mxu1 %v5655_v10  ;;  %v5742_v9 = vld [vmem:[%s6382_s21 + $0x7c0] ss:$16 sps:$4 sm:$0xff]   ;;  %v5745_v10 = vld [vmem:[%s6382_s21 + $0x7c8] ss:$16 sps:$4 sm:$0xff]  }
 0x165   : > { %2521 = vmatprep.subr.bf16.mxu0 %v5660_v12  ;;  %2685 = vmatprep.subr.bf16.mxu1 %v5663_v13  ;;  %v5753_v12 = vld [vmem:[%s6382_s21 + $0x7ec] ss:$16 sps:$4 sm:$0xff]   ;;  %v2742_v13 = vld [vmem:[%s6380_s26] sm:$0xff] }
 0x167   : > { %2513 = vmatmul.mubr.bf16.vlgmr.msra.gmra.mrb[0].mxu0 %v836_v14  ;;  %2677 = vmatmul.mubr.bf16.vlgmr.msra.gmra.mrb[0].mxu1 %v836_v14  ;;  %v2746_v14 = vld [vmem:[%s6380_s26 + $0x20] sm:$0xff] }
 0x168   : > { %2522 = vmatpush1.bf16.msra.mxu0 %v5658_v16  ;;  %2686 = vmatpush1.bf16.msra.mxu1 %v5661_v17  ;;  %v2874_v16 = vld [vmem:[%s6380_s26 + $0x420] sm:$0xff] }
 0x169   : > { %2523 = vmatprep.subr.bf16.mxu0 %v5666_v18  ;;  %2687 = vmatprep.subr.bf16.mxu1 %v5669_v19  ;;  %v5748_v17 = vld [vmem:[%s6382_s21 + $0x7e0] ss:$16 sps:$4 sm:$0xff]   ;;  %v5751_v18 = vld [vmem:[%s6382_s21 + $0x7e8] ss:$16 sps:$4 sm:$0xff]  }
 0x16a   : > { %2553 = vmatprep.mubr.bf16.mxu0 %v839_v20  ;;  %2717 = vmatprep.mubr.bf16.mxu1 %v839_v20  ;;  %v830_v19 = vld [vmem:[%s7158_s0 + $0x30] sm:$0xff]  ;;  %v5057_v20 = vcombine.high %v2742_v13, %v2746_v14 }
 0x16c   : > { %2524 = vmatpush1.bf16.msra.mxu0 %v5664_v21  ;;  %2688 = vmatpush1.bf16.msra.mxu1 %v5667_v22  ;;  %v5185_v21 = vcombine.high %v2870_v15, %v2874_v16  ;;  %v2750_v22 = vld [vmem:[%s6380_s26 + $0x40] sm:$0xff] }
 0x16d   : > { %2525 = vmatprep.subr.bf16.mxu0 %v5672_v23  ;;  %2689 = vmatprep.subr.bf16.mxu1 %v5675_v24  ;;  %v2754_v23 = vld [vmem:[%s6380_s26 + $0x60] sm:$0xff] }
 0x16e   : > { %v2878_v24 = vld [vmem:[%s6380_s26 + $0x440] sm:$0xff] }
 0x170   : > { %2526 = vmatpush1.bf16.msra.mxu0 %v5670_v25  ;;  %2690 = vmatpush1.bf16.msra.mxu1 %v5673_v26  ;;  %v2882_v25 = vld [vmem:[%s6380_s26 + $0x460] sm:$0xff]  ;;  %v838_v26 = vpack.c.bf16 %v830_v19, %v830_v19 }
 0x171   : > { %2527 = vmatprep.subr.bf16.mxu0 %v5678_v27  ;;  %2691 = vmatprep.subr.bf16.mxu1 %v5681_v28  ;;  %v5056_v27 = vcombine.low %v2742_v13, %v2746_v14  ;;  %v5184_v28 = vcombine.low %v2870_v15, %v2874_v16  ;;  %v2806_v15 = vld [vmem:[%s6380_s26 + $0x200] sm:$0xff] }
 0x172   : > { %v2810_v16 = vld [vmem:[%s6380_s26 + $0x220] sm:$0xff] }
 0x174   : > { %2528 = vmatpush1.bf16.msra.mxu0 %v5676_v29  ;;  %2692 = vmatpush1.bf16.msra.mxu1 %v5679_v30  ;;  %v5065_v29 = vcombine.high %v2750_v22, %v2754_v23  ;;  %v5193_v30 = vcombine.high %v2878_v24, %v2882_v25 }
 0x175   : > { %2529 = vmatprep.subr.bf16.mxu0 %v5684_v31  ;;  %2693 = vmatprep.subr.bf16.mxu1 %v5687_v32  ;;  %v2758_v31 = vld [vmem:[%s6380_s26 + $0x80] sm:$0xff] }
 0x176   : > { %v2762_v32 = vld [vmem:[%s6380_s26 + $0xa0] sm:$0xff] }
 0x178   : > { %2530 = vmatpush1.bf16.msra.mxu0 %v5682_v33  ;;  %2694 = vmatpush1.bf16.msra.mxu1 %v5685_v34  ;;  %v2886_v33 = vld [vmem:[%s6380_s26 + $0x480] sm:$0xff] }
 0x179   : > { %2531 = vmatprep.subr.bf16.mxu0 %v5690_v35  ;;  %2695 = vmatprep.subr.bf16.mxu1 %v5693_v36  ;;  %v2890_v34 = vld [vmem:[%s6380_s26 + $0x4a0] sm:$0xff]  ;;  %v5064_v35 = vcombine.low %v2750_v22, %v2754_v23  ;;  %v5192_v36 = vcombine.low %v2878_v24, %v2882_v25 }
 0x17a   : > { %v2814_v23 = vld [vmem:[%s6380_s26 + $0x240] sm:$0xff] }
 0x17b   : > { %v2818_v24 = vld [vmem:[%s6380_s26 + $0x260] sm:$0xff] }
 0x17c   : > { %2532 = vmatpush1.bf16.msra.mxu0 %v5688_v37  ;;  %2696 = vmatpush1.bf16.msra.mxu1 %v5691_v38  ;;  %v5073_v37 = vcombine.high %v2758_v31, %v2762_v32  ;;  %v5201_v38 = vcombine.high %v2886_v33, %v2890_v34  ;;  %v2942_v25 = vld [vmem:[%s6380_s26 + $0x640] sm:$0xff] }
 0x17d   : > { %2533 = vmatprep.subr.bf16.mxu0 %v5696_v39  ;;  %2697 = vmatprep.subr.bf16.mxu1 %v5699_v40  ;;  %v2766_v39 = vld [vmem:[%s6380_s26 + $0xc0] sm:$0xff] }
 0x17e   : > { %v2770_v40 = vld [vmem:[%s6380_s26 + $0xe0] sm:$0xff] }
 0x180   : > { %2534 = vmatpush1.bf16.msra.mxu0 %v5694_v41  ;;  %2698 = vmatpush1.bf16.msra.mxu1 %v5697_v42  ;;  %v2894_v41 = vld [vmem:[%s6380_s26 + $0x4c0] sm:$0xff] }
 0x181   : > { %2535 = vmatprep.subr.bf16.mxu0 %v5702_v43  ;;  %2699 = vmatprep.subr.bf16.mxu1 %v5705_v44  ;;  %v2898_v42 = vld [vmem:[%s6380_s26 + $0x4e0] sm:$0xff]  ;;  %v5072_v43 = vcombine.low %v2758_v31, %v2762_v32  ;;  %v5200_v44 = vcombine.low %v2886_v33, %v2890_v34 }
 0x182   : > { %v2822_v31 = vld [vmem:[%s6380_s26 + $0x280] sm:$0xff] }
 0x183   : > { %v2826_v32 = vld [vmem:[%s6380_s26 + $0x2a0] sm:$0xff] }
 0x184   : > { %2536 = vmatpush1.bf16.msra.mxu0 %v5700_v45  ;;  %2700 = vmatpush1.bf16.msra.mxu1 %v5703_v46  ;;  %v5081_v45 = vcombine.high %v2766_v39, %v2770_v40  ;;  %v5209_v46 = vcombine.high %v2894_v41, %v2898_v42  ;;  %v2950_v33 = vld [vmem:[%s6380_s26 + $0x680] sm:$0xff] }
 0x185   : > { %2537 = vmatprep.subr.bf16.mxu0 %v5708_v47  ;;  %2701 = vmatprep.subr.bf16.mxu1 %v5711_v48  ;;  %v2774_v47 = vld [vmem:[%s6380_s26 + $0x100] sm:$0xff] }
 0x186   : > { %v2778_v48 = vld [vmem:[%s6380_s26 + $0x120] sm:$0xff] }
 0x187   : > { %v2954_v34 = vld [vmem:[%s6380_s26 + $0x6a0] sm:$0xff] }
 0x188   : > { %2538 = vmatpush1.bf16.msra.mxu0 %v5706_v49  ;;  %2702 = vmatpush1.bf16.msra.mxu1 %v5709_v50  ;;  %v2902_v49 = vld [vmem:[%s6380_s26 + $0x500] sm:$0xff] }
 0x189   : > { %2539 = vmatprep.subr.bf16.mxu0 %v5714_v51  ;;  %2703 = vmatprep.subr.bf16.mxu1 %v5717_v52  ;;  %v2906_v50 = vld [vmem:[%s6380_s26 + $0x520] sm:$0xff]  ;;  %v5080_v51 = vcombine.low %v2766_v39, %v2770_v40  ;;  %v5208_v52 = vcombine.low %v2894_v41, %v2898_v42 }
 0x18a   : > { %v2830_v39 = vld [vmem:[%s6380_s26 + $0x2c0] sm:$0xff] }
 0x18b   : > { %v2834_v40 = vld [vmem:[%s6380_s26 + $0x2e0] sm:$0xff] }
 0x18c   : > { %2540 = vmatpush1.bf16.msra.mxu0 %v5712_v53  ;;  %2704 = vmatpush1.bf16.msra.mxu1 %v5715_v54  ;;  %v5089_v53 = vcombine.high %v2774_v47, %v2778_v48  ;;  %v5217_v54 = vcombine.high %v2902_v49, %v2906_v50  ;;  %v2958_v41 = vld [vmem:[%s6380_s26 + $0x6c0] sm:$0xff] }
 0x18d   : > { %2541 = vmatprep.subr.bf16.mxu0 %v5720_v55  ;;  %2705 = vmatprep.subr.bf16.mxu1 %v5723_v56  ;;  %v2782_v55 = vld [vmem:[%s6380_s26 + $0x140] sm:$0xff] }
 0x18e   : > { %v2786_v56 = vld [vmem:[%s6380_s26 + $0x160] sm:$0xff] }
 0x18f   : > { %v2962_v42 = vld [vmem:[%s6380_s26 + $0x6e0] sm:$0xff] }
 0x190   : > { %2542 = vmatpush1.bf16.msra.mxu0 %v5718_v57  ;;  %2706 = vmatpush1.bf16.msra.mxu1 %v5721_v58  ;;  %v2910_v57 = vld [vmem:[%s6380_s26 + $0x540] sm:$0xff] }
 0x191   : > { %2543 = vmatprep.subr.bf16.mxu0 %v5726_v59  ;;  %2707 = vmatprep.subr.bf16.mxu1 %v5729_v60  ;;  %v2914_v58 = vld [vmem:[%s6380_s26 + $0x560] sm:$0xff]  ;;  %v5088_v59 = vcombine.low %v2774_v47, %v2778_v48  ;;  %v5216_v60 = vcombine.low %v2902_v49, %v2906_v50 }
 0x192   : > { %v2838_v47 = vld [vmem:[%s6380_s26 + $0x300] sm:$0xff] }
 0x193   : > { %v2842_v48 = vld [vmem:[%s6380_s26 + $0x320] sm:$0xff] }
 0x194   : > { %2544 = vmatpush1.bf16.msra.mxu0 %v5724_v61  ;;  %2708 = vmatpush1.bf16.msra.mxu1 %v5727_v62  ;;  %v5097_v61 = vcombine.high %v2782_v55, %v2786_v56  ;;  %v5225_v62 = vcombine.high %v2910_v57, %v2914_v58  ;;  %v2966_v49 = vld [vmem:[%s6380_s26 + $0x700] sm:$0xff] }
 0x195   : > { %2545 = vmatprep.subr.bf16.mxu0 %v5732_v63  ;;  %2709 = vmatprep.subr.bf16.mxu1 %v5735_v0  ;;  %v2790_v63 = vld [vmem:[%s6380_s26 + $0x180] sm:$0xff] }
 0x196   : > { %v2794_v0 = vld [vmem:[%s6380_s26 + $0x1a0] sm:$0xff] }
 0x197   : > { %v2970_v50 = vld [vmem:[%s6380_s26 + $0x720] sm:$0xff] }
 0x198   : > { %2546 = vmatpush1.bf16.msra.mxu0 %v5730_v1  ;;  %2710 = vmatpush1.bf16.msra.mxu1 %v5733_v2  ;;  %v2918_v1 = vld [vmem:[%s6380_s26 + $0x580] sm:$0xff] }
 0x199   : > { %2547 = vmatprep.subr.bf16.mxu0 %v5738_v3  ;;  %2711 = vmatprep.subr.bf16.mxu1 %v5741_v4  ;;  %v2922_v2 = vld [vmem:[%s6380_s26 + $0x5a0] sm:$0xff]  ;;  %v5096_v3 = vcombine.low %v2782_v55, %v2786_v56  ;;  %v5224_v4 = vcombine.low %v2910_v57, %v2914_v58 }
 0x19a   : > { %v2846_v55 = vld [vmem:[%s6380_s26 + $0x340] sm:$0xff] }
 0x19b   : > { %v2850_v56 = vld [vmem:[%s6380_s26 + $0x360] sm:$0xff] }
 0x19c   : > { %2548 = vmatpush1.bf16.msra.mxu0 %v5736_v5  ;;  %2712 = vmatpush1.bf16.msra.mxu1 %v5739_v6  ;;  %v5105_v5 = vcombine.high %v2790_v63, %v2794_v0  ;;  %v5233_v6 = vcombine.high %v2918_v1, %v2922_v2  ;;  %v2974_v57 = vld [vmem:[%s6380_s26 + $0x740] sm:$0xff] }
 0x19d   : > { %2549 = vmatprep.subr.bf16.mxu0 %v5744_v7  ;;  %2713 = vmatprep.subr.bf16.mxu1 %v5747_v8  ;;  %v2798_v7 = vld [vmem:[%s6380_s26 + $0x1c0] sm:$0xff] }
 0x19e   : > { %v2802_v8 = vld [vmem:[%s6380_s26 + $0x1e0] sm:$0xff] }
 0x19f   : > { %v5113_v13 = vcombine.high %v2798_v7, %v2802_v8  ;;  %v5112_v19 = vcombine.low %v2798_v7, %v2802_v8  ;;  %v2978_v58 = vld [vmem:[%s6380_s26 + $0x760] sm:$0xff] }
 0x1a0   : > { %2550 = vmatpush1.bf16.msra.mxu0 %v5742_v9  ;;  %2714 = vmatpush1.bf16.msra.mxu1 %v5745_v10  ;;  %v2926_v9 = vld [vmem:[%s6380_s26 + $0x5c0] sm:$0xff] }
 0x1a1   : > { %2551 = vmatprep.subr.bf16.mxu0 %v5750_v11  ;;  %2715 = vmatprep.subr.bf16.mxu1 %v5753_v12  ;;  %v2930_v10 = vld [vmem:[%s6380_s26 + $0x5e0] sm:$0xff]  ;;  %v5104_v11 = vcombine.low %v2790_v63, %v2794_v0  ;;  %v5232_v12 = vcombine.low %v2918_v1, %v2922_v2  ;;  %v5160_v63 = vcombine.low %v2846_v55, %v2850_v56 }
 0x1a2   : > { %v5241_v14 = vcombine.high %v2926_v9, %v2930_v10  ;;  %v5288_v0 = vcombine.low %v2974_v57, %v2978_v58  ;;  %v2854_v1 = vld [vmem:[%s6380_s26 + $0x380] sm:$0xff] }
 0x1a3   : > { %v2858_v2 = vld [vmem:[%s6380_s26 + $0x3a0] sm:$0xff] }
 0x1a4   : > { %2552 = vmatpush1.bf16.msra.mxu0 %v5748_v17  ;;  %2716 = vmatpush1.bf16.msra.mxu1 %v5751_v18  ;;  %v2934_v17 = vld [vmem:[%s6380_s26 + $0x600] sm:$0xff] }
 0x1a5   : > { %4278 = vmatprep.subr.bf16.mxu0 %v5057_v20  ;;  %4319 = vmatprep.subr.bf16.mxu1 %v5185_v21  ;;  %v2938_v18 = vld [vmem:[%s6380_s26 + $0x620] sm:$0xff]  ;;  %v5240_v20 = vcombine.low %v2926_v9, %v2930_v10  ;;  %v5121_v21 = vcombine.high %v2806_v15, %v2810_v16 }
 0x1a6   : > { %v5249_v22 = vcombine.high %v2934_v17, %v2938_v18  ;;  %v2862_v9 = vld [vmem:[%s6380_s26 + $0x3c0] sm:$0xff] }
 0x1a7   : > { %2554 = vmatmul.mubr.bf16.vlgmr.msra.gmra.mrb[0].mxu0 %v838_v26  ;;  %2718 = vmatmul.mubr.bf16.vlgmr.msra.gmra.mrb[0].mxu1 %v838_v26  ;;  %v2946_v26 = vld [vmem:[%s6380_s26 + $0x660] sm:$0xff] }
 0x1a8   : > { %4279 = vmatpush1.bf16.msra.mxu0 %v5056_v27  ;;  %4320 = vmatpush1.bf16.msra.mxu1 %v5184_v28  ;;  %v5120_v27 = vcombine.low %v2806_v15, %v2810_v16  ;;  %v5248_v28 = vcombine.low %v2934_v17, %v2938_v18  ;;  %v2866_v10 = vld [vmem:[%s6380_s26 + $0x3e0] sm:$0xff]  ;;  %v2743_v17 = vld [vmem:[%s6380_s26 + $0x8] sm:$0xff] }
 0x1a9   : > { %4280 = vmatprep.subr.bf16.mxu0 %v5065_v29  ;;  %4321 = vmatprep.subr.bf16.mxu1 %v5193_v30  ;;  %v5129_v29 = vcombine.high %v2814_v23, %v2818_v24  ;;  %v5257_v30 = vcombine.high %v2942_v25, %v2946_v26  ;;  %v2747_v18 = vld [vmem:[%s6380_s26 + $0x28] sm:$0xff] }
 0x1ac   : > { %4281 = vmatpush1.bf16.msra.mxu0 %v5064_v35  ;;  %4322 = vmatpush1.bf16.msra.mxu1 %v5192_v36  ;;  %v5128_v35 = vcombine.low %v2814_v23, %v2818_v24  ;;  %v5256_v36 = vcombine.low %v2942_v25, %v2946_v26  ;;  %v1098_v25 = vlaneseq }
 0x1ad   : > { %4282 = vmatprep.subr.bf16.mxu0 %v5073_v37  ;;  %4323 = vmatprep.subr.bf16.mxu1 %v5201_v38  ;;  %v5137_v37 = vcombine.high %v2822_v31, %v2826_v32  ;;  %v5265_v38 = vcombine.high %v2950_v33, %v2954_v34 }
 0x1ae   : > { %v6757_v26 = vshrl.u32 %v1098_v25, 7  ;;  %v2915_v25 = vld [vmem:[%s6380_s26 + $0x568] sm:$0xff] }
 0x1b0   : > { %4283 = vmatpush1.bf16.msra.mxu0 %v5072_v43  ;;  %4324 = vmatpush1.bf16.msra.mxu1 %v5200_v44  ;;  %v5136_v43 = vcombine.low %v2822_v31, %v2826_v32  ;;  %v5264_v44 = vcombine.low %v2950_v33, %v2954_v34  ;;  %v1112_v31 = vsub.s32 3, %v6757_v26 }
 0x1b1   : > { %4284 = vmatprep.subr.bf16.mxu0 %v5081_v45  ;;  %4325 = vmatprep.subr.bf16.mxu1 %v5209_v46  ;;  %v5145_v45 = vcombine.high %v2830_v39, %v2834_v40  ;;  %v5273_v46 = vcombine.high %v2958_v41, %v2962_v42 }
 0x1b4   : > { %4285 = vmatpush1.bf16.msra.mxu0 %v5080_v51  ;;  %4326 = vmatpush1.bf16.msra.mxu1 %v5208_v52  ;;  %v5144_v51 = vcombine.low %v2830_v39, %v2834_v40  ;;  %v5272_v52 = vcombine.low %v2958_v41, %v2962_v42 }
 0x1b5   : > { %4286 = vmatprep.subr.bf16.mxu0 %v5089_v53  ;;  %4327 = vmatprep.subr.bf16.mxu1 %v5217_v54  ;;  %v5153_v53 = vcombine.high %v2838_v47, %v2842_v48  ;;  %v5281_v54 = vcombine.high %v2966_v49, %v2970_v50 }
 0x1b8   : > { %4287 = vmatpush1.bf16.msra.mxu0 %v5088_v59  ;;  %4328 = vmatpush1.bf16.msra.mxu1 %v5216_v60  ;;  %v5152_v59 = vcombine.low %v2838_v47, %v2842_v48  ;;  %v5280_v60 = vcombine.low %v2966_v49, %v2970_v50 }
 0x1b9   : > { %4288 = vmatprep.subr.bf16.mxu0 %v5097_v61  ;;  %4329 = vmatprep.subr.bf16.mxu1 %v5225_v62  ;;  %v5161_v61 = vcombine.high %v2846_v55, %v2850_v56  ;;  %v5289_v62 = vcombine.high %v2974_v57, %v2978_v58  ;;  %v2883_v55 = vld [vmem:[%s6380_s26 + $0x468] sm:$0xff] }
 0x1bc   : > { %4289 = vmatpush1.bf16.msra.mxu0 %v5096_v3  ;;  %4330 = vmatpush1.bf16.msra.mxu1 %v5224_v4  ;;  %v2982_v3 = vld [vmem:[%s6380_s26 + $0x780] sm:$0xff]  ;;  %v5169_v4 = vcombine.high %v2854_v1, %v2858_v2 }
 0x1bd   : > { %4290 = vmatprep.subr.bf16.mxu0 %v5105_v5  ;;  %4331 = vmatprep.subr.bf16.mxu1 %v5233_v6  ;;  %v2986_v5 = vld [vmem:[%s6380_s26 + $0x7a0] sm:$0xff]  ;;  %v5168_v6 = vcombine.low %v2854_v1, %v2858_v2  ;;  %v2891_v1 = vld [vmem:[%s6380_s26 + $0x4a8] sm:$0xff] }
 0x1be   : > { %v5296_v7 = vcombine.low %v2982_v3, %v2986_v5  ;;  %v5297_v8 = vcombine.high %v2982_v3, %v2986_v5 }
 0x1c0   : > { %4291 = vmatpush1.bf16.msra.mxu0 %v5104_v11  ;;  %4332 = vmatpush1.bf16.msra.mxu1 %v5232_v12  ;;  %v2990_v11 = vld [vmem:[%s6380_s26 + $0x7c0] sm:$0xff]  ;;  %v5177_v12 = vcombine.high %v2862_v9, %v2866_v10 }
 0x1c1   : > { %4292 = vmatprep.subr.bf16.mxu0 %v5113_v13  ;;  %4333 = vmatprep.subr.bf16.mxu1 %v5241_v14  ;;  %v2994_v13 = vld [vmem:[%s6380_s26 + $0x7e0] sm:$0xff]  ;;  %v5176_v14 = vcombine.low %v2862_v9, %v2866_v10  ;;  %v2899_v9 = vld [vmem:[%s6380_s26 + $0x4e8] sm:$0xff] }
 0x1c2   : > { %v5304_v15 = vcombine.low %v2990_v11, %v2994_v13  ;;  %v5305_v16 = vcombine.high %v2990_v11, %v2994_v13 }
 0x1c4   : > { %4293 = vmatpush1.bf16.msra.mxu0 %v5112_v19  ;;  %4334 = vmatpush1.bf16.msra.mxu1 %v5240_v20  ;;  %v2871_v19 = vld [vmem:[%s6380_s26 + $0x408] sm:$0xff]  ;;  %v5059_v20 = vcombine.high %v2743_v17, %v2747_v18 }
 0x1c5   : > { %4294 = vmatprep.subr.bf16.mxu0 %v5121_v21  ;;  %4335 = vmatprep.subr.bf16.mxu1 %v5249_v22  ;;  %v2875_v21 = vld [vmem:[%s6380_s26 + $0x428] sm:$0xff]  ;;  %v5058_v22 = vcombine.low %v2743_v17, %v2747_v18 }
 0x1c6   : > { %v5186_v23 = vcombine.low %v2871_v19, %v2875_v21  ;;  %v5187_v24 = vcombine.high %v2871_v19, %v2875_v21  ;;  %v2907_v17 = vld [vmem:[%s6380_s26 + $0x528] sm:$0xff] }
 0x1c8   : > { %4295 = vmatpush1.bf16.msra.mxu0 %v5120_v27  ;;  %4336 = vmatpush1.bf16.msra.mxu1 %v5248_v28  ;;  %v1100_v27 = vsub.s32 0, %v6757_v26  ;;  %v1108_v28 = vsub.s32 2, %v6757_v26 }
 0x1c9   : > { %4296 = vmatprep.subr.bf16.mxu0 %v5129_v29  ;;  %4337 = vmatprep.subr.bf16.mxu1 %v5257_v30  ;;  %v1096_v29 = vld [vmem:[%s803_s18] sm:$0xf]  ;;  %v1104_v30 = vsub.s32 1, %v6757_v26 }
 0x1ca   : > { %v1101_v32 = vrot.slane %v1096_v29, %v1100_v27  ;;  %v1109_v33 = vrot.slane %v1096_v29, %v1108_v28 }
 0x1cb   : > { %v1105_v34 = vrot.slane %v1096_v29, %v1104_v30 }
 0x1cc   : > { %4297 = vmatpush1.bf16.msra.mxu0 %v5128_v35  ;;  %4338 = vmatpush1.bf16.msra.mxu1 %v5256_v36  ;;  %v1113_v35 = vrot.slane %v1096_v29, %v1112_v31 }
 0x1cd   : > { %4298 = vmatprep.subr.bf16.mxu0 %v5137_v37  ;;  %4339 = vmatprep.subr.bf16.mxu1 %v5265_v38 }
 0x1d0   : > { %4299 = vmatpush1.bf16.msra.mxu0 %v5136_v43  ;;  %4340 = vmatpush1.bf16.msra.mxu1 %v5264_v44 }
 0x1d1   : > { %4300 = vmatprep.subr.bf16.mxu0 %v5145_v45  ;;  %4341 = vmatprep.subr.bf16.mxu1 %v5273_v46 }
 0x1d4   : > { %4301 = vmatpush1.bf16.msra.mxu0 %v5144_v51  ;;  %4342 = vmatpush1.bf16.msra.mxu1 %v5272_v52  ;;  %v2751_v52 = vld [vmem:[%s6380_s26 + $0x48] sm:$0xff] }
 0x1d5   : > { %4302 = vmatprep.subr.bf16.mxu0 %v5153_v53  ;;  %4343 = vmatprep.subr.bf16.mxu1 %v5281_v54  ;;  %v2755_v53 = vld [vmem:[%s6380_s26 + $0x68] sm:$0xff] }
 0x1d6   : > { %v2879_v54 = vld [vmem:[%s6380_s26 + $0x448] sm:$0xff]  ;;  %v5066_v2 = vcombine.low %v2751_v52, %v2755_v53 }
 0x1d7   : > { %v5194_v3 = vcombine.low %v2879_v54, %v2883_v55 }
 0x1d8   : > { %4303 = vmatpush1.bf16.msra.mxu0 %v5152_v59  ;;  %4344 = vmatpush1.bf16.msra.mxu1 %v5280_v60  ;;  %v2759_v60 = vld [vmem:[%s6380_s26 + $0x88] sm:$0xff] }
 0x1d9   : > { %4304 = vmatprep.subr.bf16.mxu0 %v5161_v61  ;;  %4345 = vmatprep.subr.bf16.mxu1 %v5289_v62  ;;  %v5067_v61 = vcombine.high %v2751_v52, %v2755_v53  ;;  %v5195_v62 = vcombine.high %v2879_v54, %v2883_v55  ;;  %v2811_v52 = vld [vmem:[%s6380_s26 + $0x228] sm:$0xff] }
 0x1da   : > { %v2935_v53 = vld [vmem:[%s6380_s26 + $0x608] sm:$0xff] }
 0x1db   : > { %v2939_v54 = vld [vmem:[%s6380_s26 + $0x628] sm:$0xff] }
 0x1dc   : > { %4305 = vmatpush1.bf16.msra.mxu0 %v5160_v63  ;;  %4346 = vmatpush1.bf16.msra.mxu1 %v5288_v0  ;;  %v2763_v63 = vld [vmem:[%s6380_s26 + $0xa8] sm:$0xff] }
 0x1dd   : > { %4306 = vmatprep.subr.bf16.mxu0 %v5169_v4  ;;  %4347 = vmatprep.subr.bf16.mxu1 %v5297_v8  ;;  %v2887_v0 = vld [vmem:[%s6380_s26 + $0x488] sm:$0xff]  ;;  %v5075_v4 = vcombine.high %v2759_v60, %v2763_v63  ;;  %v5074_v10 = vcombine.low %v2759_v60, %v2763_v63 }
 0x1de   : > { %v5203_v5 = vcombine.high %v2887_v0, %v2891_v1  ;;  %v2895_v8 = vld [vmem:[%s6380_s26 + $0x4c8] sm:$0xff]  ;;  %v5202_v11 = vcombine.low %v2887_v0, %v2891_v1 }
 0x1df   : > { %v5211_v13 = vcombine.high %v2895_v8, %v2899_v9  ;;  %v5210_v19 = vcombine.low %v2895_v8, %v2899_v9  ;;  %v2815_v63 = vld [vmem:[%s6380_s26 + $0x248] sm:$0xff] }
 0x1e0   : > { %4307 = vmatpush1.bf16.msra.mxu0 %v5168_v6  ;;  %4348 = vmatpush1.bf16.msra.mxu1 %v5296_v7  ;;  %v2767_v6 = vld [vmem:[%s6380_s26 + $0xc8] sm:$0xff] }
 0x1e1   : > { %4308 = vmatprep.subr.bf16.mxu0 %v5177_v12  ;;  %4349 = vmatprep.subr.bf16.mxu1 %v5305_v16  ;;  %v2771_v7 = vld [vmem:[%s6380_s26 + $0xe8] sm:$0xff] }
 0x1e2   : > { %v5083_v12 = vcombine.high %v2767_v6, %v2771_v7  ;;  %v2903_v16 = vld [vmem:[%s6380_s26 + $0x508] sm:$0xff]  ;;  %v5082_v18 = vcombine.low %v2767_v6, %v2771_v7 }
 0x1e3   : > { %v5219_v21 = vcombine.high %v2903_v16, %v2907_v17  ;;  %v2819_v0 = vld [vmem:[%s6380_s26 + $0x268] sm:$0xff] }
 0x1e4   : > { %4309 = vmatpush1.bf16.msra.mxu0 %v5176_v14  ;;  %4350 = vmatpush1.bf16.msra.mxu1 %v5304_v15  ;;  %v2775_v14 = vld [vmem:[%s6380_s26 + $0x108] sm:$0xff] }
 0x1e5   : > { %4360 = vmatprep.subr.bf16.mxu0 %v5059_v20  ;;  %4401 = vmatprep.subr.bf16.mxu1 %v5187_v24  ;;  %v2779_v15 = vld [vmem:[%s6380_s26 + $0x128] sm:$0xff] }
 0x1e6   : > { %v5091_v20 = vcombine.high %v2775_v14, %v2779_v15  ;;  %v2911_v24 = vld [vmem:[%s6380_s26 + $0x548] sm:$0xff]  ;;  %v5090_v29 = vcombine.low %v2775_v14, %v2779_v15 }
 0x1e7   : > { %v2943_v1 = vld [vmem:[%s6380_s26 + $0x648] sm:$0xff] }
 0x1e8   : > { %v2823_v7 = vld [vmem:[%s6380_s26 + $0x288] sm:$0xff] }
 0x1e9   : > { %v2827_v8 = vld [vmem:[%s6380_s26 + $0x2a8] sm:$0xff] }
 0x1ea   : > { %v2951_v9 = vld [vmem:[%s6380_s26 + $0x688] sm:$0xff] }
 0x1eb   : > { %v2831_v15 = vld [vmem:[%s6380_s26 + $0x2c8] sm:$0xff] }
 0x27a   : > { %v2555_v36 = vpop.f32.mrb[0].mxu0  ;;  %v2719_v37 = vpop.f32.mrb[0].mxu1 }
 0x27b   : > { %v5317_v38 = vadd.f32 %v2555_v36, %v1101_v32  ;;  %v5319_v39 = vadd.f32 %v2719_v37, %v1109_v33  ;;  %v2557_v40 = vpop.f32.mrb[1].mxu0  ;;  %v2721_v41 = vpop.f32.mrb[1].mxu1  ;;  %v5218_v32 = vcombine.low %v2903_v16, %v2907_v17  ;;  %v2795_v36 = vld [vmem:[%s6380_s26 + $0x1a8] sm:$0xff] }
 0x27c   : > { %v5318_v42 = vadd.f32 %v2557_v40, %v1105_v34  ;;  %v5320_v43 = vadd.f32 %v2721_v41, %v1113_v35  ;;  %v2559_v44 = vpop.f32.mrb[2].mxu0  ;;  %v2723_v45 = vpop.f32.mrb[2].mxu1  ;;  %v5227_v34 = vcombine.high %v2911_v24, %v2915_v25  ;;  %v2791_v35 = vld [vmem:[%s6380_s26 + $0x188] sm:$0xff]  ;;  %v5226_v40 = vcombine.low %v2911_v24, %v2915_v25 }
 0x27d   : > { %v2726_v46 = vmax.f32 %v5317_v38, 0.0  ;;  %v2728_v47 = vmax.f32 %v5319_v39, 0.0  ;;  %v2560_v48 = vpop.f32.mrb[3].mxu0  ;;  %v2724_v49 = vpop.f32.mrb[3].mxu1  ;;  %v2919_v37 = vld [vmem:[%s6380_s26 + $0x588] sm:$0xff]  ;;  %v5107_v41 = vcombine.high %v2791_v35, %v2795_v36 }
 0x27e   : > { %v2727_v50 = vmax.f32 %v5318_v42, 0.0  ;;  %v2729_v51 = vmax.f32 %v5320_v43, 0.0  ;;  %v2923_v38 = vld [vmem:[%s6380_s26 + $0x5a8] sm:$0xff] }
 0x27f   : > { %v6784_v58 = vpack.c.bf16 %v2726_v46, %v2726_v46  ;;  %v6786_v59 = vpack.c.bf16 %v2728_v47, %v2728_v47  ;;  %v5235_v42 = vcombine.high %v2919_v37, %v2923_v38  ;;  %v2799_v43 = vld [vmem:[%s6380_s26 + $0x1c8] sm:$0xff]  ;;  %v5106_v47 = vcombine.low %v2791_v35, %v2795_v36 }
 0x280   : > { %v6780_v56 = vpack.c.bf16 %v2727_v50, %v2727_v50  ;;  %v6782_v57 = vpack.c.bf16 %v2729_v51, %v2729_v51  ;;  %v2803_v44 = vld [vmem:[%s6380_s26 + $0x1e8] sm:$0xff]  ;;  %v5234_v48 = vcombine.low %v2919_v37, %v2923_v38 }
 0x281   : > { %v2927_v45 = vld [vmem:[%s6380_s26 + $0x5c8] sm:$0xff]  ;;  %v5115_v49 = vcombine.high %v2799_v43, %v2803_v44  ;;  %v5114_v55 = vcombine.low %v2799_v43, %v2803_v44 }
 0x282   : > { %4310 = vmatprep.mubr.bf16.mxu0 %v6780_v56  ;;  %4351 = vmatprep.mubr.bf16.mxu1 %v6782_v57  ;;  %v2931_v46 = vld [vmem:[%s6380_s26 + $0x5e8] sm:$0xff] }
 0x283   : > { %4311 = vmatmul.mubr.bf16.vlgmr.msra.gmra.mrb[4].mxu0 %v6784_v58  ;;  %4352 = vmatmul.mubr.bf16.vlgmr.msra.gmra.mrb[4].mxu1 %v6786_v59  ;;  %v5243_v50 = vcombine.high %v2927_v45, %v2931_v46  ;;  %v2807_v51 = vld [vmem:[%s6380_s26 + $0x208] sm:$0xff]  ;;  %v5242_v60 = vcombine.low %v2927_v45, %v2931_v46 }
 0x284   : > { %4361 = vmatpush1.bf16.msra.mxu0 %v5058_v22  ;;  %4402 = vmatpush1.bf16.msra.mxu1 %v5186_v23  ;;  %v2783_v22 = vld [vmem:[%s6380_s26 + $0x148] sm:$0xff] }
 0x285   : > { %4392 = vmatprep.mubr.bf16.mxu0 %v6780_v56  ;;  %4433 = vmatprep.mubr.bf16.mxu1 %v6782_v57  ;;  %v2787_v23 = vld [vmem:[%s6380_s26 + $0x168] sm:$0xff] }
 0x286   : > { %4362 = vmatprep.subr.bf16.mxu0 %v5067_v61  ;;  %4403 = vmatprep.subr.bf16.mxu1 %v5195_v62  ;;  %v5099_v33 = vcombine.high %v2783_v22, %v2787_v23  ;;  %v5098_v39 = vcombine.low %v2783_v22, %v2787_v23  ;;  %v5123_v61 = vcombine.high %v2807_v51, %v2811_v52  ;;  %v2835_v16 = vld [vmem:[%s6380_s26 + $0x2e8] sm:$0xff] }
 0x287   : > { %v5251_v62 = vcombine.high %v2935_v53, %v2939_v54  ;;  %v2959_v17 = vld [vmem:[%s6380_s26 + $0x6c8] sm:$0xff] }
 0x288   : > { %4363 = vmatpush1.bf16.msra.mxu0 %v5066_v2  ;;  %4404 = vmatpush1.bf16.msra.mxu1 %v5194_v3  ;;  %v2947_v2 = vld [vmem:[%s6380_s26 + $0x668] sm:$0xff]  ;;  %v5122_v3 = vcombine.low %v2807_v51, %v2811_v52 }
 0x289   : > { %4364 = vmatprep.subr.bf16.mxu0 %v5075_v4  ;;  %4405 = vmatprep.subr.bf16.mxu1 %v5203_v5  ;;  %v5250_v4 = vcombine.low %v2935_v53, %v2939_v54  ;;  %v5131_v5 = vcombine.high %v2815_v63, %v2819_v0  ;;  %v5259_v6 = vcombine.high %v2943_v1, %v2947_v2  ;;  %v2839_v23 = vld [vmem:[%s6380_s26 + $0x308] sm:$0xff] }
 0x28a   : > { %v2843_v24 = vld [vmem:[%s6380_s26 + $0x328] sm:$0xff] }
 0x28b   : > { %v2967_v25 = vld [vmem:[%s6380_s26 + $0x708] sm:$0xff] }
 0x28c   : > { %4365 = vmatpush1.bf16.msra.mxu0 %v5074_v10  ;;  %4406 = vmatpush1.bf16.msra.mxu1 %v5202_v11  ;;  %v2955_v10 = vld [vmem:[%s6380_s26 + $0x6a8] sm:$0xff]  ;;  %v5130_v11 = vcombine.low %v2815_v63, %v2819_v0  ;;  %v2744_v0 = vld [vmem:[%s6380_s26 + $0x10] sm:$0xff] }
 0x28d   : > { %4366 = vmatprep.subr.bf16.mxu0 %v5083_v12  ;;  %4407 = vmatprep.subr.bf16.mxu1 %v5211_v13  ;;  %v5258_v12 = vcombine.low %v2943_v1, %v2947_v2  ;;  %v5139_v13 = vcombine.high %v2823_v7, %v2827_v8  ;;  %v5267_v14 = vcombine.high %v2951_v9, %v2955_v10  ;;  %v2847_v36 = vld [vmem:[%s6380_s26 + $0x348] sm:$0xff]  ;;  %v2748_v1 = vld [vmem:[%s6380_s26 + $0x30] sm:$0xff] }
 0x28e   : > { %v2851_v37 = vld [vmem:[%s6380_s26 + $0x368] sm:$0xff]  ;;  %v2872_v2 = vld [vmem:[%s6380_s26 + $0x410] sm:$0xff] }
 0x28f   : > { %v2975_v38 = vld [vmem:[%s6380_s26 + $0x748] sm:$0xff] }
 0x290   : > { %4367 = vmatpush1.bf16.msra.mxu0 %v5082_v18  ;;  %4408 = vmatpush1.bf16.msra.mxu1 %v5210_v19  ;;  %v2963_v18 = vld [vmem:[%s6380_s26 + $0x6e8] sm:$0xff]  ;;  %v5138_v19 = vcombine.low %v2823_v7, %v2827_v8  ;;  %v2752_v8 = vld [vmem:[%s6380_s26 + $0x50] sm:$0xff] }
 0x291   : > { %4368 = vmatprep.subr.bf16.mxu0 %v5091_v20  ;;  %4409 = vmatprep.subr.bf16.mxu1 %v5219_v21  ;;  %v5266_v20 = vcombine.low %v2951_v9, %v2955_v10  ;;  %v5147_v21 = vcombine.high %v2831_v15, %v2835_v16  ;;  %v5275_v22 = vcombine.high %v2959_v17, %v2963_v18  ;;  %v2855_v44 = vld [vmem:[%s6380_s26 + $0x388] sm:$0xff]  ;;  %v2756_v9 = vld [vmem:[%s6380_s26 + $0x70] sm:$0xff] }
 0x292   : > { %v2859_v45 = vld [vmem:[%s6380_s26 + $0x3a8] sm:$0xff]  ;;  %v2880_v10 = vld [vmem:[%s6380_s26 + $0x450] sm:$0xff] }
 0x293   : > { %v2983_v46 = vld [vmem:[%s6380_s26 + $0x788] sm:$0xff] }
 0x294   : > { %4369 = vmatpush1.bf16.msra.mxu0 %v5090_v29  ;;  %4410 = vmatpush1.bf16.msra.mxu1 %v5218_v32  ;;  %v2971_v29 = vld [vmem:[%s6380_s26 + $0x728] sm:$0xff]  ;;  %v5146_v32 = vcombine.low %v2831_v15, %v2835_v16  ;;  %v2760_v16 = vld [vmem:[%s6380_s26 + $0x90] sm:$0xff] }
 0x295   : > { %4370 = vmatprep.subr.bf16.mxu0 %v5099_v33  ;;  %4411 = vmatprep.subr.bf16.mxu1 %v5227_v34  ;;  %v5274_v33 = vcombine.low %v2959_v17, %v2963_v18  ;;  %v5155_v34 = vcombine.high %v2839_v23, %v2843_v24  ;;  %v5283_v35 = vcombine.high %v2967_v25, %v2971_v29  ;;  %v2863_v52 = vld [vmem:[%s6380_s26 + $0x3c8] sm:$0xff]  ;;  %v2764_v17 = vld [vmem:[%s6380_s26 + $0xb0] sm:$0xff] }
 0x296   : > { %v2867_v53 = vld [vmem:[%s6380_s26 + $0x3e8] sm:$0xff]  ;;  %v2888_v18 = vld [vmem:[%s6380_s26 + $0x490] sm:$0xff] }
 0x297   : > { %v2991_v54 = vld [vmem:[%s6380_s26 + $0x7c8] sm:$0xff] }
 0x298   : > { %4371 = vmatpush1.bf16.msra.mxu0 %v5098_v39  ;;  %4412 = vmatpush1.bf16.msra.mxu1 %v5226_v40  ;;  %v2979_v39 = vld [vmem:[%s6380_s26 + $0x768] sm:$0xff]  ;;  %v5154_v40 = vcombine.low %v2839_v23, %v2843_v24  ;;  %v2768_v24 = vld [vmem:[%s6380_s26 + $0xd0] sm:$0xff] }
 0x299   : > { %4372 = vmatprep.subr.bf16.mxu0 %v5107_v41  ;;  %4413 = vmatprep.subr.bf16.mxu1 %v5235_v42  ;;  %v5282_v41 = vcombine.low %v2967_v25, %v2971_v29  ;;  %v5163_v42 = vcombine.high %v2847_v36, %v2851_v37  ;;  %v5291_v43 = vcombine.high %v2975_v38, %v2979_v39  ;;  %v2772_v25 = vld [vmem:[%s6380_s26 + $0xf0] sm:$0xff] }
 0x29a   : > { %v2896_v29 = vld [vmem:[%s6380_s26 + $0x4d0] sm:$0xff] }
 0x29c   : > { %4373 = vmatpush1.bf16.msra.mxu0 %v5106_v47  ;;  %4414 = vmatpush1.bf16.msra.mxu1 %v5234_v48  ;;  %v2987_v47 = vld [vmem:[%s6380_s26 + $0x7a8] sm:$0xff]  ;;  %v5162_v48 = vcombine.low %v2847_v36, %v2851_v37  ;;  %v2776_v37 = vld [vmem:[%s6380_s26 + $0x110] sm:$0xff] }
 0x29d   : > { %4374 = vmatprep.subr.bf16.mxu0 %v5115_v49  ;;  %4415 = vmatprep.subr.bf16.mxu1 %v5243_v50  ;;  %v5290_v49 = vcombine.low %v2975_v38, %v2979_v39  ;;  %v5171_v50 = vcombine.high %v2855_v44, %v2859_v45  ;;  %v5299_v51 = vcombine.high %v2983_v46, %v2987_v47  ;;  %v2780_v38 = vld [vmem:[%s6380_s26 + $0x130] sm:$0xff] }
 0x29e   : > { %v2904_v39 = vld [vmem:[%s6380_s26 + $0x510] sm:$0xff] }
 0x2a0   : > { %4375 = vmatpush1.bf16.msra.mxu0 %v5114_v55  ;;  %4416 = vmatpush1.bf16.msra.mxu1 %v5242_v60  ;;  %v2995_v55 = vld [vmem:[%s6380_s26 + $0x7e8] sm:$0xff]  ;;  %v5170_v60 = vcombine.low %v2855_v44, %v2859_v45  ;;  %v2784_v45 = vld [vmem:[%s6380_s26 + $0x150] sm:$0xff] }
 0x2a1   : > { %4376 = vmatprep.subr.bf16.mxu0 %v5123_v61  ;;  %4417 = vmatprep.subr.bf16.mxu1 %v5251_v62  ;;  %v5298_v61 = vcombine.low %v2983_v46, %v2987_v47  ;;  %v5179_v62 = vcombine.high %v2863_v52, %v2867_v53  ;;  %v5307_v63 = vcombine.high %v2991_v54, %v2995_v55  ;;  %v2788_v46 = vld [vmem:[%s6380_s26 + $0x170] sm:$0xff] }
 0x2a2   : > { %v2912_v47 = vld [vmem:[%s6380_s26 + $0x550] sm:$0xff] }
 0x2a4   : > { %4377 = vmatpush1.bf16.msra.mxu0 %v5122_v3  ;;  %4418 = vmatpush1.bf16.msra.mxu1 %v5250_v4  ;;  %v2876_v3 = vld [vmem:[%s6380_s26 + $0x430] sm:$0xff]  ;;  %v5178_v4 = vcombine.low %v2863_v52, %v2867_v53 }
 0x2a5   : > { %4378 = vmatprep.subr.bf16.mxu0 %v5131_v5  ;;  %4419 = vmatprep.subr.bf16.mxu1 %v5259_v6  ;;  %v5306_v5 = vcombine.low %v2991_v54, %v2995_v55  ;;  %v5061_v6 = vcombine.high %v2744_v0, %v2748_v1  ;;  %v5189_v7 = vcombine.high %v2872_v2, %v2876_v3  ;;  %v2792_v53 = vld [vmem:[%s6380_s26 + $0x190] sm:$0xff] }
 0x2a6   : > { %v2796_v54 = vld [vmem:[%s6380_s26 + $0x1b0] sm:$0xff] }
 0x2a7   : > { %v2920_v55 = vld [vmem:[%s6380_s26 + $0x590] sm:$0xff] }
 0x2a8   : > { %4379 = vmatpush1.bf16.msra.mxu0 %v5130_v11  ;;  %4420 = vmatpush1.bf16.msra.mxu1 %v5258_v12  ;;  %v2884_v11 = vld [vmem:[%s6380_s26 + $0x470] sm:$0xff]  ;;  %v5060_v12 = vcombine.low %v2744_v0, %v2748_v1 }
 0x2a9   : > { %4380 = vmatprep.subr.bf16.mxu0 %v5139_v13  ;;  %4421 = vmatprep.subr.bf16.mxu1 %v5267_v14  ;;  %v5188_v13 = vcombine.low %v2872_v2, %v2876_v3  ;;  %v5069_v14 = vcombine.high %v2752_v8, %v2756_v9  ;;  %v5197_v15 = vcombine.high %v2880_v10, %v2884_v11  ;;  %v2800_v1 = vld [vmem:[%s6380_s26 + $0x1d0] sm:$0xff] }
 0x2aa   : > { %v2804_v2 = vld [vmem:[%s6380_s26 + $0x1f0] sm:$0xff] }
 0x2ab   : > { %v2928_v3 = vld [vmem:[%s6380_s26 + $0x5d0] sm:$0xff] }
 0x2ac   : > { %4381 = vmatpush1.bf16.msra.mxu0 %v5138_v19  ;;  %4422 = vmatpush1.bf16.msra.mxu1 %v5266_v20  ;;  %v2892_v19 = vld [vmem:[%s6380_s26 + $0x4b0] sm:$0xff]  ;;  %v5068_v20 = vcombine.low %v2752_v8, %v2756_v9 }
 0x2ad   : > { %4382 = vmatprep.subr.bf16.mxu0 %v5147_v21  ;;  %4423 = vmatprep.subr.bf16.mxu1 %v5275_v22  ;;  %v5196_v21 = vcombine.low %v2880_v10, %v2884_v11  ;;  %v5077_v22 = vcombine.high %v2760_v16, %v2764_v17  ;;  %v5205_v23 = vcombine.high %v2888_v18, %v2892_v19  ;;  %v2808_v9 = vld [vmem:[%s6380_s26 + $0x210] sm:$0xff] }
 0x2ae   : > { %v2812_v10 = vld [vmem:[%s6380_s26 + $0x230] sm:$0xff] }
 0x2af   : > { %v2936_v11 = vld [vmem:[%s6380_s26 + $0x610] sm:$0xff] }
 0x2b0   : > { %4383 = vmatpush1.bf16.msra.mxu0 %v5146_v32  ;;  %4424 = vmatpush1.bf16.msra.mxu1 %v5274_v33  ;;  %v2900_v32 = vld [vmem:[%s6380_s26 + $0x4f0] sm:$0xff]  ;;  %v5076_v33 = vcombine.low %v2760_v16, %v2764_v17 }
 0x2b1   : > { %4384 = vmatprep.subr.bf16.mxu0 %v5155_v34  ;;  %4425 = vmatprep.subr.bf16.mxu1 %v5283_v35  ;;  %v5204_v34 = vcombine.low %v2888_v18, %v2892_v19  ;;  %v5085_v35 = vcombine.high %v2768_v24, %v2772_v25  ;;  %v5213_v36 = vcombine.high %v2896_v29, %v2900_v32  ;;  %v2816_v17 = vld [vmem:[%s6380_s26 + $0x250] sm:$0xff] }
 0x2b2   : > { %v2820_v18 = vld [vmem:[%s6380_s26 + $0x270] sm:$0xff] }
 0x2b3   : > { %v2944_v19 = vld [vmem:[%s6380_s26 + $0x650] sm:$0xff] }
 0x2b4   : > { %4385 = vmatpush1.bf16.msra.mxu0 %v5154_v40  ;;  %4426 = vmatpush1.bf16.msra.mxu1 %v5282_v41  ;;  %v2908_v40 = vld [vmem:[%s6380_s26 + $0x530] sm:$0xff]  ;;  %v5084_v41 = vcombine.low %v2768_v24, %v2772_v25 }
 0x2b5   : > { %4386 = vmatprep.subr.bf16.mxu0 %v5163_v42  ;;  %4427 = vmatprep.subr.bf16.mxu1 %v5291_v43  ;;  %v5212_v42 = vcombine.low %v2896_v29, %v2900_v32  ;;  %v5093_v43 = vcombine.high %v2776_v37, %v2780_v38  ;;  %v5221_v44 = vcombine.high %v2904_v39, %v2908_v40  ;;  %v2824_v25 = vld [vmem:[%s6380_s26 + $0x290] sm:$0xff] }
 0x2b6   : > { %v2828_v29 = vld [vmem:[%s6380_s26 + $0x2b0] sm:$0xff] }
 0x2b7   : > { %v2952_v32 = vld [vmem:[%s6380_s26 + $0x690] sm:$0xff] }
 0x2b8   : > { %4387 = vmatpush1.bf16.msra.mxu0 %v5162_v48  ;;  %4428 = vmatpush1.bf16.msra.mxu1 %v5290_v49  ;;  %v2916_v48 = vld [vmem:[%s6380_s26 + $0x570] sm:$0xff]  ;;  %v5092_v49 = vcombine.low %v2776_v37, %v2780_v38 }
 0x2b9   : > { %4388 = vmatprep.subr.bf16.mxu0 %v5171_v50  ;;  %4429 = vmatprep.subr.bf16.mxu1 %v5299_v51  ;;  %v5220_v50 = vcombine.low %v2904_v39, %v2908_v40  ;;  %v5101_v51 = vcombine.high %v2784_v45, %v2788_v46  ;;  %v5229_v52 = vcombine.high %v2912_v47, %v2916_v48  ;;  %v2832_v38 = vld [vmem:[%s6380_s26 + $0x2d0] sm:$0xff] }
 0x2ba   : > { %v2836_v39 = vld [vmem:[%s6380_s26 + $0x2f0] sm:$0xff] }
 0x2bb   : > { %v2960_v40 = vld [vmem:[%s6380_s26 + $0x6d0] sm:$0xff] }
 0x2bc   : > { %4389 = vmatpush1.bf16.msra.mxu0 %v5170_v60  ;;  %4430 = vmatpush1.bf16.msra.mxu1 %v5298_v61  ;;  %v2924_v60 = vld [vmem:[%s6380_s26 + $0x5b0] sm:$0xff]  ;;  %v5100_v61 = vcombine.low %v2784_v45, %v2788_v46 }
 0x2bd   : > { %4390 = vmatprep.subr.bf16.mxu0 %v5179_v62  ;;  %4431 = vmatprep.subr.bf16.mxu1 %v5307_v63  ;;  %v5228_v62 = vcombine.low %v2912_v47, %v2916_v48  ;;  %v5109_v63 = vcombine.high %v2792_v53, %v2796_v54  ;;  %v5237_v0 = vcombine.high %v2920_v55, %v2924_v60  ;;  %v2840_v46 = vld [vmem:[%s6380_s26 + $0x310] sm:$0xff] }
 0x2be   : > { %v2844_v47 = vld [vmem:[%s6380_s26 + $0x330] sm:$0xff] }
 0x2bf   : > { %v2968_v48 = vld [vmem:[%s6380_s26 + $0x710] sm:$0xff] }
 0x2c0   : > { %4391 = vmatpush1.bf16.msra.mxu0 %v5178_v4  ;;  %4432 = vmatpush1.bf16.msra.mxu1 %v5306_v5  ;;  %v2932_v4 = vld [vmem:[%s6380_s26 + $0x5f0] sm:$0xff]  ;;  %v5108_v5 = vcombine.low %v2792_v53, %v2796_v54 }
 0x2c1   : > { %4442 = vmatprep.subr.bf16.mxu0 %v5061_v6  ;;  %4483 = vmatprep.subr.bf16.mxu1 %v5189_v7  ;;  %v5236_v6 = vcombine.low %v2920_v55, %v2924_v60  ;;  %v5117_v7 = vcombine.high %v2800_v1, %v2804_v2  ;;  %v5245_v8 = vcombine.high %v2928_v3, %v2932_v4  ;;  %v2848_v54 = vld [vmem:[%s6380_s26 + $0x350] sm:$0xff] }
 0x2c2   : > { %v2852_v55 = vld [vmem:[%s6380_s26 + $0x370] sm:$0xff] }
 0x2c3   : > { %4393 = vmatmul.mubr.bf16.vlgmr.msra.gmra.mrb[8].mxu0 %v6784_v58  ;;  %4434 = vmatmul.mubr.bf16.vlgmr.msra.gmra.mrb[8].mxu1 %v6786_v59  ;;  %v2976_v60 = vld [vmem:[%s6380_s26 + $0x750] sm:$0xff] }
 0x2c4   : > { %4443 = vmatpush1.bf16.msra.mxu0 %v5060_v12  ;;  %4474 = vmatprep.mubr.bf16.mxu0 %v6780_v56  ;;  %v2940_v12 = vld [vmem:[%s6380_s26 + $0x630] sm:$0xff] }
 0x2c5   : > { %4484 = vmatpush1.bf16.msra.mxu1 %v5188_v13  ;;  %4515 = vmatprep.mubr.bf16.mxu1 %v6782_v57  ;;  %v5116_v13 = vcombine.low %v2800_v1, %v2804_v2  ;;  %v5253_v16 = vcombine.high %v2936_v11, %v2940_v12  ;;  %v2856_v2 = vld [vmem:[%s6380_s26 + $0x390] sm:$0xff] }
 0x2c6   : > { %4444 = vmatprep.subr.bf16.mxu0 %v5069_v14  ;;  %4485 = vmatprep.subr.bf16.mxu1 %v5197_v15  ;;  %v5244_v14 = vcombine.low %v2928_v3, %v2932_v4  ;;  %v5125_v15 = vcombine.high %v2808_v9, %v2812_v10  ;;  %v2860_v3 = vld [vmem:[%s6380_s26 + $0x3b0] sm:$0xff] }
 0x2c7   : > { %v2984_v4 = vld [vmem:[%s6380_s26 + $0x790] sm:$0xff] }
 0x2c8   : > { %4445 = vmatpush1.bf16.msra.mxu0 %v5068_v20  ;;  %v2948_v20 = vld [vmem:[%s6380_s26 + $0x670] sm:$0xff] }
 0x2c9   : > { %4486 = vmatpush1.bf16.msra.mxu1 %v5196_v21  ;;  %4446 = vmatprep.subr.bf16.mxu0 %v5077_v22  ;;  %v5124_v21 = vcombine.low %v2808_v9, %v2812_v10  ;;  %v5252_v22 = vcombine.low %v2936_v11, %v2940_v12  ;;  %v5261_v24 = vcombine.high %v2944_v19, %v2948_v20  ;;  %v2864_v10 = vld [vmem:[%s6380_s26 + $0x3d0] sm:$0xff] }
 0x2ca   : > { %4487 = vmatprep.subr.bf16.mxu1 %v5205_v23  ;;  %v5133_v23 = vcombine.high %v2816_v17, %v2820_v18  ;;  %v2868_v11 = vld [vmem:[%s6380_s26 + $0x3f0] sm:$0xff] }
 0x2cb   : > { %v2992_v12 = vld [vmem:[%s6380_s26 + $0x7d0] sm:$0xff] }
 0x2cc   : > { %4447 = vmatpush1.bf16.msra.mxu0 %v5076_v33  ;;  %v2956_v33 = vld [vmem:[%s6380_s26 + $0x6b0] sm:$0xff] }
 0x2cd   : > { %4488 = vmatpush1.bf16.msra.mxu1 %v5204_v34  ;;  %4448 = vmatprep.subr.bf16.mxu0 %v5085_v35  ;;  %v5132_v34 = vcombine.low %v2816_v17, %v2820_v18  ;;  %v5260_v35 = vcombine.low %v2944_v19, %v2948_v20  ;;  %v5269_v37 = vcombine.high %v2952_v32, %v2956_v33  ;;  %v2745_v18 = vld [vmem:[%s6380_s26 + $0x18] sm:$0xff] }
 0x2ce   : > { %4489 = vmatprep.subr.bf16.mxu1 %v5213_v36  ;;  %v5141_v36 = vcombine.high %v2824_v25, %v2828_v29  ;;  %v2749_v19 = vld [vmem:[%s6380_s26 + $0x38] sm:$0xff] }
 0x2cf   : > { %v2873_v20 = vld [vmem:[%s6380_s26 + $0x418] sm:$0xff] }
 0x2d0   : > { %4449 = vmatpush1.bf16.msra.mxu0 %v5084_v41  ;;  %v2964_v41 = vld [vmem:[%s6380_s26 + $0x6f0] sm:$0xff] }
 0x2d1   : > { %4490 = vmatpush1.bf16.msra.mxu1 %v5212_v42  ;;  %4450 = vmatprep.subr.bf16.mxu0 %v5093_v43  ;;  %v5140_v42 = vcombine.low %v2824_v25, %v2828_v29  ;;  %v5268_v43 = vcombine.low %v2952_v32, %v2956_v33  ;;  %v5277_v45 = vcombine.high %v2960_v40, %v2964_v41  ;;  %v2753_v29 = vld [vmem:[%s6380_s26 + $0x58] sm:$0xff] }
 0x2d2   : > { %4491 = vmatprep.subr.bf16.mxu1 %v5221_v44  ;;  %v5149_v44 = vcombine.high %v2832_v38, %v2836_v39  ;;  %v2757_v32 = vld [vmem:[%s6380_s26 + $0x78] sm:$0xff]  ;;  %v5062_v33 = vcombine.low %v2745_v18, %v2749_v19 }
 0x2d4   : > { %4451 = vmatpush1.bf16.msra.mxu0 %v5092_v49  ;;  %v2972_v49 = vld [vmem:[%s6380_s26 + $0x730] sm:$0xff] }
 0x2d5   : > { %4492 = vmatpush1.bf16.msra.mxu1 %v5220_v50  ;;  %4452 = vmatprep.subr.bf16.mxu0 %v5101_v51  ;;  %v5148_v50 = vcombine.low %v2832_v38, %v2836_v39  ;;  %v5276_v51 = vcombine.low %v2960_v40, %v2964_v41  ;;  %v5285_v53 = vcombine.high %v2968_v48, %v2972_v49  ;;  %v2761_v38 = vld [vmem:[%s6380_s26 + $0x98] sm:$0xff] }
 0x2d6   : > { %4493 = vmatprep.subr.bf16.mxu1 %v5229_v52  ;;  %v5157_v52 = vcombine.high %v2840_v46, %v2844_v47  ;;  %v2765_v39 = vld [vmem:[%s6380_s26 + $0xb8] sm:$0xff] }
 0x2d7   : > { %v2889_v41 = vld [vmem:[%s6380_s26 + $0x498] sm:$0xff] }
 0x2d8   : > { %4453 = vmatpush1.bf16.msra.mxu0 %v5100_v61  ;;  %v2980_v61 = vld [vmem:[%s6380_s26 + $0x770] sm:$0xff] }
 0x2d9   : > { %4494 = vmatpush1.bf16.msra.mxu1 %v5228_v62  ;;  %4454 = vmatprep.subr.bf16.mxu0 %v5109_v63  ;;  %v5156_v62 = vcombine.low %v2840_v46, %v2844_v47  ;;  %v5284_v63 = vcombine.low %v2968_v48, %v2972_v49  ;;  %v5293_v1 = vcombine.high %v2976_v60, %v2980_v61  ;;  %v2769_v47 = vld [vmem:[%s6380_s26 + $0xd8] sm:$0xff] }
 0x2da   : > { %4495 = vmatprep.subr.bf16.mxu1 %v5237_v0  ;;  %v5165_v0 = vcombine.high %v2848_v54, %v2852_v55  ;;  %v2773_v48 = vld [vmem:[%s6380_s26 + $0xf8] sm:$0xff] }
 0x2db   : > { %v2897_v49 = vld [vmem:[%s6380_s26 + $0x4d8] sm:$0xff] }
 0x2dc   : > { %4455 = vmatpush1.bf16.msra.mxu0 %v5108_v5  ;;  %v2988_v5 = vld [vmem:[%s6380_s26 + $0x7b0] sm:$0xff] }
 0x2dd   : > { %4496 = vmatpush1.bf16.msra.mxu1 %v5236_v6  ;;  %4456 = vmatprep.subr.bf16.mxu0 %v5117_v7  ;;  %v5164_v6 = vcombine.low %v2848_v54, %v2852_v55  ;;  %v5292_v7 = vcombine.low %v2976_v60, %v2980_v61  ;;  %v5301_v9 = vcombine.high %v2984_v4, %v2988_v5  ;;  %v2781_v54 = vld [vmem:[%s6380_s26 + $0x138] sm:$0xff] }
 0x2de   : > { %4497 = vmatprep.subr.bf16.mxu1 %v5245_v8  ;;  %v5173_v8 = vcombine.high %v2856_v2, %v2860_v3  ;;  %v2905_v55 = vld [vmem:[%s6380_s26 + $0x518] sm:$0xff]  ;;  %v5086_v61 = vcombine.low %v2769_v47, %v2773_v48 }
 0x2df   : > { %v2909_v60 = vld [vmem:[%s6380_s26 + $0x538] sm:$0xff] }
 0x2e0   : > { %4457 = vmatpush1.bf16.msra.mxu0 %v5116_v13  ;;  %v2996_v13 = vld [vmem:[%s6380_s26 + $0x7f0] sm:$0xff] }
 0x2e1   : > { %4498 = vmatpush1.bf16.msra.mxu1 %v5244_v14  ;;  %4458 = vmatprep.subr.bf16.mxu0 %v5125_v15  ;;  %v5172_v14 = vcombine.low %v2856_v2, %v2860_v3  ;;  %v5300_v15 = vcombine.low %v2984_v4, %v2988_v5  ;;  %v5309_v17 = vcombine.high %v2992_v12, %v2996_v13  ;;  %v2789_v2 = vld [vmem:[%s6380_s26 + $0x178] sm:$0xff] }
 0x2e2   : > { %4499 = vmatprep.subr.bf16.mxu1 %v5253_v16  ;;  %v5181_v16 = vcombine.high %v2864_v10, %v2868_v11  ;;  %v2913_v3 = vld [vmem:[%s6380_s26 + $0x558] sm:$0xff] }
 0x2e3   : > { %v2917_v4 = vld [vmem:[%s6380_s26 + $0x578] sm:$0xff] }
 0x2e4   : > { %4459 = vmatpush1.bf16.msra.mxu0 %v5124_v21  ;;  %v2877_v21 = vld [vmem:[%s6380_s26 + $0x438] sm:$0xff] }
 0x2e5   : > { %4500 = vmatpush1.bf16.msra.mxu1 %v5252_v22  ;;  %4460 = vmatprep.subr.bf16.mxu0 %v5133_v23  ;;  %v5180_v22 = vcombine.low %v2864_v10, %v2868_v11  ;;  %v5308_v23 = vcombine.low %v2992_v12, %v2996_v13  ;;  %v5191_v25 = vcombine.high %v2873_v20, %v2877_v21  ;;  %v2797_v10 = vld [vmem:[%s6380_s26 + $0x1b8] sm:$0xff] }
 0x2e6   : > { %4501 = vmatprep.subr.bf16.mxu1 %v5261_v24  ;;  %v5063_v24 = vcombine.high %v2745_v18, %v2749_v19  ;;  %v2921_v11 = vld [vmem:[%s6380_s26 + $0x598] sm:$0xff] }
 0x2e7   : > { %v2925_v12 = vld [vmem:[%s6380_s26 + $0x5b8] sm:$0xff] }
 0x2e8   : > { %4461 = vmatpush1.bf16.msra.mxu0 %v5132_v34  ;;  %v2881_v34 = vld [vmem:[%s6380_s26 + $0x458] sm:$0xff] }
 0x2e9   : > { %4502 = vmatpush1.bf16.msra.mxu1 %v5260_v35  ;;  %4462 = vmatprep.subr.bf16.mxu0 %v5141_v36  ;;  %v2885_v35 = vld [vmem:[%s6380_s26 + $0x478] sm:$0xff]  ;;  %v5190_v36 = vcombine.low %v2873_v20, %v2877_v21 }
 0x2ea   : > { %4503 = vmatprep.subr.bf16.mxu1 %v5269_v37  ;;  %v5071_v37 = vcombine.high %v2753_v29, %v2757_v32  ;;  %v5199_v40 = vcombine.high %v2881_v34, %v2885_v35  ;;  %v2805_v18 = vld [vmem:[%s6380_s26 + $0x1f8] sm:$0xff] }
 0x2eb   : > { %v2929_v19 = vld [vmem:[%s6380_s26 + $0x5d8] sm:$0xff] }
 0x2ec   : > { %4463 = vmatpush1.bf16.msra.mxu0 %v5140_v42  ;;  %v2893_v42 = vld [vmem:[%s6380_s26 + $0x4b8] sm:$0xff] }
 0x2ed   : > { %4504 = vmatpush1.bf16.msra.mxu1 %v5268_v43  ;;  %4464 = vmatprep.subr.bf16.mxu0 %v5149_v44  ;;  %v5070_v43 = vcombine.low %v2753_v29, %v2757_v32  ;;  %v5198_v44 = vcombine.low %v2881_v34, %v2885_v35  ;;  %v5207_v46 = vcombine.high %v2889_v41, %v2893_v42  ;;  %v2933_v20 = vld [vmem:[%s6380_s26 + $0x5f8] sm:$0xff] }
 0x2ee   : > { %4505 = vmatprep.subr.bf16.mxu1 %v5277_v45  ;;  %v5079_v45 = vcombine.high %v2761_v38, %v2765_v39  ;;  %v2813_v29 = vld [vmem:[%s6380_s26 + $0x238] sm:$0xff]  ;;  %v5246_v35 = vcombine.low %v2929_v19, %v2933_v20 }
 0x2ef   : > { %v2937_v32 = vld [vmem:[%s6380_s26 + $0x618] sm:$0xff] }
 0x2f0   : > { %4465 = vmatpush1.bf16.msra.mxu0 %v5148_v50  ;;  %v2901_v50 = vld [vmem:[%s6380_s26 + $0x4f8] sm:$0xff] }
 0x2f1   : > { %4506 = vmatpush1.bf16.msra.mxu1 %v5276_v51  ;;  %4466 = vmatprep.subr.bf16.mxu0 %v5157_v52  ;;  %v5078_v51 = vcombine.low %v2761_v38, %v2765_v39  ;;  %v5087_v52 = vcombine.high %v2769_v47, %v2773_v48  ;;  %v2817_v38 = vld [vmem:[%s6380_s26 + $0x258] sm:$0xff] }
 0x2f2   : > { %4507 = vmatprep.subr.bf16.mxu1 %v5285_v53  ;;  %v2777_v53 = vld [vmem:[%s6380_s26 + $0x118] sm:$0xff] }
 0x2f3   : > { %v5094_v5 = vcombine.low %v2777_v53, %v2781_v54  ;;  %v2821_v39 = vld [vmem:[%s6380_s26 + $0x278] sm:$0xff] }
 0x2f4   : > { %4467 = vmatpush1.bf16.msra.mxu0 %v5156_v62  ;;  %v5214_v62 = vcombine.low %v2897_v49, %v2901_v50  ;;  %v2829_v47 = vld [vmem:[%s6380_s26 + $0x2b8] sm:$0xff] }
 0x2f5   : > { %4508 = vmatpush1.bf16.msra.mxu1 %v5284_v63  ;;  %4468 = vmatprep.subr.bf16.mxu0 %v5165_v0  ;;  %v5095_v63 = vcombine.high %v2777_v53, %v2781_v54  ;;  %v5223_v0 = vcombine.high %v2905_v55, %v2909_v60  ;;  %v2953_v48 = vld [vmem:[%s6380_s26 + $0x698] sm:$0xff] }
 0x2f6   : > { %4509 = vmatprep.subr.bf16.mxu1 %v5293_v1  ;;  %v2785_v1 = vld [vmem:[%s6380_s26 + $0x158] sm:$0xff] }
 0x2f7   : > { %v5102_v13 = vcombine.low %v2785_v1, %v2789_v2  ;;  %v2837_v53 = vld [vmem:[%s6380_s26 + $0x2f8] sm:$0xff] }
 0x2f8   : > { %4469 = vmatpush1.bf16.msra.mxu0 %v5164_v6  ;;  %v5222_v6 = vcombine.low %v2905_v55, %v2909_v60  ;;  %v2961_v54 = vld [vmem:[%s6380_s26 + $0x6d8] sm:$0xff] }
 0x2f9   : > { %4510 = vmatpush1.bf16.msra.mxu1 %v5292_v7  ;;  %4470 = vmatprep.subr.bf16.mxu0 %v5173_v8  ;;  %v5103_v7 = vcombine.high %v2785_v1, %v2789_v2  ;;  %v5231_v8 = vcombine.high %v2913_v3, %v2917_v4  ;;  %v2965_v55 = vld [vmem:[%s6380_s26 + $0x6f8] sm:$0xff] }
 0x2fa   : > { %4511 = vmatprep.subr.bf16.mxu1 %v5301_v9  ;;  %v2793_v9 = vld [vmem:[%s6380_s26 + $0x198] sm:$0xff] }
 0x2fb   : > { %v5110_v21 = vcombine.low %v2793_v9, %v2797_v10  ;;  %v2845_v1 = vld [vmem:[%s6380_s26 + $0x338] sm:$0xff] }
 0x2fc   : > { %4471 = vmatpush1.bf16.msra.mxu0 %v5172_v14  ;;  %v5230_v14 = vcombine.low %v2913_v3, %v2917_v4  ;;  %v2969_v2 = vld [vmem:[%s6380_s26 + $0x718] sm:$0xff] }
 0x2fd   : > { %4512 = vmatpush1.bf16.msra.mxu1 %v5300_v15  ;;  %4472 = vmatprep.subr.bf16.mxu0 %v5181_v16  ;;  %v5111_v15 = vcombine.high %v2793_v9, %v2797_v10  ;;  %v5239_v16 = vcombine.high %v2921_v11, %v2925_v12  ;;  %v2973_v3 = vld [vmem:[%s6380_s26 + $0x738] sm:$0xff] }
 0x2fe   : > { %4513 = vmatprep.subr.bf16.mxu1 %v5309_v17  ;;  %v2801_v17 = vld [vmem:[%s6380_s26 + $0x1d8] sm:$0xff] }
 0x2ff   : > { %v5118_v34 = vcombine.low %v2801_v17, %v2805_v18  ;;  %v2853_v9 = vld [vmem:[%s6380_s26 + $0x378] sm:$0xff] }
 0x300   : > { %4473 = vmatpush1.bf16.msra.mxu0 %v5180_v22  ;;  %v5238_v22 = vcombine.low %v2921_v11, %v2925_v12  ;;  %v2977_v10 = vld [vmem:[%s6380_s26 + $0x758] sm:$0xff] }
 0x301   : > { %4514 = vmatpush1.bf16.msra.mxu1 %v5308_v23  ;;  %4524 = vmatprep.subr.bf16.mxu0 %v5063_v24  ;;  %v5119_v23 = vcombine.high %v2801_v17, %v2805_v18  ;;  %v5247_v24 = vcombine.high %v2929_v19, %v2933_v20  ;;  %v2981_v11 = vld [vmem:[%s6380_s26 + $0x778] sm:$0xff] }
 0x302   : > { %4565 = vmatprep.subr.bf16.mxu1 %v5191_v25  ;;  %v2809_v25 = vld [vmem:[%s6380_s26 + $0x218] sm:$0xff] }
 0x303   : > { %4475 = vmatmul.mubr.bf16.vlgmr.msra.gmra.mrb[12].mxu0 %v6784_v58  ;;  %v2861_v17 = vld [vmem:[%s6380_s26 + $0x3b8] sm:$0xff] }
 0x304   : > { %4516 = vmatmul.mubr.bf16.vlgmr.msra.gmra.mrb[12].mxu1 %v6786_v59  ;;  %4525 = vmatpush1.bf16.msra.mxu0 %v5062_v33  ;;  %v2941_v33 = vld [vmem:[%s6380_s26 + $0x638] sm:$0xff] }
 0x305   : > { %4556 = vmatprep.mubr.bf16.mxu0 %v6780_v56  ;;  %4566 = vmatpush1.bf16.msra.mxu1 %v5190_v36  ;;  %v5206_v56 = vcombine.low %v2889_v41, %v2893_v42  ;;  %v5127_v36 = vcombine.high %v2809_v25, %v2813_v29  ;;  %v2949_v41 = vld [vmem:[%s6380_s26 + $0x678] sm:$0xff]  ;;  %v5126_v42 = vcombine.low %v2809_v25, %v2813_v29 }
 0x306   : > { %4597 = vmatprep.mubr.bf16.mxu1 %v6782_v57  ;;  %4526 = vmatprep.subr.bf16.mxu0 %v5071_v37  ;;  %v5215_v57 = vcombine.high %v2897_v49, %v2901_v50  ;;  %v5255_v37 = vcombine.high %v2937_v32, %v2941_v33  ;;  %v2957_v49 = vld [vmem:[%s6380_s26 + $0x6b8] sm:$0xff]  ;;  %v5134_v50 = vcombine.low %v2817_v38, %v2821_v39 }
 0x307   : > { %4567 = vmatprep.subr.bf16.mxu1 %v5199_v40  ;;  %v2945_v40 = vld [vmem:[%s6380_s26 + $0x658] sm:$0xff] }
 0x308   : > { %4527 = vmatpush1.bf16.msra.mxu0 %v5070_v43  ;;  %v5254_v43 = vcombine.low %v2937_v32, %v2941_v33  ;;  %v2985_v18 = vld [vmem:[%s6380_s26 + $0x798] sm:$0xff] }
 0x309   : > { %4568 = vmatpush1.bf16.msra.mxu1 %v5198_v44  ;;  %4528 = vmatprep.subr.bf16.mxu0 %v5079_v45  ;;  %v5135_v44 = vcombine.high %v2817_v38, %v2821_v39  ;;  %v5263_v45 = vcombine.high %v2945_v40, %v2949_v41  ;;  %v2989_v19 = vld [vmem:[%s6380_s26 + $0x7b8] sm:$0xff] }
 0x30a   : > { %4569 = vmatprep.subr.bf16.mxu1 %v5207_v46  ;;  %v2825_v46 = vld [vmem:[%s6380_s26 + $0x298] sm:$0xff] }
 0x30b   : > { %v5142_v60 = vcombine.low %v2825_v46, %v2829_v47  ;;  %v2869_v25 = vld [vmem:[%s6380_s26 + $0x3f8] sm:$0xff] }
 0x30c   : > { %4529 = vmatpush1.bf16.msra.mxu0 %v5078_v51  ;;  %v5262_v51 = vcombine.low %v2945_v40, %v2949_v41  ;;  %v2993_v29 = vld [vmem:[%s6380_s26 + $0x7d8] sm:$0xff]  ;;  %v2730_v40 = vld [vmem:[%s7164_s6] sm:$0xff] }
 0x30d   : > { %4570 = vmatpush1.bf16.msra.mxu1 %v5206_v56  ;;  %4530 = vmatprep.subr.bf16.mxu0 %v5087_v52  ;;  %v5143_v56 = vcombine.high %v2825_v46, %v2829_v47  ;;  %v5271_v52 = vcombine.high %v2953_v48, %v2957_v49  ;;  %v2997_v32 = vld [vmem:[%s6380_s26 + $0x7f8] sm:$0xff] }
 0x30e   : > { %4571 = vmatprep.subr.bf16.mxu1 %v5215_v57  ;;  %v2833_v57 = vld [vmem:[%s6380_s26 + $0x2d8] sm:$0xff]  ;;  %v5310_v38 = vcombine.low %v2993_v29, %v2997_v32 }
 0x30f   : > { %v5150_v4 = vcombine.low %v2833_v57, %v2837_v53 }
 0x310   : > { %4531 = vmatpush1.bf16.msra.mxu0 %v5086_v61  ;;  %v5270_v61 = vcombine.low %v2953_v48, %v2957_v49 }
 0x311   : > { %4572 = vmatpush1.bf16.msra.mxu1 %v5214_v62  ;;  %4532 = vmatprep.subr.bf16.mxu0 %v5095_v63  ;;  %v5151_v62 = vcombine.high %v2833_v57, %v2837_v53  ;;  %v5279_v63 = vcombine.high %v2961_v54, %v2965_v55 }
 0x312   : > { %4573 = vmatprep.subr.bf16.mxu1 %v5223_v0  ;;  %v2841_v0 = vld [vmem:[%s6380_s26 + $0x318] sm:$0xff] }
 0x313   : > { %v5158_v12 = vcombine.low %v2841_v0, %v2845_v1 }
 0x314   : > { %4533 = vmatpush1.bf16.msra.mxu0 %v5094_v5  ;;  %v5278_v5 = vcombine.low %v2961_v54, %v2965_v55  ;;  %v2733_v54 = vld [vmem:[%s7164_s6 + $0x18] sm:$0xff] }
 0x315   : > { %4574 = vmatpush1.bf16.msra.mxu1 %v5222_v6  ;;  %4534 = vmatprep.subr.bf16.mxu0 %v5103_v7  ;;  %v5159_v6 = vcombine.high %v2841_v0, %v2845_v1  ;;  %v5287_v7 = vcombine.high %v2969_v2, %v2973_v3 }
 0x316   : > { %4575 = vmatprep.subr.bf16.mxu1 %v5231_v8  ;;  %v2849_v8 = vld [vmem:[%s6380_s26 + $0x358] sm:$0xff] }
 0x317   : > { %v5166_v20 = vcombine.low %v2849_v8, %v2853_v9 }
 0x318   : > { %4535 = vmatpush1.bf16.msra.mxu0 %v5102_v13  ;;  %v5286_v13 = vcombine.low %v2969_v2, %v2973_v3 }
 0x319   : > { %4576 = vmatpush1.bf16.msra.mxu1 %v5230_v14  ;;  %4536 = vmatprep.subr.bf16.mxu0 %v5111_v15  ;;  %v5167_v14 = vcombine.high %v2849_v8, %v2853_v9  ;;  %v5295_v15 = vcombine.high %v2977_v10, %v2981_v11  ;;  %v2735_v8 = vld [vmem:[%s7164_s6 + $0x28] sm:$0xff] }
 0x31a   : > { %4577 = vmatprep.subr.bf16.mxu1 %v5239_v16  ;;  %v2857_v16 = vld [vmem:[%s6380_s26 + $0x398] sm:$0xff] }
 0x31b   : > { %v5174_v33 = vcombine.low %v2857_v16, %v2861_v17 }
 0x31c   : > { %4537 = vmatpush1.bf16.msra.mxu0 %v5110_v21  ;;  %v5294_v21 = vcombine.low %v2977_v10, %v2981_v11 }
 0x31d   : > { %4578 = vmatpush1.bf16.msra.mxu1 %v5238_v22  ;;  %4538 = vmatprep.subr.bf16.mxu0 %v5119_v23  ;;  %v5175_v22 = vcombine.high %v2857_v16, %v2861_v17  ;;  %v5303_v23 = vcombine.high %v2985_v18, %v2989_v19 }
 0x31e   : > { %4579 = vmatprep.subr.bf16.mxu1 %v5247_v24  ;;  %v2865_v24 = vld [vmem:[%s6380_s26 + $0x3d8] sm:$0xff] }
 0x320   : > { %4539 = vmatpush1.bf16.msra.mxu0 %v5118_v34  ;;  %v5302_v34 = vcombine.low %v2985_v18, %v2989_v19  ;;  %v2736_v18 = vld [vmem:[%s7164_s6 + $0x30] sm:$0xff] }
 0x321   : > { %4580 = vmatpush1.bf16.msra.mxu1 %v5246_v35  ;;  %4540 = vmatprep.subr.bf16.mxu0 %v5127_v36  ;;  %v5183_v35 = vcombine.high %v2865_v24, %v2869_v25  ;;  %v5311_v36 = vcombine.high %v2993_v29, %v2997_v32 }
 0x322   : > { %4581 = vmatprep.subr.bf16.mxu1 %v5255_v37  ;;  %v5182_v37 = vcombine.low %v2865_v24, %v2869_v25 }
 0x324   : > { %4541 = vmatpush1.bf16.msra.mxu0 %v5126_v42 }
 0x325   : > { %4582 = vmatpush1.bf16.msra.mxu1 %v5254_v43  ;;  %4542 = vmatprep.subr.bf16.mxu0 %v5135_v44  ;;  %v2731_v44 = vld [vmem:[%s7164_s6 + $0x8] sm:$0xff] }
 0x326   : > { %4583 = vmatprep.subr.bf16.mxu1 %v5263_v45 }
 0x328   : > { %4543 = vmatpush1.bf16.msra.mxu0 %v5134_v50 }
 0x329   : > { %4584 = vmatpush1.bf16.msra.mxu1 %v5262_v51  ;;  %4544 = vmatprep.subr.bf16.mxu0 %v5143_v56  ;;  %v2732_v56 = vld [vmem:[%s7164_s6 + $0x10] sm:$0xff] }
 0x32a   : > { %4585 = vmatprep.subr.bf16.mxu1 %v5271_v52 }
 0x32c   : > { %4545 = vmatpush1.bf16.msra.mxu0 %v5142_v60 }
 0x32d   : > { %4586 = vmatpush1.bf16.msra.mxu1 %v5270_v61  ;;  %4546 = vmatprep.subr.bf16.mxu0 %v5151_v62 }
 0x32e   : > { %4587 = vmatprep.subr.bf16.mxu1 %v5279_v63 }
 0x330   : > { %4547 = vmatpush1.bf16.msra.mxu0 %v5150_v4  ;;  %v2734_v4 = vld [vmem:[%s7164_s6 + $0x20] sm:$0xff] }
 0x331   : > { %4588 = vmatpush1.bf16.msra.mxu1 %v5278_v5  ;;  %4548 = vmatprep.subr.bf16.mxu0 %v5159_v6 }
 0x332   : > { %4589 = vmatprep.subr.bf16.mxu1 %v5287_v7 }
 0x334   : > { %4549 = vmatpush1.bf16.msra.mxu0 %v5158_v12 }
 0x335   : > { %4590 = vmatpush1.bf16.msra.mxu1 %v5286_v13  ;;  %4550 = vmatprep.subr.bf16.mxu0 %v5167_v14 }
 0x336   : > { %4591 = vmatprep.subr.bf16.mxu1 %v5295_v15 }
 0x338   : > { %4551 = vmatpush1.bf16.msra.mxu0 %v5166_v20 }
 0x339   : > { %4592 = vmatpush1.bf16.msra.mxu1 %v5294_v21  ;;  %4552 = vmatprep.subr.bf16.mxu0 %v5175_v22  ;;  %v2737_v22 = vld [vmem:[%s7164_s6 + $0x38] sm:$0xff] }
 0x33a   : > { %4593 = vmatprep.subr.bf16.mxu1 %v5303_v23 }
 0x33c   : > { %4553 = vmatpush1.bf16.msra.mxu0 %v5174_v33 }
 0x33d   : > { %4594 = vmatpush1.bf16.msra.mxu1 %v5302_v34  ;;  %4554 = vmatprep.subr.bf16.mxu0 %v5183_v35 }
 0x33e   : > { %4595 = vmatprep.subr.bf16.mxu1 %v5311_v36 }
 0x340   : > { %4555 = vmatpush1.bf16.msra.mxu0 %v5182_v37  ;;  %v4634_v37 = vld [vmem:[%s7162_s4] sm:$0xff] (!%p5312_p11) }
 0x341   : > { %4596 = vmatpush1.bf16.msra.mxu1 %v5310_v38  ;;  %v4654_v38 = vsub.s32 (!%p5312_p11), 4, %v6757_v26 }
 0x343   : > { %4557 = vmatmul.mubr.bf16.vlgmr.msra.gmra.mrb[16].mxu0 %v6784_v58 }
 0x344   : > { %4598 = vmatmul.mubr.bf16.vlgmr.msra.gmra.mrb[16].mxu1 %v6786_v59 }
 0x356   : > { %v4312_v39 = vpop.f32.mrb[4].mxu0  ;;  %v4353_v41 = vpop.f32.mrb[4].mxu1 }
 0x357   : > { %v4354_v42 = vadd.f32 %v4353_v41, %v4312_v39  ;;  %v4314_v43 = vpop.f32.mrb[5].mxu0  ;;  %v4355_v45 = vpop.f32.mrb[5].mxu1  ;;  %v4658_v39 = vsub.s32 (!%p5312_p11), 5, %v6757_v26  ;;  %v4639_v41 = vrot.slane (!%p5312_p11), %v4634_v37, %v1100_v27  ;;  %v4685_v27 = vld [vmem:[%s7158_s0 + $0x8] sm:$0xff] (!%p5312_p11) }
 0x358   : > { %v4356_v46 = vadd.f32 %v4355_v45, %v4314_v43  ;;  %v4316_v47 = vpop.f32.mrb[6].mxu0  ;;  %v4357_v48 = vpop.f32.mrb[6].mxu1  ;;  %v4647_v45 = vrot.slane (!%p5312_p11), %v4634_v37, %v1108_v28 }
 0x359   : > { %v4606_v49 = vadd.f32 %v4354_v42, %v2730_v40  ;;  %v4317_v58 = vpop.f32.mrb[7].mxu0  ;;  %v4358_v50 = vpop.f32.mrb[7].mxu1  ;;  %v4662_v40 = vsub.s32 (!%p5312_p11), 6, %v6757_v26  ;;  %v4684_v42 = vld [vmem:[%s7158_s0] sm:$0xff] (!%p5312_p11)  ;;  %v4686_v48 = vld [vmem:[%s7158_s0 + $0x10] sm:$0xff] (!%p5312_p11) }
 0x35a   : > { %v4607_v59 = vadd.f32 %v4356_v46, %v2731_v44  ;;  %v4643_v44 = vrot.slane (!%p5312_p11), %v4634_v37, %v1104_v30  ;;  %v4651_v46 = vrot.slane (!%p5312_p11), %v4634_v37, %v1112_v31  ;;  %v4659_v30 = vrot.slane (!%p5312_p11), %v4634_v37, %v4658_v39 }
 0x35b   : > { %4614 = vst [vmem:[%s7164_s6] sm:$0xff] %v4606_v49  ;;  %v4655_v49 = vrot.slane (!%p5312_p11), %v4634_v37, %v4654_v38  ;;  %v4666_v58 = vsub.s32 (!%p5312_p11), 7, %v6757_v26 }
 0x35c   : > { %4615 = vst [vmem:[%s7164_s6 + $0x8] sm:$0xff] %v4607_v59 }
 0x362   : > { %v4626_v36 = vld [vmem:[%s7164_s6] sm:$0xff] (!%p5312_p11) }
 0x363   : > { %v4627_v43 = vld [vmem:[%s7164_s6 + $0x8] sm:$0xff] (!%p5312_p11)  ;;  %v4676_v28 = vadd.f32 (!%p5312_p11), %v4639_v41, %v4626_v36 }
 0x364   : > { %v4677_v50 = vadd.f32 (!%p5312_p11), %v4643_v44, %v4627_v43 }
 0x396   : > { %v4394_v51 = vpop.f32.mrb[8].mxu0  ;;  %v4435_v52 = vpop.f32.mrb[8].mxu1 }
 0x397   : > { %v4436_v57 = vadd.f32 %v4435_v52, %v4394_v51  ;;  %v4396_v53 = vpop.f32.mrb[9].mxu0  ;;  %v4437_v55 = vpop.f32.mrb[9].mxu1  ;;  %v4687_v51 = vld [vmem:[%s7158_s0 + $0x18] sm:$0xff] (!%p5312_p11) }
 0x398   : > { %v4438_v60 = vadd.f32 %v4437_v55, %v4396_v53  ;;  %v4398_v61 = vpop.f32.mrb[10].mxu0  ;;  %v4439_v62 = vpop.f32.mrb[10].mxu1  ;;  %v4663_v53 = vrot.slane (!%p5312_p11), %v4634_v37, %v4662_v40  ;;  %v4692_v55 = vadd.f32 (!%p5312_p11), %v4684_v42, %v4676_v28 }
 0x399   : > { %v4608_v63 = vadd.f32 %v4436_v57, %v2732_v56  ;;  %v4399_v0 = vpop.f32.mrb[11].mxu0  ;;  %v4440_v1 = vpop.f32.mrb[11].mxu1  ;;  %v4708_v56 = vld [vmem:[%s7163_s5] sm:$0xff] (!%p5312_p11)  ;;  %v4709_v61 = vld [vmem:[%s7163_s5 + $0x8] sm:$0xff] (!%p5312_p11) }
 0x39a   : > { %v4609_v2 = vadd.f32 %v4438_v60, %v2733_v54  ;;  %v4688_v57 = vld [vmem:[%s7158_s0 + $0x20] sm:$0xff] (!%p5312_p11)  ;;  %v4667_v54 = vrot.slane (!%p5312_p11), %v4634_v37, %v4666_v58  ;;  %v4693_v60 = vadd.f32 (!%p5312_p11), %v4685_v27, %v4677_v50  ;;  %v4689_v1 = vld [vmem:[%s7158_s0 + $0x28] sm:$0xff] (!%p5312_p11) }
 0x39b   : > { %4616 = vst [vmem:[%s7164_s6 + $0x10] sm:$0xff] %v4608_v63 }
 0x39c   : > { %4617 = vst [vmem:[%s7164_s6 + $0x18] sm:$0xff] %v4609_v2  ;;  %v4710_v2 = vld [vmem:[%s7163_s5 + $0x10] sm:$0xff] (!%p5312_p11) }
 0x3a2   : > { %v4628_v47 = vld [vmem:[%s7164_s6 + $0x10] sm:$0xff] (!%p5312_p11) }
 0x3a3   : > { %v4678_v59 = vadd.f32 (!%p5312_p11), %v4647_v45, %v4628_v47  ;;  %v4629_v31 = vld [vmem:[%s7164_s6 + $0x18] sm:$0xff] (!%p5312_p11) }
 0x3a4   : > { %v4679_v52 = vadd.f32 (!%p5312_p11), %v4651_v46, %v4629_v31 }
 0x3a5   : > { %v4694_v62 = vadd.f32 (!%p5312_p11), %v4686_v48, %v4678_v59 }
 0x3d6   : > { %v4476_v3 = vpop.f32.mrb[12].mxu0 }
 0x3d7   : > { %v4517_v5 = vpop.f32.mrb[12].mxu1  ;;  %v4478_v6 = vpop.f32.mrb[13].mxu0 }
 0x3d8   : > { %v4518_v7 = vadd.f32 %v4517_v5, %v4476_v3  ;;  %v4519_v9 = vpop.f32.mrb[13].mxu1  ;;  %v4480_v10 = vpop.f32.mrb[14].mxu0  ;;  %v4695_v3 = vadd.f32 (!%p5312_p11), %v4687_v51, %v4679_v52 }
 0x3d9   : > { %v4520_v11 = vadd.f32 %v4519_v9, %v4478_v6  ;;  %v4521_v12 = vpop.f32.mrb[14].mxu1  ;;  %v4481_v13 = vpop.f32.mrb[15].mxu0  ;;  %v4702_v9 = vmax.f32 (!%p5312_p11), %v4694_v62, 0.0 }
 0x3da   : > { %v4610_v14 = vadd.f32 %v4518_v7, %v2734_v4  ;;  %v4522_v15 = vpop.f32.mrb[15].mxu1  ;;  %v4711_v4 = vld [vmem:[%s7163_s5 + $0x18] sm:$0xff] (!%p5312_p11)  ;;  %v4700_v7 = vmax.f32 (!%p5312_p11), %v4692_v55, 0.0 }
 0x3db   : > { %v4611_v16 = vadd.f32 %v4520_v11, %v2735_v8  ;;  %v4701_v8 = vmax.f32 (!%p5312_p11), %v4693_v60, 0.0  ;;  %v4690_v11 = vld [vmem:[%s7158_s0 + $0x30] sm:$0xff] (!%p5312_p11)  ;;  %v4691_v13 = vld [vmem:[%s7158_s0 + $0x38] sm:$0xff] (!%p5312_p11)  ;;  %v4712_v15 = vld [vmem:[%s7163_s5 + $0x20] sm:$0xff] (!%p5312_p11) }
 0x3dc   : > { %4618 = vst [vmem:[%s7164_s6 + $0x20] sm:$0xff] %v4610_v14  ;;  %v4703_v14 = vmax.f32 (!%p5312_p11), %v4695_v3, 0.0 }
 0x3dd   : > { %4619 = vst [vmem:[%s7164_s6 + $0x28] sm:$0xff] %v4611_v16 }
 0x3e3   : > { %v4630_v26 = vld [vmem:[%s7164_s6 + $0x20] sm:$0xff] (!%p5312_p11) }
 0x3e4   : > { %v4680_v63 = vadd.f32 (!%p5312_p11), %v4655_v49, %v4630_v26  ;;  %v4631_v0 = vld [vmem:[%s7164_s6 + $0x28] sm:$0xff] (!%p5312_p11) }
 0x3e5   : > { %v4681_v5 = vadd.f32 (!%p5312_p11), %v4659_v30, %v4631_v0 }
 0x3e6   : > { %v4696_v10 = vadd.f32 (!%p5312_p11), %v4688_v57, %v4680_v63 }
 0x3e7   : > { %v4697_v16 = vadd.f32 (!%p5312_p11), %v4689_v1, %v4681_v5 }
 0x416   : > { %v4558_v17 = vpop.f32.mrb[16].mxu0 }
 0x417   : > { %v4599_v19 = vpop.f32.mrb[16].mxu1  ;;  %v4560_v20 = vpop.f32.mrb[17].mxu0  ;;  %4625 = sbr.rel (%p5312_p11) target bundleno = 1070 (0x42e), region = 75 }
 0x418   : > { %v4600_v21 = vadd.f32 %v4599_v19, %v4558_v17  ;;  %v4601_v23 = vpop.f32.mrb[17].mxu1  ;;  %v4562_v24 = vpop.f32.mrb[18].mxu0  ;;  %v4716_v19 = vadd.f32 (!%p5312_p11), %v4708_v56, %v4700_v7 }
 0x419   : > { %v4602_v25 = vadd.f32 %v4601_v23, %v4560_v20  ;;  %v4603_v29 = vpop.f32.mrb[18].mxu1  ;;  %v4563_v32 = vpop.f32.mrb[19].mxu0  ;;  %v4717_v20 = vadd.f32 (!%p5312_p11), %v4709_v61, %v4701_v8  ;;  %v4713_v23 = vld [vmem:[%s7163_s5 + $0x28] sm:$0xff] (!%p5312_p11)  ;;  %v4719_v24 = vadd.f32 (!%p5312_p11), %v4711_v4, %v4703_v14 }
 0x41a   : > { %v4612_v33 = vadd.f32 %v4600_v21, %v2736_v18  ;;  %v4604_v34 = vpop.f32.mrb[19].mxu1  ;;  %v4718_v21 = vadd.f32 (!%p5312_p11), %v4710_v2, %v4702_v9  ;;  %4724 = vst [vmem:[%s7164_s6] sm:$0xff] (!%p5312_p11), %v4716_v19 }
 0x41b   : > { %v4613_v35 = vadd.f32 %v4602_v25, %v2737_v22  ;;  %v4704_v22 = vmax.f32 (!%p5312_p11), %v4696_v10, 0.0  ;;  %v4705_v25 = vmax.f32 (!%p5312_p11), %v4697_v16, 0.0  ;;  %4725 = vst [vmem:[%s7164_s6 + $0x8] sm:$0xff] (!%p5312_p11), %v4717_v20  ;;  %v4714_v34 = vld [vmem:[%s7163_s5 + $0x30] sm:$0xff] (!%p5312_p11)  ;;  %4727 = vst [vmem:[%s7164_s6 + $0x18] sm:$0xff] (!%p5312_p11), %v4719_v24 }
 0x41c   : > { %4620 = vst [vmem:[%s7164_s6 + $0x30] sm:$0xff] %v4612_v33  ;;  %4726 = vst [vmem:[%s7164_s6 + $0x10] sm:$0xff] (!%p5312_p11), %v4718_v21 }
 0x41d   : > { %4621 = vst [vmem:[%s7164_s6 + $0x38] sm:$0xff] %v4613_v35  ;;  %v4720_v33 = vadd.f32 (!%p5312_p11), %v4712_v15, %v4704_v22  ;;  %v4715_v35 = vld [vmem:[%s7163_s5 + $0x38] sm:$0xff] (!%p5312_p11)  ;;  %v4721_v36 = vadd.f32 (!%p5312_p11), %v4713_v23, %v4705_v25 }
 0x41f   : > { %4728 = vst [vmem:[%s7164_s6 + $0x20] sm:$0xff] %v4720_v33  ;;  %4729 = vst [vmem:[%s7164_s6 + $0x28] sm:$0xff] %v4721_v36 }
 0x423   : > { %v4632_v6 = vld [vmem:[%s7164_s6 + $0x30] sm:$0xff] }
 0x424   : > { %v4633_v12 = vld [vmem:[%s7164_s6 + $0x38] sm:$0xff]  ;;  %v4682_v17 = vadd.f32 %v4663_v53, %v4632_v6 }
 0x425   : > { %v4683_v18 = vadd.f32 %v4667_v54, %v4633_v12 }
 0x426   : > { %v4698_v29 = vadd.f32 %v4690_v11, %v4682_v17 }
 0x427   : > { %v4699_v32 = vadd.f32 %v4691_v13, %v4683_v18 }
 0x428   : > { %v4706_v37 = vmax.f32 %v4698_v29, 0.0 }
 0x429   : > { %v4707_v38 = vmax.f32 %v4699_v32, 0.0 }
 0x42a   : > { %v4722_v39 = vadd.f32 %v4714_v34, %v4706_v37 }
 0x42b   : > { %v4723_v40 = vadd.f32 %v4715_v35, %v4707_v38 }
 0x42c   : > { %4730 = vst [vmem:[%s7164_s6 + $0x30] sm:$0xff] %v4722_v39 }
 0x42d   : > { %4731 = vst [vmem:[%s7164_s6 + $0x38] sm:$0xff] %v4723_v40 }
 0x42e PF: > { %p13_p12 = scmp.ge.s32.totalorder %s5833_s25, 6   ;;  %s7165_s21 = smov %s5772_s22 }
 0x42f   : > { %s7166_s22 = smov %s5842_s28  ;;  %s7167_s23 = smov %s5833_s25 }
 0x430   :  { %15 = sbr.rel (!%p13_p12) target bundleno = 2 (0x2), region = 112 }

</bundles_post_ra>
